<compile_context>
chip_gen: v5e
topology: v5e:2x2
jax: 0.10.0
libtpu: 0.0.40
codegen_flags: <defaults>
</compile_context>

<pallas_src>
import functools

import jax
import jax.numpy as jnp
import numpy as np
from jax.experimental import pallas as pl
from jax.experimental.pallas import tpu as pltpu

PB = 80                  # lanes per parity block of the padded 14x14 grid (9x9 slots)
RS = 64                  # conv2 output lanes per (batch, pool2-member) plane
K1 = 16                  # conv1 im2col contraction (9 taps padded to 16)
FC_IN = 64 * 7 * 7       # 3136
FC_IN_PAD = 3200         # padded to a multiple of 128
EPS = 1e-5


# ----------------------------------------------------------------------------
# Static index maps (numpy, trace-time only)
# ----------------------------------------------------------------------------
@functools.lru_cache(maxsize=None)
def _stage1_maps(B):
    """Row maps for the (member, batch, parity-block, block-row) im2col ordering."""
    lanes_per_member = B * 4 * PB
    r1 = 4 * lanes_per_member
    b_idx = np.zeros(r1, np.int32)
    pix_idx = np.zeros(r1, np.int32)
    valid = np.zeros(r1, np.float32)
    for m in range(4):                       # pool1-window member (mh, mw)
        mh, mw = divmod(m, 2)
        for b in range(B):
            for blk in range(4):             # parity block (rh, rw) of the 16x16 grid
                rh, rw = divmod(blk, 2)
                for q in range(PB):          # row inside the block
                    qh, qw = divmod(q, 9)
                    ph, pw = 2 * qh + rh, 2 * qw + rw      # padded-16 grid coords
                    row = ((m * B + b) * 4 + blk) * PB + q
                    b_idx[row] = b
                    if 1 <= ph <= 14 and 1 <= pw <= 14:    # interior (real) slot
                        h2, w2 = ph - 1, pw - 1            # pooled 14x14 coords
                        h1, w1 = 2 * h2 + mh, 2 * w2 + mw  # conv1-output 28x28 coords
                        pix_idx[row] = h1 * 28 + w1
                        valid[row] = 1.0
    return b_idx, pix_idx, valid


@functools.lru_cache(maxsize=None)
def _stage2_mask(B):
    r = np.arange(RS)
    ok = ((r // 9) <= 6) & ((r % 9) <= 6)    # valid 7x7 pool2 windows of the 9x9 slab
    return np.tile(ok.astype(np.float32), 4 * B)[None, :]   # [1, B*4*RS]


def _conv1_im2col(x_nchw):
    """x [B,1,28,28] -> (X1T [K1, 4*B*4*PB] bf16, mask1 [1,.] f32, mask2 [1,.] f32)."""
    B = x_nchw.shape[0]
    x = x_nchw.reshape(B, 28, 28).astype(jnp.float32)
    xp = jnp.pad(x, ((0, 0), (1, 1), (1, 1)))
    taps = jnp.stack([xp[:, dy:dy + 28, dx:dx + 28].reshape(B, 28 * 28)
                      for dy in range(3) for dx in range(3)], axis=0)      # [9, B, 784]
    b_idx, pix_idx, valid = _stage1_maps(B)
    x1t = taps[:, b_idx, pix_idx] * valid[None, :]                         # [9, R1]
    x1t = jnp.pad(x1t, ((0, K1 - 9), (0, 0)))                              # pad K to 16
    mask1 = jnp.asarray(valid)[None, :]
    mask2 = jnp.asarray(_stage2_mask(B))
    return x1t.astype(jnp.bfloat16), mask1, mask2


def _full_spec(shape):
    zeros = (0,) * len(shape)
    return pl.BlockSpec(shape, lambda i: zeros)


# ----------------------------------------------------------------------------
# Kernel 1: conv1 -> BN1 -> ReLU -> maxpool1 -> conv2 -> BN2 -> ReLU -> maxpool2
# ----------------------------------------------------------------------------
def _feature_kernel(B,
                    x1t_ref, m1_ref, m2_ref,
                    w1_ref, b1_ref, g1_ref, be1_ref,
                    w2_ref, b2_ref, g2_ref, be2_ref,
                    out_ref):
    f32 = jnp.float32
    inv_n1 = 1.0 / float(B * 28 * 28)
    inv_n2 = 1.0 / float(B * 14 * 14)
    lanes_per_member = B * 4 * PB          # pool1 member-plane width
    lanes_per_batch = 4 * PB               # parity-blocked padded grid per batch

    # ---- conv1: one im2col matmul  [32,K1] @ [K1, 4*B*4*PB]  (bf16 -> f32 acc) ----
    y1 = jnp.dot(w1_ref[...], x1t_ref[...], preferred_element_type=f32)
    y1 = y1 + b1_ref[...]

    # ---- BatchNorm1: training-mode batch stats, masked + centered variance ----
    m1 = m1_ref[...]
    mean1 = jnp.sum(y1 * m1, axis=1, keepdims=True) * inv_n1
    d1 = y1 - mean1
    var1 = jnp.sum(d1 * d1 * m1, axis=1, keepdims=True) * inv_n1
    a1 = d1 * jax.lax.rsqrt(var1 + EPS) * g1_ref[...] + be1_ref[...]
    a1 = jnp.maximum(a1, 0.0)                                    # ReLU

    # ---- maxpool1: elementwise max over 4 contiguous member-plane lane slices ----
    L = lanes_per_member
    z = jnp.maximum(jnp.maximum(a1[:, 0:L], a1[:, L:2 * L]),
                    jnp.maximum(a1[:, 2 * L:3 * L], a1[:, 3 * L:4 * L]))
    z = z * m1[:, 0:L]                     # zero the padded-grid border slots
    zb = z.astype(jnp.bfloat16)

    # ---- conv2 im2col [288, B*4*RS]: every tap is a contiguous lane slice ----
    pieces = []
    for b in range(B):
        for jh in range(2):
            for jw in range(2):            # pool2-member plane (jh, jw)
                rows = []
                for dy in range(3):
                    for dx in range(3):    # conv tap (dy, dx)
                        blk = ((jh + dy) % 2) * 2 + ((jw + dx) % 2)
                        off = ((jh + dy) // 2) * 9 + ((jw + dx) // 2)
                        s = b * lanes_per_batch + blk * PB + off
                        rows.append(zb[:, s:s + RS])             # [32, RS]
                pieces.append(jnp.concatenate(rows, axis=0))     # [288, RS]
    cols2 = jnp.concatenate(pieces, axis=1)                      # [288, B*4*RS]

    y2 = jnp.dot(w2_ref[...], cols2, preferred_element_type=f32)  # [64, B*4*RS]
    y2 = y2 + b2_ref[...]

    # ---- BatchNorm2 + ReLU ----
    m2 = m2_ref[...]
    mean2 = jnp.sum(y2 * m2, axis=1, keepdims=True) * inv_n2
    d2 = y2 - mean2
    var2 = jnp.sum(d2 * d2 * m2, axis=1, keepdims=True) * inv_n2
    a2 = d2 * jax.lax.rsqrt(var2 + EPS) * g2_ref[...] + be2_ref[...]
    a2 = jnp.maximum(a2, 0.0)

    # ---- maxpool2: elementwise max over the 4 member planes (lane slices) ----
    outs = []
    for b in range(B):
        s = b * 4 * RS
        outs.append(jnp.maximum(
            jnp.maximum(a2[:, s:s + RS], a2[:, s + RS:s + 2 * RS]),
            jnp.maximum(a2[:, s + 2 * RS:s + 3 * RS], a2[:, s + 3 * RS:s + 4 * RS])))
    out_ref[...] = jnp.concatenate(outs, axis=1)                 # [64, B*RS]


def _features(x1t, mask1, mask2, params, B):
    r1 = x1t.shape[1]
    r2 = mask2.shape[1]
    kernel = functools.partial(_feature_kernel, B)
    return pl.pallas_call(
        kernel,
        out_shape=jax.ShapeDtypeStruct((64, B * RS), jnp.float32),
        grid_spec=pltpu.PrefetchScalarGridSpec(
            num_scalar_prefetch=0,
            grid=(1,),
            in_specs=[
                _full_spec((K1, r1)),
                _full_spec((1, r1)),
                _full_spec((1, r2)),
                _full_spec((32, K1)),
                _full_spec((32, 1)),
                _full_spec((32, 1)),
                _full_spec((32, 1)),
                _full_spec((64, 288)),
                _full_spec((64, 1)),
                _full_spec((64, 1)),
                _full_spec((64, 1)),
            ],
            out_specs=_full_spec((64, B * RS)),
        ),
        compiler_params=pltpu.CompilerParams(dimension_semantics=("arbitrary",)),
    )(x1t, mask1, mask2,
      params["conv1_w_k"], params["conv1_b"], params["bn1_gamma"], params["bn1_beta"],
      params["conv2_w_k"], params["conv2_b"], params["bn2_gamma"], params["bn2_beta"])


# ----------------------------------------------------------------------------
# Kernel 2: classifier  Linear -> ReLU -> Linear  (output padded to 128 lanes)
# ----------------------------------------------------------------------------
def _mlp_kernel(x_ref, w1_ref, b1_ref, w2_ref, b2_ref, out_ref):
    h = jnp.dot(x_ref[...], w1_ref[...], preferred_element_type=jnp.float32) + b1_ref[...]
    h = jnp.maximum(h, 0.0).astype(jnp.bfloat16)
    out_ref[...] = jnp.dot(h, w2_ref[...], preferred_element_type=jnp.float32) + b2_ref[...]


def _classifier(feat, params):
    B = feat.shape[0]
    hd = params["fc1_w"].shape[1]
    return pl.pallas_call(
        _mlp_kernel,
        out_shape=jax.ShapeDtypeStruct((B, 128), jnp.float32),
        grid_spec=pltpu.PrefetchScalarGridSpec(
            num_scalar_prefetch=0,
            grid=(1,),
            in_specs=[
                _full_spec((B, FC_IN_PAD)),
                _full_spec((FC_IN_PAD, hd)),
                _full_spec((1, hd)),
                _full_spec((hd, 128)),
                _full_spec((1, 128)),
            ],
            out_specs=_full_spec((B, 128)),
        ),
        compiler_params=pltpu.CompilerParams(dimension_semantics=("arbitrary",)),
    )(feat, params["fc1_w"], params["fc1_b"], params["fc2_w"], params["fc2_b"])


# ----------------------------------------------------------------------------
# Forward, params, reference
# ----------------------------------------------------------------------------
def custom_cnn_forward(x_nchw, params):
    """Mirrors CustomCNN.forward: returns (logits, first conv layer weights)."""
    B = x_nchw.shape[0]
    x1t, mask1, mask2 = _conv1_im2col(x_nchw)
    pooled = _features(x1t, mask1, mask2, params, B)              # [64, B*RS]
    # Drop the padded 9x9 window slots down to the valid 7x7 and flatten in
    # PyTorch NCHW order (tiny XLA glue on a 32 KB tensor).
    p = pooled.reshape(64, B, RS)[:, :, :63].reshape(64, B, 7, 9)[:, :, :, :7]
    feat = jnp.transpose(p, (1, 0, 2, 3)).reshape(B, FC_IN)
    feat = jnp.pad(feat, ((0, 0), (0, FC_IN_PAD - FC_IN))).astype(jnp.bfloat16)
    logits = _classifier(feat, params)[:, :10]
    return logits, params["conv1_w_pt"]


def init_params(key, num_neurons=128, num_classes=10):
    f32 = jnp.float32
    ks = jax.random.split(key, 6)

    def nrm(k, shape, std):
        return (std * jax.random.normal(k, shape)).astype(f32)

    conv1_w = nrm(ks[0], (32, 1, 3, 3), 0.30)        # PyTorch [Cout, Cin, kH, kW]
    conv1_b = nrm(ks[1], (32,), 0.05)
    conv2_w = nrm(ks[2], (64, 32, 3, 3), 0.06)
    conv2_b = nrm(ks[3], (64,), 0.05)
    bn1_gamma, bn1_beta = jnp.ones((32,), f32), jnp.zeros((32,), f32)
    bn2_gamma, bn2_beta = jnp.ones((64,), f32), jnp.zeros((64,), f32)
    fc1_w = nrm(ks[4], (FC_IN, num_neurons), 0.02)
    fc1_b = jnp.zeros((num_neurons,), f32)
    fc2_w = nrm(ks[5], (num_neurons, num_classes), 0.05)
    fc2_b = jnp.zeros((num_classes,), f32)

    # channels-first im2col weight layouts for the transposed matmuls
    w1k_t = jnp.transpose(conv1_w, (2, 3, 1, 0)).reshape(9, 32).T          # [32, 9]
    w1k_t = jnp.pad(w1k_t, ((0, 0), (0, K1 - 9)))                          # [32, 16]
    w2k_t = jnp.transpose(conv2_w, (2, 3, 1, 0)).reshape(9 * 32, 64).T     # [64, 288]
    fc1_w_pad = jnp.pad(fc1_w, ((0, FC_IN_PAD - FC_IN), (0, 0)))
    fc2_w_pad = jnp.pad(fc2_w, ((0, 0), (0, 128 - num_classes)))
    fc2_b_pad = jnp.pad(fc2_b, ((0, 128 - num_classes),))

    return dict(
        # originals (returned by forward / used by the fp32 reference)
        conv1_w_pt=conv1_w, conv2_w_pt=conv2_w,
        conv1_b_pt=conv1_b, conv2_b_pt=conv2_b,
        bn1_gamma_pt=bn1_gamma, bn1_beta_pt=bn1_beta,
        bn2_gamma_pt=bn2_gamma, bn2_beta_pt=bn2_beta,
        fc1_w_pt=fc1_w, fc1_b_pt=fc1_b, fc2_w_pt=fc2_w, fc2_b_pt=fc2_b,
        # kernel-side tensors
        conv1_w_k=w1k_t.astype(jnp.bfloat16), conv1_b=conv1_b.reshape(32, 1),
        bn1_gamma=bn1_gamma.reshape(32, 1), bn1_beta=bn1_beta.reshape(32, 1),
        conv2_w_k=w2k_t.astype(jnp.bfloat16), conv2_b=conv2_b.reshape(64, 1),
        bn2_gamma=bn2_gamma.reshape(64, 1), bn2_beta=bn2_beta.reshape(64, 1),
        fc1_w=fc1_w_pad.astype(jnp.bfloat16), fc1_b=fc1_b.reshape(1, num_neurons),
        fc2_w=fc2_w_pad.astype(jnp.bfloat16), fc2_b=fc2_b_pad.reshape(1, 128),
    )


def reference_forward(x, params):
    """Pure-JAX fp32 reference of the same representative CustomCNN config."""
    hp = jax.lax.Precision.HIGHEST

    def conv(h, w, b):
        y = jax.lax.conv_general_dilated(
            h, w, window_strides=(1, 1), padding=((1, 1), (1, 1)),
            dimension_numbers=("NCHW", "OIHW", "NCHW"), precision=hp)
        return y + b.reshape(1, -1, 1, 1)

    def bn(y, gamma, beta):
        mean = jnp.mean(y, axis=(0, 2, 3), keepdims=True)
        var = jnp.mean((y - mean) ** 2, axis=(0, 2, 3), keepdims=True)
        return ((y - mean) * jax.lax.rsqrt(var + EPS)
                * gamma.reshape(1, -1, 1, 1) + beta.reshape(1, -1, 1, 1))

    def pool(y):
        return jax.lax.reduce_window(y, -jnp.inf, jax.lax.max,
                                     (1, 1, 2, 2), (1, 1, 2, 2), "VALID")

    h = pool(jax.nn.relu(bn(conv(x, params["conv1_w_pt"], params["conv1_b_pt"]),
                            params["bn1_gamma_pt"], params["bn1_beta_pt"])))
    h = pool(jax.nn.relu(bn(conv(h, params["conv2_w_pt"], params["conv2_b_pt"]),
                            params["bn2_gamma_pt"], params["bn2_beta_pt"])))
    feat = h.reshape(h.shape[0], -1)
    hid = jax.nn.relu(jnp.dot(feat, params["fc1_w_pt"], precision=hp) + params["fc1_b_pt"])
    return jnp.dot(hid, params["fc2_w_pt"], precision=hp) + params["fc2_b_pt"]


if __name__ == "__main__":
    key = jax.random.PRNGKey(0)
    kx, kp = jax.random.split(key)
    B = 2
    x = jax.random.normal(kx, (B, 1, 28, 28), dtype=jnp.float32)   # NCHW like PyTorch
    params = init_params(kp, num_neurons=128, num_classes=10)

    fwd = jax.jit(custom_cnn_forward)
    logits, conv1_w = fwd(x, params)
    jax.block_until_ready((logits, conv1_w))

    assert logits.shape == (B, 10) and logits.dtype == jnp.float32
    assert conv1_w.shape == (32, 1, 3, 3)

    # loose tolerance: kernel uses bf16 matmul operands with fp32 accumulation
    ref = reference_forward(x, params)
    err = float(jnp.max(jnp.abs(logits - ref)))
    assert err < 0.1, f"Pallas output deviates from fp32 reference: max|diff|={err}"

    print("KERNEL_OK")
</pallas_src>

<mosaic_0001>
module attributes {stable_mosaic.version = 11 : i64} {
  func.func @_feature_kernel(%arg0: i32, %arg1: memref<16x2560xbf16, #tpu.memory_space<vmem>>, %arg2: memref<1x2560xf32, #tpu.memory_space<vmem>>, %arg3: memref<1x512xf32, #tpu.memory_space<vmem>>, %arg4: memref<32x16xbf16, #tpu.memory_space<vmem>>, %arg5: memref<32x1xf32, #tpu.memory_space<vmem>>, %arg6: memref<32x1xf32, #tpu.memory_space<vmem>>, %arg7: memref<32x1xf32, #tpu.memory_space<vmem>>, %arg8: memref<64x288xbf16, #tpu.memory_space<vmem>>, %arg9: memref<64x1xf32, #tpu.memory_space<vmem>>, %arg10: memref<64x1xf32, #tpu.memory_space<vmem>>, %arg11: memref<64x1xf32, #tpu.memory_space<vmem>>, %arg12: memref<64x128xf32, #tpu.memory_space<vmem>>) attributes {dimension_semantics = [#tpu.dimension_semantics<arbitrary>], iteration_bounds = array<i64: 1>, scalar_prefetch = 0 : i64, scratch_operands = 0 : i64, tpu.core_type = #tpu.core_type<tc>, window_params = [{pipeline_mode = #tpu.pipeline_mode<synchronous>, transform_indices = @transform_0, window_bounds = array<i64: 16, 2560>}, {pipeline_mode = #tpu.pipeline_mode<synchronous>, transform_indices = @transform_1, window_bounds = array<i64: 1, 2560>}, {pipeline_mode = #tpu.pipeline_mode<synchronous>, transform_indices = @transform_2, window_bounds = array<i64: 1, 512>}, {pipeline_mode = #tpu.pipeline_mode<synchronous>, transform_indices = @transform_3, window_bounds = array<i64: 32, 16>}, {pipeline_mode = #tpu.pipeline_mode<synchronous>, transform_indices = @transform_4, window_bounds = array<i64: 32, 1>}, {pipeline_mode = #tpu.pipeline_mode<synchronous>, transform_indices = @transform_5, window_bounds = array<i64: 32, 1>}, {pipeline_mode = #tpu.pipeline_mode<synchronous>, transform_indices = @transform_6, window_bounds = array<i64: 32, 1>}, {pipeline_mode = #tpu.pipeline_mode<synchronous>, transform_indices = @transform_7, window_bounds = array<i64: 64, 288>}, {pipeline_mode = #tpu.pipeline_mode<synchronous>, transform_indices = @transform_8, window_bounds = array<i64: 64, 1>}, {pipeline_mode = #tpu.pipeline_mode<synchronous>, transform_indices = @transform_9, window_bounds = array<i64: 64, 1>}, {pipeline_mode = #tpu.pipeline_mode<synchronous>, transform_indices = @transform_10, window_bounds = array<i64: 64, 1>}, {pipeline_mode = #tpu.pipeline_mode<synchronous>, transform_indices = @transform_11, window_bounds = array<i64: 64, 128>}]} {
    %c0 = arith.constant 0 : index
    %c0_0 = arith.constant 0 : index
    %0 = vector.load %arg4[%c0, %c0_0] : memref<32x16xbf16, #tpu.memory_space<vmem>>, vector<32x16xbf16>
    %c0_1 = arith.constant 0 : index
    %c0_2 = arith.constant 0 : index
    %1 = vector.load %arg1[%c0_1, %c0_2] : memref<16x2560xbf16, #tpu.memory_space<vmem>>, vector<16x2560xbf16>
    %cst = arith.constant dense<0.000000e+00> : vector<32x2560xf32>
    %2 = tpu.matmul %0, %1, %cst {dimension_numbers = #tpu.dot_dimension_numbers<[1], [0], [0], [1], [0, 0, 1, 1], [], []>} : vector<32x16xbf16>, vector<16x2560xbf16>, vector<32x2560xf32> -> vector<32x2560xf32>
    %c0_3 = arith.constant 0 : index
    %c0_4 = arith.constant 0 : index
    %3 = vector.load %arg5[%c0_3, %c0_4] : memref<32x1xf32, #tpu.memory_space<vmem>>, vector<32x1xf32>
    %4 = vector.broadcast %3 : vector<32x1xf32> to vector<32x2560xf32>
    %5 = arith.addf %2, %4 : vector<32x2560xf32>
    %c0_5 = arith.constant 0 : index
    %c0_6 = arith.constant 0 : index
    %6 = vector.load %arg2[%c0_5, %c0_6] : memref<1x2560xf32, #tpu.memory_space<vmem>>, vector<1x2560xf32>
    %7 = vector.broadcast %6 : vector<1x2560xf32> to vector<32x2560xf32>
    %8 = arith.mulf %5, %7 : vector<32x2560xf32>
    %cst_7 = arith.constant dense<0.000000e+00> : vector<32xf32>
    %9 = vector.multi_reduction <add>, %8, %cst_7 [1] : vector<32x2560xf32> to vector<32xf32>
    %10 = vector.shape_cast %9 : vector<32xf32> to vector<32x1xf32>
    %cst_8 = arith.constant 6.37755089E-4 : f32
    %11 = vector.broadcast %cst_8 : f32 to vector<32x1xf32>
    %12 = arith.mulf %10, %11 : vector<32x1xf32>
    %13 = vector.broadcast %12 : vector<32x1xf32> to vector<32x2560xf32>
    %14 = arith.subf %5, %13 : vector<32x2560xf32>
    %15 = arith.mulf %14, %14 : vector<32x2560xf32>
    %16 = vector.broadcast %6 : vector<1x2560xf32> to vector<32x2560xf32>
    %17 = arith.mulf %15, %16 : vector<32x2560xf32>
    %cst_9 = arith.constant dense<0.000000e+00> : vector<32xf32>
    %18 = vector.multi_reduction <add>, %17, %cst_9 [1] : vector<32x2560xf32> to vector<32xf32>
    %19 = vector.shape_cast %18 : vector<32xf32> to vector<32x1xf32>
    %cst_10 = arith.constant 6.37755089E-4 : f32
    %20 = vector.broadcast %cst_10 : f32 to vector<32x1xf32>
    %21 = arith.mulf %19, %20 : vector<32x1xf32>
    %cst_11 = arith.constant 9.99999974E-6 : f32
    %22 = vector.broadcast %cst_11 : f32 to vector<32x1xf32>
    %23 = arith.addf %21, %22 : vector<32x1xf32>
    %24 = math.rsqrt %23 : vector<32x1xf32>
    %25 = vector.broadcast %24 : vector<32x1xf32> to vector<32x2560xf32>
    %26 = arith.mulf %14, %25 : vector<32x2560xf32>
    %c0_12 = arith.constant 0 : index
    %c0_13 = arith.constant 0 : index
    %27 = vector.load %arg6[%c0_12, %c0_13] : memref<32x1xf32, #tpu.memory_space<vmem>>, vector<32x1xf32>
    %28 = vector.broadcast %27 : vector<32x1xf32> to vector<32x2560xf32>
    %29 = arith.mulf %26, %28 : vector<32x2560xf32>
    %c0_14 = arith.constant 0 : index
    %c0_15 = arith.constant 0 : index
    %30 = vector.load %arg7[%c0_14, %c0_15] : memref<32x1xf32, #tpu.memory_space<vmem>>, vector<32x1xf32>
    %31 = vector.broadcast %30 : vector<32x1xf32> to vector<32x2560xf32>
    %32 = arith.addf %29, %31 : vector<32x2560xf32>
    %cst_16 = arith.constant 0.000000e+00 : f32
    %33 = vector.broadcast %cst_16 : f32 to vector<32x2560xf32>
    %34 = arith.maximumf %32, %33 : vector<32x2560xf32>
    %35 = vector.extract_strided_slice %34 {offsets = [0, 0], sizes = [32, 640], strides = [1, 1]} : vector<32x2560xf32> to vector<32x640xf32>
    %36 = vector.extract_strided_slice %34 {offsets = [0, 640], sizes = [32, 640], strides = [1, 1]} : vector<32x2560xf32> to vector<32x640xf32>
    %37 = arith.maximumf %35, %36 : vector<32x640xf32>
    %38 = vector.extract_strided_slice %34 {offsets = [0, 1280], sizes = [32, 640], strides = [1, 1]} : vector<32x2560xf32> to vector<32x640xf32>
    %39 = vector.extract_strided_slice %34 {offsets = [0, 1920], sizes = [32, 640], strides = [1, 1]} : vector<32x2560xf32> to vector<32x640xf32>
    %40 = arith.maximumf %38, %39 : vector<32x640xf32>
    %41 = arith.maximumf %37, %40 : vector<32x640xf32>
    %42 = vector.extract_strided_slice %6 {offsets = [0, 0], sizes = [1, 640], strides = [1, 1]} : vector<1x2560xf32> to vector<1x640xf32>
    %43 = vector.broadcast %42 : vector<1x640xf32> to vector<32x640xf32>
    %44 = arith.mulf %41, %43 : vector<32x640xf32>
    %45 = arith.truncf %44 : vector<32x640xf32> to vector<32x640xbf16>
    %46 = vector.extract_strided_slice %45 {offsets = [0, 0], sizes = [32, 64], strides = [1, 1]} : vector<32x640xbf16> to vector<32x64xbf16>
    %47 = vector.extract_strided_slice %45 {offsets = [0, 80], sizes = [32, 64], strides = [1, 1]} : vector<32x640xbf16> to vector<32x64xbf16>
    %48 = vector.extract_strided_slice %45 {offsets = [0, 1], sizes = [32, 64], strides = [1, 1]} : vector<32x640xbf16> to vector<32x64xbf16>
    %49 = vector.extract_strided_slice %45 {offsets = [0, 160], sizes = [32, 64], strides = [1, 1]} : vector<32x640xbf16> to vector<32x64xbf16>
    %50 = vector.extract_strided_slice %45 {offsets = [0, 240], sizes = [32, 64], strides = [1, 1]} : vector<32x640xbf16> to vector<32x64xbf16>
    %51 = vector.extract_strided_slice %45 {offsets = [0, 161], sizes = [32, 64], strides = [1, 1]} : vector<32x640xbf16> to vector<32x64xbf16>
    %52 = vector.extract_strided_slice %45 {offsets = [0, 9], sizes = [32, 64], strides = [1, 1]} : vector<32x640xbf16> to vector<32x64xbf16>
    %53 = vector.extract_strided_slice %45 {offsets = [0, 89], sizes = [32, 64], strides = [1, 1]} : vector<32x640xbf16> to vector<32x64xbf16>
    %54 = vector.extract_strided_slice %45 {offsets = [0, 10], sizes = [32, 64], strides = [1, 1]} : vector<32x640xbf16> to vector<32x64xbf16>
    %55 = tpu.concatenate %46, %47, %48, %49, %50, %51, %52, %53, %54 in 0 : vector<32x64xbf16>, vector<32x64xbf16>, vector<32x64xbf16>, vector<32x64xbf16>, vector<32x64xbf16>, vector<32x64xbf16>, vector<32x64xbf16>, vector<32x64xbf16>, vector<32x64xbf16> -> vector<288x64xbf16>
    %56 = vector.extract_strided_slice %45 {offsets = [0, 80], sizes = [32, 64], strides = [1, 1]} : vector<32x640xbf16> to vector<32x64xbf16>
    %57 = vector.extract_strided_slice %45 {offsets = [0, 1], sizes = [32, 64], strides = [1, 1]} : vector<32x640xbf16> to vector<32x64xbf16>
    %58 = vector.extract_strided_slice %45 {offsets = [0, 81], sizes = [32, 64], strides = [1, 1]} : vector<32x640xbf16> to vector<32x64xbf16>
    %59 = vector.extract_strided_slice %45 {offsets = [0, 240], sizes = [32, 64], strides = [1, 1]} : vector<32x640xbf16> to vector<32x64xbf16>
    %60 = vector.extract_strided_slice %45 {offsets = [0, 161], sizes = [32, 64], strides = [1, 1]} : vector<32x640xbf16> to vector<32x64xbf16>
    %61 = vector.extract_strided_slice %45 {offsets = [0, 241], sizes = [32, 64], strides = [1, 1]} : vector<32x640xbf16> to vector<32x64xbf16>
    %62 = vector.extract_strided_slice %45 {offsets = [0, 89], sizes = [32, 64], strides = [1, 1]} : vector<32x640xbf16> to vector<32x64xbf16>
    %63 = vector.extract_strided_slice %45 {offsets = [0, 10], sizes = [32, 64], strides = [1, 1]} : vector<32x640xbf16> to vector<32x64xbf16>
    %64 = vector.extract_strided_slice %45 {offsets = [0, 90], sizes = [32, 64], strides = [1, 1]} : vector<32x640xbf16> to vector<32x64xbf16>
    %65 = tpu.concatenate %56, %57, %58, %59, %60, %61, %62, %63, %64 in 0 : vector<32x64xbf16>, vector<32x64xbf16>, vector<32x64xbf16>, vector<32x64xbf16>, vector<32x64xbf16>, vector<32x64xbf16>, vector<32x64xbf16>, vector<32x64xbf16>, vector<32x64xbf16> -> vector<288x64xbf16>
    %66 = vector.extract_strided_slice %45 {offsets = [0, 160], sizes = [32, 64], strides = [1, 1]} : vector<32x640xbf16> to vector<32x64xbf16>
    %67 = vector.extract_strided_slice %45 {offsets = [0, 240], sizes = [32, 64], strides = [1, 1]} : vector<32x640xbf16> to vector<32x64xbf16>
    %68 = vector.extract_strided_slice %45 {offsets = [0, 161], sizes = [32, 64], strides = [1, 1]} : vector<32x640xbf16> to vector<32x64xbf16>
    %69 = vector.extract_strided_slice %45 {offsets = [0, 9], sizes = [32, 64], strides = [1, 1]} : vector<32x640xbf16> to vector<32x64xbf16>
    %70 = vector.extract_strided_slice %45 {offsets = [0, 89], sizes = [32, 64], strides = [1, 1]} : vector<32x640xbf16> to vector<32x64xbf16>
    %71 = vector.extract_strided_slice %45 {offsets = [0, 10], sizes = [32, 64], strides = [1, 1]} : vector<32x640xbf16> to vector<32x64xbf16>
    %72 = vector.extract_strided_slice %45 {offsets = [0, 169], sizes = [32, 64], strides = [1, 1]} : vector<32x640xbf16> to vector<32x64xbf16>
    %73 = vector.extract_strided_slice %45 {offsets = [0, 249], sizes = [32, 64], strides = [1, 1]} : vector<32x640xbf16> to vector<32x64xbf16>
    %74 = vector.extract_strided_slice %45 {offsets = [0, 170], sizes = [32, 64], strides = [1, 1]} : vector<32x640xbf16> to vector<32x64xbf16>
    %75 = tpu.concatenate %66, %67, %68, %69, %70, %71, %72, %73, %74 in 0 : vector<32x64xbf16>, vector<32x64xbf16>, vector<32x64xbf16>, vector<32x64xbf16>, vector<32x64xbf16>, vector<32x64xbf16>, vector<32x64xbf16>, vector<32x64xbf16>, vector<32x64xbf16> -> vector<288x64xbf16>
    %76 = vector.extract_strided_slice %45 {offsets = [0, 240], sizes = [32, 64], strides = [1, 1]} : vector<32x640xbf16> to vector<32x64xbf16>
    %77 = vector.extract_strided_slice %45 {offsets = [0, 161], sizes = [32, 64], strides = [1, 1]} : vector<32x640xbf16> to vector<32x64xbf16>
    %78 = vector.extract_strided_slice %45 {offsets = [0, 241], sizes = [32, 64], strides = [1, 1]} : vector<32x640xbf16> to vector<32x64xbf16>
    %79 = vector.extract_strided_slice %45 {offsets = [0, 89], sizes = [32, 64], strides = [1, 1]} : vector<32x640xbf16> to vector<32x64xbf16>
    %80 = vector.extract_strided_slice %45 {offsets = [0, 10], sizes = [32, 64], strides = [1, 1]} : vector<32x640xbf16> to vector<32x64xbf16>
    %81 = vector.extract_strided_slice %45 {offsets = [0, 90], sizes = [32, 64], strides = [1, 1]} : vector<32x640xbf16> to vector<32x64xbf16>
    %82 = vector.extract_strided_slice %45 {offsets = [0, 249], sizes = [32, 64], strides = [1, 1]} : vector<32x640xbf16> to vector<32x64xbf16>
    %83 = vector.extract_strided_slice %45 {offsets = [0, 170], sizes = [32, 64], strides = [1, 1]} : vector<32x640xbf16> to vector<32x64xbf16>
    %84 = vector.extract_strided_slice %45 {offsets = [0, 250], sizes = [32, 64], strides = [1, 1]} : vector<32x640xbf16> to vector<32x64xbf16>
    %85 = tpu.concatenate %76, %77, %78, %79, %80, %81, %82, %83, %84 in 0 : vector<32x64xbf16>, vector<32x64xbf16>, vector<32x64xbf16>, vector<32x64xbf16>, vector<32x64xbf16>, vector<32x64xbf16>, vector<32x64xbf16>, vector<32x64xbf16>, vector<32x64xbf16> -> vector<288x64xbf16>
    %86 = vector.extract_strided_slice %45 {offsets = [0, 320], sizes = [32, 64], strides = [1, 1]} : vector<32x640xbf16> to vector<32x64xbf16>
    %87 = vector.extract_strided_slice %45 {offsets = [0, 400], sizes = [32, 64], strides = [1, 1]} : vector<32x640xbf16> to vector<32x64xbf16>
    %88 = vector.extract_strided_slice %45 {offsets = [0, 321], sizes = [32, 64], strides = [1, 1]} : vector<32x640xbf16> to vector<32x64xbf16>
    %89 = vector.extract_strided_slice %45 {offsets = [0, 480], sizes = [32, 64], strides = [1, 1]} : vector<32x640xbf16> to vector<32x64xbf16>
    %90 = vector.extract_strided_slice %45 {offsets = [0, 560], sizes = [32, 64], strides = [1, 1]} : vector<32x640xbf16> to vector<32x64xbf16>
    %91 = vector.extract_strided_slice %45 {offsets = [0, 481], sizes = [32, 64], strides = [1, 1]} : vector<32x640xbf16> to vector<32x64xbf16>
    %92 = vector.extract_strided_slice %45 {offsets = [0, 329], sizes = [32, 64], strides = [1, 1]} : vector<32x640xbf16> to vector<32x64xbf16>
    %93 = vector.extract_strided_slice %45 {offsets = [0, 409], sizes = [32, 64], strides = [1, 1]} : vector<32x640xbf16> to vector<32x64xbf16>
    %94 = vector.extract_strided_slice %45 {offsets = [0, 330], sizes = [32, 64], strides = [1, 1]} : vector<32x640xbf16> to vector<32x64xbf16>
    %95 = tpu.concatenate %86, %87, %88, %89, %90, %91, %92, %93, %94 in 0 : vector<32x64xbf16>, vector<32x64xbf16>, vector<32x64xbf16>, vector<32x64xbf16>, vector<32x64xbf16>, vector<32x64xbf16>, vector<32x64xbf16>, vector<32x64xbf16>, vector<32x64xbf16> -> vector<288x64xbf16>
    %96 = vector.extract_strided_slice %45 {offsets = [0, 400], sizes = [32, 64], strides = [1, 1]} : vector<32x640xbf16> to vector<32x64xbf16>
    %97 = vector.extract_strided_slice %45 {offsets = [0, 321], sizes = [32, 64], strides = [1, 1]} : vector<32x640xbf16> to vector<32x64xbf16>
    %98 = vector.extract_strided_slice %45 {offsets = [0, 401], sizes = [32, 64], strides = [1, 1]} : vector<32x640xbf16> to vector<32x64xbf16>
    %99 = vector.extract_strided_slice %45 {offsets = [0, 560], sizes = [32, 64], strides = [1, 1]} : vector<32x640xbf16> to vector<32x64xbf16>
    %100 = vector.extract_strided_slice %45 {offsets = [0, 481], sizes = [32, 64], strides = [1, 1]} : vector<32x640xbf16> to vector<32x64xbf16>
    %101 = vector.extract_strided_slice %45 {offsets = [0, 561], sizes = [32, 64], strides = [1, 1]} : vector<32x640xbf16> to vector<32x64xbf16>
    %102 = vector.extract_strided_slice %45 {offsets = [0, 409], sizes = [32, 64], strides = [1, 1]} : vector<32x640xbf16> to vector<32x64xbf16>
    %103 = vector.extract_strided_slice %45 {offsets = [0, 330], sizes = [32, 64], strides = [1, 1]} : vector<32x640xbf16> to vector<32x64xbf16>
    %104 = vector.extract_strided_slice %45 {offsets = [0, 410], sizes = [32, 64], strides = [1, 1]} : vector<32x640xbf16> to vector<32x64xbf16>
    %105 = tpu.concatenate %96, %97, %98, %99, %100, %101, %102, %103, %104 in 0 : vector<32x64xbf16>, vector<32x64xbf16>, vector<32x64xbf16>, vector<32x64xbf16>, vector<32x64xbf16>, vector<32x64xbf16>, vector<32x64xbf16>, vector<32x64xbf16>, vector<32x64xbf16> -> vector<288x64xbf16>
    %106 = vector.extract_strided_slice %45 {offsets = [0, 480], sizes = [32, 64], strides = [1, 1]} : vector<32x640xbf16> to vector<32x64xbf16>
    %107 = vector.extract_strided_slice %45 {offsets = [0, 560], sizes = [32, 64], strides = [1, 1]} : vector<32x640xbf16> to vector<32x64xbf16>
    %108 = vector.extract_strided_slice %45 {offsets = [0, 481], sizes = [32, 64], strides = [1, 1]} : vector<32x640xbf16> to vector<32x64xbf16>
    %109 = vector.extract_strided_slice %45 {offsets = [0, 329], sizes = [32, 64], strides = [1, 1]} : vector<32x640xbf16> to vector<32x64xbf16>
    %110 = vector.extract_strided_slice %45 {offsets = [0, 409], sizes = [32, 64], strides = [1, 1]} : vector<32x640xbf16> to vector<32x64xbf16>
    %111 = vector.extract_strided_slice %45 {offsets = [0, 330], sizes = [32, 64], strides = [1, 1]} : vector<32x640xbf16> to vector<32x64xbf16>
    %112 = vector.extract_strided_slice %45 {offsets = [0, 489], sizes = [32, 64], strides = [1, 1]} : vector<32x640xbf16> to vector<32x64xbf16>
    %113 = vector.extract_strided_slice %45 {offsets = [0, 569], sizes = [32, 64], strides = [1, 1]} : vector<32x640xbf16> to vector<32x64xbf16>
    %114 = vector.extract_strided_slice %45 {offsets = [0, 490], sizes = [32, 64], strides = [1, 1]} : vector<32x640xbf16> to vector<32x64xbf16>
    %115 = tpu.concatenate %106, %107, %108, %109, %110, %111, %112, %113, %114 in 0 : vector<32x64xbf16>, vector<32x64xbf16>, vector<32x64xbf16>, vector<32x64xbf16>, vector<32x64xbf16>, vector<32x64xbf16>, vector<32x64xbf16>, vector<32x64xbf16>, vector<32x64xbf16> -> vector<288x64xbf16>
    %116 = vector.extract_strided_slice %45 {offsets = [0, 560], sizes = [32, 64], strides = [1, 1]} : vector<32x640xbf16> to vector<32x64xbf16>
    %117 = vector.extract_strided_slice %45 {offsets = [0, 481], sizes = [32, 64], strides = [1, 1]} : vector<32x640xbf16> to vector<32x64xbf16>
    %118 = vector.extract_strided_slice %45 {offsets = [0, 561], sizes = [32, 64], strides = [1, 1]} : vector<32x640xbf16> to vector<32x64xbf16>
    %119 = vector.extract_strided_slice %45 {offsets = [0, 409], sizes = [32, 64], strides = [1, 1]} : vector<32x640xbf16> to vector<32x64xbf16>
    %120 = vector.extract_strided_slice %45 {offsets = [0, 330], sizes = [32, 64], strides = [1, 1]} : vector<32x640xbf16> to vector<32x64xbf16>
    %121 = vector.extract_strided_slice %45 {offsets = [0, 410], sizes = [32, 64], strides = [1, 1]} : vector<32x640xbf16> to vector<32x64xbf16>
    %122 = vector.extract_strided_slice %45 {offsets = [0, 569], sizes = [32, 64], strides = [1, 1]} : vector<32x640xbf16> to vector<32x64xbf16>
    %123 = vector.extract_strided_slice %45 {offsets = [0, 490], sizes = [32, 64], strides = [1, 1]} : vector<32x640xbf16> to vector<32x64xbf16>
    %124 = vector.extract_strided_slice %45 {offsets = [0, 570], sizes = [32, 64], strides = [1, 1]} : vector<32x640xbf16> to vector<32x64xbf16>
    %125 = tpu.concatenate %116, %117, %118, %119, %120, %121, %122, %123, %124 in 0 : vector<32x64xbf16>, vector<32x64xbf16>, vector<32x64xbf16>, vector<32x64xbf16>, vector<32x64xbf16>, vector<32x64xbf16>, vector<32x64xbf16>, vector<32x64xbf16>, vector<32x64xbf16> -> vector<288x64xbf16>
    %126 = tpu.concatenate %55, %65, %75, %85, %95, %105, %115, %125 in 1 : vector<288x64xbf16>, vector<288x64xbf16>, vector<288x64xbf16>, vector<288x64xbf16>, vector<288x64xbf16>, vector<288x64xbf16>, vector<288x64xbf16>, vector<288x64xbf16> -> vector<288x512xbf16>
    %c0_17 = arith.constant 0 : index
    %c0_18 = arith.constant 0 : index
    %127 = vector.load %arg8[%c0_17, %c0_18] : memref<64x288xbf16, #tpu.memory_space<vmem>>, vector<64x288xbf16>
    %cst_19 = arith.constant dense<0.000000e+00> : vector<64x512xf32>
    %128 = tpu.matmul %127, %126, %cst_19 {dimension_numbers = #tpu.dot_dimension_numbers<[1], [0], [0], [1], [0, 0, 1, 1], [], []>} : vector<64x288xbf16>, vector<288x512xbf16>, vector<64x512xf32> -> vector<64x512xf32>
    %c0_20 = arith.constant 0 : index
    %c0_21 = arith.constant 0 : index
    %129 = vector.load %arg9[%c0_20, %c0_21] : memref<64x1xf32, #tpu.memory_space<vmem>>, vector<64x1xf32>
    %130 = vector.broadcast %129 : vector<64x1xf32> to vector<64x512xf32>
    %131 = arith.addf %128, %130 : vector<64x512xf32>
    %c0_22 = arith.constant 0 : index
    %c0_23 = arith.constant 0 : index
    %132 = vector.load %arg3[%c0_22, %c0_23] : memref<1x512xf32, #tpu.memory_space<vmem>>, vector<1x512xf32>
    %133 = vector.broadcast %132 : vector<1x512xf32> to vector<64x512xf32>
    %134 = arith.mulf %131, %133 : vector<64x512xf32>
    %cst_24 = arith.constant dense<0.000000e+00> : vector<64xf32>
    %135 = vector.multi_reduction <add>, %134, %cst_24 [1] : vector<64x512xf32> to vector<64xf32>
    %136 = vector.shape_cast %135 : vector<64xf32> to vector<64x1xf32>
    %cst_25 = arith.constant 0.00255102036 : f32
    %137 = vector.broadcast %cst_25 : f32 to vector<64x1xf32>
    %138 = arith.mulf %136, %137 : vector<64x1xf32>
    %139 = vector.broadcast %138 : vector<64x1xf32> to vector<64x512xf32>
    %140 = arith.subf %131, %139 : vector<64x512xf32>
    %141 = arith.mulf %140, %140 : vector<64x512xf32>
    %142 = vector.broadcast %132 : vector<1x512xf32> to vector<64x512xf32>
    %143 = arith.mulf %141, %142 : vector<64x512xf32>
    %cst_26 = arith.constant dense<0.000000e+00> : vector<64xf32>
    %144 = vector.multi_reduction <add>, %143, %cst_26 [1] : vector<64x512xf32> to vector<64xf32>
    %145 = vector.shape_cast %144 : vector<64xf32> to vector<64x1xf32>
    %cst_27 = arith.constant 0.00255102036 : f32
    %146 = vector.broadcast %cst_27 : f32 to vector<64x1xf32>
    %147 = arith.mulf %145, %146 : vector<64x1xf32>
    %cst_28 = arith.constant 9.99999974E-6 : f32
    %148 = vector.broadcast %cst_28 : f32 to vector<64x1xf32>
    %149 = arith.addf %147, %148 : vector<64x1xf32>
    %150 = math.rsqrt %149 : vector<64x1xf32>
    %151 = vector.broadcast %150 : vector<64x1xf32> to vector<64x512xf32>
    %152 = arith.mulf %140, %151 : vector<64x512xf32>
    %c0_29 = arith.constant 0 : index
    %c0_30 = arith.constant 0 : index
    %153 = vector.load %arg10[%c0_29, %c0_30] : memref<64x1xf32, #tpu.memory_space<vmem>>, vector<64x1xf32>
    %154 = vector.broadcast %153 : vector<64x1xf32> to vector<64x512xf32>
    %155 = arith.mulf %152, %154 : vector<64x512xf32>
    %c0_31 = arith.constant 0 : index
    %c0_32 = arith.constant 0 : index
    %156 = vector.load %arg11[%c0_31, %c0_32] : memref<64x1xf32, #tpu.memory_space<vmem>>, vector<64x1xf32>
    %157 = vector.broadcast %156 : vector<64x1xf32> to vector<64x512xf32>
    %158 = arith.addf %155, %157 : vector<64x512xf32>
    %cst_33 = arith.constant 0.000000e+00 : f32
    %159 = vector.broadcast %cst_33 : f32 to vector<64x512xf32>
    %160 = arith.maximumf %158, %159 : vector<64x512xf32>
    %161 = vector.extract_strided_slice %160 {offsets = [0, 0], sizes = [64, 64], strides = [1, 1]} : vector<64x512xf32> to vector<64x64xf32>
    %162 = vector.extract_strided_slice %160 {offsets = [0, 64], sizes = [64, 64], strides = [1, 1]} : vector<64x512xf32> to vector<64x64xf32>
    %163 = arith.maximumf %161, %162 : vector<64x64xf32>
    %164 = vector.extract_strided_slice %160 {offsets = [0, 128], sizes = [64, 64], strides = [1, 1]} : vector<64x512xf32> to vector<64x64xf32>
    %165 = vector.extract_strided_slice %160 {offsets = [0, 192], sizes = [64, 64], strides = [1, 1]} : vector<64x512xf32> to vector<64x64xf32>
    %166 = arith.maximumf %164, %165 : vector<64x64xf32>
    %167 = arith.maximumf %163, %166 : vector<64x64xf32>
    %168 = vector.extract_strided_slice %160 {offsets = [0, 256], sizes = [64, 64], strides = [1, 1]} : vector<64x512xf32> to vector<64x64xf32>
    %169 = vector.extract_strided_slice %160 {offsets = [0, 320], sizes = [64, 64], strides = [1, 1]} : vector<64x512xf32> to vector<64x64xf32>
    %170 = arith.maximumf %168, %169 : vector<64x64xf32>
    %171 = vector.extract_strided_slice %160 {offsets = [0, 384], sizes = [64, 64], strides = [1, 1]} : vector<64x512xf32> to vector<64x64xf32>
    %172 = vector.extract_strided_slice %160 {offsets = [0, 448], sizes = [64, 64], strides = [1, 1]} : vector<64x512xf32> to vector<64x64xf32>
    %173 = arith.maximumf %171, %172 : vector<64x64xf32>
    %174 = arith.maximumf %170, %173 : vector<64x64xf32>
    %175 = tpu.concatenate %167, %174 in 1 : vector<64x64xf32>, vector<64x64xf32> -> vector<64x128xf32>
    %c0_34 = arith.constant 0 : index
    %c0_35 = arith.constant 0 : index
    %176 = vector.load %arg12[%c0_34, %c0_35] : memref<64x128xf32, #tpu.memory_space<vmem>>, vector<64x128xf32>
    tpu.vector_store %arg12[%c0_34, %c0_35], %175 {strides = array<i32>} : memref<64x128xf32, #tpu.memory_space<vmem>>, vector<64x128xf32>,
    return
  }
  func.func @transform_0(%arg0: i32) -> (i32, i32) {
    %c0_i32 = arith.constant 0 : i32
    %c0_i32_0 = arith.constant 0 : i32
    %c0_i32_1 = arith.constant 0 : i32
    return %c0_i32, %c0_i32_0 : i32, i32
  }
  func.func @transform_1(%arg0: i32) -> (i32, i32) {
    %c0_i32 = arith.constant 0 : i32
    %c0_i32_0 = arith.constant 0 : i32
    %c0_i32_1 = arith.constant 0 : i32
    return %c0_i32, %c0_i32_0 : i32, i32
  }
  func.func @transform_2(%arg0: i32) -> (i32, i32) {
    %c0_i32 = arith.constant 0 : i32
    %c0_i32_0 = arith.constant 0 : i32
    %c0_i32_1 = arith.constant 0 : i32
    return %c0_i32, %c0_i32_0 : i32, i32
  }
  func.func @transform_3(%arg0: i32) -> (i32, i32) {
    %c0_i32 = arith.constant 0 : i32
    %c0_i32_0 = arith.constant 0 : i32
    %c0_i32_1 = arith.constant 0 : i32
    return %c0_i32, %c0_i32_0 : i32, i32
  }
  func.func @transform_4(%arg0: i32) -> (i32, i32) {
    %c0_i32 = arith.constant 0 : i32
    %c0_i32_0 = arith.constant 0 : i32
    %c0_i32_1 = arith.constant 0 : i32
    return %c0_i32, %c0_i32_0 : i32, i32
  }
  func.func @transform_5(%arg0: i32) -> (i32, i32) {
    %c0_i32 = arith.constant 0 : i32
    %c0_i32_0 = arith.constant 0 : i32
    %c0_i32_1 = arith.constant 0 : i32
    return %c0_i32, %c0_i32_0 : i32, i32
  }
  func.func @transform_6(%arg0: i32) -> (i32, i32) {
    %c0_i32 = arith.constant 0 : i32
    %c0_i32_0 = arith.constant 0 : i32
    %c0_i32_1 = arith.constant 0 : i32
    return %c0_i32, %c0_i32_0 : i32, i32
  }
  func.func @transform_7(%arg0: i32) -> (i32, i32) {
    %c0_i32 = arith.constant 0 : i32
    %c0_i32_0 = arith.constant 0 : i32
    %c0_i32_1 = arith.constant 0 : i32
    return %c0_i32, %c0_i32_0 : i32, i32
  }
  func.func @transform_8(%arg0: i32) -> (i32, i32) {
    %c0_i32 = arith.constant 0 : i32
    %c0_i32_0 = arith.constant 0 : i32
    %c0_i32_1 = arith.constant 0 : i32
    return %c0_i32, %c0_i32_0 : i32, i32
  }
  func.func @transform_9(%arg0: i32) -> (i32, i32) {
    %c0_i32 = arith.constant 0 : i32
    %c0_i32_0 = arith.constant 0 : i32
    %c0_i32_1 = arith.constant 0 : i32
    return %c0_i32, %c0_i32_0 : i32, i32
  }
  func.func @transform_10(%arg0: i32) -> (i32, i32) {
    %c0_i32 = arith.constant 0 : i32
    %c0_i32_0 = arith.constant 0 : i32
    %c0_i32_1 = arith.constant 0 : i32
    return %c0_i32, %c0_i32_0 : i32, i32
  }
  func.func @transform_11(%arg0: i32) -> (i32, i32) {
    %c0_i32 = arith.constant 0 : i32
    %c0_i32_0 = arith.constant 0 : i32
    %c0_i32_1 = arith.constant 0 : i32
    return %c0_i32, %c0_i32_0 : i32, i32
  }
}

module attributes {stable_mosaic.version = 11 : i64} {
  func.func @_mlp_kernel(%arg0: i32, %arg1: memref<2x3200xbf16, #tpu.memory_space<vmem>>, %arg2: memref<3200x128xbf16, #tpu.memory_space<vmem>>, %arg3: memref<1x128xf32, #tpu.memory_space<vmem>>, %arg4: memref<128x128xbf16, #tpu.memory_space<vmem>>, %arg5: memref<1x128xf32, #tpu.memory_space<vmem>>, %arg6: memref<2x128xf32, #tpu.memory_space<vmem>>) attributes {dimension_semantics = [#tpu.dimension_semantics<arbitrary>], iteration_bounds = array<i64: 1>, scalar_prefetch = 0 : i64, scratch_operands = 0 : i64, tpu.core_type = #tpu.core_type<tc>, window_params = [{pipeline_mode = #tpu.pipeline_mode<synchronous>, transform_indices = @transform_0, window_bounds = array<i64: 2, 3200>}, {pipeline_mode = #tpu.pipeline_mode<synchronous>, transform_indices = @transform_1, window_bounds = array<i64: 3200, 128>}, {pipeline_mode = #tpu.pipeline_mode<synchronous>, transform_indices = @transform_2, window_bounds = array<i64: 1, 128>}, {pipeline_mode = #tpu.pipeline_mode<synchronous>, transform_indices = @transform_3, window_bounds = array<i64: 128, 128>}, {pipeline_mode = #tpu.pipeline_mode<synchronous>, transform_indices = @transform_4, window_bounds = array<i64: 1, 128>}, {pipeline_mode = #tpu.pipeline_mode<synchronous>, transform_indices = @transform_5, window_bounds = array<i64: 2, 128>}]} {
    %c0 = arith.constant 0 : index
    %c0_0 = arith.constant 0 : index
    %0 = vector.load %arg1[%c0, %c0_0] : memref<2x3200xbf16, #tpu.memory_space<vmem>>, vector<2x3200xbf16>
    %c0_1 = arith.constant 0 : index
    %c0_2 = arith.constant 0 : index
    %1 = vector.load %arg2[%c0_1, %c0_2] : memref<3200x128xbf16, #tpu.memory_space<vmem>>, vector<3200x128xbf16>
    %cst = arith.constant dense<0.000000e+00> : vector<2x128xf32>
    %2 = tpu.matmul %0, %1, %cst {dimension_numbers = #tpu.dot_dimension_numbers<[1], [0], [0], [1], [0, 0, 1, 1], [], []>} : vector<2x3200xbf16>, vector<3200x128xbf16>, vector<2x128xf32> -> vector<2x128xf32>
    %c0_3 = arith.constant 0 : index
    %c0_4 = arith.constant 0 : index
    %3 = vector.load %arg3[%c0_3, %c0_4] : memref<1x128xf32, #tpu.memory_space<vmem>>, vector<1x128xf32>
    %4 = vector.broadcast %3 : vector<1x128xf32> to vector<2x128xf32>
    %5 = arith.addf %2, %4 : vector<2x128xf32>
    %cst_5 = arith.constant 0.000000e+00 : f32
    %6 = vector.broadcast %cst_5 : f32 to vector<2x128xf32>
    %7 = arith.maximumf %5, %6 : vector<2x128xf32>
    %8 = arith.truncf %7 : vector<2x128xf32> to vector<2x128xbf16>
    %c0_6 = arith.constant 0 : index
    %c0_7 = arith.constant 0 : index
    %9 = vector.load %arg4[%c0_6, %c0_7] : memref<128x128xbf16, #tpu.memory_space<vmem>>, vector<128x128xbf16>
    %cst_8 = arith.constant dense<0.000000e+00> : vector<2x128xf32>
    %10 = tpu.matmul %8, %9, %cst_8 {dimension_numbers = #tpu.dot_dimension_numbers<[1], [0], [0], [1], [0, 0, 1, 1], [], []>} : vector<2x128xbf16>, vector<128x128xbf16>, vector<2x128xf32> -> vector<2x128xf32>
    %c0_9 = arith.constant 0 : index
    %c0_10 = arith.constant 0 : index
    %11 = vector.load %arg5[%c0_9, %c0_10] : memref<1x128xf32, #tpu.memory_space<vmem>>, vector<1x128xf32>
    %12 = vector.broadcast %11 : vector<1x128xf32> to vector<2x128xf32>
    %13 = arith.addf %10, %12 : vector<2x128xf32>
    %c0_11 = arith.constant 0 : index
    %c0_12 = arith.constant 0 : index
    %14 = vector.load %arg6[%c0_11, %c0_12] : memref<2x128xf32, #tpu.memory_space<vmem>>, vector<2x128xf32>
    tpu.vector_store %arg6[%c0_11, %c0_12], %13 {strides = array<i32>} : memref<2x128xf32, #tpu.memory_space<vmem>>, vector<2x128xf32>,
    return
  }
  func.func @transform_0(%arg0: i32) -> (i32, i32) {
    %c0_i32 = arith.constant 0 : i32
    %c0_i32_0 = arith.constant 0 : i32
    %c0_i32_1 = arith.constant 0 : i32
    return %c0_i32, %c0_i32_0 : i32, i32
  }
  func.func @transform_1(%arg0: i32) -> (i32, i32) {
    %c0_i32 = arith.constant 0 : i32
    %c0_i32_0 = arith.constant 0 : i32
    %c0_i32_1 = arith.constant 0 : i32
    return %c0_i32, %c0_i32_0 : i32, i32
  }
  func.func @transform_2(%arg0: i32) -> (i32, i32) {
    %c0_i32 = arith.constant 0 : i32
    %c0_i32_0 = arith.constant 0 : i32
    %c0_i32_1 = arith.constant 0 : i32
    return %c0_i32, %c0_i32_0 : i32, i32
  }
  func.func @transform_3(%arg0: i32) -> (i32, i32) {
    %c0_i32 = arith.constant 0 : i32
    %c0_i32_0 = arith.constant 0 : i32
    %c0_i32_1 = arith.constant 0 : i32
    return %c0_i32, %c0_i32_0 : i32, i32
  }
  func.func @transform_4(%arg0: i32) -> (i32, i32) {
    %c0_i32 = arith.constant 0 : i32
    %c0_i32_0 = arith.constant 0 : i32
    %c0_i32_1 = arith.constant 0 : i32
    return %c0_i32, %c0_i32_0 : i32, i32
  }
  func.func @transform_5(%arg0: i32) -> (i32, i32) {
    %c0_i32 = arith.constant 0 : i32
    %c0_i32_0 = arith.constant 0 : i32
    %c0_i32_1 = arith.constant 0 : i32
    return %c0_i32, %c0_i32_0 : i32, i32
  }
}

</mosaic_0001>

<bundles_post_ra>
// kernel: custom_cnn_forward.3
= control target key start
LH: loop header
LB: loop body
LE: loop exit
PB: predicated region body
PF: predicated region fallthrough
CT: control target
= control target key end

     0   :  { %s3869_s0 = inlined_call_operand.vmem [shape: bf16[2,3200], index: 0, kind: input, shape index: {}]   ;;  %s3870_s1 = inlined_call_operand.vmem [shape: bf16[3200,128], index: 1, kind: input, shape index: {}]   ;;  %s3871_s2 = inlined_call_operand.vmem [shape: f32[1,128], index: 2, kind: input, shape index: {}]   ;;  %s3872_s3 = inlined_call_operand.vmem [shape: bf16[128,128], index: 3, kind: input, shape index: {}]   ;;  %s3873_s4 = inlined_call_operand.vmem [shape: f32[1,128], index: 4, kind: input, shape index: {}]   ;;  %s3874_s5 = inlined_call_operand.hbm [shape: f32[2,128], index: 5, kind: output, shape index: {}]  }
   0x1   :  { %v2951_v0 = vld [vmem:[%s3870_s1 + $0x38] sm:$0xff]  ;;  %v2950_v4 = vld [vmem:[%s3870_s1 + $0x30] sm:$0xff]  ;;  %v2949_v8 = vld [vmem:[%s3870_s1 + $0x28] sm:$0xff] }
   0x2   :  { %v2967_v1 = vld [vmem:[%s3870_s1 + $0xb8] sm:$0xff]  ;;  %1687 = vmatpush.bf16.msra.mxu0 %v2951_v0  ;;  %v2966_v5 = vld [vmem:[%s3870_s1 + $0xb0] sm:$0xff]  ;;  %v2965_v9 = vld [vmem:[%s3870_s1 + $0xa8] sm:$0xff] }
   0x3   :  { %v2959_v2 = vld [vmem:[%s3870_s1 + $0x78] sm:$0xff]  ;;  %1713 = vmatpush.bf16.msra.mxu2 %v2967_v1  ;;  %v2958_v6 = vld [vmem:[%s3870_s1 + $0x70] sm:$0xff]  ;;  %v2957_v10 = vld [vmem:[%s3870_s1 + $0x68] sm:$0xff] }
   0x4   :  { %v2975_v3 = vld [vmem:[%s3870_s1 + $0xf8] sm:$0xff]  ;;  %1700 = vmatpush.bf16.msra.mxu1 %v2959_v2  ;;  %v2974_v7 = vld [vmem:[%s3870_s1 + $0xf0] sm:$0xff]  ;;  %v2973_v11 = vld [vmem:[%s3870_s1 + $0xe8] sm:$0xff] }
   0x5   :  { %1726 = vmatpush.bf16.msra.mxu3 %v2975_v3  ;;  %v2948_v12 = vld [vmem:[%s3870_s1 + $0x20] sm:$0xff]  ;;  %v2947_v16 = vld [vmem:[%s3870_s1 + $0x18] sm:$0xff]  ;;  %v2946_v21 = vld [vmem:[%s3870_s1 + $0x10] sm:$0xff] }
   0x6   :  { %1688 = vmatpush.bf16.msra.mxu0 %v2950_v4  ;;  %v2964_v13 = vld [vmem:[%s3870_s1 + $0xa0] sm:$0xff]  ;;  %v2963_v17 = vld [vmem:[%s3870_s1 + $0x98] sm:$0xff]  ;;  %v2962_v22 = vld [vmem:[%s3870_s1 + $0x90] sm:$0xff] }
   0x7   :  { %1714 = vmatpush.bf16.msra.mxu2 %v2966_v5  ;;  %v2956_v14 = vld [vmem:[%s3870_s1 + $0x60] sm:$0xff]  ;;  %v2955_v18 = vld [vmem:[%s3870_s1 + $0x58] sm:$0xff]  ;;  %v2954_v23 = vld [vmem:[%s3870_s1 + $0x50] sm:$0xff] }
   0x8   :  { %1701 = vmatpush.bf16.msra.mxu1 %v2958_v6  ;;  %v2972_v15 = vld [vmem:[%s3870_s1 + $0xe0] sm:$0xff]  ;;  %v2971_v19 = vld [vmem:[%s3870_s1 + $0xd8] sm:$0xff]  ;;  %v2970_v24 = vld [vmem:[%s3870_s1 + $0xd0] sm:$0xff] }
   0x9   :  { %1727 = vmatpush.bf16.msra.mxu3 %v2974_v7  ;;  %v21_v20 = vld [vmem:[%s3869_s0] sm:$0xff] }
   0xa   :  { %1689 = vmatpush.bf16.msra.mxu0 %v2949_v8  ;;  %430 = vst [vmem:[#allocation1] ss:$9 sm:$0xff] %v21_v20 }
   0xb   :  { %1715 = vmatpush.bf16.msra.mxu2 %v2965_v9 }
   0xc   :  { %1702 = vmatpush.bf16.msra.mxu1 %v2957_v10 }
   0xd   :  { %1728 = vmatpush.bf16.msra.mxu3 %v2973_v11 }
   0xe   :  { %1690 = vmatpush.bf16.msra.mxu0 %v2948_v12 }
   0xf   :  { %1716 = vmatpush.bf16.msra.mxu2 %v2964_v13 }
  0x10   :  { %1703 = vmatpush.bf16.msra.mxu1 %v2956_v14 }
  0x11   :  { %1729 = vmatpush.bf16.msra.mxu3 %v2972_v15 }
  0x12   :  { %1691 = vmatpush.bf16.msra.mxu0 %v2947_v16 }
  0x13   :  { %1717 = vmatpush.bf16.msra.mxu2 %v2963_v17 }
  0x14   :  { %1704 = vmatpush.bf16.msra.mxu1 %v2955_v18 }
  0x15   :  { %1730 = vmatpush.bf16.msra.mxu3 %v2971_v19 }
  0x16   :  { %10 = vsyncpa [#allocation3], 0  ;;  %1692 = vmatpush.bf16.msra.mxu0 %v2946_v21  ;;  %v2945_v25 = vld [vmem:[%s3870_s1 + $0x8] sm:$0xff]  ;;  %v2944_v29 = vld [vmem:[%s3870_s1] sm:$0xff]  ;;  %s3181_s14 = smov [#allocation2]   ;;  %s2103_s18 = sshll.u32 %s3874_s5, 4  ;;  %s2104_s18 = int_to_ptr.hbm [resolvable:$true] %s2103_s18 }
  0x17   :  { %1718 = vmatpush.bf16.msra.mxu2 %v2962_v22  ;;  %v2961_v26 = vld [vmem:[%s3870_s1 + $0x88] sm:$0xff]  ;;  %v2960_v30 = vld [vmem:[%s3870_s1 + $0x80] sm:$0xff]  ;;  %v2983_v31 = vld [vmem:[%s3870_s1 + $0x138] sm:$0xff]  ;;  %s2101_s15 = sshll.u32 %s3181_s14, 4  ;;  %s2102_s15 = int_to_ptr.vmem [resolvable:$true] %s2101_s15 }
  0x18   :  { %1705 = vmatpush.bf16.msra.mxu1 %v2954_v23  ;;  %v2953_v27 = vld [vmem:[%s3870_s1 + $0x48] sm:$0xff]  ;;  %v2999_v32 = vld [vmem:[%s3870_s1 + $0x1b8] sm:$0xff]  ;;  %v2952_v33 = vld [vmem:[%s3870_s1 + $0x40] sm:$0xff] }
  0x19   :  { %1731 = vmatpush.bf16.msra.mxu3 %v2970_v24  ;;  %v2969_v28 = vld [vmem:[%s3870_s1 + $0xc8] sm:$0xff]  ;;  %v2968_v34 = vld [vmem:[%s3870_s1 + $0xc0] sm:$0xff]  ;;  %v2991_v35 = vld [vmem:[%s3870_s1 + $0x178] sm:$0xff] }
  0x1a   :  { %1693 = vmatpush.bf16.msra.mxu0 %v2945_v25  ;;  %v3007_v36 = vld [vmem:[%s3870_s1 + $0x1f8] sm:$0xff]  ;;  %v2982_v37 = vld [vmem:[%s3870_s1 + $0x130] sm:$0xff]  ;;  %v431_v40 = vld [vmem:[#allocation1] sm:$0xff] }
  0x1b   :  { %1719 = vmatpush.bf16.msra.mxu2 %v2961_v26  ;;  %v2998_v38 = vld [vmem:[%s3870_s1 + $0x1b0] sm:$0xff]  ;;  %v434_v43 = vld [vmem:[#allocation1 + $0x1b] sm:$0xff]  ;;  %v2981_v45 = vld [vmem:[%s3870_s1 + $0x128] sm:$0xff] }
  0x1c   :  { %1706 = vmatpush.bf16.msra.mxu1 %v2953_v27  ;;  %v433_v39 = vld [vmem:[#allocation1 + $0x12] sm:$0xff]  ;;  %v432_v44 = vld [vmem:[#allocation1 + $0x9] sm:$0xff]  ;;  %v3345_v49 = vld [vmem:[#allocation1 + $0x3f] sm:$0xff] }
  0x1d   :  { %1732 = vmatpush.bf16.msra.mxu3 %v2969_v28  ;;  %v2990_v41 = vld [vmem:[%s3870_s1 + $0x170] sm:$0xff]  ;;  %v2997_v46 = vld [vmem:[%s3870_s1 + $0x1a8] sm:$0xff]  ;;  %v2980_v54 = vld [vmem:[%s3870_s1 + $0x120] sm:$0xff] }
  0x1e   :  { %1694 = vmatpush.bf16.msra.mxu0 %v2944_v29  ;;  %v3006_v42 = vld [vmem:[%s3870_s1 + $0x1f0] sm:$0xff]  ;;  %v3343_v48 = vld [vmem:[#allocation1 + $0x24] sm:$0xff]  ;;  %v2979_v58 = vld [vmem:[%s3870_s1 + $0x118] sm:$0xff] }
  0x1f   :  { %1720 = vmatpush.bf16.msra.mxu2 %v2960_v30  ;;  %v3341_v47 = vld [vmem:[#allocation1 + $0x36] sm:$0xff]  ;;  %v22_v50 = vld [vmem:[%s3869_s0 + $0x8] sm:$0xff]  ;;  %v2996_v55 = vld [vmem:[%s3870_s1 + $0x1a0] sm:$0xff] }
  0x20   :  { %1707 = vmatpush.bf16.msra.mxu1 %v2952_v33  ;;  %v3350_v51 = vld [vmem:[#allocation1 + $0x2d] sm:$0xff]  ;;  %v2988_v56 = vld [vmem:[%s3870_s1 + $0x160] sm:$0xff]  ;;  %v2995_v59 = vld [vmem:[%s3870_s1 + $0x198] sm:$0xff] }
  0x21   :  { %1733 = vmatpush.bf16.msra.mxu3 %v2968_v34  ;;  %1695 = vmatmul.bf16.vlgmr.msra.gmra.mxu0 %v431_v40  ;;  %v2989_v52 = vld [vmem:[%s3870_s1 + $0x168] sm:$0xff]  ;;  %440 = vst [vmem:[#allocation1] ss:$9 sm:$0xff] %v22_v50  ;;  %v3004_v57 = vld [vmem:[%s3870_s1 + $0x1e0] sm:$0xff]  ;;  %v2987_v60 = vld [vmem:[%s3870_s1 + $0x158] sm:$0xff] }
  0x22   :  { %1739 = vmatpush.bf16.msrb.mxu0 %v2983_v31  ;;  %1721 = vmatmul.bf16.vlgmr.msra.gmra.mxu2 %v433_v39  ;;  %v3005_v53 = vld [vmem:[%s3870_s1 + $0x1e8] sm:$0xff]  ;;  %v3003_v61 = vld [vmem:[%s3870_s1 + $0x1d8] sm:$0xff]  ;;  %v2978_v62 = vld [vmem:[%s3870_s1 + $0x110] sm:$0xff] }
  0x23   :  { %1765 = vmatpush.bf16.msrb.mxu2 %v2999_v32  ;;  %1708 = vmatmul.bf16.vlgmr.msra.gmra.mxu1 %v432_v44  ;;  %v2994_v63 = vld [vmem:[%s3870_s1 + $0x190] sm:$0xff]  ;;  %v2977_v2 = vld [vmem:[%s3870_s1 + $0x108] sm:$0xff]  ;;  %v2976_v6 = vld [vmem:[%s3870_s1 + $0x100] sm:$0xff] }
  0x24   :  { %1752 = vmatpush.bf16.msrb.mxu1 %v2991_v35  ;;  %1734 = vmatmul.bf16.vlgmr.msra.gmra.mxu3 %v434_v43  ;;  %v2986_v0 = vld [vmem:[%s3870_s1 + $0x150] sm:$0xff]  ;;  %v2993_v3 = vld [vmem:[%s3870_s1 + $0x188] sm:$0xff]  ;;  %v2992_v7 = vld [vmem:[%s3870_s1 + $0x180] sm:$0xff] }
  0x25   :  { %1778 = vmatpush.bf16.msrb.mxu3 %v3007_v36  ;;  %v3002_v1 = vld [vmem:[%s3870_s1 + $0x1d0] sm:$0xff]  ;;  %v2985_v4 = vld [vmem:[%s3870_s1 + $0x148] sm:$0xff]  ;;  %v3015_v8 = vld [vmem:[%s3870_s1 + $0x238] sm:$0xff] }
  0x26   :  { %1740 = vmatpush.bf16.msrb.mxu0 %v2982_v37  ;;  %v3001_v5 = vld [vmem:[%s3870_s1 + $0x1c8] sm:$0xff]  ;;  %v3031_v9 = vld [vmem:[%s3870_s1 + $0x2b8] sm:$0xff]  ;;  %v2984_v10 = vld [vmem:[%s3870_s1 + $0x140] sm:$0xff] }
  0x27   :  { %1766 = vmatpush.bf16.msrb.mxu2 %v2998_v38  ;;  %v3000_v11 = vld [vmem:[%s3870_s1 + $0x1c0] sm:$0xff]  ;;  %v3023_v12 = vld [vmem:[%s3870_s1 + $0x278] sm:$0xff]  ;;  %v3014_v14 = vld [vmem:[%s3870_s1 + $0x230] sm:$0xff] }
  0x28   :  { %1753 = vmatpush.bf16.msrb.mxu1 %v2990_v41  ;;  %v3039_v13 = vld [vmem:[%s3870_s1 + $0x2f8] sm:$0xff]  ;;  %v3030_v15 = vld [vmem:[%s3870_s1 + $0x2b0] sm:$0xff]  ;;  %v3013_v18 = vld [vmem:[%s3870_s1 + $0x228] sm:$0xff] }
  0x29   :  { %1779 = vmatpush.bf16.msrb.mxu3 %v3006_v42  ;;  %v3022_v16 = vld [vmem:[%s3870_s1 + $0x270] sm:$0xff]  ;;  %v3029_v19 = vld [vmem:[%s3870_s1 + $0x2a8] sm:$0xff]  ;;  %v3012_v22 = vld [vmem:[%s3870_s1 + $0x220] sm:$0xff] }
  0x2a   :  { %1741 = vmatpush.bf16.msrb.mxu0 %v2981_v45  ;;  %v3038_v17 = vld [vmem:[%s3870_s1 + $0x2f0] sm:$0xff]  ;;  %v3021_v20 = vld [vmem:[%s3870_s1 + $0x268] sm:$0xff]  ;;  %v3028_v23 = vld [vmem:[%s3870_s1 + $0x2a0] sm:$0xff] }
  0x2b   :  { %1767 = vmatpush.bf16.msrb.mxu2 %v2997_v46  ;;  %v3037_v21 = vld [vmem:[%s3870_s1 + $0x2e8] sm:$0xff]  ;;  %v3020_v24 = vld [vmem:[%s3870_s1 + $0x260] sm:$0xff]  ;;  %v3011_v26 = vld [vmem:[%s3870_s1 + $0x218] sm:$0xff] }
  0x2c   :  { %1754 = vmatpush.bf16.msrb.mxu1 %v2989_v52  ;;  %v3036_v25 = vld [vmem:[%s3870_s1 + $0x2e0] sm:$0xff]  ;;  %v3027_v27 = vld [vmem:[%s3870_s1 + $0x298] sm:$0xff]  ;;  %v3010_v30 = vld [vmem:[%s3870_s1 + $0x210] sm:$0xff] }
  0x2d   :  { %1780 = vmatpush.bf16.msrb.mxu3 %v3005_v53  ;;  %v3019_v28 = vld [vmem:[%s3870_s1 + $0x258] sm:$0xff]  ;;  %v3026_v31 = vld [vmem:[%s3870_s1 + $0x290] sm:$0xff]  ;;  %v3009_v34 = vld [vmem:[%s3870_s1 + $0x208] sm:$0xff] }
  0x2e   :  { %1742 = vmatpush.bf16.msrb.mxu0 %v2980_v54  ;;  %v3035_v29 = vld [vmem:[%s3870_s1 + $0x2d8] sm:$0xff]  ;;  %v3018_v32 = vld [vmem:[%s3870_s1 + $0x250] sm:$0xff]  ;;  %v3025_v35 = vld [vmem:[%s3870_s1 + $0x288] sm:$0xff] }
  0x2f   :  { %1768 = vmatpush.bf16.msrb.mxu2 %v2996_v55  ;;  %v3034_v33 = vld [vmem:[%s3870_s1 + $0x2d0] sm:$0xff]  ;;  %v3017_v36 = vld [vmem:[%s3870_s1 + $0x248] sm:$0xff]  ;;  %v3008_v38 = vld [vmem:[%s3870_s1 + $0x200] sm:$0xff] }
  0x30   :  { %1755 = vmatpush.bf16.msrb.mxu1 %v2988_v56  ;;  %v3033_v37 = vld [vmem:[%s3870_s1 + $0x2c8] sm:$0xff]  ;;  %v3024_v39 = vld [vmem:[%s3870_s1 + $0x280] sm:$0xff]  ;;  %v3047_v40 = vld [vmem:[%s3870_s1 + $0x338] sm:$0xff] }
  0x31   :  { %1781 = vmatpush.bf16.msrb.mxu3 %v3004_v57  ;;  %v3063_v41 = vld [vmem:[%s3870_s1 + $0x3b8] sm:$0xff]  ;;  %v3016_v42 = vld [vmem:[%s3870_s1 + $0x240] sm:$0xff]  ;;  %v3046_v50 = vld [vmem:[%s3870_s1 + $0x330] sm:$0xff] }
  0x32   :  { %1743 = vmatpush.bf16.msrb.mxu0 %v2979_v58  ;;  %v3032_v43 = vld [vmem:[%s3870_s1 + $0x2c0] sm:$0xff]  ;;  %v3055_v44 = vld [vmem:[%s3870_s1 + $0x378] sm:$0xff]  ;;  %v3054_v52 = vld [vmem:[%s3870_s1 + $0x370] sm:$0xff] }
  0x33   :  { %1769 = vmatpush.bf16.msrb.mxu2 %v2995_v59  ;;  %v441_v45 = vld [vmem:[#allocation1] sm:$0xff]  ;;  %v443_v46 = vld [vmem:[#allocation1 + $0x12] sm:$0xff]  ;;  %v3045_v54 = vld [vmem:[%s3870_s1 + $0x328] sm:$0xff] }
  0x34   :  { %1756 = vmatpush.bf16.msrb.mxu1 %v2987_v60  ;;  %v3070_v53 = vld [vmem:[%s3870_s1 + $0x3f0] sm:$0xff]  ;;  %v3061_v55 = vld [vmem:[%s3870_s1 + $0x3a8] sm:$0xff]  ;;  %v3044_v58 = vld [vmem:[%s3870_s1 + $0x320] sm:$0xff] }
  0x35   :  { %1782 = vmatpush.bf16.msrb.mxu3 %v3003_v61  ;;  %v3053_v56 = vld [vmem:[%s3870_s1 + $0x368] sm:$0xff]  ;;  %v3060_v59 = vld [vmem:[%s3870_s1 + $0x3a0] sm:$0xff] }
  0x36   :  { %1744 = vmatpush.bf16.msrb.mxu0 %v2978_v62  ;;  %v3069_v57 = vld [vmem:[%s3870_s1 + $0x3e8] sm:$0xff]  ;;  %v3052_v60 = vld [vmem:[%s3870_s1 + $0x360] sm:$0xff]  ;;  %v3043_v62 = vld [vmem:[%s3870_s1 + $0x318] sm:$0xff] }
  0x37   :  { %1770 = vmatpush.bf16.msrb.mxu2 %v2994_v63  ;;  %v3068_v61 = vld [vmem:[%s3870_s1 + $0x3e0] sm:$0xff]  ;;  %v3059_v63 = vld [vmem:[%s3870_s1 + $0x398] sm:$0xff] }
  0x38   :  { %1757 = vmatpush.bf16.msrb.mxu1 %v2986_v0  ;;  %v3051_v0 = vld [vmem:[%s3870_s1 + $0x358] sm:$0xff] }
  0x39   :  { %1783 = vmatpush.bf16.msrb.mxu3 %v3002_v1  ;;  %v3067_v1 = vld [vmem:[%s3870_s1 + $0x3d8] sm:$0xff] }
  0x3a   :  { %1745 = vmatpush.bf16.msrb.mxu0 %v2977_v2  ;;  %v3042_v2 = vld [vmem:[%s3870_s1 + $0x310] sm:$0xff] }
  0x3b   :  { %1771 = vmatpush.bf16.msrb.mxu2 %v2993_v3  ;;  %v3058_v3 = vld [vmem:[%s3870_s1 + $0x390] sm:$0xff] }
  0x3c   :  { %1758 = vmatpush.bf16.msrb.mxu1 %v2985_v4  ;;  %v3050_v4 = vld [vmem:[%s3870_s1 + $0x350] sm:$0xff] }
  0x3d   :  { %1784 = vmatpush.bf16.msrb.mxu3 %v3001_v5  ;;  %v3066_v5 = vld [vmem:[%s3870_s1 + $0x3d0] sm:$0xff] }
  0x3e   :  { %1746 = vmatpush.bf16.msrb.mxu0 %v2976_v6  ;;  %v3041_v6 = vld [vmem:[%s3870_s1 + $0x308] sm:$0xff] }
  0x3f   :  { %1772 = vmatpush.bf16.msrb.mxu2 %v2992_v7  ;;  %v3057_v7 = vld [vmem:[%s3870_s1 + $0x388] sm:$0xff] }
  0x40   :  { %1759 = vmatpush.bf16.msrb.mxu1 %v2984_v10  ;;  %v446_v10 = vld [vmem:[#allocation1 + $0x2d] sm:$0xff] }
  0x41   :  { %1785 = vmatpush.bf16.msrb.mxu3 %v3000_v11  ;;  %1747 = vmatmul.bf16.vlgmr.msrb.gmra.mxu0 %v3343_v48  ;;  %v442_v48 = vld [vmem:[#allocation1 + $0x9] sm:$0xff]  ;;  %v448_v11 = vld [vmem:[#allocation1 + $0x3f] sm:$0xff] }
  0x42   :  { %1791 = vmatpush.bf16.msra.mxu0 %v3015_v8  ;;  %1773 = vmatmul.bf16.vlgmr.msrb.gmra.mxu2 %v3341_v47  ;;  %v3071_v47 = vld [vmem:[%s3870_s1 + $0x3f8] sm:$0xff]  ;;  %v445_v8 = vld [vmem:[#allocation1 + $0x24] sm:$0xff] }
  0x43   :  { %1817 = vmatpush.bf16.msra.mxu2 %v3031_v9  ;;  %1760 = vmatmul.bf16.vlgmr.msrb.gmra.mxu1 %v3350_v51  ;;  %v3062_v51 = vld [vmem:[%s3870_s1 + $0x3b0] sm:$0xff] }
  0x44   :  { %1804 = vmatpush.bf16.msra.mxu1 %v3023_v12  ;;  %1786 = vmatmul.bf16.vlgmr.msrb.gmra.mxu3 %v3345_v49  ;;  %v444_v49 = vld [vmem:[#allocation1 + $0x1b] sm:$0xff]  ;;  %v23_v12 = vld [vmem:[%s3869_s0 + $0x10] sm:$0xff] }
  0x45   :  { %1830 = vmatpush.bf16.msra.mxu3 %v3039_v13  ;;  %v447_v9 = vld [vmem:[#allocation1 + $0x36] sm:$0xff]  ;;  %v3049_v13 = vld [vmem:[%s3870_s1 + $0x348] sm:$0xff] }
  0x46   :  { %1792 = vmatpush.bf16.msra.mxu0 %v3014_v14  ;;  %450 = vst [vmem:[#allocation1] ss:$9 sm:$0xff] %v23_v12  ;;  %v3065_v14 = vld [vmem:[%s3870_s1 + $0x3c8] sm:$0xff]  ;;  %v3123_v12 = vld [vmem:[%s3870_s1 + $0x598] sm:$0xff] }
  0x47   :  { %1818 = vmatpush.bf16.msra.mxu2 %v3030_v15  ;;  %v3040_v15 = vld [vmem:[%s3870_s1 + $0x300] sm:$0xff] }
  0x48   :  { %1805 = vmatpush.bf16.msra.mxu1 %v3022_v16  ;;  %v3056_v16 = vld [vmem:[%s3870_s1 + $0x380] sm:$0xff] }
  0x49   :  { %1831 = vmatpush.bf16.msra.mxu3 %v3038_v17  ;;  %v3079_v17 = vld [vmem:[%s3870_s1 + $0x438] sm:$0xff] }
  0x4a   :  { %1793 = vmatpush.bf16.msra.mxu0 %v3013_v18  ;;  %v3095_v18 = vld [vmem:[%s3870_s1 + $0x4b8] sm:$0xff] }
  0x4b   :  { %1819 = vmatpush.bf16.msra.mxu2 %v3029_v19  ;;  %v3048_v19 = vld [vmem:[%s3870_s1 + $0x340] sm:$0xff] }
  0x4c   :  { %1806 = vmatpush.bf16.msra.mxu1 %v3021_v20  ;;  %v3064_v20 = vld [vmem:[%s3870_s1 + $0x3c0] sm:$0xff] }
  0x4d   :  { %1832 = vmatpush.bf16.msra.mxu3 %v3037_v21  ;;  %v3087_v21 = vld [vmem:[%s3870_s1 + $0x478] sm:$0xff] }
  0x4e   :  { %1794 = vmatpush.bf16.msra.mxu0 %v3012_v22  ;;  %v3103_v22 = vld [vmem:[%s3870_s1 + $0x4f8] sm:$0xff] }
  0x4f   :  { %1820 = vmatpush.bf16.msra.mxu2 %v3028_v23  ;;  %v3078_v23 = vld [vmem:[%s3870_s1 + $0x430] sm:$0xff] }
  0x50   :  { %1807 = vmatpush.bf16.msra.mxu1 %v3020_v24  ;;  %v3094_v24 = vld [vmem:[%s3870_s1 + $0x4b0] sm:$0xff] }
  0x51   :  { %1833 = vmatpush.bf16.msra.mxu3 %v3036_v25  ;;  %v3086_v25 = vld [vmem:[%s3870_s1 + $0x470] sm:$0xff] }
  0x52   :  { %1795 = vmatpush.bf16.msra.mxu0 %v3011_v26  ;;  %v3102_v26 = vld [vmem:[%s3870_s1 + $0x4f0] sm:$0xff] }
  0x53   :  { %1821 = vmatpush.bf16.msra.mxu2 %v3027_v27  ;;  %v3077_v27 = vld [vmem:[%s3870_s1 + $0x428] sm:$0xff] }
  0x54   :  { %1808 = vmatpush.bf16.msra.mxu1 %v3019_v28  ;;  %v3093_v28 = vld [vmem:[%s3870_s1 + $0x4a8] sm:$0xff] }
  0x55   :  { %1834 = vmatpush.bf16.msra.mxu3 %v3035_v29  ;;  %v3085_v29 = vld [vmem:[%s3870_s1 + $0x468] sm:$0xff] }
  0x56   :  { %1796 = vmatpush.bf16.msra.mxu0 %v3010_v30  ;;  %v3101_v30 = vld [vmem:[%s3870_s1 + $0x4e8] sm:$0xff] }
  0x57   :  { %1822 = vmatpush.bf16.msra.mxu2 %v3026_v31  ;;  %v3076_v31 = vld [vmem:[%s3870_s1 + $0x420] sm:$0xff] }
  0x58   :  { %1809 = vmatpush.bf16.msra.mxu1 %v3018_v32  ;;  %v3092_v32 = vld [vmem:[%s3870_s1 + $0x4a0] sm:$0xff] }
  0x59   :  { %1835 = vmatpush.bf16.msra.mxu3 %v3034_v33  ;;  %v3084_v33 = vld [vmem:[%s3870_s1 + $0x460] sm:$0xff] }
  0x5a   :  { %1797 = vmatpush.bf16.msra.mxu0 %v3009_v34  ;;  %v3100_v34 = vld [vmem:[%s3870_s1 + $0x4e0] sm:$0xff] }
  0x5b   :  { %1823 = vmatpush.bf16.msra.mxu2 %v3025_v35  ;;  %v3075_v35 = vld [vmem:[%s3870_s1 + $0x418] sm:$0xff] }
  0x5c   :  { %1810 = vmatpush.bf16.msra.mxu1 %v3017_v36  ;;  %v3091_v36 = vld [vmem:[%s3870_s1 + $0x498] sm:$0xff] }
  0x5d   :  { %1836 = vmatpush.bf16.msra.mxu3 %v3033_v37  ;;  %v3083_v37 = vld [vmem:[%s3870_s1 + $0x458] sm:$0xff] }
  0x5e   :  { %1798 = vmatpush.bf16.msra.mxu0 %v3008_v38  ;;  %v3099_v38 = vld [vmem:[%s3870_s1 + $0x4d8] sm:$0xff] }
  0x5f   :  { %1824 = vmatpush.bf16.msra.mxu2 %v3024_v39  ;;  %v3074_v39 = vld [vmem:[%s3870_s1 + $0x410] sm:$0xff] }
  0x60   :  { %1811 = vmatpush.bf16.msra.mxu1 %v3016_v42  ;;  %v3098_v42 = vld [vmem:[%s3870_s1 + $0x4d0] sm:$0xff] }
  0x61   :  { %1837 = vmatpush.bf16.msra.mxu3 %v3032_v43  ;;  %1799 = vmatmul.bf16.vlgmr.msra.gmra.mxu0 %v441_v45  ;;  %v3073_v43 = vld [vmem:[%s3870_s1 + $0x408] sm:$0xff] }
  0x62   :  { %1843 = vmatpush.bf16.msrb.mxu0 %v3047_v40  ;;  %1825 = vmatmul.bf16.vlgmr.msra.gmra.mxu2 %v443_v46  ;;  %v3090_v40 = vld [vmem:[%s3870_s1 + $0x490] sm:$0xff]  ;;  %v3081_v45 = vld [vmem:[%s3870_s1 + $0x448] sm:$0xff] }
  0x63   :  { %1869 = vmatpush.bf16.msrb.mxu2 %v3063_v41  ;;  %1812 = vmatmul.bf16.vlgmr.msra.gmra.mxu1 %v442_v48  ;;  %v3082_v41 = vld [vmem:[%s3870_s1 + $0x450] sm:$0xff]  ;;  %v3097_v46 = vld [vmem:[%s3870_s1 + $0x4c8] sm:$0xff]  ;;  %v3088_v48 = vld [vmem:[%s3870_s1 + $0x480] sm:$0xff] }
  0x64   :  { %1856 = vmatpush.bf16.msrb.mxu1 %v3055_v44  ;;  %1838 = vmatmul.bf16.vlgmr.msra.gmra.mxu3 %v444_v49  ;;  %v3089_v44 = vld [vmem:[%s3870_s1 + $0x488] sm:$0xff]  ;;  %v3111_v49 = vld [vmem:[%s3870_s1 + $0x538] sm:$0xff] }
  0x65   :  { %1882 = vmatpush.bf16.msrb.mxu3 %v3071_v47  ;;  %v3072_v47 = vld [vmem:[%s3870_s1 + $0x400] sm:$0xff] }
  0x66   :  { %1844 = vmatpush.bf16.msrb.mxu0 %v3046_v50  ;;  %v3127_v50 = vld [vmem:[%s3870_s1 + $0x5b8] sm:$0xff] }
  0x67   :  { %1870 = vmatpush.bf16.msrb.mxu2 %v3062_v51  ;;  %v3080_v51 = vld [vmem:[%s3870_s1 + $0x440] sm:$0xff] }
  0x68   :  { %1857 = vmatpush.bf16.msrb.mxu1 %v3054_v52  ;;  %v3096_v52 = vld [vmem:[%s3870_s1 + $0x4c0] sm:$0xff] }
  0x69   :  { %1883 = vmatpush.bf16.msrb.mxu3 %v3070_v53  ;;  %v3119_v53 = vld [vmem:[%s3870_s1 + $0x578] sm:$0xff] }
  0x6a   :  { %1845 = vmatpush.bf16.msrb.mxu0 %v3045_v54  ;;  %v451_v54 = vld [vmem:[#allocation1] sm:$0xff] }
  0x6b   :  { %1871 = vmatpush.bf16.msrb.mxu2 %v3061_v55  ;;  %v453_v55 = vld [vmem:[#allocation1 + $0x12] sm:$0xff] }
  0x6c   :  { %1858 = vmatpush.bf16.msrb.mxu1 %v3053_v56  ;;  %v3135_v56 = vld [vmem:[%s3870_s1 + $0x5f8] sm:$0xff] }
  0x6d   :  { %1884 = vmatpush.bf16.msrb.mxu3 %v3069_v57  ;;  %v452_v57 = vld [vmem:[#allocation1 + $0x9] sm:$0xff] }
  0x6e   :  { %1846 = vmatpush.bf16.msrb.mxu0 %v3044_v58  ;;  %v454_v58 = vld [vmem:[#allocation1 + $0x1b] sm:$0xff] }
  0x6f   :  { %1872 = vmatpush.bf16.msrb.mxu2 %v3060_v59  ;;  %v3110_v59 = vld [vmem:[%s3870_s1 + $0x530] sm:$0xff] }
  0x70   :  { %1859 = vmatpush.bf16.msrb.mxu1 %v3052_v60  ;;  %v3126_v60 = vld [vmem:[%s3870_s1 + $0x5b0] sm:$0xff] }
  0x71   :  { %1885 = vmatpush.bf16.msrb.mxu3 %v3068_v61  ;;  %v3118_v61 = vld [vmem:[%s3870_s1 + $0x570] sm:$0xff] }
  0x72   :  { %1847 = vmatpush.bf16.msrb.mxu0 %v3043_v62  ;;  %v3134_v62 = vld [vmem:[%s3870_s1 + $0x5f0] sm:$0xff] }
  0x73   :  { %1873 = vmatpush.bf16.msrb.mxu2 %v3059_v63  ;;  %v3109_v63 = vld [vmem:[%s3870_s1 + $0x528] sm:$0xff] }
  0x74   :  { %1860 = vmatpush.bf16.msrb.mxu1 %v3051_v0  ;;  %v3125_v0 = vld [vmem:[%s3870_s1 + $0x5a8] sm:$0xff] }
  0x75   :  { %1886 = vmatpush.bf16.msrb.mxu3 %v3067_v1  ;;  %v3117_v1 = vld [vmem:[%s3870_s1 + $0x568] sm:$0xff] }
  0x76   :  { %1848 = vmatpush.bf16.msrb.mxu0 %v3042_v2  ;;  %v3133_v2 = vld [vmem:[%s3870_s1 + $0x5e8] sm:$0xff] }
  0x77   :  { %1874 = vmatpush.bf16.msrb.mxu2 %v3058_v3  ;;  %v3153_v3 = vld [vmem:[%s3871_s2] ss:$0 sm:$0xff] }
  0x78   :  { %1861 = vmatpush.bf16.msrb.mxu1 %v3050_v4  ;;  %v3108_v4 = vld [vmem:[%s3870_s1 + $0x520] sm:$0xff] }
  0x79   :  { %1887 = vmatpush.bf16.msrb.mxu3 %v3066_v5  ;;  %v3124_v5 = vld [vmem:[%s3870_s1 + $0x5a0] sm:$0xff] }
  0x7a   :  { %1849 = vmatpush.bf16.msrb.mxu0 %v3041_v6 }
  0x7b   :  { %1875 = vmatpush.bf16.msrb.mxu2 %v3057_v7  ;;  %v3116_v7 = vld [vmem:[%s3870_s1 + $0x560] sm:$0xff] }
  0x7c   :  { %1862 = vmatpush.bf16.msrb.mxu1 %v3049_v13 }
  0x7d   :  { %1888 = vmatpush.bf16.msrb.mxu3 %v3065_v14  ;;  %v3115_v14 = vld [vmem:[%s3870_s1 + $0x558] sm:$0xff] }
  0x7e   :  { %1850 = vmatpush.bf16.msrb.mxu0 %v3040_v15  ;;  %v3131_v15 = vld [vmem:[%s3870_s1 + $0x5d8] sm:$0xff] }
  0x7f   :  { %1876 = vmatpush.bf16.msrb.mxu2 %v3056_v16 }
  0x80   :  { %1863 = vmatpush.bf16.msrb.mxu1 %v3048_v19 }
  0x81   :  { %1889 = vmatpush.bf16.msrb.mxu3 %v3064_v20  ;;  %1851 = vmatmul.bf16.vlgmr.msrb.gmra.mxu0 %v445_v8  ;;  %v3132_v8 = vld [vmem:[%s3870_s1 + $0x5e0] sm:$0xff] }
  0x82   :  { %1895 = vmatpush.bf16.msra.mxu0 %v3079_v17  ;;  %1877 = vmatmul.bf16.vlgmr.msrb.gmra.mxu2 %v447_v9  ;;  %v3106_v17 = vld [vmem:[%s3870_s1 + $0x510] sm:$0xff] }
  0x83   :  { %1921 = vmatpush.bf16.msra.mxu2 %v3095_v18  ;;  %1864 = vmatmul.bf16.vlgmr.msrb.gmra.mxu1 %v446_v10  ;;  %v3122_v18 = vld [vmem:[%s3870_s1 + $0x590] sm:$0xff] }
  0x84   :  { %1908 = vmatpush.bf16.msra.mxu1 %v3087_v21  ;;  %1890 = vmatmul.bf16.vlgmr.msrb.gmra.mxu3 %v448_v11  ;;  %v3107_v11 = vld [vmem:[%s3870_s1 + $0x518] sm:$0xff] }
  0x85   :  { %1934 = vmatpush.bf16.msra.mxu3 %v3103_v22  ;;  %v3114_v22 = vld [vmem:[%s3870_s1 + $0x550] sm:$0xff] }
  0x86   :  { %1896 = vmatpush.bf16.msra.mxu0 %v3078_v23  ;;  %v3130_v23 = vld [vmem:[%s3870_s1 + $0x5d0] sm:$0xff] }
  0x87   :  { %1922 = vmatpush.bf16.msra.mxu2 %v3094_v24  ;;  %v3105_v24 = vld [vmem:[%s3870_s1 + $0x508] sm:$0xff] }
  0x88   :  { %1909 = vmatpush.bf16.msra.mxu1 %v3086_v25 }
  0x89   :  { %1935 = vmatpush.bf16.msra.mxu3 %v3102_v26  ;;  %v3121_v26 = vld [vmem:[%s3870_s1 + $0x588] sm:$0xff] }
  0x8a   :  { %1897 = vmatpush.bf16.msra.mxu0 %v3077_v27  ;;  %v455_v27 = vld [vmem:[#allocation1 + $0x24] sm:$0xff] }
  0x8b   :  { %1923 = vmatpush.bf16.msra.mxu2 %v3093_v28  ;;  %v457_v28 = vld [vmem:[#allocation1 + $0x36] sm:$0xff] }
  0x8c   :  { %1910 = vmatpush.bf16.msra.mxu1 %v3085_v29 }
  0x8d   :  { %1936 = vmatpush.bf16.msra.mxu3 %v3101_v30  ;;  %v456_v30 = vld [vmem:[#allocation1 + $0x2d] sm:$0xff] }
  0x8e   :  { %1898 = vmatpush.bf16.msra.mxu0 %v3076_v31  ;;  %v458_v31 = vld [vmem:[#allocation1 + $0x3f] sm:$0xff] }
  0x8f   :  { %1924 = vmatpush.bf16.msra.mxu2 %v3092_v32  ;;  %v24_v32 = vld [vmem:[%s3869_s0 + $0x18] sm:$0x1] }
  0x90   :  { %1911 = vmatpush.bf16.msra.mxu1 %v3084_v33  ;;  %460 = vst [vmem:[#allocation1] ss:$9 sm:$0xff] %v24_v32  ;;  %v3113_v33 = vld [vmem:[%s3870_s1 + $0x548] sm:$0xff] }
  0x91   :  { %1937 = vmatpush.bf16.msra.mxu3 %v3100_v34  ;;  %v3129_v34 = vld [vmem:[%s3870_s1 + $0x5c8] sm:$0xff] }
  0x92   :  { %1899 = vmatpush.bf16.msra.mxu0 %v3075_v35 }
  0x93   :  { %1925 = vmatpush.bf16.msra.mxu2 %v3091_v36  ;;  %v3104_v36 = vld [vmem:[%s3870_s1 + $0x500] sm:$0xff] }
  0x94   :  { %1912 = vmatpush.bf16.msra.mxu1 %v3083_v37  ;;  %v3120_v37 = vld [vmem:[%s3870_s1 + $0x580] sm:$0xff] }
  0x95   :  { %1938 = vmatpush.bf16.msra.mxu3 %v3099_v38  ;;  %v3143_v38 = vld [vmem:[%s3870_s1 + $0x638] sm:$0xff] }
  0x96   :  { %1900 = vmatpush.bf16.msra.mxu0 %v3074_v39 }
  0x97   :  { %1926 = vmatpush.bf16.msra.mxu2 %v3090_v40  ;;  %v3112_v40 = vld [vmem:[%s3870_s1 + $0x540] sm:$0xff] }
  0x98   :  { %1913 = vmatpush.bf16.msra.mxu1 %v3082_v41  ;;  %v3128_v41 = vld [vmem:[%s3870_s1 + $0x5c0] sm:$0xff] }
  0x99   :  { %1939 = vmatpush.bf16.msra.mxu3 %v3098_v42  ;;  %v3142_v42 = vld [vmem:[%s3870_s1 + $0x630] sm:$0xff] }
  0x9a   :  { %1901 = vmatpush.bf16.msra.mxu0 %v3073_v43  ;;  %v3141_v43 = vld [vmem:[%s3870_s1 + $0x628] sm:$0xff] }
  0x9b   :  { %1927 = vmatpush.bf16.msra.mxu2 %v3089_v44  ;;  %v3140_v44 = vld [vmem:[%s3870_s1 + $0x620] sm:$0xff] }
  0x9c   :  { %1914 = vmatpush.bf16.msra.mxu1 %v3081_v45 }
  0x9d   :  { %1940 = vmatpush.bf16.msra.mxu3 %v3097_v46 }
  0x9e   :  { %1902 = vmatpush.bf16.msra.mxu0 %v3072_v47  ;;  %v1696_v6 = vpop.f32.mrf.mxu0 }
  0x9f   :  { %1928 = vmatpush.bf16.msra.mxu2 %v3088_v48  ;;  %v1697_v9 = vadd.f32 %v3153_v3, %v1696_v6 }
  0xa0   :  { %1915 = vmatpush.bf16.msra.mxu1 %v3080_v51  ;;  %v1709_v10 = vpop.f32.mrf.mxu1 }
  0xa1   :  { %1941 = vmatpush.bf16.msra.mxu3 %v3096_v52  ;;  %1903 = vmatmul.bf16.vlgmr.msra.gmra.mxu0 %v451_v54  ;;  %v1710_v13 = vadd.f32 %v1709_v10, %v1697_v9  ;;  %v3138_v52 = vld [vmem:[%s3870_s1 + $0x610] sm:$0xff] }
  0xa2   :  { %1947 = vmatpush.bf16.msrb.mxu0 %v3111_v49  ;;  %1929 = vmatmul.bf16.vlgmr.msra.gmra.mxu2 %v453_v55  ;;  %v3139_v49 = vld [vmem:[%s3870_s1 + $0x618] sm:$0xff] }
  0xa3   :  { %1973 = vmatpush.bf16.msrb.mxu2 %v3127_v50  ;;  %1916 = vmatmul.bf16.vlgmr.msra.gmra.mxu1 %v452_v57  ;;  %v3137_v57 = vld [vmem:[%s3870_s1 + $0x608] sm:$0xff] }
  0xa4   :  { %1960 = vmatpush.bf16.msrb.mxu1 %v3119_v53  ;;  %1942 = vmatmul.bf16.vlgmr.msra.gmra.mxu3 %v454_v58 }
  0xa5   :  { %1986 = vmatpush.bf16.msrb.mxu3 %v3135_v56  ;;  %v1722_v16 = vpop.f32.mrf.mxu2 }
  0xa6   :  { %1948 = vmatpush.bf16.msrb.mxu0 %v3110_v59  ;;  %v1723_v19 = vadd.f32 %v1722_v16, %v1710_v13  ;;  %v1698_v21 = vpop.f32.mrf.mxu0  ;;  %v3136_v59 = vld [vmem:[%s3870_s1 + $0x600] sm:$0xff] }
  0xa7   :  { %1974 = vmatpush.bf16.msrb.mxu2 %v3126_v60  ;;  %v1735_v20 = vpop.f32.mrf.mxu3 }
  0xa8   :  { %1961 = vmatpush.bf16.msrb.mxu1 %v3118_v61  ;;  %v1736_v25 = vadd.f32 %v1735_v20, %v1723_v19  ;;  %v1711_v29 = vpop.f32.mrf.mxu1  ;;  %v461_v61 = vld [vmem:[#allocation1] sm:$0xff] }
  0xa9   :  { %1987 = vmatpush.bf16.msrb.mxu3 %v3134_v62  ;;  %v3149_v29 = vld [vmem:[%s3872_s3 + $0x28] sm:$0xff] }
  0xaa   :  { %1949 = vmatpush.bf16.msrb.mxu0 %v3109_v63 }
  0xab   :  { %1975 = vmatpush.bf16.msrb.mxu2 %v3125_v0 }
  0xac   :  { %1962 = vmatpush.bf16.msrb.mxu1 %v3117_v1 }
  0xad   :  { %1988 = vmatpush.bf16.msrb.mxu3 %v3133_v2  ;;  %v1724_v35 = vpop.f32.mrf.mxu2 }
  0xae   :  { %1950 = vmatpush.bf16.msrb.mxu0 %v3108_v4  ;;  %v3146_v35 = vld [vmem:[%s3872_s3 + $0x10] sm:$0xff] }
  0xaf   :  { %1976 = vmatpush.bf16.msrb.mxu2 %v3124_v5  ;;  %v1737_v39 = vpop.f32.mrf.mxu3 }
  0xb0   :  { %1963 = vmatpush.bf16.msrb.mxu1 %v3116_v7 }
  0xb1   :  { %1989 = vmatpush.bf16.msrb.mxu3 %v3132_v8 }
  0xb2   :  { %1951 = vmatpush.bf16.msrb.mxu0 %v3107_v11 }
  0xb3   :  { %1977 = vmatpush.bf16.msrb.mxu2 %v3123_v12 }
  0xb4   :  { %1964 = vmatpush.bf16.msrb.mxu1 %v3115_v14 }
  0xb5   :  { %1990 = vmatpush.bf16.msrb.mxu3 %v3131_v15 }
  0xb6   :  { %1952 = vmatpush.bf16.msrb.mxu0 %v3106_v17 }
  0xb7   :  { %1978 = vmatpush.bf16.msrb.mxu2 %v3122_v18 }
  0xb8   :  { %1965 = vmatpush.bf16.msrb.mxu1 %v3114_v22 }
  0xb9   :  { %1991 = vmatpush.bf16.msrb.mxu3 %v3130_v23  ;;  %v3151_v23 = vld [vmem:[%s3872_s3 + $0x38] sm:$0xff] }
  0xba   :  { %1953 = vmatpush.bf16.msrb.mxu0 %v3105_v24 }
  0xbb   :  { %1979 = vmatpush.bf16.msrb.mxu2 %v3121_v26  ;;  %v3150_v26 = vld [vmem:[%s3872_s3 + $0x30] sm:$0xff] }
  0xbc   :  { %1966 = vmatpush.bf16.msrb.mxu1 %v3113_v33 }
  0xbd   :  { %1992 = vmatpush.bf16.msrb.mxu3 %v3129_v34  ;;  %v3147_v34 = vld [vmem:[%s3872_s3 + $0x18] sm:$0xff] }
  0xbe   :  { %1954 = vmatpush.bf16.msrb.mxu0 %v3104_v36  ;;  %v1748_v45 = vpop.f32.mrf.mxu0  ;;  %v3145_v36 = vld [vmem:[%s3872_s3 + $0x8] sm:$0xff] }
  0xbf   :  { %1980 = vmatpush.bf16.msrb.mxu2 %v3120_v37  ;;  %v1749_v46 = vadd.f32 %v1748_v45, %v1736_v25 }
  0xc0   :  { %1967 = vmatpush.bf16.msrb.mxu1 %v3112_v40  ;;  %v1761_v47 = vpop.f32.mrf.mxu1 }
  0xc1   :  { %1993 = vmatpush.bf16.msrb.mxu3 %v3128_v41  ;;  %1955 = vmatmul.bf16.vlgmr.msrb.gmra.mxu0 %v455_v27  ;;  %v1762_v48 = vadd.f32 %v1761_v47, %v1749_v46 }
  0xc2   :  { %1999 = vmatpush.bf16.msra.mxu0 %v3143_v38  ;;  %1981 = vmatmul.bf16.vlgmr.msrb.gmra.mxu2 %v457_v28  ;;  %v3144_v38 = vld [vmem:[%s3872_s3] sm:$0xff] }
  0xc3   :  { %1968 = vmatmul.bf16.vlgmr.msrb.gmra.mxu1 %v456_v30 }
  0xc4   :  { %1994 = vmatmul.bf16.vlgmr.msrb.gmra.mxu3 %v458_v31  ;;  %2082 = vmatpush.bf16.msra.mxu1 %v3151_v23  ;;  %v3148_v31 = vld [vmem:[%s3872_s3 + $0x20] sm:$0xff] }
  0xc5   :  { %v1774_v50 = vpop.f32.mrf.mxu2 }
  0xc6   :  { %2000 = vmatpush.bf16.msra.mxu0 %v3142_v42  ;;  %v1775_v51 = vadd.f32 %v1774_v50, %v1762_v48  ;;  %v1750_v54 = vpop.f32.mrf.mxu0 }
  0xc7   :  { %v1787_v53 = vpop.f32.mrf.mxu3 }
  0xc8   :  { %v1788_v55 = vadd.f32 %v1787_v53, %v1775_v51  ;;  %v1763_v56 = vpop.f32.mrf.mxu1  ;;  %2083 = vmatpush.bf16.msra.mxu1 %v3150_v26 }
  0xca   :  { %2001 = vmatpush.bf16.msra.mxu0 %v3141_v43 }
  0xcc   :  { %2084 = vmatpush.bf16.msra.mxu1 %v3149_v29 }
  0xcd   :  { %v1776_v58 = vpop.f32.mrf.mxu2 }
  0xce   :  { %2002 = vmatpush.bf16.msra.mxu0 %v3140_v44 }
  0xcf   :  { %v1789_v60 = vpop.f32.mrf.mxu3 }
  0xd0   :  { %2085 = vmatpush.bf16.msra.mxu1 %v3148_v31 }
  0xd2   :  { %2003 = vmatpush.bf16.msra.mxu0 %v3139_v49 }
  0xd4   :  { %2086 = vmatpush.bf16.msra.mxu1 %v3147_v34 }
  0xd6   :  { %2004 = vmatpush.bf16.msra.mxu0 %v3138_v52 }
  0xd8   :  { %2087 = vmatpush.bf16.msra.mxu1 %v3146_v35 }
  0xda   :  { %2005 = vmatpush.bf16.msra.mxu0 %v3137_v57 }
  0xdc   :  { %2088 = vmatpush.bf16.msra.mxu1 %v3145_v36 }
  0xde   :  { %2006 = vmatpush.bf16.msra.mxu0 %v3136_v59  ;;  %v1800_v62 = vpop.f32.mrf.mxu0  ;;  %v3154_v59 = vld [vmem:[%s3873_s4] ss:$0 sm:$0xff] }
  0xdf   :  { %v1801_v63 = vadd.f32 %v1800_v62, %v1788_v55 }
  0xe0   :  { %v1813_v0 = vpop.f32.mrf.mxu1  ;;  %2089 = vmatpush.bf16.msra.mxu1 %v3144_v38 }
  0xe1   :  { %2007 = vmatmul.bf16.vlgmr.msra.gmra.mxu0 %v461_v61  ;;  %v1814_v1 = vadd.f32 %v1813_v0, %v1801_v63 }
  0xe5   :  { %v1826_v2 = vpop.f32.mrf.mxu2 }
  0xe6   :  { %v1827_v3 = vadd.f32 %v1826_v2, %v1814_v1  ;;  %v1802_v5 = vpop.f32.mrf.mxu0 }
  0xe7   :  { %v1839_v4 = vpop.f32.mrf.mxu3 }
  0xe8   :  { %v1840_v6 = vadd.f32 %v1839_v4, %v1827_v3  ;;  %v1815_v7 = vpop.f32.mrf.mxu1 }
  0xed   :  { %v1828_v8 = vpop.f32.mrf.mxu2 }
  0xef   :  { %v1841_v9 = vpop.f32.mrf.mxu3 }
  0xfe   :  { %v1852_v10 = vpop.f32.mrf.mxu0 }
  0xff   :  { %v1853_v11 = vadd.f32 %v1852_v10, %v1840_v6 }
 0x100   :  { %v1865_v12 = vpop.f32.mrf.mxu1 }
 0x101   :  { %v1866_v13 = vadd.f32 %v1865_v12, %v1853_v11 }
 0x105   :  { %v1878_v14 = vpop.f32.mrf.mxu2 }
 0x106   :  { %v1879_v15 = vadd.f32 %v1878_v14, %v1866_v13  ;;  %v1854_v17 = vpop.f32.mrf.mxu0 }
 0x107   :  { %v1891_v16 = vpop.f32.mrf.mxu3 }
 0x108   :  { %v1892_v18 = vadd.f32 %v1891_v16, %v1879_v15  ;;  %v1867_v19 = vpop.f32.mrf.mxu1 }
 0x10d   :  { %v1880_v20 = vpop.f32.mrf.mxu2 }
 0x10f   :  { %v1893_v21 = vpop.f32.mrf.mxu3 }
 0x11e   :  { %v1904_v22 = vpop.f32.mrf.mxu0 }
 0x11f   :  { %v1905_v41 = vadd.f32 %v1904_v22, %v1892_v18 }
 0x120   :  { %v1917_v24 = vpop.f32.mrf.mxu1 }
 0x121   :  { %v1918_v45 = vadd.f32 %v1917_v24, %v1905_v41 }
 0x125   :  { %v1930_v25 = vpop.f32.mrf.mxu2 }
 0x126   :  { %v1906_v28 = vpop.f32.mrf.mxu0  ;;  %v1931_v46 = vadd.f32 %v1930_v25, %v1918_v45 }
 0x127   :  { %v1943_v27 = vpop.f32.mrf.mxu3 }
 0x128   :  { %v1919_v30 = vpop.f32.mrf.mxu1  ;;  %v1944_v49 = vadd.f32 %v1943_v27, %v1931_v46 }
 0x12d   :  { %v1932_v32 = vpop.f32.mrf.mxu2 }
 0x12f   :  { %v1945_v33 = vpop.f32.mrf.mxu3 }
 0x13e   :  { %v1956_v37 = vpop.f32.mrf.mxu0 }
 0x13f   :  { %v1957_v50 = vadd.f32 %v1956_v37, %v1944_v49 }
 0x140   :  { %v1969_v39 = vpop.f32.mrf.mxu1 }
 0x141   :  { %v1970_v51 = vadd.f32 %v1969_v39, %v1957_v50 }
 0x145   :  { %v1982_v40 = vpop.f32.mrf.mxu2 }
 0x146   :  { %v1958_v43 = vpop.f32.mrf.mxu0  ;;  %v1983_v52 = vadd.f32 %v1982_v40, %v1970_v51 }
 0x147   :  { %v1995_v42 = vpop.f32.mrf.mxu3 }
 0x148   :  { %v1971_v44 = vpop.f32.mrf.mxu1  ;;  %v1996_v53 = vadd.f32 %v1995_v42, %v1983_v52 }
 0x14d   :  { %v1984_v47 = vpop.f32.mrf.mxu2 }
 0x14f   :  { %v1997_v48 = vpop.f32.mrf.mxu3 }
 0x15e   :  { %v2008_v54 = vpop.f32.mrf.mxu0 }
 0x15f   :  { %v2009_v55 = vadd.f32 %v2008_v54, %v1996_v53 }
 0x161   :  { %v2012_v56 = vmax.f32 %v2009_v55, 0.0 }
 0x163   :  { %v2013_v57 = vpack.c.bf16 %v2012_v56, %v2012_v56 }
 0x165   :  { %2090 = vmatmul.bf16.vlgmr.msra.gmra.mxu1 %v2013_v57 }
 0x166   :  { %v2010_v58 = vpop.f32.mrf.mxu0 }
 0x1e2   :  { %v2091_v60 = vpop.f32.mrf.mxu1 }
 0x1e3   :  { %v2092_v61 = vadd.f32 %v3154_v59, %v2091_v60 }
 0x1e5   :  { %2095 = vst [vmem:[#allocation2] sm:$0x3] %v2092_v61 }
 0x1e6   :  { %2106 = dma.vmem_to_hbm [thread:$0]  %s2102_s15, 32, %s2104_s18, [#allocation3]  }
 0x1ea   :  { %v2093_v62 = vpop.f32.mrf.mxu1 }
 0x1eb   :  { %3179 = dma.done.wait [#allocation3], 32  }
 0x1ec   :  { %3180 = vsyncadd [#allocation3], 4294967264 }
 0x1ed   :  { %2111 = vsyncpa [#allocation3], 1 }

// kernel: custom_cnn_forward.2
= control target key start
LH: loop header
LB: loop body
LE: loop exit
PB: predicated region body
PF: predicated region fallthrough
CT: control target
= control target key end

     0   :  { %v4062_v3 = vmov 0   ;;  %vm197_vm0 = vcmask 130048   ;;  %s4065_s26 = smov 119   ;;  %s4066_s27 = smov 127   ;;  %vm1717_vm13 = vcmask 1039360   ;;  %vm1702_vm14 = vcmask 318464   ;;  %s8403_s0 = inlined_call_operand.vmem [shape: bf16[16,2560], index: 0, kind: input, shape index: {}]   ;;  %s8404_s3 = inlined_call_operand.vmem [shape: bf16[32,16], index: 3, kind: input, shape index: {}]   ;;  %s8405_s4 = inlined_call_operand.vmem [shape: f32[32,1], index: 4, kind: input, shape index: {}]   ;;  %s8406_s5 = inlined_call_operand.vmem [shape: f32[32,1], index: 5, kind: input, shape index: {}]   ;;  %s8407_s6 = inlined_call_operand.vmem [shape: f32[32,1], index: 6, kind: input, shape index: {}]   ;;  %s8408_s1 = inlined_call_operand.vmem [shape: f32[1,2560], index: 1, kind: input, shape index: {}]   ;;  %s8409_s7 = inlined_call_operand.vmem [shape: bf16[64,288], index: 7, kind: input, shape index: {}]   ;;  %s8410_s8 = inlined_call_operand.vmem [shape: f32[64,1], index: 8, kind: input, shape index: {}]   ;;  %s8411_s9 = inlined_call_operand.vmem [shape: f32[64,1], index: 9, kind: input, shape index: {}]   ;;  %s8412_s10 = inlined_call_operand.vmem [shape: f32[64,1], index: 10, kind: input, shape index: {}]   ;;  %s8413_s2 = inlined_call_operand.vmem [shape: f32[1,512], index: 2, kind: input, shape index: {}]   ;;  %s8414_s11 = inlined_call_operand.vmem [shape: f32[64,128], index: 11, kind: output, shape index: {}]  }
   0x1   :  { %v3787_v0 = vld [vmem:[%s8403_s0] sm:$0xf]  ;;  %v3981_v1 = vld [vmem:[%s8403_s0 + $0x4c] sm:$0xf0]  ;;  %v3971_v2 = vld [vmem:[%s8403_s0 + $0x4] sm:$0xf]  ;;  %4035 = vset.pattern.permute.xlu0 %v4062_v3  ;;  %4036 = vset.pattern.permute.xlu1 %v4062_v3 }
   0x2   :  { %v3788_v4 = vor.u32 %v3981_v1, %v3787_v0  ;;  %v3789_v5 = vld [vmem:[%s8403_s0 + $0x50] sm:$0xf0]  ;;  %v3795_v6 = vld [vmem:[%s8403_s0 + $0x8] sm:$0xf]  ;;  %v3982_v7 = vld [vmem:[%s8403_s0 + $0x54] sm:$0xf0]  ;;  %4037 = vset.pattern.permute.xlu2 %v4062_v3 }
   0x3   :  { %v3792_v8 = vor.u32 %v3971_v2, %v3789_v5  ;;  %v3796_v9 = vor.u32 %v3982_v7, %v3795_v6  ;;  %v3972_v10 = vld [vmem:[%s8403_s0 + $0xc] sm:$0xf]  ;;  %v3797_v11 = vld [vmem:[%s8403_s0 + $0x58] sm:$0xf0]  ;;  %v4181_v12 = vld [vmem:[%s8404_s3] sm:$0xff]  ;;  %s4067_s28 = smov 96  }
   0x4   :  { %211 = vmatpush.bf16.msra.mxu0 %v3788_v4  ;;  %v3800_v13 = vor.u32 %v3972_v10, %v3797_v11  ;;  %v63_v14 = vld [vmem:[%s8405_s4] sm:$0xff]  ;;  %v65_v15 = vld [vmem:[%s8405_s4 + $0x10] sm:$0xff]  ;;  %v3811_v21 = vld [vmem:[%s8403_s0 + $0x18] sm:$0xf]  ;;  %s4068_s29 = smov 39   ;;  %s4069_s30 = smov 118  }
   0x5   :  { %230 = vmatpush.bf16.msra.mxu1 %v3792_v8  ;;  %249 = vmatpush.bf16.msra.mxu2 %v3796_v9  ;;  %v3803_v16 = vld [vmem:[%s8403_s0 + $0x10] sm:$0xf]  ;;  %v3983_v17 = vld [vmem:[%s8403_s0 + $0x5c] sm:$0xf0]  ;;  %v3973_v19 = vld [vmem:[%s8403_s0 + $0x14] sm:$0xf] }
   0x6   :  { %268 = vmatpush.bf16.msra.mxu3 %v3800_v13  ;;  %69 = vperm.xlu0 %4035, %v63_v14   ;;  %v3804_v18 = vor.u32 %v3983_v17, %v3803_v16  ;;  %v3805_v20 = vld [vmem:[%s8403_s0 + $0x60] sm:$0xf0]  ;;  %v3984_v23 = vld [vmem:[%s8403_s0 + $0x64] sm:$0xf0]  ;;  %v3974_v24 = vld [vmem:[%s8403_s0 + $0x1c] sm:$0xf] }
   0x7   :  { %3865 = vmatmul.msk.bf16.vlgmr.msra.gmra.mxu0 %vm197_vm0, %v4181_v12  ;;  %79 = vperm.xlu1 %4036, %v65_v15   ;;  %v3808_v22 = vor.u32 %v3973_v19, %v3805_v20  ;;  %v3813_v25 = vld [vmem:[%s8403_s0 + $0x68] sm:$0xf0]  ;;  %v3812_v26 = vor.u32 %v3984_v23, %v3811_v21  ;;  %v66_v29 = vld [vmem:[%s8405_s4 + $0x18] sm:$0xff]  ;;  %v3819_v31 = vld [vmem:[%s8403_s0 + $0x20] sm:$0xf]  ;;  %s4070_s12 = smov 79  }
   0x8   :  { %3867 = vmatmul.msk.bf16.vlgmr.msra.gmra.mxu1 %vm197_vm0, %v4181_v12  ;;  %3869 = vmatmul.msk.bf16.vlgmr.msra.gmra.mxu2 %vm197_vm0, %v4181_v12  ;;  %v3816_v27 = vor.u32 %v3974_v24, %v3813_v25  ;;  %v64_v28 = vld [vmem:[%s8405_s4 + $0x8] sm:$0xff]  ;;  %v3985_v32 = vld [vmem:[%s8403_s0 + $0x6c] sm:$0xf0]  ;;  %v3975_v33 = vld [vmem:[%s8403_s0 + $0x24] sm:$0xf]  ;;  %s4071_s13 = smov 47  }
   0x9   :  { %3871 = vmatmul.msk.bf16.vlgmr.msra.gmra.mxu3 %vm197_vm0, %v4181_v12  ;;  %287 = vmatpush.bf16.msrb.mxu0 %v3804_v18  ;;  %v4230_v30 = vld [vmem:[%s8404_s3 + $0x8] sm:$0xff]  ;;  %v3820_v34 = vor.u32 %v3985_v32, %v3819_v31  ;;  %v3821_v35 = vld [vmem:[%s8403_s0 + $0x70] sm:$0xf0]  ;;  %v3986_v37 = vld [vmem:[%s8403_s0 + $0x74] sm:$0xf0]  ;;  %s4064_s3 = smov 48  }
   0xa   :  { %306 = vmatpush.bf16.msrb.mxu1 %v3808_v22  ;;  %325 = vmatpush.bf16.msrb.mxu2 %v3812_v26  ;;  %v3827_v36 = vld [vmem:[%s8403_s0 + $0x28] sm:$0xf]  ;;  %v3824_v38 = vor.u32 %v3975_v33, %v3821_v35  ;;  %v3976_v40 = vld [vmem:[%s8403_s0 + $0x2c] sm:$0xf]  ;;  %v3829_v41 = vld [vmem:[%s8403_s0 + $0x78] sm:$0xf0] }
   0xb   :  { %344 = vmatpush.bf16.msrb.mxu3 %v3816_v27  ;;  %v3828_v39 = vor.u32 %v3986_v37, %v3827_v36  ;;  %v3832_v42 = vor.u32 %v3976_v40, %v3829_v41  ;;  %v3835_v43 = vld [vmem:[%s8403_s0 + $0x30] sm:$0xf]  ;;  %v3987_v44 = vld [vmem:[%s8403_s0 + $0x7c] sm:$0xf0]  ;;  %v3977_v45 = vld [vmem:[%s8403_s0 + $0x34] sm:$0xf] }
   0xc   :  { %v3836_v46 = vor.u32 %v3987_v44, %v3835_v43  ;;  %v3837_v47 = vld [vmem:[%s8403_s0 + $0x80] sm:$0xf0]  ;;  %v3843_v48 = vld [vmem:[%s8403_s0 + $0x38] sm:$0xf]  ;;  %v3988_v49 = vld [vmem:[%s8403_s0 + $0x84] sm:$0xf0] }
   0xd   :  { %363 = vmatpush.bf16.msra.mxu0 %v3820_v34  ;;  %v3840_v50 = vor.u32 %v3977_v45, %v3837_v47  ;;  %v3844_v51 = vor.u32 %v3988_v49, %v3843_v48  ;;  %v3978_v52 = vld [vmem:[%s8403_s0 + $0x3c] sm:$0xf]  ;;  %v3845_v53 = vld [vmem:[%s8403_s0 + $0x88] sm:$0xf0]  ;;  %v1354_v56 = vld [vmem:[%s8407_s6] sm:$0xff]  ;;  %s4073_s14 = smov 70  }
   0xe   :  { %74 = vperm.xlu0 %4035, %v64_v28   ;;  %382 = vmatpush.bf16.msra.mxu1 %v3824_v38  ;;  %v1251_v54 = vld [vmem:[%s8406_s5 + $0x8] sm:$0xff]  ;;  %v3848_v55 = vor.u32 %v3978_v52, %v3845_v53  ;;  %v1357_v57 = vld [vmem:[%s8407_s6 + $0x18] sm:$0xff]  ;;  %v3851_v58 = vld [vmem:[%s8403_s0 + $0x40] sm:$0xf]  ;;  %s4074_s15 = smov 87   ;;  %s4075_s16 = smov 7  }
   0xf   :  { %84 = vperm.xlu1 %4036, %v66_v29   ;;  %401 = vmatpush.bf16.msra.mxu2 %v3828_v39  ;;  %v3989_v59 = vld [vmem:[%s8403_s0 + $0x8c] sm:$0xf0]  ;;  %v3979_v60 = vld [vmem:[%s8403_s0 + $0x44] sm:$0xf]  ;;  %v3853_v62 = vld [vmem:[%s8403_s0 + $0x90] sm:$0xf0] }
  0x10   :  { %420 = vmatpush.bf16.msra.mxu3 %v3832_v42  ;;  %v3852_v61 = vor.u32 %v3989_v59, %v3851_v58  ;;  %v3859_v63 = vld [vmem:[%s8403_s0 + $0x48] sm:$0xf]  ;;  %v3990_v0 = vld [vmem:[%s8403_s0 + $0x94] sm:$0xf0]  ;;  %v3856_v1 = vor.u32 %v3979_v60, %v3853_v62  ;;  %v3980_v3 = vld [vmem:[%s8403_s0 + $0x4c] sm:$0xf] }
  0x11   :  { %v3860_v2 = vor.u32 %v3990_v0, %v3859_v63  ;;  %v3861_v4 = vld [vmem:[%s8403_s0 + $0x98] sm:$0xf0]  ;;  %v1250_v25 = vld [vmem:[%s8406_s5] sm:$0xff]  ;;  %v1355_v35 = vld [vmem:[%s8407_s6 + $0x8] sm:$0xff]  ;;  %s4072_s0 = smov 95   ;;  %s4076_s17 = smov 15  }
  0x12   :  { %v3864_v5 = vor.u32 %v3980_v3, %v3861_v4  ;;  %1256 = vperm.xlu2 %4037, %v1250_v25   ;;  %v584_v48 = vld [vmem:[%s8408_s1] sm:$0xff]  ;;  %s4077_s18 = smov 86   ;;  %s4078_s19 = smov 6   ;;  %vm1783_vm15 = vcmask 121856  }
  0x13   :  { %v4486_v59 = vperm.slane %v584_v48, 2  ;;  %s4079_s20 = smov 38   ;;  %s4080_s21 = smov 31  }
  0x14   :  { %s8538_s22 = smov 103   ;;  %s8540_s4 = smov 54  }
  0x15   :  { %s8544_s23 = smov 102   ;;  %s4086_s24 = smov 111  }
  0x16   :  { %1261 = vperm.xlu0 %4035, %v1251_v54   ;;  %v4474_v54 = vperm.slane %v584_v48, 0  ;;  %s8539_s25 = smov 80  }
  0x17   :  { %3866 = vmatmul.msk.bf16.gmra.mxu0 %vm197_vm0, %v4230_v30 }
  0x18   :  { %3868 = vmatmul.msk.bf16.gmra.mxu1 %vm197_vm0, %v4230_v30  ;;  %3870 = vmatmul.msk.bf16.gmra.mxu2 %vm197_vm0, %v4230_v30  ;;  %8589 = vst [vmem:[#allocation3_spill] sm:$0xff] %v4474_v54 }
  0x19   :  { %3872 = vmatmul.msk.bf16.gmra.mxu3 %vm197_vm0, %v4230_v30 }
  0x1e   :  { %1360 = vperm.xlu0 %4035, %v1354_v56   ;;  %v4479_v56 = vperm.slane %v584_v48, 1 }
  0x20   :  { %8591 = vst [vmem:[#allocation5_spill] sm:$0xff] %v4479_v56 }
  0x26   :  { %1375 = vperm.xlu0 %4035, %v1357_v57  }
  0x27   :  { %3873 = vmatmul.msk.bf16.vlgmr.msrb.gmra.mxu0 %vm197_vm0, %v4181_v12 }
  0x28   :  { %3875 = vmatmul.msk.bf16.vlgmr.msrb.gmra.mxu1 %vm197_vm0, %v4181_v12  ;;  %3877 = vmatmul.msk.bf16.vlgmr.msrb.gmra.mxu2 %vm197_vm0, %v4181_v12 }
  0x29   :  { %3879 = vmatmul.msk.bf16.vlgmr.msrb.gmra.mxu3 %vm197_vm0, %v4181_v12  ;;  %439 = vmatpush.bf16.msrb.mxu0 %v3836_v46 }
  0x2a   :  { %458 = vmatpush.bf16.msrb.mxu1 %v3840_v50  ;;  %477 = vmatpush.bf16.msrb.mxu2 %v3844_v51 }
  0x2b   :  { %496 = vmatpush.bf16.msrb.mxu3 %v3848_v55 }
  0x37   :  { %3874 = vmatmul.msk.bf16.gmra.mxu0 %vm197_vm0, %v4230_v30 }
  0x38   :  { %3876 = vmatmul.msk.bf16.gmra.mxu1 %vm197_vm0, %v4230_v30  ;;  %3878 = vmatmul.msk.bf16.gmra.mxu2 %vm197_vm0, %v4230_v30 }
  0x39   :  { %3880 = vmatmul.msk.bf16.gmra.mxu3 %vm197_vm0, %v4230_v30 }
  0x47   :  { %3881 = vmatmul.msk.bf16.vlgmr.msra.gmra.mxu0 %vm197_vm0, %v4181_v12 }
  0x48   :  { %3883 = vmatmul.msk.bf16.vlgmr.msra.gmra.mxu1 %vm197_vm0, %v4181_v12  ;;  %3885 = vmatmul.msk.bf16.vlgmr.msra.gmra.mxu2 %vm197_vm0, %v4181_v12 }
  0x49   :  { %3887 = vmatmul.msk.bf16.vlgmr.msra.gmra.mxu3 %vm197_vm0, %v4181_v12  ;;  %515 = vmatpush.bf16.msra.mxu0 %v3852_v61 }
  0x4a   :  { %534 = vmatpush.bf16.msra.mxu1 %v3856_v1  ;;  %553 = vmatpush.bf16.msra.mxu2 %v3860_v2  ;;  %v1252_v1 = vld [vmem:[%s8406_s5 + $0x10] sm:$0xff] }
  0x4b   :  { %572 = vmatpush.bf16.msra.mxu3 %v3864_v5  ;;  %1266 = vperm.xlu1 %4036, %v1252_v1  }
  0x57   :  { %3882 = vmatmul.msk.bf16.gmra.mxu0 %vm197_vm0, %v4230_v30 }
  0x58   :  { %3884 = vmatmul.msk.bf16.gmra.mxu1 %vm197_vm0, %v4230_v30  ;;  %3886 = vmatmul.msk.bf16.gmra.mxu2 %vm197_vm0, %v4230_v30 }
  0x59   :  { %3888 = vmatmul.msk.bf16.gmra.mxu3 %vm197_vm0, %v4230_v30 }
  0x67   :  { %3889 = vmatmul.msk.bf16.vlgmr.msrb.gmra.mxu0 %vm197_vm0, %v4181_v12 }
  0x68   :  { %3891 = vmatmul.msk.bf16.vlgmr.msrb.gmra.mxu1 %vm197_vm0, %v4181_v12  ;;  %3893 = vmatmul.msk.bf16.vlgmr.msrb.gmra.mxu2 %vm197_vm0, %v4181_v12 }
  0x69   :  { %3895 = vmatmul.msk.bf16.vlgmr.msrb.gmra.mxu3 %vm197_vm0, %v4181_v12 }
  0x77   :  { %3890 = vmatmul.msk.bf16.gmra.mxu0 %vm197_vm0, %v4230_v30 }
  0x78   :  { %3892 = vmatmul.msk.bf16.gmra.mxu1 %vm197_vm0, %v4230_v30  ;;  %3894 = vmatmul.msk.bf16.gmra.mxu2 %vm197_vm0, %v4230_v30  ;;  %v4450_v43 = vpop.permute.xlu0 %69 }
  0x79   :  { %3896 = vmatmul.msk.bf16.gmra.mxu3 %vm197_vm0, %v4230_v30  ;;  %v4494_v62 = vpop.permute.xlu1 %79 }
  0x80   :  { %v4481_v57 = vpop.permute.xlu0 %74 }
  0x84   :  { %v213_v6 = vpop.f32.mrf.mxu0 }
  0x85   :  { %v232_v7 = vpop.f32.mrf.mxu1  ;;  %v4472_v53 = vadd.f32 %v213_v6, %v4450_v43  ;;  %v4514_v6 = vperm.slane %v584_v48, 3 }
  0x86   :  { %v4477_v55 = vadd.f32 %v232_v7, %v4450_v43 }
  0x87   :  { %3897 = vmatmul.msk.bf16.vlgmr.msra.gmra.mxu0 %vm197_vm0, %v4181_v12  ;;  %8588 = vst [vmem:[#allocation2_spill] sm:$0xff] %v4472_v53  ;;  %v630_v63 = vmul.f32 %v4474_v54, %v4472_v53 }
  0x88   :  { %3899 = vmatmul.msk.bf16.vlgmr.msra.gmra.mxu1 %vm197_vm0, %v4181_v12  ;;  %3901 = vmatmul.msk.bf16.vlgmr.msra.gmra.mxu2 %vm197_vm0, %v4181_v12  ;;  %8590 = vst [vmem:[#allocation4_spill] sm:$0xff] %v4477_v55  ;;  %v631_v0 = vmul.f32 %v4479_v56, %v4477_v55 }
  0x89   :  { %3903 = vmatmul.msk.bf16.vlgmr.msra.gmra.mxu3 %vm197_vm0, %v4181_v12 }
  0x8b   :  { %v251_v8 = vpop.f32.mrf.mxu2 }
  0x8c   :  { %v4377_v9 = vpop.f32.mrf.mxu3  ;;  %v215_v10 = vpop.f32.mrf.mxu0  ;;  %v4484_v58 = vadd.f32 %v251_v8, %v4450_v43 }
  0x8d   :  { %v234_v11 = vpop.f32.mrf.mxu1  ;;  %v4489_v60 = vadd.f32 %v215_v10, %v4481_v57  ;;  %v4512_v5 = vadd.f32 %v4377_v9, %v4450_v43 }
  0x8e   :  { %8592 = vst [vmem:[#allocation6_spill] sm:$0xff] %v4484_v58  ;;  %v4492_v61 = vadd.f32 %v234_v11, %v4481_v57  ;;  %v632_v4 = vmul.f32 %v4486_v59, %v4484_v58 }
  0x8f   :  { %8593 = vst [vmem:[#allocation7_spill] sm:$0xff] %v4489_v60  ;;  %v650_v10 = vmul.f32 %v4474_v54, %v4489_v60  ;;  %v633_v58 = vmul.f32 %v4514_v6, %v4512_v5 }
  0x90   :  { %8594 = vst [vmem:[#allocation8_spill] sm:$0xff] %v4492_v61  ;;  %v651_v11 = vmul.f32 %v4479_v56, %v4492_v61 }
  0x91   :  { %8596 = vst [vmem:[#allocation10_spill] sm:$0xff] %v4512_v5 }
  0x93   :  { %v253_v13 = vpop.f32.mrf.mxu2 }
  0x94   :  { %v4379_v14 = vpop.f32.mrf.mxu3  ;;  %v4381_v15 = vpop.f32.mrf.mxu0  ;;  %v4504_v2 = vadd.f32 %v253_v13, %v4481_v57  ;;  %v4524_v13 = vperm.slane %v584_v48, 4 }
  0x95   :  { %v4383_v16 = vpop.f32.mrf.mxu1  ;;  %v4530_v9 = vadd.f32 %v4381_v15, %v4494_v62  ;;  %v731_v15 = vadd.f32 %v651_v11, %v650_v10 }
  0x96   :  { %8595 = vst [vmem:[#allocation9_spill] sm:$0xff] %v4504_v2  ;;  %v652_v61 = vmul.f32 %v4486_v59, %v4504_v2  ;;  %v4573_v2 = vperm.slane %v584_v48, 6 }
  0x97   :  { %3898 = vmatmul.msk.bf16.gmra.mxu0 %vm197_vm0, %v4230_v30  ;;  %8597 = vst [vmem:[#allocation11_spill] sm:$0xff] %v4530_v9 }
  0x98   :  { %3902 = vmatmul.msk.bf16.gmra.mxu2 %vm197_vm0, %v4230_v30  ;;  %3900 = vmatmul.msk.bf16.gmra.mxu1 %vm197_vm0, %v4230_v30  ;;  %v732_v11 = vadd.f32 %v731_v15, %v652_v61 }
  0x99   :  { %3904 = vmatmul.msk.bf16.gmra.mxu3 %vm197_vm0, %v4230_v30  ;;  %v1253_v30 = vld [vmem:[%s8406_s5 + $0x18] sm:$0xff]  ;;  %s4082_s5 = smov 112  }
  0x9a   :  { %1271 = vperm.xlu2 %4037, %v1253_v30   ;;  %v710_v30 = vadd.f32 %v631_v0, %v630_v63  ;;  %v4552_v0 = vperm.slane %v584_v48, 5 }
  0x9b   :  { %v4393_v12 = vpop.f32.mrf.mxu2 }
  0x9c   :  { %v4395_v17 = vpop.f32.mrf.mxu3  ;;  %v4397_v18 = vpop.f32.mrf.mxu0  ;;  %v711_v60 = vadd.f32 %v710_v30, %v632_v4  ;;  %v4546_v63 = vadd.f32 %v4393_v12, %v4494_v62  ;;  %v670_v4 = vmul.f32 %v4474_v54, %v4530_v9 }
  0x9d   :  { %v4399_v19 = vpop.f32.mrf.mxu1 }
  0x9e   :  { %8600 = vst [vmem:[#allocation14_spill] sm:$0xff] %v4546_v63 }
  0xa2   :  { %1365 = vperm.xlu2 %4037, %v1355_v35   ;;  %v4534_v35 = vadd.f32 %v4383_v16, %v4494_v62  ;;  %v4550_v16 = vadd.f32 %v4379_v14, %v4481_v57  ;;  %v1356_v14 = vld [vmem:[%s8407_s6 + $0x10] sm:$0xff]  ;;  %s4084_s6 = smov 63  }
  0xa3   :  { %v4401_v20 = vpop.f32.mrf.mxu2  ;;  %1370 = vperm.xlu1 %4036, %v1356_v14   ;;  %v4593_v14 = vperm.slane %v584_v48, 7 }
  0xa4   :  { %v4403_v21 = vpop.f32.mrf.mxu3  ;;  %v4405_v22 = vpop.f32.mrf.mxu0  ;;  %8598 = vst [vmem:[#allocation12_spill] sm:$0xff] %v4534_v35  ;;  %v671_v30 = vmul.f32 %v4479_v56, %v4534_v35  ;;  %v712_v35 = vadd.f32 %v711_v60, %v633_v58  ;;  %v653_v55 = vmul.f32 %v4514_v6, %v4550_v16 }
  0xa5   :  { %v4407_v23 = vpop.f32.mrf.mxu1  ;;  %v4538_v1 = vadd.f32 %v4405_v22, %v4450_v43  ;;  %8601 = vst [vmem:[#allocation15_spill] sm:$0xff] %v4550_v16 }
  0xa6   :  { %v4566_v10 = vadd.f32 %v4407_v23, %v4450_v43  ;;  %v4581_v23 = vadd.f32 %v4395_v17, %v4494_v62  ;;  %v752_v17 = vadd.f32 %v671_v30, %v670_v4 }
  0xa7   :  { %8599 = vst [vmem:[#allocation13_spill] sm:$0xff] %v4538_v1  ;;  %v634_v12 = vmul.f32 %v4524_v13, %v4538_v1  ;;  %v672_v1 = vmul.f32 %v4486_v59, %v4546_v63 }
  0xa8   :  { %8603 = vst [vmem:[#allocation17_spill] sm:$0xff] %v4581_v23  ;;  %v635_v53 = vmul.f32 %v4552_v0, %v4566_v10 }
  0xab   :  { %v4409_v24 = vpop.f32.mrf.mxu2 }
  0xac   :  { %v4414_v26 = vpop.f32.mrf.mxu3  ;;  %v4416_v27 = vpop.f32.mrf.mxu0  ;;  %v4585_v5 = vadd.f32 %v4409_v24, %v4450_v43  ;;  %v713_v24 = vadd.f32 %v712_v35, %v634_v12  ;;  %v753_v35 = vadd.f32 %v752_v17, %v672_v1 }
  0xad   :  { %v4418_v28 = vpop.f32.mrf.mxu1  ;;  %v4556_v22 = vadd.f32 %v4416_v27, %v4481_v57  ;;  %v4571_v27 = vpop.permute.xlu1 %84 }
  0xae   :  { %v4601_v63 = vadd.f32 %v4397_v18, %v4571_v27  ;;  %v4607_v16 = vadd.f32 %v4399_v19, %v4571_v27  ;;  %v4611_v48 = vadd.f32 %v4418_v28, %v4481_v57  ;;  %v4620_v18 = vld [vmem:[%s8408_s1 + $0x8] sm:$0xff]  ;;  %v636_v19 = vmul.f32 %v4573_v2, %v4585_v5 }
  0xaf   :  { %8602 = vst [vmem:[#allocation16_spill] sm:$0xff] %v4556_v22  ;;  %v654_v58 = vmul.f32 %v4524_v13, %v4556_v22  ;;  %v4628_v28 = vadd.f32 %v4414_v26, %v4450_v43  ;;  %v4641_v17 = vperm.slane %v4620_v18, 0 }
  0xb0   :  { %8605 = vst [vmem:[#allocation19_spill] sm:$0xff] %v4601_v63  ;;  %v690_v12 = vmul.f32 %v4474_v54, %v4601_v63  ;;  %v691_v26 = vmul.f32 %v4479_v56, %v4607_v16 }
  0xb1   :  { %8606 = vst [vmem:[#allocation20_spill] sm:$0xff] %v4607_v16  ;;  %v637_v63 = vmul.f32 %v4593_v14, %v4628_v28 }
  0xb2   :  { %8607 = vst [vmem:[#allocation21_spill] sm:$0xff] %v4611_v48 }
  0xb3   :  { %v4420_v29 = vpop.f32.mrf.mxu2  ;;  %8609 = vst [vmem:[#allocation23_spill] sm:$0xff] %v4628_v28 }
  0xb4   :  { %v4425_v31 = vpop.f32.mrf.mxu3  ;;  %v4427_v32 = vpop.f32.mrf.mxu0  ;;  %v4615_v4 = vadd.f32 %v4420_v29, %v4481_v57 }
  0xb5   :  { %v4429_v33 = vpop.f32.mrf.mxu1  ;;  %v4632_v29 = vadd.f32 %v4427_v32, %v4494_v62  ;;  %v655_v32 = vmul.f32 %v4552_v0, %v4611_v48 }
  0xb6   :  { %8608 = vst [vmem:[#allocation22_spill] sm:$0xff] %v4615_v4 }
  0xb7   :  { %8610 = vst [vmem:[#allocation24_spill] sm:$0xff] %v4632_v29  ;;  %v674_v48 = vmul.f32 %v4524_v13, %v4632_v29  ;;  %v4689_v29 = vperm.slane %v4620_v18, 2 }
  0xbb   :  { %v4431_v34 = vpop.f32.mrf.mxu2 }
  0xbc   :  { %v4436_v36 = vpop.f32.mrf.mxu3  ;;  %v4438_v37 = vpop.f32.mrf.mxu0  ;;  %v4693_v28 = vadd.f32 %v4431_v34, %v4494_v62 }
  0xbd   :  { %v4440_v38 = vpop.f32.mrf.mxu1 }
  0xbe   :  { %8616 = vst [vmem:[#allocation30_spill] sm:$0xff] %v4693_v28 }
  0xc3   :  { %v4442_v39 = vpop.f32.mrf.mxu2 }
  0xc4   :  { %v4444_v40 = vpop.f32.mrf.mxu3  ;;  %v4446_v41 = vpop.f32.mrf.mxu0 }
  0xc5   :  { %v4448_v42 = vpop.f32.mrf.mxu1  ;;  %v4638_v1 = vadd.f32 %v4446_v41, %v4450_v43 }
  0xc7   :  { %8611 = vst [vmem:[#allocation25_spill] sm:$0xff] %v4638_v1 }
  0xcb   :  { %v4452_v44 = vpop.f32.mrf.mxu2 }
  0xcc   :  { %v4454_v45 = vpop.f32.mrf.mxu3  ;;  %v4456_v46 = vpop.f32.mrf.mxu0 }
  0xcd   :  { %v4458_v47 = vpop.f32.mrf.mxu1 }
  0xd3   :  { %v4463_v49 = vpop.f32.mrf.mxu2 }
  0xd4   :  { %v4465_v50 = vpop.f32.mrf.mxu3  ;;  %v4467_v51 = vpop.f32.mrf.mxu0 }
  0xd5   :  { %v4469_v52 = vpop.f32.mrf.mxu1 }
  0xdb   :  { %v4506_v3 = vpop.f32.mrf.mxu2 }
  0xdc   :  { %v4516_v7 = vpop.f32.mrf.mxu3  ;;  %v4518_v8 = vpop.f32.mrf.mxu0 }
  0xdd   :  { %v4526_v25 = vpop.f32.mrf.mxu1 }
  0xe3   :  { %v4575_v9 = vpop.f32.mrf.mxu2 }
  0xe4   :  { %v4587_v61 = vpop.f32.mrf.mxu3  ;;  %v4589_v15 = vpop.f32.mrf.mxu0 }
  0xe5   :  { %8604 = vst [vmem:[#allocation18_spill] sm:$0xff] %v4587_v61  ;;  %v4597_v60 = vpop.f32.mrf.mxu1  ;;  %v733_v61 = vadd.f32 %v732_v11, %v653_v55  ;;  %v673_v55 = vmul.f32 %v4514_v6, %v4581_v23  ;;  %v714_v11 = vadd.f32 %v713_v24, %v635_v53  ;;  %v656_v53 = vmul.f32 %v4573_v2, %v4615_v4 }
  0xe6   :  { %v4669_v4 = vadd.f32 %v4429_v33, %v4494_v62 }
  0xe7   :  { %v734_v30 = vadd.f32 %v733_v61, %v654_v58  ;;  %v4647_v61 = vadd.f32 %v4401_v20, %v4571_v27  ;;  %v754_v41 = vadd.f32 %v753_v35, %v673_v55  ;;  %v715_v24 = vadd.f32 %v714_v11, %v636_v19 }
  0xe8   :  { %v4663_v20 = vadd.f32 %v4425_v31, %v4481_v57  ;;  %8614 = vst [vmem:[#allocation28_spill] sm:$0xff] %v4669_v4  ;;  %v4675_v55 = vadd.f32 %v4403_v21, %v4571_v27  ;;  %v638_v19 = vmul.f32 %v4641_v17, %v4638_v1  ;;  %v4681_v31 = vadd.f32 %v4448_v42, %v4450_v43 }
  0xe9   :  { %8612 = vst [vmem:[#allocation26_spill] sm:$0xff] %v4647_v61  ;;  %v735_v22 = vadd.f32 %v734_v30, %v655_v32  ;;  %v4684_v30 = vperm.slane %v4620_v18, 1  ;;  %v773_v11 = vadd.f32 %v691_v26, %v690_v12  ;;  %v692_v33 = vmul.f32 %v4486_v59, %v4647_v61 }
  0xea   :  { %8613 = vst [vmem:[#allocation27_spill] sm:$0xff] %v4663_v20  ;;  %v716_v21 = vadd.f32 %v715_v24, %v637_v63  ;;  %v4697_v42 = vadd.f32 %v4452_v44, %v4450_v43  ;;  %v4701_v1 = vadd.f32 %v4456_v46, %v4481_v57  ;;  %v657_v12 = vmul.f32 %v4593_v14, %v4663_v20 }
  0xeb   :  { %v4653_v58 = vpop.f32.mrf.mxu2  ;;  %8615 = vst [vmem:[#allocation29_spill] sm:$0xff] %v4675_v55  ;;  %v736_v32 = vadd.f32 %v735_v22, %v656_v53  ;;  %v755_v22 = vadd.f32 %v754_v41, %v674_v48  ;;  %v675_v26 = vmul.f32 %v4552_v0, %v4669_v4  ;;  %v4709_v63 = vadd.f32 %v4438_v37, %v4571_v27 }
  0xec   :  { %v4657_v23 = vpop.f32.mrf.mxu3  ;;  %v4659_v16 = vpop.f32.mrf.mxu0  ;;  %8617 = vst [vmem:[#allocation31_spill] sm:$0xff] %v4697_v42  ;;  %v693_v34 = vmul.f32 %v4514_v6, %v4675_v55  ;;  %v717_v44 = vadd.f32 %v716_v21, %v638_v19  ;;  %v639_v53 = vmul.f32 %v4684_v30, %v4681_v31  ;;  %v774_v46 = vadd.f32 %v773_v11, %v692_v33 }
  0xed   :  { %v4671_v35 = vpop.f32.mrf.mxu1  ;;  %8618 = vst [vmem:[#allocation32_spill] sm:$0xff] %v4701_v1  ;;  %v737_v24 = vadd.f32 %v736_v32, %v657_v12  ;;  %v4717_v61 = vadd.f32 %v4436_v36, %v4494_v62  ;;  %v4720_v48 = vperm.slane %v4620_v18, 3  ;;  %v676_v37 = vmul.f32 %v4573_v2, %v4693_v28 }
  0xee   :  { %8619 = vst [vmem:[#allocation33_spill] sm:$0xff] %v4709_v63  ;;  %v640_v19 = vmul.f32 %v4689_v29, %v4697_v42  ;;  %v4730_v21 = vadd.f32 %v4454_v45, %v4450_v43  ;;  %v658_v11 = vmul.f32 %v4641_v17, %v4701_v1  ;;  %v756_v32 = vadd.f32 %v755_v22, %v675_v26 }
  0xef   :  { %8620 = vst [vmem:[#allocation34_spill] sm:$0xff] %v4717_v61  ;;  %v694_v12 = vmul.f32 %v4524_v13, %v4709_v63  ;;  %v4742_v55 = vadd.f32 %v4440_v38, %v4571_v27  ;;  %v4745_v28 = vperm.slane %v4620_v18, 4  ;;  %v718_v4 = vadd.f32 %v717_v44, %v639_v53 }
  0xf0   :  { %v4751_v1 = vadd.f32 %v4458_v47, %v4481_v57  ;;  %v4755_v22 = vadd.f32 %v4463_v49, %v4481_v57  ;;  %v4759_v26 = vadd.f32 %v4589_v15, %v4450_v43  ;;  %v775_v38 = vadd.f32 %v774_v46, %v693_v34 }
  0xf1   :  { %8621 = vst [vmem:[#allocation35_spill] sm:$0xff] %v4742_v55  ;;  %v677_v63 = vmul.f32 %v4593_v14, %v4717_v61  ;;  %v4765_v20 = vadd.f32 %v4442_v39, %v4571_v27  ;;  %v4769_v47 = vadd.f32 %v4467_v51, %v4494_v62  ;;  %v757_v44 = vadd.f32 %v756_v32, %v676_v37 }
  0xf2   :  { %8622 = vst [vmem:[#allocation36_spill] sm:$0xff] %v4751_v1  ;;  %v719_v53 = vadd.f32 %v718_v4, %v640_v19  ;;  %v641_v49 = vmul.f32 %v4720_v48, %v4730_v21  ;;  %v738_v42 = vadd.f32 %v737_v24, %v658_v11  ;;  %v776_v15 = vadd.f32 %v775_v38, %v694_v12 }
  0xf3   :  { %v4722_v41 = vpop.f32.mrf.mxu2  ;;  %8623 = vst [vmem:[#allocation37_spill] sm:$0xff] %v4755_v22  ;;  %v695_v34 = vmul.f32 %v4552_v0, %v4742_v55  ;;  %v4777_v46 = vadd.f32 %v4444_v40, %v4571_v27  ;;  %v4780_v39 = vperm.slane %v4620_v18, 5  ;;  %v659_v51 = vmul.f32 %v4684_v30, %v4751_v1 }
  0xf4   :  { %v4734_v36 = vpop.f32.mrf.mxu3  ;;  %v4736_v33 = vpop.f32.mrf.mxu0  ;;  %8624 = vst [vmem:[#allocation38_spill] sm:$0xff] %v4765_v20  ;;  %v660_v4 = vmul.f32 %v4689_v29, %v4755_v22  ;;  %v642_v24 = vmul.f32 %v4745_v28, %v4759_v26  ;;  %v4790_v37 = vadd.f32 %v4597_v60, %v4450_v43  ;;  %v696_v40 = vmul.f32 %v4573_v2, %v4765_v20 }
  0xf5   :  { %v4747_v45 = vpop.f32.mrf.mxu1  ;;  %8625 = vst [vmem:[#allocation39_spill] sm:$0xff] %v4769_v47  ;;  %v678_v19 = vmul.f32 %v4641_v17, %v4769_v47  ;;  %v4798_v11 = vadd.f32 %v4469_v52, %v4494_v62  ;;  %v4801_v32 = vperm.slane %v4620_v18, 6  ;;  %v720_v38 = vadd.f32 %v719_v53, %v641_v49 }
  0xf6   :  { %8626 = vst [vmem:[#allocation40_spill] sm:$0xff] %v4777_v46  ;;  %v739_v55 = vadd.f32 %v738_v42, %v659_v51  ;;  %v4807_v60 = vadd.f32 %v4465_v50, %v4481_v57  ;;  %v4811_v20 = vadd.f32 %v4653_v58, %v4450_v43  ;;  %v758_v52 = vadd.f32 %v757_v44, %v677_v63 }
  0xf7   :  { %8627 = vst [vmem:[#allocation41_spill] sm:$0xff] %v4798_v11  ;;  %v777_v22 = vadd.f32 %v776_v15, %v695_v34  ;;  %v4819_v1 = vadd.f32 %v4506_v3, %v4494_v62  ;;  %v4823_v42 = vadd.f32 %v4659_v16, %v4481_v57  ;;  %v4829_v58 = vadd.f32 %v4518_v8, %v4571_v27  ;;  %v586_v8 = vld [vmem:[%s8408_s1 + $0x10] sm:$0xf]  ;;  %s4063_s1 = smov 16  }
  0xf8   :  { %v740_v53 = vadd.f32 %v739_v55, %v660_v4  ;;  %v721_v49 = vadd.f32 %v720_v38, %v642_v24  ;;  %v643_v63 = vmul.f32 %v4780_v39, %v4790_v37  ;;  %v759_v44 = vadd.f32 %v758_v52, %v678_v19 }
  0xf9   :  { %8628 = vst [vmem:[#allocation42_spill] sm:$0xff] %v4819_v1  ;;  %v679_v3 = vmul.f32 %v4684_v30, %v4798_v11  ;;  %v778_v15 = vadd.f32 %v777_v22, %v696_v40  ;;  %v697_v16 = vmul.f32 %v4593_v14, %v4777_v46  ;;  %v661_v34 = vmul.f32 %v4720_v48, %v4807_v60 }
  0xfa   :  { %8629 = vst [vmem:[#allocation43_spill] sm:$0xff] %v4823_v42  ;;  %v644_v55 = vmul.f32 %v4801_v32, %v4811_v20  ;;  %v680_v51 = vmul.f32 %v4689_v29, %v4819_v1  ;;  %v4848_v4 = vadd.f32 %v4516_v7, %v4494_v62  ;;  %v4851_v22 = vperm.slane %v4620_v18, 7 }
  0xfb   :  { %v4803_v12 = vpop.f32.mrf.mxu2  ;;  %8630 = vst [vmem:[#allocation44_spill] sm:$0xff] %v4829_v58  ;;  %v662_v24 = vmul.f32 %v4745_v28, %v4823_v42  ;;  %v741_v40 = vadd.f32 %v740_v53, %v661_v34  ;;  %v698_v19 = vmul.f32 %v4641_v17, %v4829_v58  ;;  %v722_v38 = vadd.f32 %v721_v49, %v643_v63 }
  0xfc   :  { %v4813_v47 = vpop.f32.mrf.mxu3  ;;  %v4815_v61 = vpop.f32.mrf.mxu0  ;;  %8631 = vst [vmem:[#allocation45_spill] sm:$0xff] %v4848_v4  ;;  %v4859_v52 = vadd.f32 %v4657_v23, %v4450_v43  ;;  %v760_v46 = vadd.f32 %v759_v44, %v679_v3  ;;  %v4863_v7 = vadd.f32 %v4671_v35, %v4481_v57  ;;  %v4867_v18 = vadd.f32 %v4722_v41, %v4481_v57 }
  0xfd   :  { %v4825_v50 = vpop.f32.mrf.mxu1  ;;  %v4871_v53 = vperm.slane %v586_v8, 0  ;;  %v779_v34 = vadd.f32 %v778_v15, %v697_v16  ;;  %v4875_v49 = vadd.f32 %v4526_v25, %v4571_v27  ;;  %v723_v23 = vadd.f32 %v722_v38, %v644_v55 }
  0xfe   :  { %8632 = vst [vmem:[#allocation46_spill] sm:$0xff] %v4863_v7  ;;  %v761_v3 = vadd.f32 %v760_v46, %v680_v51  ;;  %v681_v35 = vmul.f32 %v4720_v48, %v4848_v4  ;;  %v742_v58 = vadd.f32 %v741_v40, %v662_v24  ;;  %v645_v15 = vmul.f32 %v4851_v22, %v4859_v52 }
  0xff   :  { %8633 = vst [vmem:[#allocation47_spill] sm:$0xff] %v4867_v18  ;;  %v780_v42 = vadd.f32 %v779_v34, %v698_v19  ;;  %v4888_v25 = vadd.f32 %v4736_v33, %v4494_v62  ;;  %v4892_v16 = vadd.f32 %v4575_v9, %v4571_v27  ;;  %v663_v46 = vmul.f32 %v4780_v39, %v4863_v7 }
 0x100   :  { %8634 = vst [vmem:[#allocation48_spill] sm:$0xff] %v4875_v49  ;;  %v664_v55 = vmul.f32 %v4801_v32, %v4867_v18  ;;  %v724_v24 = vadd.f32 %v723_v23, %v645_v15  ;;  %v4903_v19 = vperm.slane %v586_v8, 1  ;;  %v762_v33 = vadd.f32 %v761_v3, %v681_v35 }
 0x101   :  { %8635 = vst [vmem:[#allocation49_spill] sm:$0xff] %v4888_v25  ;;  %v699_v9 = vmul.f32 %v4684_v30, %v4875_v49  ;;  %v743_v38 = vadd.f32 %v742_v58, %v663_v46  ;;  %v4909_v34 = vadd.f32 %v4734_v36, %v4481_v57  ;;  %v4915_v23 = vadd.f32 %v4747_v45, %v4494_v62  ;;  %v8639_v58 = vld [vmem:[#allocation18_spill] sm:$0xff] }
 0x102   :  { %8636 = vst [vmem:[#allocation50_spill] sm:$0xff] %v4892_v16  ;;  %v4917_v15 = vperm.slane %v586_v8, 2  ;;  %v700_v3 = vmul.f32 %v4689_v29, %v4892_v16  ;;  %v4923_v35 = vadd.f32 %v8639_v58, %v4571_v27  ;;  %v4927_v49 = vadd.f32 %v4803_v12, %v4494_v62 }
 0x103   :  { %v4869_v1 = vpop.f32.mrf.mxu2  ;;  %8637 = vst [vmem:[#allocation51_spill] sm:$0xff] %v4909_v34  ;;  %v781_v4 = vadd.f32 %v780_v42, %v699_v9  ;;  %v744_v36 = vadd.f32 %v743_v38, %v664_v55  ;;  %v665_v58 = vmul.f32 %v4851_v22, %v4909_v34  ;;  %v4940_v55 = vadd.f32 %v4815_v61, %v4571_v27 }
 0x104   :  { %v4877_v63 = vpop.f32.mrf.mxu3  ;;  %v517_v44 = vpop.f32.mrf.mxu0  ;;  %8638 = vst [vmem:[#allocation52_spill] sm:$0xff] %v4915_v23  ;;  %v4954_v61 = vadd.f32 %v4813_v47, %v4494_v62 }
 0x105   :  { %v4882_v41 = vadd.f32 %v517_v44, %v4450_v43  ;;  %v536_v11 = vpop.f32.mrf.mxu1  ;;  %v682_v44 = vmul.f32 %v4745_v28, %v4888_v25  ;;  %8640 = vst [vmem:[#allocation18_spill] sm:$0xff] %v4927_v49  ;;  %v782_v34 = vadd.f32 %v781_v4, %v700_v3  ;;  %v745_v7 = vadd.f32 %v744_v36, %v665_v58 }
 0x106   :  { %v4901_v40 = vadd.f32 %v536_v11, %v4450_v43  ;;  %v701_v4 = vmul.f32 %v4720_v48, %v4923_v35  ;;  %v702_v47 = vmul.f32 %v4745_v28, %v4940_v55  ;;  %v685_v58 = vmul.f32 %v4851_v22, %v4954_v61 }
 0x107   :  { %v646_v51 = vmul.f32 %v4871_v53, %v4882_v41 }
 0x108   :  { %v647_v45 = vmul.f32 %v4903_v19, %v4901_v40 }
 0x109   :  { %v725_v11 = vadd.f32 %v724_v24, %v646_v51  ;;  %v4934_v24 = vperm.slane %v586_v8, 3  ;;  %v683_v8 = vmul.f32 %v4780_v39, %v4915_v23 }
 0x10b   :  { %v555_v46 = vpop.f32.mrf.mxu2  ;;  %v726_v25 = vadd.f32 %v725_v11, %v647_v45 }
 0x10c   :  { %v4932_v51 = vadd.f32 %v555_v46, %v4450_v43  ;;  %v574_v42 = vpop.f32.mrf.mxu3  ;;  %v519_v9 = vpop.f32.mrf.mxu0  ;;  %v763_v46 = vadd.f32 %v762_v33, %v682_v44 }
 0x10d   :  { %v4943_v12 = vadd.f32 %v574_v42, %v4450_v43  ;;  %v4946_v38 = vadd.f32 %v519_v9, %v4481_v57  ;;  %v538_v16 = vpop.f32.mrf.mxu1  ;;  %v684_v42 = vmul.f32 %v4801_v32, %v4927_v49  ;;  %v783_v9 = vadd.f32 %v782_v34, %v701_v4 }
 0x10e   :  { %v648_v18 = vmul.f32 %v4917_v15, %v4932_v51  ;;  %v4963_v44 = vadd.f32 %v538_v16, %v4481_v57  ;;  %v764_v3 = vadd.f32 %v763_v46, %v683_v8  ;;  %v4973_v49 = vadd.f32 %v4825_v50, %v4571_v27 }
 0x10f   :  { %v666_v43 = vmul.f32 %v4871_v53, %v4946_v38  ;;  %v649_v33 = vmul.f32 %v4934_v24, %v4943_v12  ;;  %v784_v8 = vadd.f32 %v783_v9, %v702_v47 }
 0x110   :  { %v727_v11 = vadd.f32 %v726_v25, %v648_v18  ;;  %8641 = vst [vmem:[#allocation53_spill] sm:$0xff] %v4973_v49  ;;  %v765_v23 = vadd.f32 %v764_v3, %v684_v42  ;;  %v4977_v18 = vadd.f32 %v4869_v1, %v4571_v27  ;;  %v667_v25 = vmul.f32 %v4903_v19, %v4963_v44 }
 0x111   :  { %v746_v36 = vadd.f32 %v745_v7, %v666_v43  ;;  %v703_v4 = vmul.f32 %v4780_v39, %v4973_v49 }
 0x112   :  { %v728_v45 = vadd.f32 %v727_v11, %v649_v33  ;;  %8642 = vst [vmem:[#allocation54_spill] sm:$0xff] %v4977_v18  ;;  %v766_v3 = vadd.f32 %v765_v23, %v685_v58 }
 0x113   :  { %v557_v16 = vpop.f32.mrf.mxu2  ;;  %v747_v11 = vadd.f32 %v746_v36, %v667_v25 }
 0x114   :  { %v4982_v7 = vadd.f32 %v557_v16, %v4481_v57  ;;  %v576_v34 = vpop.f32.mrf.mxu3  ;;  %729 = vadd.xlane.f32.xlu2 %v728_v45  ;;  %v522_v46 = vpop.f32.mrf.mxu0  ;;  %v785_v16 = vadd.f32 %v784_v8, %v703_v4 }
 0x115   :  { %v4985_v43 = vadd.f32 %v576_v34, %v4481_v57  ;;  %v4988_v50 = vadd.f32 %v522_v46, %v4494_v62  ;;  %v541_v42 = vpop.f32.mrf.mxu1  ;;  %v704_v57 = vmul.f32 %v4801_v32, %v4977_v18  ;;  %v5005_v34 = vadd.f32 %v4877_v63, %v4571_v27 }
 0x116   :  { %v668_v1 = vmul.f32 %v4917_v15, %v4982_v7  ;;  %v4993_v33 = vadd.f32 %v541_v42, %v4494_v62 }
 0x117   :  { %v686_v47 = vmul.f32 %v4871_v53, %v4988_v50  ;;  %v669_v45 = vmul.f32 %v4934_v24, %v4985_v43  ;;  %v786_v49 = vadd.f32 %v785_v16, %v704_v57 }
 0x118   :  { %v748_v9 = vadd.f32 %v747_v11, %v668_v1  ;;  %v687_v25 = vmul.f32 %v4903_v19, %v4993_v33  ;;  %v705_v11 = vmul.f32 %v4851_v22, %v5005_v34 }
 0x119   :  { %v767_v36 = vadd.f32 %v766_v3, %v686_v47 }
 0x11a   :  { %v749_v46 = vadd.f32 %v748_v9, %v669_v45  ;;  %v787_v9 = vadd.f32 %v786_v49, %v705_v11 }
 0x11b   :  { %v560_v42 = vpop.f32.mrf.mxu2  ;;  %v768_v4 = vadd.f32 %v767_v36, %v687_v25 }
 0x11c   :  { %v5010_v23 = vadd.f32 %v560_v42, %v4494_v62  ;;  %750 = vadd.xlane.f32.xlu2 %v749_v46  ;;  %v524_v58 = vpop.f32.mrf.mxu0  ;;  %v579_v18 = vpop.f32.mrf.mxu3 }
 0x11d   :  { %v5013_v1 = vadd.f32 %v524_v58, %v4571_v27  ;;  %v5016_v8 = vadd.f32 %v579_v18, %v4494_v62  ;;  %v543_v63 = vpop.f32.mrf.mxu1 }
 0x11e   :  { %v688_v47 = vmul.f32 %v4917_v15, %v5010_v23  ;;  %v5023_v3 = vadd.f32 %v543_v63, %v4571_v27 }
 0x11f   :  { %8643 = vst [vmem:[#allocation55_spill] sm:$0xff] %v5013_v1  ;;  %v706_v57 = vmul.f32 %v4871_v53, %v5013_v1  ;;  %v689_v45 = vmul.f32 %v4934_v24, %v5016_v8 }
 0x120   :  { %v769_v62 = vadd.f32 %v768_v4, %v688_v47  ;;  %v707_v16 = vmul.f32 %v4903_v19, %v5023_v3  ;;  %v5041_v47 = vpop.permute.xlu2 %1256 }
 0x121   :  { %v788_v18 = vadd.f32 %v787_v9, %v706_v57  ;;  %8646 = vst [vmem:[#allocation58_spill] sm:$0xff] %v5041_v47 }
 0x122   :  { %v770_v46 = vadd.f32 %v769_v62, %v689_v45 }
 0x123   :  { %v562_v36 = vpop.f32.mrf.mxu2  ;;  %v789_v1 = vadd.f32 %v788_v18, %v707_v16  ;;  %v8651_v18 = vld [vmem:[#allocation4_spill] sm:$0xff] }
 0x124   :  { %v5032_v25 = vadd.f32 %v562_v36, %v4571_v27  ;;  %771 = vadd.xlane.f32.xlu0 %v770_v46  ;;  %v581_v42 = vpop.f32.mrf.mxu3  ;;  %v8654_v36 = vld [vmem:[#allocation6_spill] sm:$0xff] }
 0x125   :  { %v5035_v58 = vadd.f32 %v581_v42, %v4571_v27  ;;  %v8649_v27 = vld [vmem:[#allocation2_spill] sm:$0xff] }
 0x126   :  { %8644 = vst [vmem:[#allocation56_spill] sm:$0xff] %v5032_v25  ;;  %v708_v63 = vmul.f32 %v4917_v15, %v5032_v25  ;;  %v8664_v25 = vld [vmem:[#allocation25_spill] sm:$0xff] }
 0x127   :  { %8645 = vst [vmem:[#allocation57_spill] sm:$0xff] %v5035_v58  ;;  %v709_v49 = vmul.f32 %v4934_v24, %v5035_v58 }
 0x128   :  { %v790_v11 = vadd.f32 %v789_v1, %v708_v63  ;;  %v5043_v57 = vpop.permute.xlu2 %1271  ;;  %v5057_v1 = vpop.permute.xlu0 %1261 }
 0x129   :  { %8647 = vst [vmem:[#allocation59_spill] sm:$0xff] %v5043_v57 }
 0x12a   :  { %v791_v4 = vadd.f32 %v790_v11, %v709_v49  ;;  %8653 = vst [vmem:[#allocation61_spill] sm:$0xff] %v5057_v1  ;;  %v8656_v11 = vld [vmem:[#allocation10_spill] sm:$0xff] }
 0x12c   :  { %792 = vadd.xlane.f32.xlu1 %v791_v4 }
 0x130   :  { %v5045_v45 = vpop.permute.xlu2 %1365 }
 0x131   :  { %8648 = vst [vmem:[#allocation60_spill] sm:$0xff] %v5045_v45 }
 0x187   :  { %v730_v9 = vpop.xlane.xlu2 %729 }
 0x188   :  { %v5047_v62 = vmul.f32 0.0006377551, %v730_v9  ;;  %v8658_v9 = vld [vmem:[#allocation13_spill] sm:$0xff] }
 0x18a   :  { %v5051_v46 = vsub.f32 %v8649_v27, %v5047_v62  ;;  %v5055_v16 = vsub.f32 %v8651_v18, %v5047_v62  ;;  %v5061_v42 = vsub.f32 %v8654_v36, %v5047_v62  ;;  %v5069_v4 = vsub.f32 %v8656_v11, %v5047_v62 }
 0x18b   :  { %v5073_v27 = vsub.f32 %v8658_v9, %v5047_v62  ;;  %v5081_v45 = vsub.f32 %v4566_v10, %v5047_v62  ;;  %v5087_v47 = vsub.f32 %v4585_v5, %v5047_v62 }
 0x18c   :  { %8650 = vst [vmem:[#allocation2_spill] sm:$0xff] %v5051_v46  ;;  %v878_v63 = vmul.f32 %v5051_v46, %v5051_v46  ;;  %v879_v49 = vmul.f32 %v5055_v16, %v5055_v16  ;;  %v880_v18 = vmul.f32 %v5061_v42, %v5061_v42  ;;  %v881_v1 = vmul.f32 %v5069_v4, %v5069_v4 }
 0x18d   :  { %8652 = vst [vmem:[#allocation4_spill] sm:$0xff] %v5055_v16  ;;  %v882_v9 = vmul.f32 %v5073_v27, %v5073_v27  ;;  %v5092_v16 = vpop.permute.xlu0 %1360 }
 0x18e   :  { %8655 = vst [vmem:[#allocation6_spill] sm:$0xff] %v5061_v42  ;;  %v958_v36 = vmul.f32 %v878_v63, %v4474_v54  ;;  %v959_v57 = vmul.f32 %v879_v49, %v4479_v56  ;;  %v960_v42 = vmul.f32 %v880_v18, %v4486_v59  ;;  %v8662_v49 = vld [vmem:[#allocation23_spill] sm:$0xff]  ;;  %v961_v5 = vmul.f32 %v881_v1, %v4514_v6 }
 0x18f   :  { %8657 = vst [vmem:[#allocation10_spill] sm:$0xff] %v5069_v4  ;;  %v751_v11 = vpop.xlane.xlu2 %750  ;;  %v5096_v10 = vsub.f32 %v8662_v49, %v5047_v62  ;;  %v883_v4 = vmul.f32 %v5081_v45, %v5081_v45  ;;  %v962_v18 = vmul.f32 %v882_v9, %v4524_v13 }
 0x190   :  { %8659 = vst [vmem:[#allocation13_spill] sm:$0xff] %v5073_v27  ;;  %v1038_v63 = vadd.f32 %v959_v57, %v958_v36  ;;  %v5098_v46 = vmul.f32 0.0006377551, %v751_v11  ;;  %v5105_v27 = vsub.f32 %v8664_v25, %v5047_v62  ;;  %v884_v57 = vmul.f32 %v5087_v47, %v5087_v47 }
 0x191   :  { %8660 = vst [vmem:[#allocation62_spill] sm:$0xff] %v5087_v47  ;;  %v5112_v11 = vsub.f32 %v4681_v31, %v5047_v62  ;;  %v885_v49 = vmul.f32 %v5096_v10, %v5096_v10  ;;  %v963_v1 = vmul.f32 %v883_v4, %v4552_v0  ;;  %v5134_v4 = vsub.f32 %v4730_v21, %v5047_v62 }
 0x192   :  { %8661 = vst [vmem:[#allocation63_spill] sm:$0xff] %v5092_v16  ;;  %v1039_v58 = vadd.f32 %v1038_v63, %v960_v42  ;;  %v8667_v63 = vld [vmem:[#allocation7_spill] sm:$0xff]  ;;  %v8669_v16 = vld [vmem:[#allocation8_spill] sm:$0xff]  ;;  %v886_v31 = vmul.f32 %v5105_v27, %v5105_v27 }
 0x193   :  { %8663 = vst [vmem:[#allocation23_spill] sm:$0xff] %v5096_v10  ;;  %v5119_v25 = vsub.f32 %v8667_v63, %v5098_v46  ;;  %v5123_v47 = vsub.f32 %v8669_v16, %v5098_v46  ;;  %v887_v16 = vmul.f32 %v5112_v11, %v5112_v11 }
 0x194   :  { %8665 = vst [vmem:[#allocation25_spill] sm:$0xff] %v5105_v27  ;;  %v1040_v36 = vadd.f32 %v1039_v58, %v961_v5  ;;  %v8671_v58 = vld [vmem:[#allocation31_spill] sm:$0xff]  ;;  %v964_v5 = vmul.f32 %v884_v57, %v4573_v2 }
 0x195   :  { %8666 = vst [vmem:[#allocation64_spill] sm:$0xff] %v5112_v11  ;;  %v5127_v9 = vsub.f32 %v8671_v58, %v5047_v62  ;;  %v8675_v58 = vld [vmem:[#allocation9_spill] sm:$0xff]  ;;  %v898_v57 = vmul.f32 %v5119_v25, %v5119_v25  ;;  %v899_v21 = vmul.f32 %v5123_v47, %v5123_v47 }
 0x196   :  { %v1041_v42 = vadd.f32 %v1040_v36, %v962_v18  ;;  %8668 = vst [vmem:[#allocation7_spill] sm:$0xff] %v5119_v25  ;;  %v5138_v18 = vsub.f32 %v4759_v26, %v5047_v62  ;;  %v965_v36 = vmul.f32 %v885_v49, %v4593_v14  ;;  %v5145_v27 = vsub.f32 %v8675_v58, %v5098_v46 }
 0x197   :  { %8670 = vst [vmem:[#allocation8_spill] sm:$0xff] %v5123_v47  ;;  %v5155_v26 = vsub.f32 %v4790_v37, %v5047_v62  ;;  %v5159_v49 = vsub.f32 %v4811_v20, %v5047_v62  ;;  %v966_v58 = vmul.f32 %v886_v31, %v4641_v17  ;;  %v8682_v37 = vld [vmem:[#allocation15_spill] sm:$0xff]  ;;  %v5178_v20 = vsub.f32 %v4901_v40, %v5047_v62  ;;  %v8685_v47 = vld [vmem:[#allocation16_spill] sm:$0xff] }
 0x198   :  { %8672 = vst [vmem:[#allocation31_spill] sm:$0xff] %v5127_v9  ;;  %v1042_v10 = vadd.f32 %v1041_v42, %v963_v1  ;;  %v5151_v1 = vpop.permute.xlu0 %1375  ;;  %v5167_v42 = vsub.f32 %v4882_v41, %v5047_v62  ;;  %v5174_v11 = vsub.f32 %v8682_v37, %v5098_v46  ;;  %v967_v41 = vmul.f32 %v887_v16, %v4684_v30 }
 0x199   :  { %8673 = vst [vmem:[#allocation65_spill] sm:$0xff] %v5134_v4  ;;  %v5185_v25 = vsub.f32 %v8685_v47, %v5098_v46  ;;  %v900_v31 = vmul.f32 %v5145_v27, %v5145_v27  ;;  %v5193_v40 = vsub.f32 %v4932_v51, %v5047_v62  ;;  %v5197_v37 = vsub.f32 %v4943_v12, %v5047_v62 }
 0x19a   :  { %8674 = vst [vmem:[#allocation66_spill] sm:$0xff] %v5138_v18  ;;  %v1043_v63 = vadd.f32 %v1042_v10, %v964_v5  ;;  %v5163_v10 = vsub.f32 %v4859_v52, %v5047_v62  ;;  %v888_v5 = vmul.f32 %v5127_v9, %v5127_v9  ;;  %v889_v52 = vmul.f32 %v5134_v4, %v5134_v4  ;;  %v8692_v4 = vld [vmem:[#allocation27_spill] sm:$0xff] }
 0x19b   :  { %8676 = vst [vmem:[#allocation9_spill] sm:$0xff] %v5145_v27  ;;  %v890_v47 = vmul.f32 %v5138_v18, %v5138_v18  ;;  %v891_v16 = vmul.f32 %v5155_v26, %v5155_v26  ;;  %v901_v51 = vmul.f32 %v5174_v11, %v5174_v11  ;;  %v892_v12 = vmul.f32 %v5159_v49, %v5159_v49 }
 0x19c   :  { %8677 = vst [vmem:[#allocation67_spill] sm:$0xff] %v5151_v1  ;;  %v1044_v1 = vadd.f32 %v1043_v63, %v965_v36  ;;  %v978_v36 = vmul.f32 %v898_v57, %v4474_v54  ;;  %v979_v63 = vmul.f32 %v899_v21, %v4479_v56  ;;  %v8689_v57 = vld [vmem:[#allocation21_spill] sm:$0xff]  ;;  %v893_v62 = vmul.f32 %v5163_v10, %v5163_v10 }
 0x19d   :  { %8678 = vst [vmem:[#allocation68_spill] sm:$0xff] %v5155_v26  ;;  %v5206_v21 = vsub.f32 %v8689_v57, %v5098_v46  ;;  %v969_v27 = vmul.f32 %v889_v52, %v4720_v48  ;;  %v8691_v26 = vld [vmem:[#allocation22_spill] sm:$0xff]  ;;  %v970_v52 = vmul.f32 %v890_v47, %v4745_v28  ;;  %v8695_v47 = vld [vmem:[#allocation32_spill] sm:$0xff] }
 0x19e   :  { %8679 = vst [vmem:[#allocation69_spill] sm:$0xff] %v5159_v49  ;;  %v1045_v9 = vadd.f32 %v1044_v1, %v966_v58  ;;  %v968_v1 = vmul.f32 %v888_v5, %v4689_v29  ;;  %v5217_v18 = vsub.f32 %v8691_v26, %v5098_v46  ;;  %v902_v5 = vmul.f32 %v5185_v25, %v5185_v25 }
 0x19f   :  { %8680 = vst [vmem:[#allocation70_spill] sm:$0xff] %v5163_v10  ;;  %v1059_v57 = vadd.f32 %v979_v63, %v978_v36  ;;  %v894_v49 = vmul.f32 %v5167_v42, %v5167_v42  ;;  %v895_v10 = vmul.f32 %v5178_v20, %v5178_v20  ;;  %v5229_v26 = vsub.f32 %v8692_v4, %v5098_v46 }
 0x1a0   :  { %8681 = vst [vmem:[#allocation71_spill] sm:$0xff] %v5167_v42  ;;  %v1046_v58 = vadd.f32 %v1045_v9, %v967_v41  ;;  %v980_v41 = vmul.f32 %v900_v31, %v4486_v59  ;;  %v903_v31 = vmul.f32 %v5206_v21, %v5206_v21  ;;  %v981_v36 = vmul.f32 %v901_v51, %v4514_v6 }
 0x1a1   :  { %8683 = vst [vmem:[#allocation15_spill] sm:$0xff] %v5174_v11  ;;  %v772_v11 = vpop.xlane.xlu0 %771  ;;  %v5241_v42 = vsub.f32 %v8695_v47, %v5098_v46  ;;  %v904_v4 = vmul.f32 %v5217_v18, %v5217_v18  ;;  %v897_v51 = vmul.f32 %v5197_v37, %v5197_v37 }
 0x1a2   :  { %8684 = vst [vmem:[#allocation72_spill] sm:$0xff] %v5178_v20  ;;  %v1047_v9 = vadd.f32 %v1046_v58, %v968_v1  ;;  %v5231_v1 = vpop.permute.xlu1 %1266  ;;  %v1060_v63 = vadd.f32 %v1059_v57, %v980_v41  ;;  %v971_v20 = vmul.f32 %v891_v16, %v4780_v39  ;;  %v972_v41 = vmul.f32 %v892_v12, %v4801_v32  ;;  %v8697_v57 = vld [vmem:[#allocation36_spill] sm:$0xff] }
 0x1a3   :  { %8686 = vst [vmem:[#allocation16_spill] sm:$0xff] %v5185_v25  ;;  %v896_v25 = vmul.f32 %v5193_v40, %v5193_v40  ;;  %v973_v16 = vmul.f32 %v893_v62, %v4851_v22  ;;  %v5254_v47 = vsub.f32 %v8697_v57, %v5098_v46  ;;  %v906_v12 = vmul.f32 %v5241_v42, %v5241_v42 }
 0x1a4   :  { %8687 = vst [vmem:[#allocation73_spill] sm:$0xff] %v5193_v40  ;;  %v1048_v58 = vadd.f32 %v1047_v9, %v969_v27  ;;  %v982_v9 = vmul.f32 %v902_v5, %v4524_v13  ;;  %v974_v5 = vmul.f32 %v894_v49, %v4871_v53  ;;  %v984_v62 = vmul.f32 %v904_v4, %v4573_v2 }
 0x1a5   :  { %8688 = vst [vmem:[#allocation74_spill] sm:$0xff] %v5197_v37  ;;  %v975_v49 = vmul.f32 %v895_v10, %v4903_v19  ;;  %v907_v4 = vmul.f32 %v5254_v47, %v5254_v47  ;;  %v986_v10 = vmul.f32 %v906_v12, %v4641_v17  ;;  %v8710_v12 = vld [vmem:[#allocation47_spill] sm:$0xff] }
 0x1a6   :  { %8690 = vst [vmem:[#allocation21_spill] sm:$0xff] %v5206_v21  ;;  %v1049_v27 = vadd.f32 %v1048_v58, %v970_v52  ;;  %v1061_v21 = vadd.f32 %v1060_v63, %v981_v36  ;;  %v983_v52 = vmul.f32 %v903_v31, %v4552_v0  ;;  %v8699_v36 = vld [vmem:[#allocation37_spill] sm:$0xff]  ;;  %v8702_v31 = vld [vmem:[#allocation12_spill] sm:$0xff] }
 0x1a7   :  { %8693 = vst [vmem:[#allocation22_spill] sm:$0xff] %v5229_v26  ;;  %v5262_v63 = vsub.f32 %v8699_v36, %v5098_v46  ;;  %v977_v36 = vmul.f32 %v897_v51, %v4934_v24  ;;  %v8706_v51 = vld [vmem:[#allocation14_spill] sm:$0xff] }
 0x1a8   :  { %8694 = vst [vmem:[#allocation27_spill] sm:$0xff] %v5231_v1  ;;  %v5245_v1 = vmul.f32 0.0006377551, %v772_v11  ;;  %v1050_v40 = vadd.f32 %v1049_v27, %v971_v20  ;;  %v905_v11 = vmul.f32 %v5229_v26, %v5229_v26  ;;  %v1062_v58 = vadd.f32 %v1061_v21, %v982_v9  ;;  %v8700_v20 = vld [vmem:[#allocation11_spill] sm:$0xff] }
 0x1a9   :  { %8696 = vst [vmem:[#allocation32_spill] sm:$0xff] %v5241_v42  ;;  %v976_v9 = vmul.f32 %v896_v25, %v4917_v15  ;;  %v5280_v42 = vsub.f32 %v4807_v60, %v5098_v46  ;;  %v908_v25 = vmul.f32 %v5262_v63, %v5262_v63 }
 0x1aa   :  { %8698 = vst [vmem:[#allocation36_spill] sm:$0xff] %v5254_v47  ;;  %v1051_v57 = vadd.f32 %v1050_v40, %v972_v41  ;;  %v1063_v37 = vadd.f32 %v1062_v58, %v983_v52  ;;  %v5269_v27 = vsub.f32 %v8700_v20, %v5245_v1  ;;  %v5273_v21 = vsub.f32 %v8702_v31, %v5245_v1  ;;  %v8705_v58 = vld [vmem:[#allocation43_spill] sm:$0xff] }
 0x1ab   :  { %8704 = vst [vmem:[#allocation12_spill] sm:$0xff] %v5280_v42  ;;  %v985_v41 = vmul.f32 %v905_v11, %v4593_v14  ;;  %v5287_v20 = vsub.f32 %v8705_v58, %v5098_v46  ;;  %v5294_v60 = vsub.f32 %v8706_v51, %v5245_v1  ;;  %v5308_v47 = vsub.f32 %v8710_v12, %v5098_v46  ;;  %v8712_v51 = vld [vmem:[#allocation51_spill] sm:$0xff] }
 0x1ac   :  { %8701 = vst [vmem:[#allocation37_spill] sm:$0xff] %v5269_v27  ;;  %v1052_v40 = vadd.f32 %v1051_v57, %v973_v16  ;;  %v1064_v52 = vadd.f32 %v1063_v37, %v984_v62  ;;  %v5296_v16 = vpop.permute.xlu1 %1370  ;;  %v918_v37 = vmul.f32 %v5269_v27, %v5269_v27  ;;  %v919_v11 = vmul.f32 %v5273_v21, %v5273_v21  ;;  %v8709_v62 = vld [vmem:[#allocation46_spill] sm:$0xff] }
 0x1ad   :  { %8703 = vst [vmem:[#allocation11_spill] sm:$0xff] %v5273_v21  ;;  %v5304_v58 = vsub.f32 %v8709_v62, %v5098_v46  ;;  %v5312_v26 = vsub.f32 %v8712_v51, %v5098_v46  ;;  %v8713_v21 = vld [vmem:[#allocation17_spill] sm:$0xff]  ;;  %v910_v62 = vmul.f32 %v5287_v20, %v5287_v20  ;;  %v988_v12 = vmul.f32 %v908_v25, %v4689_v29 }
 0x1ae   :  { %8707 = vst [vmem:[#allocation43_spill] sm:$0xff] %v5294_v60  ;;  %v1053_v57 = vadd.f32 %v1052_v40, %v974_v5  ;;  %v1065_v31 = vadd.f32 %v1064_v52, %v985_v41  ;;  %v909_v5 = vmul.f32 %v5280_v42, %v5280_v42  ;;  %v987_v41 = vmul.f32 %v907_v4, %v4684_v30 }
 0x1af   :  { %8708 = vst [vmem:[#allocation14_spill] sm:$0xff] %v5296_v16  ;;  %v5319_v27 = vsub.f32 %v8713_v21, %v5245_v1  ;;  %v8715_v16 = vld [vmem:[#allocation24_spill] sm:$0xff]  ;;  %v920_v42 = vmul.f32 %v5294_v60, %v5294_v60  ;;  %v998_v4 = vmul.f32 %v918_v37, %v4474_v54  ;;  %v5334_v21 = vsub.f32 %v4946_v38, %v5098_v46 }
 0x1b0   :  { %8711 = vst [vmem:[#allocation46_spill] sm:$0xff] %v5308_v47  ;;  %v1054_v40 = vadd.f32 %v1053_v57, %v975_v49  ;;  %v1066_v52 = vadd.f32 %v1065_v31, %v986_v10  ;;  %v5326_v51 = vsub.f32 %v8715_v16, %v5245_v1  ;;  %v999_v10 = vmul.f32 %v919_v11, %v4479_v56 }
 0x1b1   :  { %8714 = vst [vmem:[#allocation47_spill] sm:$0xff] %v5319_v27  ;;  %v5338_v25 = vsub.f32 %v4963_v44, %v5098_v46  ;;  %v911_v16 = vmul.f32 %v5304_v58, %v5304_v58  ;;  %v989_v31 = vmul.f32 %v909_v5, %v4720_v48  ;;  %v921_v11 = vmul.f32 %v5319_v27, %v5319_v27  ;;  %v8720_v5 = vld [vmem:[#allocation30_spill] sm:$0xff] }
 0x1b2   :  { %8716 = vst [vmem:[#allocation51_spill] sm:$0xff] %v5326_v51  ;;  %v1055_v49 = vadd.f32 %v1054_v40, %v976_v9  ;;  %v1067_v57 = vadd.f32 %v1066_v52, %v987_v41  ;;  %v8717_v40 = vld [vmem:[#allocation28_spill] sm:$0xff]  ;;  %v5351_v38 = vsub.f32 %v4982_v7, %v5098_v46  ;;  %v912_v44 = vmul.f32 %v5308_v47, %v5308_v47 }
 0x1b3   :  { %v5345_v37 = vsub.f32 %v8717_v40, %v5245_v1  ;;  %v990_v41 = vmul.f32 %v910_v62, %v4745_v28  ;;  %v1080_v40 = vadd.f32 %v999_v10, %v998_v4  ;;  %v5365_v7 = vsub.f32 %v4985_v43, %v5098_v46 }
 0x1b4   :  { %v1056_v60 = vadd.f32 %v1055_v49, %v977_v36  ;;  %v1068_v9 = vadd.f32 %v1067_v57, %v988_v12  ;;  %8719 = vst [vmem:[#allocation24_spill] sm:$0xff] %v5351_v38  ;;  %v5358_v36 = vsub.f32 %v8720_v5, %v5245_v1  ;;  %v793_v52 = vpop.xlane.xlu1 %792  ;;  %v922_v49 = vmul.f32 %v5326_v51, %v5326_v51  ;;  %v8723_v5 = vld [vmem:[#allocation34_spill] sm:$0xff]  ;;  %v8731_v51 = vld [vmem:[#allocation19_spill] sm:$0xff] }
 0x1b5   :  { %8718 = vst [vmem:[#allocation17_spill] sm:$0xff] %v5345_v37  ;;  %v1000_v57 = vmul.f32 %v920_v42, %v4486_v59  ;;  %v913_v62 = vmul.f32 %v5312_v26, %v5312_v26  ;;  %v991_v27 = vmul.f32 %v911_v16, %v4780_v39  ;;  %v5372_v47 = vsub.f32 %v8723_v5, %v5245_v1  ;;  %v8725_v16 = vld [vmem:[#allocation39_spill] sm:$0xff] }
 0x1b6   :  { %8721 = vst [vmem:[#allocation28_spill] sm:$0xff] %v5358_v36  ;;  %1057 = vadd.xlane.f32.xlu2 %v1056_v60  ;;  %v1069_v12 = vadd.f32 %v1068_v9, %v989_v31  ;;  %v923_v31 = vmul.f32 %v5345_v37, %v5345_v37  ;;  %v1001_v42 = vmul.f32 %v921_v11, %v4514_v6  ;;  %v5377_v10 = vmul.f32 0.0006377551, %v793_v52 }
 0x1b7   :  { %8722 = vst [vmem:[#allocation30_spill] sm:$0xff] %v5365_v7  ;;  %v1081_v4 = vadd.f32 %v1080_v40, %v1000_v57  ;;  %v914_v43 = vmul.f32 %v5334_v21, %v5334_v21  ;;  %v992_v46 = vmul.f32 %v912_v44, %v4801_v32  ;;  %v5384_v9 = vsub.f32 %v8725_v16, %v5245_v1  ;;  %v8727_v44 = vld [vmem:[#allocation41_spill] sm:$0xff] }
 0x1b8   :  { %8724 = vst [vmem:[#allocation34_spill] sm:$0xff] %v5372_v47  ;;  %v1070_v60 = vadd.f32 %v1069_v12, %v990_v41  ;;  %v924_v41 = vmul.f32 %v5358_v36, %v5358_v36  ;;  %v1002_v12 = vmul.f32 %v922_v49, %v4524_v13  ;;  %v915_v11 = vmul.f32 %v5338_v25, %v5338_v25 }
 0x1b9   :  { %8726 = vst [vmem:[#allocation39_spill] sm:$0xff] %v5384_v9  ;;  %v1082_v37 = vadd.f32 %v1081_v4, %v1001_v42  ;;  %v916_v52 = vmul.f32 %v5351_v38, %v5351_v38  ;;  %v993_v57 = vmul.f32 %v913_v62, %v4851_v22  ;;  %v5396_v40 = vsub.f32 %v8727_v44, %v5245_v1  ;;  %v8729_v4 = vld [vmem:[#allocation42_spill] sm:$0xff]  ;;  %v8733_v44 = vld [vmem:[#allocation20_spill] sm:$0xff] }
 0x1ba   :  { %v1071_v5 = vadd.f32 %v1070_v60, %v991_v27  ;;  %v925_v27 = vmul.f32 %v5372_v47, %v5372_v47  ;;  %v1003_v60 = vmul.f32 %v923_v31, %v4552_v0  ;;  %v994_v42 = vmul.f32 %v914_v43, %v4871_v53 }
 0x1bb   :  { %8728 = vst [vmem:[#allocation41_spill] sm:$0xff] %v5396_v40  ;;  %v1083_v49 = vadd.f32 %v1082_v37, %v1002_v12  ;;  %v5404_v36 = vsub.f32 %v8729_v4, %v5245_v1  ;;  %v5408_v62 = vsub.f32 %v8731_v51, %v5377_v10  ;;  %v5412_v38 = vsub.f32 %v8733_v44, %v5377_v10  ;;  %v8735_v51 = vld [vmem:[#allocation45_spill] sm:$0xff] }
 0x1bc   :  { %v1072_v16 = vadd.f32 %v1071_v5, %v992_v46  ;;  %v926_v5 = vmul.f32 %v5384_v9, %v5384_v9  ;;  %v1004_v37 = vmul.f32 %v924_v41, %v4573_v2  ;;  %v917_v43 = vmul.f32 %v5365_v7, %v5365_v7  ;;  %v8737_v41 = vld [vmem:[#allocation49_spill] sm:$0xff] }
 0x1bd   :  { %8730 = vst [vmem:[#allocation42_spill] sm:$0xff] %v5404_v36  ;;  %v1084_v31 = vadd.f32 %v1083_v49, %v1003_v60  ;;  %v995_v12 = vmul.f32 %v915_v11, %v4903_v19  ;;  %v996_v4 = vmul.f32 %v916_v52, %v4917_v15  ;;  %v5423_v47 = vsub.f32 %v8735_v51, %v5245_v1  ;;  %v8738_v49 = vld [vmem:[#allocation26_spill] sm:$0xff] }
 0x1be   :  { %8732 = vst [vmem:[#allocation19_spill] sm:$0xff] %v5408_v62  ;;  %v1073_v46 = vadd.f32 %v1072_v16, %v993_v57  ;;  %v927_v57 = vmul.f32 %v5396_v40, %v5396_v40  ;;  %v1005_v16 = vmul.f32 %v925_v27, %v4593_v14  ;;  %v5430_v60 = vsub.f32 %v8737_v41, %v5245_v1  ;;  %v8739_v41 = vld [vmem:[#allocation52_spill] sm:$0xff] }
 0x1bf   :  { %8734 = vst [vmem:[#allocation20_spill] sm:$0xff] %v5412_v38  ;;  %v1085_v9 = vadd.f32 %v1084_v31, %v1004_v37  ;;  %v5434_v11 = vsub.f32 %v8738_v49, %v5377_v10  ;;  %v938_v52 = vmul.f32 %v5408_v62, %v5408_v62  ;;  %v928_v51 = vmul.f32 %v5404_v36, %v5404_v36  ;;  %v8740_v49 = vld [vmem:[#allocation18_spill] sm:$0xff]  ;;  %v8741_v62 = vld [vmem:[#allocation29_spill] sm:$0xff] }
 0x1c0   :  { %8736 = vst [vmem:[#allocation45_spill] sm:$0xff] %v5423_v47  ;;  %v1074_v44 = vadd.f32 %v1073_v46, %v994_v42  ;;  %v939_v42 = vmul.f32 %v5412_v38, %v5412_v38  ;;  %v1006_v27 = vmul.f32 %v926_v5, %v4641_v17  ;;  %v997_v31 = vmul.f32 %v917_v43, %v4934_v24  ;;  %v8742_v43 = vld [vmem:[#allocation33_spill] sm:$0xff] }
 0x1c1   :  { %v1086_v37 = vadd.f32 %v1085_v9, %v1005_v16  ;;  %v5446_v40 = vsub.f32 %v8739_v41, %v5245_v1  ;;  %v5450_v7 = vsub.f32 %v8740_v49, %v5245_v1  ;;  %v5454_v38 = vsub.f32 %v8741_v62, %v5377_v10 }
 0x1c2   :  { %v1075_v46 = vadd.f32 %v1074_v44, %v995_v12  ;;  %v929_v44 = vmul.f32 %v5423_v47, %v5423_v47  ;;  %v1007_v9 = vmul.f32 %v927_v57, %v4684_v30  ;;  %v5461_v16 = vsub.f32 %v8742_v43, %v5377_v10  ;;  %v8744_v57 = vld [vmem:[#allocation35_spill] sm:$0xff] }
 0x1c3   :  { %v1087_v5 = vadd.f32 %v1086_v37, %v1006_v27  ;;  %v940_v41 = vmul.f32 %v5434_v11, %v5434_v11  ;;  %v1018_v49 = vmul.f32 %v938_v52, %v4474_v54  ;;  %v1019_v36 = vmul.f32 %v939_v42, %v4479_v56 }
 0x1c4   :  { %v1076_v12 = vadd.f32 %v1075_v46, %v996_v4  ;;  %8743 = vst [vmem:[#allocation49_spill] sm:$0xff] %v5461_v16  ;;  %v930_v4 = vmul.f32 %v5430_v60, %v5430_v60  ;;  %v1008_v46 = vmul.f32 %v928_v51, %v4689_v29  ;;  %v5472_v27 = vsub.f32 %v8744_v57, %v5377_v10  ;;  %v8747_v51 = vld [vmem:[#allocation38_spill] sm:$0xff] }
 0x1c5   :  { %v1088_v47 = vadd.f32 %v1087_v5, %v1007_v9  ;;  %v941_v37 = vmul.f32 %v5454_v38, %v5454_v38  ;;  %v5478_v52 = vsub.f32 %v4954_v61, %v5245_v1  ;;  %v931_v42 = vmul.f32 %v5446_v40, %v5446_v40 }
 0x1c6   :  { %v1077_v62 = vadd.f32 %v1076_v12, %v997_v31  ;;  %8745 = vst [vmem:[#allocation26_spill] sm:$0xff] %v5472_v27  ;;  %v1009_v31 = vmul.f32 %v929_v44, %v4720_v48  ;;  %v5485_v9 = vsub.f32 %v8747_v51, %v5377_v10  ;;  %v942_v5 = vmul.f32 %v5461_v16, %v5461_v16 }
 0x1c7   :  { %8746 = vst [vmem:[#allocation52_spill] sm:$0xff] %v5478_v52  ;;  %v1089_v12 = vadd.f32 %v1088_v47, %v1008_v46  ;;  %v1020_v43 = vmul.f32 %v940_v41, %v4486_v59  ;;  %v5492_v61 = vsub.f32 %v4988_v50, %v5245_v1  ;;  %v932_v57 = vmul.f32 %v5450_v7, %v5450_v7  ;;  %v8750_v46 = vld [vmem:[#allocation40_spill] sm:$0xff] }
 0x1c8   :  { %1078 = vadd.xlane.f32.xlu2 %v1077_v62  ;;  %8748 = vst [vmem:[#allocation18_spill] sm:$0xff] %v5485_v9  ;;  %v1101_v62 = vadd.f32 %v1019_v36, %v1018_v49  ;;  %v1010_v44 = vmul.f32 %v930_v4, %v4745_v28  ;;  %v5499_v51 = vsub.f32 %v8750_v46, %v5377_v10 }
 0x1c9   :  { %8749 = vst [vmem:[#allocation29_spill] sm:$0xff] %v5492_v61  ;;  %v1090_v47 = vadd.f32 %v1089_v12, %v1009_v31  ;;  %v943_v16 = vmul.f32 %v5472_v27, %v5472_v27  ;;  %v1021_v41 = vmul.f32 %v941_v37, %v4514_v6  ;;  %v5506_v50 = vsub.f32 %v4993_v33, %v5245_v1  ;;  %v8751_v12 = vld [vmem:[#allocation44_spill] sm:$0xff] }
 0x1ca   :  { %v1102_v36 = vadd.f32 %v1101_v62, %v1020_v43  ;;  %v933_v49 = vmul.f32 %v5478_v52, %v5478_v52  ;;  %v1011_v4 = vmul.f32 %v931_v42, %v4780_v39  ;;  %v5513_v46 = vsub.f32 %v8751_v12, %v5377_v10 }
 0x1cb   :  { %v1091_v31 = vadd.f32 %v1090_v47, %v1010_v44  ;;  %v944_v27 = vmul.f32 %v5485_v9, %v5485_v9  ;;  %v1022_v37 = vmul.f32 %v942_v5, %v4524_v13  ;;  %v5520_v33 = vsub.f32 %v5010_v23, %v5245_v1  ;;  %v8752_v47 = vld [vmem:[#allocation48_spill] sm:$0xff] }
 0x1cc   :  { %v1103_v43 = vadd.f32 %v1102_v36, %v1021_v41  ;;  %v934_v62 = vmul.f32 %v5492_v61, %v5492_v61  ;;  %v1012_v42 = vmul.f32 %v932_v57, %v4801_v32  ;;  %v5527_v12 = vsub.f32 %v8752_v47, %v5377_v10 }
 0x1cd   :  { %v1092_v44 = vadd.f32 %v1091_v31, %v1011_v4  ;;  %v945_v52 = vmul.f32 %v5499_v51, %v5499_v51  ;;  %v1023_v5 = vmul.f32 %v943_v16, %v4552_v0  ;;  %v5534_v23 = vsub.f32 %v5016_v8, %v5245_v1  ;;  %v8753_v31 = vld [vmem:[#allocation50_spill] sm:$0xff] }
 0x1ce   :  { %v1104_v41 = vadd.f32 %v1103_v43, %v1022_v37  ;;  %v935_v36 = vmul.f32 %v5506_v50, %v5506_v50  ;;  %v1013_v57 = vmul.f32 %v933_v49, %v4851_v22  ;;  %v5541_v47 = vsub.f32 %v8753_v31, %v5377_v10 }
 0x1cf   :  { %v1093_v4 = vadd.f32 %v1092_v44, %v1012_v42  ;;  %v946_v61 = vmul.f32 %v5513_v46, %v5513_v46  ;;  %v1024_v0 = vmul.f32 %v944_v27, %v4573_v2  ;;  %v936_v8 = vmul.f32 %v5520_v33, %v5520_v33 }
 0x1d0   :  { %8754 = vst [vmem:[#allocation33_spill] sm:$0xff] %v5541_v47  ;;  %v1105_v16 = vadd.f32 %v1104_v41, %v1023_v5  ;;  %v1014_v1 = vmul.f32 %v934_v62, %v4871_v53  ;;  %v5551_v49 = vsub.f32 %v4923_v35, %v5377_v10  ;;  %v947_v43 = vmul.f32 %v5527_v12, %v5527_v12 }
 0x1d1   :  { %v1094_v37 = vadd.f32 %v1093_v4, %v1013_v57  ;;  %v1025_v42 = vmul.f32 %v945_v52, %v4593_v14  ;;  %v937_v2 = vmul.f32 %v5534_v23, %v5534_v23  ;;  %v1015_v27 = vmul.f32 %v935_v36, %v4903_v19  ;;  %v8756_v52 = vld [vmem:[#allocation53_spill] sm:$0xff] }
 0x1d2   :  { %8755 = vst [vmem:[#allocation35_spill] sm:$0xff] %v5551_v49  ;;  %v1106_v44 = vadd.f32 %v1105_v16, %v1024_v0  ;;  %v5561_v62 = vsub.f32 %v4940_v55, %v5377_v10  ;;  %v948_v35 = vmul.f32 %v5541_v47, %v5541_v47  ;;  %v1026_v41 = vmul.f32 %v946_v61, %v4641_v17 }
 0x1d3   :  { %v1095_v5 = vadd.f32 %v1094_v37, %v1014_v1  ;;  %v1016_v4 = vmul.f32 %v936_v8, %v4917_v15  ;;  %v5569_v31 = vsub.f32 %v8756_v52, %v5377_v10  ;;  %v949_v36 = vmul.f32 %v5551_v49, %v5551_v49  ;;  %v8757_v37 = vld [vmem:[#allocation54_spill] sm:$0xff]  ;;  %v8762_v52 = vld [vmem:[#allocation56_spill] sm:$0xff] }
 0x1d4   :  { %v1107_v57 = vadd.f32 %v1106_v44, %v1025_v42  ;;  %v1027_v0 = vmul.f32 %v947_v43, %v4684_v30  ;;  %v1017_v16 = vmul.f32 %v937_v2, %v4934_v24  ;;  %v5577_v17 = vsub.f32 %v8757_v37, %v5377_v10 }
 0x1d5   :  { %v1096_v14 = vadd.f32 %v1095_v5, %v1015_v27  ;;  %v950_v61 = vmul.f32 %v5561_v62, %v5561_v62  ;;  %v1028_v8 = vmul.f32 %v948_v35, %v4689_v29  ;;  %v5584_v27 = vsub.f32 %v5005_v34, %v5377_v10  ;;  %v8760_v5 = vld [vmem:[#allocation55_spill] sm:$0xff] }
 0x1d6   :  { %v1108_v55 = vadd.f32 %v1107_v57, %v1026_v41  ;;  %8758 = vst [vmem:[#allocation38_spill] sm:$0xff] %v5577_v17  ;;  %v951_v30 = vmul.f32 %v5569_v31, %v5569_v31  ;;  %v1029_v43 = vmul.f32 %v949_v36, %v4720_v48  ;;  %v5591_v41 = vsub.f32 %v8760_v5, %v5377_v10 }
 0x1d7   :  { %v1097_v1 = vadd.f32 %v1096_v14, %v1016_v4  ;;  %8759 = vst [vmem:[#allocation40_spill] sm:$0xff] %v5584_v27  ;;  %v952_v29 = vmul.f32 %v5577_v17, %v5577_v17  ;;  %v1030_v35 = vmul.f32 %v950_v61, %v4745_v28  ;;  %v5598_v34 = vsub.f32 %v5023_v3, %v5377_v10 }
 0x1d8   :  { %v1109_v42 = vadd.f32 %v1108_v55, %v1027_v0  ;;  %8761 = vst [vmem:[#allocation44_spill] sm:$0xff] %v5591_v41  ;;  %v953_v4 = vmul.f32 %v5584_v27, %v5584_v27  ;;  %v1031_v48 = vmul.f32 %v951_v30, %v4780_v39  ;;  %v5605_v36 = vsub.f32 %v8762_v52, %v5377_v10 }
 0x1d9   :  { %v1098_v44 = vadd.f32 %v1097_v1, %v1017_v16  ;;  %v954_v0 = vmul.f32 %v5591_v41, %v5591_v41  ;;  %v1032_v28 = vmul.f32 %v952_v29, %v4801_v32  ;;  %v8763_v16 = vld [vmem:[#allocation57_spill] sm:$0xff]  ;;  %v955_v1 = vmul.f32 %v5598_v34, %v5598_v34 }
 0x1da   :  { %v1110_v2 = vadd.f32 %v1109_v42, %v1028_v8  ;;  %v5612_v3 = vsub.f32 %v8763_v16, %v5377_v10  ;;  %v1033_v39 = vmul.f32 %v953_v4, %v4851_v22  ;;  %v956_v61 = vmul.f32 %v5605_v36, %v5605_v36 }
 0x1db   :  { %1099 = vadd.xlane.f32.xlu2 %v1098_v44  ;;  %v1034_v8 = vmul.f32 %v954_v0, %v4871_v53  ;;  %v1035_v44 = vmul.f32 %v955_v1, %v4903_v19  ;;  %v8766_v1 = vld [vmem:[#allocation4_spill] sm:$0xff] }
 0x1dc   :  { %v1111_v57 = vadd.f32 %v1110_v2, %v1029_v43  ;;  %8764 = vst [vmem:[#allocation48_spill] sm:$0xff] %v5612_v3  ;;  %v957_v32 = vmul.f32 %v5612_v3, %v5612_v3  ;;  %v1036_v10 = vmul.f32 %v956_v61, %v4917_v15  ;;  %v8767_v61 = vld [vmem:[#allocation62_spill] sm:$0xff] }
 0x1de   :  { %v1112_v14 = vadd.f32 %v1111_v57, %v1030_v35  ;;  %v1037_v2 = vmul.f32 %v957_v32, %v4934_v24 }
 0x1e0   :  { %v1113_v55 = vadd.f32 %v1112_v14, %v1031_v48 }
 0x1e2   :  { %v1114_v37 = vadd.f32 %v1113_v55, %v1032_v28  ;;  %v8765_v55 = vld [vmem:[#allocation2_spill] sm:$0xff] }
 0x1e4   :  { %v1115_v42 = vadd.f32 %v1114_v37, %v1033_v39 }
 0x1e6   :  { %v1116_v30 = vadd.f32 %v1115_v42, %v1034_v8  ;;  %v8768_v42 = vld [vmem:[#allocation31_spill] sm:$0xff] }
 0x1e8   :  { %v1117_v43 = vadd.f32 %v1116_v30, %v1035_v44  ;;  %v8769_v44 = vld [vmem:[#allocation65_spill] sm:$0xff] }
 0x1ea   :  { %v1118_v5 = vadd.f32 %v1117_v43, %v1036_v10  ;;  %v8770_v10 = vld [vmem:[#allocation70_spill] sm:$0xff] }
 0x1ec   :  { %v1119_v22 = vadd.f32 %v1118_v5, %v1037_v2  ;;  %v8771_v2 = vld [vmem:[#allocation71_spill] sm:$0xff] }
 0x1ee   :  { %1120 = vadd.xlane.f32.xlu2 %v1119_v22  ;;  %v8772_v22 = vld [vmem:[#allocation58_spill] sm:$0xff] }
 0x229   :  { %v1058_v29 = vpop.xlane.xlu2 %1057 }
 0x22a   :  { %v1122_v35 = vmul.f32 0.0006377551, %v1058_v29 }
 0x22c   :  { %v1126_v57 = vadd.f32 1e-05, %v1122_v35 }
 0x22e   :  { %4038 = vrsqrt.f32 %v1126_v57  ;;  %vm1136_vm2 = vweird.f32 %v1126_v57 }
 0x234   :  { %v4039_v53 = vpop.eup %4038 }
 0x235   :  { %v1131_v4 = vmul.f32 %v4039_v53, %v1126_v57  ;;  %vm1137_vm1 = vweird.f32 %v4039_v53 }
 0x236   :  { %vm1138_vm3 = vmor %vm1136_vm2, %vm1137_vm1  ;;  %vm1753_vm1 = vcmask 965632   ;;  %vm1724_vm2 = vcmask 785408  }
 0x237   :  { %v1132_v48 = vmul.f32 %v4039_v53, %v1131_v4 }
 0x239   :  { %v1133_v14 = vmul.f32 0.5, %v1132_v48 }
 0x23b   :  { %v1134_v52 = vsub.f32 1.5, %v1133_v14  ;;  %v1079_v0 = vpop.xlane.xlu2 %1078 }
 0x23c   :  { %v1123_v19 = vmul.f32 0.0006377551, %v1079_v0 }
 0x23d   :  { %v1135_v28 = vmul.f32 %v4039_v53, %v1134_v52 }
 0x23e   :  { %v1127_v15 = vadd.f32 1e-05, %v1123_v19  ;;  %v8773_v19 = vld [vmem:[#allocation63_spill] sm:$0xff] }
 0x23f   :  { %v5625_v24 = vsel %vm1138_vm3, %v4039_v53, %v1135_v28  ;;  %vm1742_vm3 = vcmask 973824  }
 0x240   :  { %v1170_v16 = vmul.f32 %v5625_v24, %v8765_v55  ;;  %v1171_v39 = vmul.f32 %v5625_v24, %v8766_v1  ;;  %4040 = vrsqrt.f32 %v1127_v15  ;;  %v1175_v37 = vmul.f32 %v5625_v24, %v5081_v45 }
 0x241   :  { %v1176_v8 = vmul.f32 %v5625_v24, %v8767_v61  ;;  %v1180_v32 = vmul.f32 %v5625_v24, %v8768_v42  ;;  %v1181_v30 = vmul.f32 %v5625_v24, %v8769_v44  ;;  %v1185_v43 = vmul.f32 %v5625_v24, %v8770_v10 }
 0x242   :  { %v1186_v5 = vmul.f32 %v5625_v24, %v8771_v2  ;;  %v1274_v29 = vmul.f32 %v8772_v22, %v1170_v16  ;;  %v1275_v35 = vmul.f32 %v8772_v22, %v1171_v39  ;;  %v1279_v45 = vmul.f32 %v8772_v22, %v1175_v37 }
 0x243   :  { %v1280_v57 = vmul.f32 %v8772_v22, %v1176_v8  ;;  %v1284_v4 = vmul.f32 %v8772_v22, %v1180_v32  ;;  %v1285_v48 = vmul.f32 %v8772_v22, %v1181_v30  ;;  %v1289_v14 = vmul.f32 %v8772_v22, %v1185_v43 }
 0x244   :  { %v1290_v52 = vmul.f32 %v8772_v22, %v1186_v5  ;;  %v1378_v28 = vadd.f32 %v8773_v19, %v1274_v29  ;;  %v1379_v55 = vadd.f32 %v8773_v19, %v1275_v35  ;;  %v1383_v16 = vadd.f32 %v8773_v19, %v1279_v45 }
 0x245   :  { %v1384_v1 = vadd.f32 %v8773_v19, %v1280_v57  ;;  %v1388_v37 = vadd.f32 %v8773_v19, %v1284_v4  ;;  %v1389_v61 = vadd.f32 %v8773_v19, %v1285_v48  ;;  %v1393_v8 = vadd.f32 %v8773_v19, %v1289_v14 }
 0x246   :  { %v4041_v53 = vpop.eup %4040  ;;  %v1394_v42 = vadd.f32 %v8773_v19, %v1290_v52  ;;  %v1458_v44 = vmax.f32 %v1378_v28, 0.0  ;;  %v1459_v30 = vmax.f32 %v1379_v55, 0.0  ;;  %v1463_v10 = vmax.f32 %v1383_v16, 0.0  ;;  %v8774_v55 = vld [vmem:[#allocation7_spill] sm:$0xff] }
 0x247   :  { %v1141_v0 = vmul.f32 %v4041_v53, %v1127_v15  ;;  %v1464_v43 = vmax.f32 %v1384_v1, 0.0  ;;  %vm1147_vm4 = vweird.f32 %v4041_v53  ;;  %v1468_v5 = vmax.f32 %v1388_v37, 0.0  ;;  %v8775_v1 = vld [vmem:[#allocation8_spill] sm:$0xff] }
 0x248   :  { %v1469_v29 = vmax.f32 %v1389_v61, 0.0  ;;  %v1473_v35 = vmax.f32 %v1393_v8, 0.0  ;;  %v1474_v45 = vmax.f32 %v1394_v42, 0.0  ;;  %vm1146_vm5 = vweird.f32 %v1127_v15  ;;  %v8776_v61 = vld [vmem:[#allocation21_spill] sm:$0xff]  ;;  %v8777_v42 = vld [vmem:[#allocation12_spill] sm:$0xff] }
 0x249   :  { %v1142_v39 = vmul.f32 %v4041_v53, %v1141_v0  ;;  %vm1148_vm6 = vmor %vm1146_vm5, %vm1147_vm4  ;;  %v1538_v48 = vmax.f32 %v1458_v44, %v1463_v10  ;;  %v1539_v14 = vmax.f32 %v1459_v30, %v1464_v43  ;;  %vm1735_vm4 = vcmask 777216  }
 0x24a   :  { %v1558_v52 = vmax.f32 %v1468_v5, %v1473_v35  ;;  %v8778_v5 = vld [vmem:[#allocation61_spill] sm:$0xff]  ;;  %vm1936_vm5 = vcmask 441344  }
 0x24b   :  { %v1143_v32 = vmul.f32 0.5, %v1142_v39  ;;  %v1559_v39 = vmax.f32 %v1469_v29, %v1474_v45 }
 0x24c   :  { %v1578_v30 = vmax.f32 %v1538_v48, %v1558_v52  ;;  %v8779_v48 = vld [vmem:[#allocation60_spill] sm:$0xff] }
 0x24d   :  { %v1144_v2 = vsub.f32 1.5, %v1143_v32  ;;  %v1579_v10 = vmax.f32 %v1539_v14, %v1559_v39 }
 0x24e   :  { %v1100_v4 = vpop.xlane.xlu2 %1099 }
 0x24f   :  { %v1145_v57 = vmul.f32 %v4041_v53, %v1144_v2  ;;  %v1124_v28 = vmul.f32 0.0006377551, %v1100_v4 }
 0x251   :  { %v5659_v0 = vsel %vm1148_vm6, %v4041_v53, %v1145_v57  ;;  %v5677_v2 = vadd.f32 1e-05, %v1124_v28  ;;  %vm1768_vm6 = vcmask 56320  }
 0x252   :  { %v1190_v16 = vmul.f32 %v5659_v0, %v8774_v55  ;;  %v1191_v37 = vmul.f32 %v5659_v0, %v8775_v1  ;;  %v1195_v8 = vmul.f32 %v5659_v0, %v8776_v61  ;;  %v1196_v15 = vmul.f32 %v5659_v0, %v5217_v18 }
 0x253   :  { %v1200_v53 = vmul.f32 %v5659_v0, %v5262_v63  ;;  %v1201_v32 = vmul.f32 %v5659_v0, %v8777_v42  ;;  %v1205_v44 = vmul.f32 %v5659_v0, %v5312_v26  ;;  %v1206_v43 = vmul.f32 %v5659_v0, %v5334_v21 }
 0x254   :  { %v1294_v29 = vmul.f32 %v8778_v5, %v1190_v16  ;;  %v1295_v18 = vmul.f32 %v8778_v5, %v1191_v37  ;;  %v1299_v35 = vmul.f32 %v8778_v5, %v1195_v8  ;;  %v1300_v63 = vmul.f32 %v8778_v5, %v1196_v15 }
 0x255   :  { %v1304_v45 = vmul.f32 %v8778_v5, %v1200_v53  ;;  %v1305_v57 = vmul.f32 %v8778_v5, %v1201_v32  ;;  %v1309_v26 = vmul.f32 %v8778_v5, %v1205_v44  ;;  %v1310_v4 = vmul.f32 %v8778_v5, %v1206_v43 }
 0x256   :  { %v1398_v21 = vadd.f32 %v8779_v48, %v1294_v29  ;;  %v1399_v14 = vadd.f32 %v8779_v48, %v1295_v18  ;;  %v1403_v52 = vadd.f32 %v8779_v48, %v1299_v35  ;;  %v1404_v39 = vadd.f32 %v8779_v48, %v1300_v63 }
 0x257   :  { %v1408_v28 = vadd.f32 %v8779_v48, %v1304_v45  ;;  %v1409_v55 = vadd.f32 %v8779_v48, %v1305_v57  ;;  %v1413_v16 = vadd.f32 %v8779_v48, %v1309_v26  ;;  %v1414_v1 = vadd.f32 %v8779_v48, %v1310_v4 }
 0x258   :  { %v1478_v37 = vmax.f32 %v1398_v21, 0.0  ;;  %v1479_v61 = vmax.f32 %v1399_v14, 0.0  ;;  %v1483_v8 = vmax.f32 %v1403_v52, 0.0  ;;  %v1484_v15 = vmax.f32 %v1404_v39, 0.0 }
 0x259   :  { %v1488_v53 = vmax.f32 %v1408_v28, 0.0  ;;  %v1489_v42 = vmax.f32 %v1409_v55, 0.0  ;;  %v1493_v32 = vmax.f32 %v1413_v16, 0.0  ;;  %v1494_v44 = vmax.f32 %v1414_v1, 0.0  ;;  %v8780_v55 = vld [vmem:[#allocation6_spill] sm:$0xff] }
 0x25a   :  { %v1543_v43 = vmax.f32 %v1478_v37, %v1483_v8  ;;  %v1544_v29 = vmax.f32 %v1479_v61, %v1484_v15  ;;  %v1598_v35 = vmul.f32 %v1578_v30, %v4474_v54  ;;  %v1599_v63 = vmul.f32 %v1579_v10, %v4479_v56  ;;  %v8781_v16 = vld [vmem:[#allocation10_spill] sm:$0xff]  ;;  %v8782_v37 = vld [vmem:[#allocation23_spill] sm:$0xff] }
 0x25b   :  { %v1563_v45 = vmax.f32 %v1488_v53, %v1493_v32  ;;  %v1564_v57 = vmax.f32 %v1489_v42, %v1494_v44  ;;  %4042 = vrsqrt.f32 %v5677_v2  ;;  %v1172_v30 = vmul.f32 %v5625_v24, %v8780_v55  ;;  %v8783_v53 = vld [vmem:[#allocation25_spill] sm:$0xff]  ;;  %v8785_v44 = vld [vmem:[#allocation68_spill] sm:$0xff] }
 0x25c   :  { %v1618_v21 = vpack.c.bf16 %v1599_v63, %v1598_v35  ;;  %v1173_v10 = vmul.f32 %v5625_v24, %v8781_v16  ;;  %v1177_v61 = vmul.f32 %v5625_v24, %v8782_v37  ;;  %v1178_v42 = vmul.f32 %v5625_v24, %v8783_v53  ;;  %v8787_v35 = vld [vmem:[#allocation73_spill] sm:$0xff] }
 0x25d   :  { %v1583_v26 = vmax.f32 %v1543_v43, %v1563_v45  ;;  %v1584_v41 = vmax.f32 %v1544_v29, %v1564_v57  ;;  %v1183_v43 = vmul.f32 %v5625_v24, %v8785_v44  ;;  %v8786_v29 = vld [vmem:[#allocation72_spill] sm:$0xff]  ;;  %v1188_v63 = vmul.f32 %v5625_v24, %v8787_v35  ;;  %v8788_v37 = vld [vmem:[#allocation9_spill] sm:$0xff]  ;;  %v8790_v44 = vld [vmem:[#allocation22_spill] sm:$0xff] }
 0x25e   :  { %v1640_v8 = vunpack.c.h.b16 %v1618_v21  ;;  %vm1156_vm7 = vweird.f32 %v5677_v2 }
 0x25f   :  { %v1603_v14 = vmul.f32 %v1583_v26, %v4474_v54  ;;  %v1604_v52 = vmul.f32 %v1584_v41, %v4479_v56  ;;  %v8784_v41 = vld [vmem:[#allocation66_spill] sm:$0xff]  ;;  %v1276_v26 = vmul.f32 %v8772_v22, %v1172_v30  ;;  %v1287_v16 = vmul.f32 %v8772_v22, %v1183_v43 }
 0x260   :  { %v1182_v32 = vmul.f32 %v5625_v24, %v8784_v41  ;;  %v8789_v41 = vld [vmem:[#allocation15_spill] sm:$0xff]  ;;  %v1197_v43 = vmul.f32 %v5659_v0, %v8790_v44  ;;  %v1634_v54 = vunpack.c.l.b16 %v1618_v21 }
 0x261   :  { %v1121_v18 = vpop.xlane.xlu2 %1120  ;;  %v1621_v39 = vpack.c.bf16 %v1604_v52, %v1603_v14  ;;  %v5706_v1 = vpop.eup %4042  ;;  %v1281_v14 = vmul.f32 %v8772_v22, %v1177_v61  ;;  %v1282_v52 = vmul.f32 %v8772_v22, %v1178_v42  ;;  %v5741_v61 = vadd.f32 %v8773_v19, %v1276_v26 }
 0x262   :  { %v1125_v4 = vmul.f32 0.0006377551, %v1121_v18  ;;  %v1187_v18 = vmul.f32 %v5625_v24, %v8786_v29  ;;  %v1151_v57 = vmul.f32 %v5706_v1, %v5677_v2  ;;  %v1286_v55 = vmul.f32 %v8772_v22, %v1182_v32  ;;  %v8791_v29 = vld [vmem:[#allocation32_spill] sm:$0xff] }
 0x263   :  { %v1641_v15 = vunpack.c.h.b16 %v1621_v39  ;;  %v1193_v32 = vmul.f32 %v5659_v0, %v8789_v41  ;;  %v1385_v35 = vadd.f32 %v8773_v19, %v1281_v14  ;;  %v1207_v26 = vmul.f32 %v5659_v0, %v5338_v25 }
 0x264   :  { %v5700_v28 = vadd.f32 1e-05, %v1125_v4  ;;  %v1277_v4 = vmul.f32 %v8772_v22, %v1173_v10  ;;  %v1291_v30 = vmul.f32 %v8772_v22, %v1187_v18  ;;  %v1292_v10 = vmul.f32 %v8772_v22, %v1188_v63 }
 0x265   :  { %v5720_v45 = vpack.c.b16 %v1641_v15, %v1640_v8  ;;  %v1192_v8 = vmul.f32 %v5659_v0, %v8788_v37  ;;  %v1152_v15 = vmul.f32 %v5706_v1, %v1151_v57  ;;  %v1198_v18 = vmul.f32 %v5659_v0, %v8791_v29 }
 0x266   :  { %4044 = vrsqrt.f32 %v5700_v28  ;;  %v5744_v53 = vadd.f32 %v8773_v19, %v1277_v4  ;;  %v1202_v63 = vmul.f32 %v5659_v0, %v5287_v20  ;;  %v1203_v57 = vmul.f32 %v5659_v0, %v5304_v58  ;;  %v8792_v4 = vld [vmem:[#allocation24_spill] sm:$0xff] }
 0x267   :  { %1675 = vrot.lane.b32.xlu0 %v5720_v45, %s4063_s1  ;;  %1648 = vrot.lane.b32.xlu1 %v5720_v45, %s4064_s3  ;;  %v1208_v37 = vmul.f32 %v5659_v0, %v8792_v4  ;;  %v1386_v41 = vadd.f32 %v8773_v19, %v1282_v52  ;;  %v1390_v44 = vadd.f32 %v8773_v19, %v1286_v55  ;;  %v1153_v56 = vmul.f32 0.5, %v1152_v15 }
 0x268   :  { %v1391_v29 = vadd.f32 %v8773_v19, %v1287_v16  ;;  %v1395_v14 = vadd.f32 %v8773_v19, %v1291_v30  ;;  %v1296_v58 = vmul.f32 %v8778_v5, %v1192_v8  ;;  %v1635_v27 = vunpack.c.l.b16 %v1621_v39 }
 0x269   :  { %v1297_v25 = vmul.f32 %v8778_v5, %v1193_v32  ;;  %v1301_v4 = vmul.f32 %v8778_v5, %v1197_v43  ;;  %v1302_v52 = vmul.f32 %v8778_v5, %v1198_v18  ;;  %v1306_v55 = vmul.f32 %v8778_v5, %v1202_v63 }
 0x26a   :  { %v1307_v16 = vmul.f32 %v8778_v5, %v1203_v57  ;;  %v1311_v30 = vmul.f32 %v8778_v5, %v1207_v26  ;;  %v1312_v15 = vmul.f32 %v8778_v5, %v1208_v37  ;;  %v5777_v49 = vpack.c.b16 %v1635_v27, %v1634_v54 }
 0x26b   :  { %v1396_v21 = vadd.f32 %v8773_v19, %v1292_v10  ;;  %v1460_v39 = vmax.f32 %v5741_v61, 0.0  ;;  %v1461_v8 = vmax.f32 %v5744_v53, 0.0  ;;  %v1154_v32 = vsub.f32 1.5, %v1153_v56 }
 0x26c   :  { %v5746_v42 = vpop.eup %4044  ;;  %8793 = vst [vmem:[#allocation50_spill] sm:$0xff] %v5777_v49  ;;  %v1400_v18 = vadd.f32 %v8779_v48, %v1296_v58  ;;  %v1465_v63 = vmax.f32 %v1385_v35, 0.0  ;;  %1646 = vrot.lane.b32.xlu2 %v5777_v49, %s4064_s3  ;;  %v1401_v54 = vadd.f32 %v8779_v48, %v1297_v25  ;;  %v1405_v27 = vadd.f32 %v8779_v48, %v1301_v4 }
 0x26d   :  { %v1161_v20 = vmul.f32 %v5746_v42, %v5700_v28  ;;  %v1406_v10 = vadd.f32 %v8779_v48, %v1302_v52  ;;  %v1466_v61 = vmax.f32 %v1386_v41, 0.0  ;;  %v1410_v56 = vadd.f32 %v8779_v48, %v1306_v55 }
 0x26e   :  { %v1411_v53 = vadd.f32 %v8779_v48, %v1307_v16  ;;  %v1415_v35 = vadd.f32 %v8779_v48, %v1311_v30  ;;  %v1416_v57 = vadd.f32 %v8779_v48, %v1312_v15  ;;  %v1470_v26 = vmax.f32 %v1390_v44, 0.0 }
 0x26f   :  { %v1162_v43 = vmul.f32 %v5746_v42, %v1161_v20  ;;  %1690 = vrot.lane.b32.xlu0 %v5777_v49, %s4065_s26  ;;  %1657 = vrot.lane.b32.xlu1 %v5777_v49, %s4066_s27  ;;  %v1471_v37 = vmax.f32 %v1391_v29, 0.0  ;;  %v1475_v20 = vmax.f32 %v1395_v14, 0.0  ;;  %v1476_v58 = vmax.f32 %v1396_v21, 0.0 }
 0x270   :  { %v1155_v25 = vmul.f32 %v5706_v1, %v1154_v32  ;;  %vm1157_vm8 = vweird.f32 %v5706_v1  ;;  %v1480_v4 = vmax.f32 %v1400_v18, 0.0  ;;  %v1481_v52 = vmax.f32 %v1401_v54, 0.0  ;;  %v8794_v32 = vld [vmem:[#allocation13_spill] sm:$0xff] }
 0x271   :  { %v1163_v41 = vmul.f32 0.5, %v1162_v43  ;;  %v1485_v55 = vmax.f32 %v1405_v27, 0.0  ;;  %v1486_v47 = vmax.f32 %v1406_v10, 0.0  ;;  %v1490_v16 = vmax.f32 %v1410_v56, 0.0  ;;  %vm1158_vm9 = vmor %vm1156_vm7, %vm1157_vm8  ;;  %v8795_v43 = vld [vmem:[#allocation64_spill] sm:$0xff]  ;;  %v8796_v27 = vld [vmem:[#allocation69_spill] sm:$0xff] }
 0x272   :  { %v1491_v9 = vmax.f32 %v1411_v53, 0.0  ;;  %v1495_v30 = vmax.f32 %v1415_v35, 0.0  ;;  %v1496_v3 = vmax.f32 %v1416_v57, 0.0  ;;  %v1540_v15 = vmax.f32 %v1460_v39, %v1465_v63  ;;  %v8798_v35 = vld [vmem:[#allocation16_spill] sm:$0xff] }
 0x273   :  { %v1541_v44 = vmax.f32 %v1461_v8, %v1466_v61  ;;  %v1560_v29 = vmax.f32 %v1470_v26, %v1475_v20  ;;  %v1561_v14 = vmax.f32 %v1471_v37, %v1476_v58  ;;  %v1164_v21 = vsub.f32 1.5, %v1163_v41  ;;  %v8797_v61 = vld [vmem:[#allocation74_spill] sm:$0xff]  ;;  %v8799_v26 = vld [vmem:[#allocation36_spill] sm:$0xff]  ;;  %v8802_v58 = vld [vmem:[#allocation43_spill] sm:$0xff] }
 0x274   :  { %v1174_v17 = vmul.f32 %v5625_v24, %v8794_v32  ;;  %v1179_v18 = vmul.f32 %v5625_v24, %v8795_v43  ;;  %v5807_v54 = vsel %vm1158_vm9, %v5706_v1, %v1155_v25  ;;  %1661 = vrot.lane.b32.xlu2 %v5720_v45, %s4067_s28  ;;  %v1545_v2 = vmax.f32 %v1480_v4, %v1485_v55  ;;  %v8801_v20 = vld [vmem:[#allocation30_spill] sm:$0xff]  ;;  %v8803_v41 = vld [vmem:[#allocation47_spill] sm:$0xff] }
 0x275   :  { %v1546_v39 = vmax.f32 %v1481_v52, %v1486_v47  ;;  %v1565_v8 = vmax.f32 %v1490_v16, %v1495_v30  ;;  %v1566_v63 = vmax.f32 %v1491_v9, %v1496_v3  ;;  %v1184_v10 = vmul.f32 %v5625_v24, %v8796_v27  ;;  %v8800_v9 = vld [vmem:[#allocation46_spill] sm:$0xff]  ;;  %v8804_v52 = vld [vmem:[#allocation51_spill] sm:$0xff] }
 0x276   :  { %v1189_v56 = vmul.f32 %v5625_v24, %v8797_v61  ;;  %v1580_v1 = vmax.f32 %v1540_v15, %v1560_v29  ;;  %v1581_v53 = vmax.f32 %v1541_v44, %v1561_v14  ;;  %v1194_v57 = vmul.f32 %v5659_v0, %v8798_v35  ;;  %v8805_v15 = vld [vmem:[#allocation34_spill] sm:$0xff] }
 0x277   :  { %1696 = vrot.lane.b32.xlu0 %v5720_v45, %s4068_s29  ;;  %1694 = vrot.lane.b32.xlu1 %v5777_v49, %s4068_s29  ;;  %v1199_v37 = vmul.f32 %v5659_v0, %v8799_v26  ;;  %v1165_v47 = vmul.f32 %v5746_v42, %v1164_v21  ;;  %vm1167_vm10 = vweird.f32 %v5746_v42  ;;  %v1204_v3 = vmul.f32 %v5659_v0, %v8800_v9  ;;  %v8807_v21 = vld [vmem:[#allocation41_spill] sm:$0xff] }
 0x278   :  { %v1209_v24 = vmul.f32 %v5659_v0, %v8801_v20  ;;  %v5831_v25 = vmul.f32 %v5807_v54, %v8802_v58  ;;  %vm1166_vm11 = vweird.f32 %v5700_v28  ;;  %v5836_v4 = vmul.f32 %v5807_v54, %v8803_v41  ;;  %v8806_v0 = vld [vmem:[#allocation39_spill] sm:$0xff] }
 0x279   :  { %v5840_v55 = vmul.f32 %v5807_v54, %v8804_v52  ;;  %v1585_v16 = vmax.f32 %v1545_v2, %v1565_v8  ;;  %v1586_v30 = vmax.f32 %v1546_v39, %v1566_v63  ;;  %v5844_v44 = vmul.f32 %v5807_v54, %v8805_v15  ;;  %vm1168_vm12 = vmor %vm1166_vm11, %vm1167_vm10 }
 0x27a   :  { %v5848_v29 = vmul.f32 %v5807_v54, %v8806_v0  ;;  %v1600_v28 = vmul.f32 %v1580_v1, %v4486_v59  ;;  %v1601_v14 = vmul.f32 %v1581_v53, %v4514_v6  ;;  %v5854_v32 = vmul.f32 %v5807_v54, %v8807_v21 }
 0x27b   :  { %v5858_v43 = vmul.f32 %v5807_v54, %v5430_v60  ;;  %v5862_v2 = vmul.f32 %v5807_v54, %v5446_v40  ;;  %v5865_v39 = vsel %vm1168_vm12, %v5746_v42, %v1165_v47  ;;  %v5869_v8 = vmul.f32 %v5807_v54, %v5450_v7 }
 0x27c   :  { %v5873_v63 = vmul.f32 %v5807_v54, %v5506_v50  ;;  %v5877_v27 = vmul.f32 %v5807_v54, %v5520_v33  ;;  %v5881_v60 = vmul.f32 %v5807_v54, %v5534_v23  ;;  %v1605_v40 = vmul.f32 %v1585_v16, %v4486_v59 }
 0x27d   :  { %v1606_v42 = vmul.f32 %v1586_v30, %v4514_v6  ;;  %v1278_v7 = vmul.f32 %v8772_v22, %v1174_v17  ;;  %v1283_v50 = vmul.f32 %v8772_v22, %v1179_v18  ;;  %v1232_v33 = vmul.f32 %v5865_v39, %v5434_v11  ;;  %v8808_v11 = vld [vmem:[#allocation49_spill] sm:$0xff] }
 0x27e   :  { %v5891_v61 = vpack.c.bf16 %v1601_v14, %v1600_v28  ;;  %v1288_v23 = vmul.f32 %v8772_v22, %v1184_v10  ;;  %v1293_v1 = vmul.f32 %v8772_v22, %v1189_v56  ;;  %v1233_v53 = vmul.f32 %v5865_v39, %v5454_v38 }
 0x27f   :  { %1705 = vrot.lane.b32.xlu0 %v5777_v49, %s4069_s30  ;;  %1709 = vrot.lane.b32.xlu1 %v5777_v49, %s4070_s12  ;;  %v5899_v35 = vpack.c.bf16 %v1606_v42, %v1605_v40  ;;  %v1298_v17 = vmul.f32 %v8778_v5, %v1194_v57  ;;  %v1303_v18 = vmul.f32 %v8778_v5, %v1199_v37  ;;  %v8810_v42 = vld [vmem:[#allocation27_spill] sm:$0xff]  ;;  %vm1794_vm7 = vcmask 310272  }
 0x280   :  { %v5905_v26 = vmul.f32 %v5865_v39, %v8808_v11  ;;  %v1237_v47 = vmul.f32 %v5865_v39, %v5499_v51  ;;  %v1308_v10 = vmul.f32 %v8778_v5, %v1204_v3  ;;  %v1313_v22 = vmul.f32 %v8778_v5, %v1209_v24 }
 0x281   :  { %v1669_v56 = vunpack.c.l.b16 %v5891_v61  ;;  %v1670_v38 = vunpack.c.l.b16 %v5899_v35  ;;  %v1382_v9 = vadd.f32 %v8773_v19, %v1278_v7  ;;  %v1387_v57 = vadd.f32 %v8773_v19, %v1283_v50 }
 0x282   :  { %v1238_v37 = vmul.f32 %v5865_v39, %v5513_v46  ;;  %v5919_v20 = vmul.f32 %v5865_v39, %v5527_v12  ;;  %v1392_v51 = vadd.f32 %v8773_v19, %v1288_v23  ;;  %v1397_v3 = vadd.f32 %v8773_v19, %v1293_v1 }
 0x283   :  { %v1242_v5 = vmul.f32 %v5865_v39, %v5561_v62  ;;  %v5925_v24 = vpack.c.b16 %v1670_v38, %v1669_v56  ;;  %v1402_v58 = vadd.f32 %v8779_v48, %v1298_v17  ;;  %v1407_v41 = vadd.f32 %v8779_v48, %v1303_v18 }
 0x284   :  { %v1243_v46 = vmul.f32 %v5865_v39, %v5569_v31  ;;  %v1412_v52 = vadd.f32 %v8779_v48, %v1308_v10  ;;  %v1417_v12 = vadd.f32 %v8779_v48, %v1313_v22  ;;  %v1462_v16 = vmax.f32 %v1382_v9, 0.0  ;;  %v8811_v22 = vld [vmem:[#allocation59_spill] sm:$0xff] }
 0x285   :  { %8809 = vst [vmem:[#allocation53_spill] sm:$0xff] %v5925_v24  ;;  %1677 = vrot.lane.b32.xlu2 %v5925_v24, %s4063_s1  ;;  %v1467_v62 = vmax.f32 %v1387_v57, 0.0  ;;  %v1472_v19 = vmax.f32 %v1392_v51, 0.0  ;;  %v1477_v30 = vmax.f32 %v1397_v3, 0.0  ;;  %v1482_v15 = vmax.f32 %v1402_v58, 0.0 }
 0x286   :  { %v1247_v0 = vmul.f32 %v5865_v39, %v5598_v34  ;;  %v1487_v31 = vmax.f32 %v1407_v41, 0.0  ;;  %v1492_v48 = vmax.f32 %v1412_v52, 0.0  ;;  %v1497_v28 = vmax.f32 %v1417_v12, 0.0 }
 0x287   :  { %1720 = vrot.lane.b32.xlu0 %v5925_v24, %s4067_s28  ;;  %1727 = vrot.lane.b32.xlu1 %v5720_v45, %s4071_s13  ;;  %v1248_v14 = vmul.f32 %v5865_v39, %v5605_v36  ;;  %v1542_v21 = vmax.f32 %v1462_v16, %v1467_v62  ;;  %v1562_v40 = vmax.f32 %v1472_v19, %v1477_v30  ;;  %v8813_v62 = vld [vmem:[#allocation67_spill] sm:$0xff]  ;;  %vm1805_vm8 = vcmask 48128  }
 0x288   :  { %v1316_v7 = vmul.f32 %v8810_v42, %v5831_v25  ;;  %v1547_v50 = vmax.f32 %v1482_v15, %v1487_v31  ;;  %v1567_v23 = vmax.f32 %v1492_v48, %v1497_v28  ;;  %v1317_v34 = vmul.f32 %v8810_v42, %v5836_v4 }
 0x289   :  { %v1321_v1 = vmul.f32 %v8810_v42, %v5844_v44  ;;  %v1582_v17 = vmax.f32 %v1542_v21, %v1562_v40  ;;  %v1322_v18 = vmul.f32 %v8810_v42, %v5848_v29  ;;  %v1326_v36 = vmul.f32 %v8810_v42, %v5858_v43 }
 0x28a   :  { %v1327_v11 = vmul.f32 %v8810_v42, %v5862_v2  ;;  %v1587_v10 = vmax.f32 %v1547_v50, %v1567_v23  ;;  %v1331_v25 = vmul.f32 %v8810_v42, %v5873_v63  ;;  %v1332_v4 = vmul.f32 %v8810_v42, %v5877_v27 }
 0x28b   :  { %v1336_v56 = vmul.f32 %v8811_v22, %v1232_v33  ;;  %v1602_v44 = vmul.f32 %v1582_v17, %v4524_v13  ;;  %v1337_v38 = vmul.f32 %v8811_v22, %v1233_v53  ;;  %v1341_v29 = vmul.f32 %v8811_v22, %v1237_v47  ;;  %v8812_v53 = vld [vmem:[#allocation14_spill] sm:$0xff] }
 0x28c   :  { %v1342_v43 = vmul.f32 %v8811_v22, %v1238_v37  ;;  %v1607_v9 = vmul.f32 %v1587_v10, %v4524_v13  ;;  %v1346_v2 = vmul.f32 %v8811_v22, %v1242_v5  ;;  %v1347_v57 = vmul.f32 %v8811_v22, %v1243_v46 }
 0x28d   :  { %v1351_v63 = vmul.f32 %v8811_v22, %v1247_v0  ;;  %1686 = vrot.lane.b32.xlu2 %v5720_v45, %s4072_s0  ;;  %v1620_v27 = vpack.c.bf16 %v1602_v44, %v1602_v44  ;;  %v1352_v33 = vmul.f32 %v8811_v22, %v1248_v14  ;;  %v1420_v47 = vadd.f32 %v8812_v53, %v1316_v7 }
 0x28e   :  { %v1623_v37 = vpack.c.bf16 %v1607_v9, %v1607_v9  ;;  %v1421_v51 = vadd.f32 %v8812_v53, %v1317_v34  ;;  %v1425_v3 = vadd.f32 %v8812_v53, %v1321_v1  ;;  %v1426_v5 = vadd.f32 %v8812_v53, %v1322_v18 }
 0x28f   :  { %1738 = vrot.lane.b32.xlu0 %v5720_v45, %s4065_s26  ;;  %1745 = vrot.lane.b32.xlu1 %v5777_v49, %s4073_s14  ;;  %v1832_v58 = vunpack.c.l.b16 %v1620_v27  ;;  %v1430_v41 = vadd.f32 %v8812_v53, %v1326_v36  ;;  %v1431_v46 = vadd.f32 %v8812_v53, %v1327_v11  ;;  %v1435_v52 = vadd.f32 %v8812_v53, %v1331_v25 }
 0x290   :  { %v1833_v12 = vunpack.c.l.b16 %v1623_v37  ;;  %v1436_v16 = vadd.f32 %v8812_v53, %v1332_v4  ;;  %v1440_v19 = vadd.f32 %v8813_v62, %v1336_v56  ;;  %v1441_v30 = vadd.f32 %v8813_v62, %v1337_v38 }
 0x291   :  { %v1445_v15 = vadd.f32 %v8813_v62, %v1341_v29  ;;  %v1446_v0 = vadd.f32 %v8813_v62, %v1342_v43  ;;  %v1450_v31 = vadd.f32 %v8813_v62, %v1346_v2  ;;  %v1451_v48 = vadd.f32 %v8813_v62, %v1347_v57 }
 0x292   :  { %v5989_v28 = vpack.c.b16 %v1833_v12, %v1832_v58  ;;  %v1455_v14 = vadd.f32 %v8813_v62, %v1351_v63  ;;  %v1456_v21 = vadd.f32 %v8813_v62, %v1352_v33  ;;  %v1500_v40 = vmax.f32 %v1420_v47, 0.0  ;;  %v8814_v63 = vld [vmem:[#allocation38_spill] sm:$0xff] }
 0x293   :  { %v1501_v7 = vmax.f32 %v1421_v51, 0.0  ;;  %v1505_v50 = vmax.f32 %v1425_v3, 0.0  ;;  %v1506_v23 = vmax.f32 %v1426_v5, 0.0  ;;  %v1510_v34 = vmax.f32 %v1430_v41, 0.0  ;;  %v8815_v51 = vld [vmem:[#allocation48_spill] sm:$0xff] }
 0x294   :  { %v1511_v1 = vmax.f32 %v1431_v46, 0.0  ;;  %v1515_v17 = vmax.f32 %v1435_v52, 0.0  ;;  %v1516_v18 = vmax.f32 %v1436_v16, 0.0  ;;  %v1520_v36 = vmax.f32 %v1440_v19, 0.0 }
 0x295   :  { %1713 = vrot.lane.b32.xlu2 %v5720_v45, %s4066_s27  ;;  %v1521_v11 = vmax.f32 %v1441_v30, 0.0  ;;  %v1525_v10 = vmax.f32 %v1445_v15, 0.0  ;;  %v1526_v25 = vmax.f32 %v1446_v0, 0.0  ;;  %v1530_v4 = vmax.f32 %v1450_v31, 0.0 }
 0x296   :  { %v1531_v56 = vmax.f32 %v1451_v48, 0.0  ;;  %v1535_v44 = vmax.f32 %v1455_v14, 0.0  ;;  %v1536_v38 = vmax.f32 %v1456_v21, 0.0  ;;  %v1550_v29 = vmax.f32 %v1500_v40, %v1505_v50 }
 0x297   :  { %1756 = vrot.lane.b32.xlu0 %v5720_v45, %s4074_s15  ;;  %1760 = vrot.lane.b32.xlu1 %v5720_v45, %s4075_s16  ;;  %v1551_v43 = vmax.f32 %v1501_v7, %v1506_v23  ;;  %v1555_v9 = vmax.f32 %v1520_v36, %v1525_v10  ;;  %v1556_v2 = vmax.f32 %v1521_v11, %v1526_v25  ;;  %vm1917_vm9 = vcmask 252928  }
 0x298   :  { %v1570_v57 = vmax.f32 %v1510_v34, %v1515_v17  ;;  %v1244_v27 = vmul.f32 %v5865_v39, %v8814_v63  ;;  %v1571_v33 = vmax.f32 %v1511_v1, %v1516_v18  ;;  %v1575_v47 = vmax.f32 %v1530_v4, %v1535_v44 }
 0x299   :  { %v1576_v37 = vmax.f32 %v1531_v56, %v1536_v38  ;;  %v1249_v3 = vmul.f32 %v5865_v39, %v8815_v51  ;;  %v1318_v58 = vmul.f32 %v8810_v42, %v5840_v55  ;;  %v1323_v41 = vmul.f32 %v8810_v42, %v5854_v32 }
 0x29a   :  { %v1590_v5 = vmax.f32 %v1550_v29, %v1570_v57  ;;  %v1591_v46 = vmax.f32 %v1551_v43, %v1571_v33  ;;  %v1595_v52 = vmax.f32 %v1555_v9, %v1575_v47  ;;  %v1328_v16 = vmul.f32 %v8810_v42, %v5869_v8 }
 0x29b   :  { %v1596_v12 = vmax.f32 %v1556_v2, %v1576_v37  ;;  %v1333_v30 = vmul.f32 %v8810_v42, %v5881_v60  ;;  %v1338_v15 = vmul.f32 %v8811_v22, %v5905_v26  ;;  %v1343_v55 = vmul.f32 %v8811_v22, %v5919_v20 }
 0x29c   :  { %v1610_v19 = vmul.f32 %v1590_v5, %v4486_v59  ;;  %v1611_v0 = vmul.f32 %v1591_v46, %v4514_v6  ;;  %v1615_v32 = vmul.f32 %v1595_v52, %v4486_v59  ;;  %v1348_v48 = vmul.f32 %v8811_v22, %v1244_v27  ;;  %v8818_v46 = vld [vmem:[#allocation37_spill] sm:$0xff] }
 0x29d   :  { %v1616_v31 = vmul.f32 %v1596_v12, %v4514_v6  ;;  %1731 = vrot.lane.b32.xlu2 %v5925_v24, %s4072_s0  ;;  %v1353_v8 = vmul.f32 %v8811_v22, %v1249_v3  ;;  %v1422_v60 = vadd.f32 %v8812_v53, %v1318_v58  ;;  %v1427_v26 = vadd.f32 %v8812_v53, %v1323_v41 }
 0x29e   :  { %v6029_v59 = vpack.c.bf16 %v1611_v0, %v1610_v19  ;;  %v1432_v20 = vadd.f32 %v8812_v53, %v1328_v16  ;;  %v1437_v14 = vadd.f32 %v8812_v53, %v1333_v30  ;;  %v1442_v21 = vadd.f32 %v8813_v62, %v1338_v15  ;;  %v8819_v16 = vld [vmem:[#allocation19_spill] sm:$0xff]  ;;  %v8820_v30 = vld [vmem:[#allocation20_spill] sm:$0xff] }
 0x29f   :  { %1762 = vrot.lane.b32.xlu0 %v5925_v24, %s4075_s16  ;;  %1775 = vrot.lane.b32.xlu1 %v5720_v45, %s4076_s17  ;;  %v6031_v6 = vpack.c.bf16 %v1616_v31, %v1615_v32  ;;  %v1447_v40 = vadd.f32 %v8813_v62, %v1343_v55  ;;  %v1452_v7 = vadd.f32 %v8813_v62, %v1348_v48  ;;  %v1502_v1 = vmax.f32 %v1422_v60, 0.0  ;;  %v8821_v55 = vld [vmem:[#allocation26_spill] sm:$0xff]  ;;  %v8824_v60 = vld [vmem:[#allocation33_spill] sm:$0xff] }
 0x2a0   :  { %v1457_v50 = vadd.f32 %v8813_v62, %v1353_v8  ;;  %v1810_v23 = vunpack.c.h.b16 %v6029_v59  ;;  %v1507_v17 = vmax.f32 %v1427_v26, 0.0  ;;  %v1512_v18 = vmax.f32 %v1432_v20, 0.0  ;;  %v8822_v32 = vld [vmem:[#allocation18_spill] sm:$0xff]  ;;  %v8825_v20 = vld [vmem:[#allocation35_spill] sm:$0xff] }
 0x2a1   :  { %v1811_v34 = vunpack.c.h.b16 %v6031_v6  ;;  %v1517_v36 = vmax.f32 %v1437_v14, 0.0  ;;  %v1522_v10 = vmax.f32 %v1442_v21, 0.0  ;;  %v1527_v25 = vmax.f32 %v1447_v40, 0.0  ;;  %v8826_v21 = vld [vmem:[#allocation40_spill] sm:$0xff] }
 0x2a2   :  { %v1532_v4 = vmax.f32 %v1452_v7, 0.0  ;;  %v1537_v56 = vmax.f32 %v1457_v50, 0.0  ;;  %v1552_v44 = vmax.f32 %v1502_v1, %v1507_v17  ;;  %v1809_v63 = vunpack.c.h.b16 %v5899_v35  ;;  %v8827_v7 = vld [vmem:[#allocation44_spill] sm:$0xff]  ;;  %v8829_v1 = vld [vmem:[#allocation17_spill] sm:$0xff] }
 0x2a3   :  { %v6041_v11 = vpack.c.b16 %v1811_v34, %v1810_v23  ;;  %v1572_v38 = vmax.f32 %v1512_v18, %v1517_v36  ;;  %v1557_v29 = vmax.f32 %v1522_v10, %v1527_v25  ;;  %v1808_v47 = vunpack.c.h.b16 %v5891_v61  ;;  %v8828_v23 = vld [vmem:[#allocation11_spill] sm:$0xff]  ;;  %v8830_v18 = vld [vmem:[#allocation28_spill] sm:$0xff]  ;;  %v8831_v10 = vld [vmem:[#allocation42_spill] sm:$0xff] }
 0x2a4   :  { %v1577_v43 = vmax.f32 %v1532_v4, %v1537_v56  ;;  %v1210_v52 = vmul.f32 %v5807_v54, %v8818_v46  ;;  %v1230_v19 = vmul.f32 %v5865_v39, %v8819_v16  ;;  %v1231_v15 = vmul.f32 %v5865_v39, %v8820_v30  ;;  %v8832_v4 = vld [vmem:[#allocation45_spill] sm:$0xff] }
 0x2a5   :  { %1749 = vrot.lane.b32.xlu2 %v5720_v45, %s4069_s30  ;;  %v1592_v9 = vmax.f32 %v1552_v44, %v1572_v38  ;;  %v6053_v51 = vpack.c.b16 %v1809_v63, %v1808_v47  ;;  %v1235_v0 = vmul.f32 %v5865_v39, %v8821_v55  ;;  %v1236_v31 = vmul.f32 %v5865_v39, %v8822_v32  ;;  %v8833_v44 = vld [vmem:[#allocation52_spill] sm:$0xff] }
 0x2a6   :  { %v1597_v2 = vmax.f32 %v1557_v29, %v1577_v43  ;;  %v1240_v26 = vmul.f32 %v5865_v39, %v8824_v60  ;;  %v1241_v14 = vmul.f32 %v5865_v39, %v8825_v20  ;;  %v1245_v40 = vmul.f32 %v5865_v39, %v8826_v21  ;;  %v8834_v29 = vld [vmem:[#allocation29_spill] sm:$0xff] }
 0x2a7   :  { %1771 = vrot.lane.b32.xlu0 %v5720_v45, %s4077_s18  ;;  %1799 = vrot.lane.b32.xlu1 %v5925_v24, %s4078_s19  ;;  %v1612_v57 = vmul.f32 %v1592_v9, %v4524_v13  ;;  %v1246_v50 = vmul.f32 %v5865_v39, %v8827_v7  ;;  %v1211_v34 = vmul.f32 %v5807_v54, %v8828_v23  ;;  %vm2241_vm10 = vcmask 523264  }
 0x2a8   :  { %v1617_v27 = vmul.f32 %v1597_v2, %v4524_v13  ;;  %v1215_v17 = vmul.f32 %v5807_v54, %v8829_v1  ;;  %v1216_v36 = vmul.f32 %v5807_v54, %v8830_v18  ;;  %v1220_v25 = vmul.f32 %v5807_v54, %v8831_v10 }
 0x2a9   :  { %v1626_v33 = vpack.c.bf16 %v1612_v57, %v1612_v57  ;;  %v1221_v56 = vmul.f32 %v5807_v54, %v8832_v4  ;;  %v1225_v38 = vmul.f32 %v5807_v54, %v8833_v44  ;;  %v1226_v39 = vmul.f32 %v5807_v54, %v8834_v29 }
 0x2aa   :  { %v1629_v37 = vpack.c.bf16 %v1617_v27, %v1617_v27  ;;  %v1314_v43 = vmul.f32 %v8810_v42, %v1210_v52  ;;  %v1334_v9 = vmul.f32 %v8811_v22, %v1230_v19  ;;  %v1335_v2 = vmul.f32 %v8811_v22, %v1231_v15 }
 0x2ab   :  { %v1834_v3 = vunpack.c.l.b16 %v1626_v33  ;;  %v1339_v57 = vmul.f32 %v8811_v22, %v1235_v0  ;;  %v1340_v63 = vmul.f32 %v8811_v22, %v1236_v31  ;;  %v1344_v27 = vmul.f32 %v8811_v22, %v1240_v26 }
 0x2ac   :  { %v1835_v5 = vunpack.c.l.b16 %v1629_v37  ;;  %v1345_v33 = vmul.f32 %v8811_v22, %v1241_v14  ;;  %v1349_v47 = vmul.f32 %v8811_v22, %v1245_v40  ;;  %v1350_v37 = vmul.f32 %v8811_v22, %v1246_v50 }
 0x2ad   :  { %1788 = vrot.lane.b32.xlu2 %v5720_v45, %s4079_s20  ;;  %v1315_v54 = vmul.f32 %v8810_v42, %v1211_v34  ;;  %v1324_v46 = vmul.f32 %v8810_v42, %v1220_v25  ;;  %v1325_v52 = vmul.f32 %v8810_v42, %v1221_v56  ;;  %v1329_v16 = vmul.f32 %v8810_v42, %v1225_v38 }
 0x2ae   :  { %v6061_v35 = vpack.c.b16 %v1835_v5, %v1834_v3  ;;  %v1319_v3 = vmul.f32 %v8810_v42, %v1215_v17  ;;  %v1320_v5 = vmul.f32 %v8810_v42, %v1216_v36  ;;  %v1330_v22 = vmul.f32 %v8810_v42, %v1226_v39 }
 0x2af   :  { %1777 = vrot.lane.b32.xlu0 %v5925_v24, %s4076_s17  ;;  %1814 = vrot.lane.b32.xlu1 %v6053_v51, %s4064_s3  ;;  %v1438_v19 = vadd.f32 %v8813_v62, %v1334_v9  ;;  %v1439_v30 = vadd.f32 %v8813_v62, %v1335_v2  ;;  %v1443_v15 = vadd.f32 %v8813_v62, %v1339_v57  ;;  %vm2021_vm11 = vcmask 572416  }
 0x2b0   :  { %v1444_v55 = vadd.f32 %v8813_v62, %v1340_v63  ;;  %v1448_v31 = vadd.f32 %v8813_v62, %v1344_v27  ;;  %v1449_v42 = vadd.f32 %v8813_v62, %v1345_v33  ;;  %v1453_v60 = vadd.f32 %v8813_v62, %v1349_v47 }
 0x2b1   :  { %v1454_v26 = vadd.f32 %v8813_v62, %v1350_v37  ;;  %v1418_v14 = vadd.f32 %v8812_v53, %v1314_v43  ;;  %v1419_v21 = vadd.f32 %v8812_v53, %v1315_v54  ;;  %v1423_v40 = vadd.f32 %v8812_v53, %v1319_v3 }
 0x2b2   :  { %v1424_v7 = vadd.f32 %v8812_v53, %v1320_v5  ;;  %v1428_v50 = vadd.f32 %v8812_v53, %v1324_v46  ;;  %v1429_v23 = vadd.f32 %v8812_v53, %v1325_v52  ;;  %v1433_v34 = vadd.f32 %v8812_v53, %v1329_v16 }
 0x2b3   :  { %v1434_v1 = vadd.f32 %v8812_v53, %v1330_v22  ;;  %v1518_v17 = vmax.f32 %v1438_v19, 0.0  ;;  %v1519_v62 = vmax.f32 %v1439_v30, 0.0  ;;  %v1523_v18 = vmax.f32 %v1443_v15, 0.0 }
 0x2b4   :  { %v1524_v36 = vmax.f32 %v1444_v55, 0.0  ;;  %v1528_v10 = vmax.f32 %v1448_v31, 0.0  ;;  %v1529_v25 = vmax.f32 %v1449_v42, 0.0  ;;  %v1533_v4 = vmax.f32 %v1453_v60, 0.0  ;;  %v8836_v31 = vld [vmem:[#allocation3_spill] sm:$0xff]  ;;  %v8837_v60 = vld [vmem:[#allocation5_spill] sm:$0xff] }
 0x2b5   :  { %1797 = vrot.lane.b32.xlu2 %v5720_v45, %s4078_s19  ;;  %v1534_v56 = vmax.f32 %v1454_v26, 0.0  ;;  %v1498_v44 = vmax.f32 %v1418_v14, 0.0  ;;  %v1499_v38 = vmax.f32 %v1419_v21, 0.0  ;;  %v1503_v29 = vmax.f32 %v1423_v40, 0.0 }
 0x2b6   :  { %v1504_v39 = vmax.f32 %v1424_v7, 0.0  ;;  %v1508_v53 = vmax.f32 %v1428_v50, 0.0  ;;  %v1509_v43 = vmax.f32 %v1429_v23, 0.0  ;;  %v1513_v9 = vmax.f32 %v1433_v34, 0.0 }
 0x2b7   :  { %1786 = vrot.lane.b32.xlu0 %v5777_v49, %s4079_s20  ;;  %1820 = vrot.lane.b32.xlu1 %v6053_v51, %s4066_s27  ;;  %v1514_v2 = vmax.f32 %v1434_v1, 0.0  ;;  %v1553_v27 = vmax.f32 %v1518_v17, %v1523_v18  ;;  %v1554_v33 = vmax.f32 %v1519_v62, %v1524_v36  ;;  %v1573_v47 = vmax.f32 %v1528_v10, %v1533_v4 }
 0x2b8   :  { %v1574_v37 = vmax.f32 %v1529_v25, %v1534_v56  ;;  %v1548_v3 = vmax.f32 %v1498_v44, %v1503_v29  ;;  %v1549_v5 = vmax.f32 %v1499_v38, %v1504_v39  ;;  %v1568_v46 = vmax.f32 %v1508_v53, %v1513_v9 }
 0x2b9   :  { %v1569_v52 = vmax.f32 %v1509_v43, %v1514_v2  ;;  %v1593_v16 = vmax.f32 %v1553_v27, %v1573_v47  ;;  %v1672_v47 = vunpack.c.l.b16 %v6031_v6  ;;  %vm2088_vm12 = vcmask 916480  }
 0x2ba   :  { %v1594_v22 = vmax.f32 %v1554_v33, %v1574_v37  ;;  %v1588_v19 = vmax.f32 %v1548_v3, %v1568_v46  ;;  %v1671_v37 = vunpack.c.l.b16 %v6029_v59 }
 0x2bb   :  { %v1589_v30 = vmax.f32 %v1549_v5, %v1569_v52  ;;  %v1613_v42 = vmul.f32 %v1593_v16, %v8836_v31 }
 0x2bc   :  { %v1614_v26 = vmul.f32 %v1594_v22, %v8837_v60  ;;  %v1608_v21 = vmul.f32 %v1588_v19, %v8836_v31  ;;  %v6293_v3 = vpack.c.b16 %v1672_v47, %v1671_v37 }
 0x2bd   :  { %1818 = vrot.lane.b32.xlu2 %v5925_v24, %s4066_s27  ;;  %v1609_v40 = vmul.f32 %v1589_v30, %v8837_v60 }
 0x2be   :  { %v1627_v7 = vpack.c.bf16 %v1614_v26, %v1613_v42  ;;  %8846 = vst [vmem:[#allocation63_spill] sm:$0xff] %v6293_v3 }
 0x2bf   :  { %1840 = vrot.lane.b32.xlu0 %v5989_v28, %s4067_s28  ;;  %1838 = vrot.lane.b32.xlu1 %v6053_v51, %s4067_s28  ;;  %v1624_v50 = vpack.c.bf16 %v1609_v40, %v1608_v21 }
 0x2c0   :  { %v1643_v1 = vunpack.c.h.b16 %v1627_v7  ;;  %v1637_v46 = vunpack.c.l.b16 %v1627_v7 }
 0x2c1   :  { %v1642_v62 = vunpack.c.h.b16 %v1624_v50  ;;  %v1636_v6 = vunpack.c.l.b16 %v1624_v50 }
 0x2c3   :  { %v6229_v18 = vpack.c.b16 %v1643_v1, %v1642_v62  ;;  %v6307_v59 = vpack.c.b16 %v1637_v46, %v1636_v6 }
 0x2c5   :  { %1864 = vrot.lane.b32.xlu2 %v6053_v51, %s4065_s26  ;;  %8848 = vst [vmem:[#allocation8_spill] sm:$0xff] %v6307_v59 }
 0x2c6   :  { %v6081_v13 = vpop.permute.xlu2 %1646 }
 0x2c7   :  { %1848 = vrot.lane.b32.xlu0 %v5989_v28, %s4063_s1  ;;  %1852 = vrot.lane.b32.xlu1 %v6053_v51, %s4072_s0  ;;  %8816 = vst [vmem:[#allocation54_spill] sm:$0xff] %v6081_v13 }
 0x2cd   :  { %1872 = vrot.lane.b32.xlu2 %v6053_v51, %s4068_s29 }
 0x2ce   :  { %v6093_v58 = vpop.permute.xlu2 %1661 }
 0x2cf   :  { %1854 = vrot.lane.b32.xlu0 %v5989_v28, %s4072_s0  ;;  %1909 = vrot.lane.b32.xlu1 %v6053_v51, %s4080_s21 }
 0x2d5   :  { %1878 = vrot.lane.b32.xlu2 %v6053_v51, %s4069_s30 }
 0x2d7   :  { %1862 = vrot.lane.b32.xlu0 %v5925_v24, %s4065_s26  ;;  %1924 = vrot.lane.b32.xlu1 %v6053_v51, %s8538_s22  ;;  %s8542_s22 = smov 32  }
 0x2d9   :  { %v6089_v61 = vpop.permute.xlu0 %1675  ;;  %v6097_v41 = vpop.permute.xlu1 %1648 }
 0x2da   :  { %8817 = vst [vmem:[#allocation55_spill] sm:$0xff] %v6097_v41 }
 0x2dd   :  { %1886 = vrot.lane.b32.xlu2 %v6053_v51, %s4082_s5 }
 0x2df   :  { %1876 = vrot.lane.b32.xlu0 %v5925_v24, %s4069_s30  ;;  %1930 = vrot.lane.b32.xlu1 %v6053_v51, %s8540_s4  ;;  %v6119_v48 = vpop.permute.xlu2 %1677 }
 0x2e1   :  { %v6109_v12 = vpop.permute.xlu0 %1690  ;;  %v6121_v8 = vpop.permute.xlu1 %1657 }
 0x2e2   :  { %8823 = vst [vmem:[#allocation56_spill] sm:$0xff] %v6121_v8 }
 0x2e5   :  { %1892 = vrot.lane.b32.xlu2 %v6053_v51, %s4084_s6 }
 0x2e7   :  { %1890 = vrot.lane.b32.xlu0 %v5925_v24, %s4084_s6  ;;  %1939 = vrot.lane.b32.xlu1 %v6053_v51, %s8544_s23  ;;  %v6171_v0 = vpop.permute.xlu2 %1686 }
 0x2e9   :  { %v6173_v32 = vpop.permute.xlu0 %1696  ;;  %v6179_v20 = vpop.permute.xlu1 %1694 }
 0x2ed   :  { %1901 = vrot.lane.b32.xlu2 %v6053_v51, %s4086_s24 }
 0x2ef   :  { %1905 = vrot.lane.b32.xlu0 %v5989_v28, %s8539_s25  ;;  %1945 = vrot.lane.b32.xlu1 %v5989_v28, %s8542_s22  ;;  %v6195_v57 = vpop.permute.xlu2 %1713  ;;  %s4089_s25 = smov 55  }
 0x2f1   :  { %v6197_v63 = vpop.permute.xlu0 %1705  ;;  %v6199_v54 = vpop.permute.xlu1 %1709 }
 0x2f2   :  { %8835 = vst [vmem:[#allocation57_spill] sm:$0xff] %v6197_v63 }
 0x2f5   :  { %1928 = vrot.lane.b32.xlu2 %v5925_v24, %s8540_s4  ;;  %s4090_s4 = smov 23  }
 0x2f7   :  { %1911 = vrot.lane.b32.xlu0 %v5989_v28, %s4080_s21  ;;  %1954 = vrot.lane.b32.xlu1 %v5925_v24, %s4089_s25  ;;  %v6207_v15 = vpop.permute.xlu2 %1731 }
 0x2f9   :  { %v6209_v55 = vpop.permute.xlu0 %1720  ;;  %v6213_v14 = vpop.permute.xlu1 %1727 }
 0x2fd   :  { %1943 = vrot.lane.b32.xlu2 %v6053_v51, %s8542_s22  ;;  %s4091_s22 = smov 71  }
 0x2ff   :  { %1920 = vrot.lane.b32.xlu0 %v5989_v28, %s4070_s12  ;;  %2002 = vrot.lane.b32.xlu1 %v5925_v24, %s8544_s23  ;;  %v6223_v23 = vpop.permute.xlu2 %1749  ;;  %s4092_s23 = smov 22  }
 0x301   :  { %v6225_v34 = vpop.permute.xlu0 %1738  ;;  %v6227_v17 = vpop.permute.xlu1 %1745 }
 0x305   :  { %1967 = vrot.lane.b32.xlu2 %v5989_v28, %s4090_s4 }
 0x307   :  { %1956 = vrot.lane.b32.xlu0 %v6053_v51, %s4089_s25  ;;  %1663 = vrot.lane.b32.xlu1 %v6229_v18, %s4067_s28  ;;  %v6237_v36 = vpop.permute.xlu2 %1788 }
 0x308   :  { %8838 = vst [vmem:[#allocation2_spill] sm:$0xff] %v6237_v36 }
 0x309   :  { %v6239_v10 = vpop.permute.xlu0 %1756  ;;  %v6241_v25 = vpop.permute.xlu1 %1760 }
 0x30a   :  { %8839 = vst [vmem:[#allocation4_spill] sm:$0xff] %v6239_v10 }
 0x30d   :  { %1976 = vrot.lane.b32.xlu2 %v5989_v28, %s4091_s22 }
 0x30f   :  { %1965 = vrot.lane.b32.xlu0 %v6053_v51, %s4090_s4  ;;  %1679 = vrot.lane.b32.xlu1 %v6229_v18, %s4063_s1  ;;  %v6249_v4 = vpop.permute.xlu2 %1797 }
 0x310   :  { %8840 = vst [vmem:[#allocation62_spill] sm:$0xff] %v6249_v4 }
 0x311   :  { %v6251_v56 = vpop.permute.xlu0 %1762  ;;  %v6253_v44 = vpop.permute.xlu1 %1775 }
 0x315   :  { %1982 = vrot.lane.b32.xlu2 %v5989_v28, %s4092_s23 }
 0x317   :  { %1980 = vrot.lane.b32.xlu0 %v6053_v51, %s4092_s23  ;;  %1688 = vrot.lane.b32.xlu1 %v6229_v18, %s4072_s0  ;;  %v6261_v38 = vpop.permute.xlu2 %1818 }
 0x318   :  { %8841 = vst [vmem:[#allocation31_spill] sm:$0xff] %v6261_v38 }
 0x319   :  { %v6263_v29 = vpop.permute.xlu0 %1771  ;;  %v6265_v39 = vpop.permute.xlu1 %1799 }
 0x31a   :  { %8842 = vst [vmem:[#allocation65_spill] sm:$0xff] %v6263_v29 }
 0x31b   :  { %8843 = vst [vmem:[#allocation70_spill] sm:$0xff] %v6265_v39 }
 0x31d   :  { %1991 = vrot.lane.b32.xlu2 %v6053_v51, %s4070_s12 }
 0x31f   :  { %1998 = vrot.lane.b32.xlu0 %v5989_v28, %s4066_s27  ;;  %1700 = vrot.lane.b32.xlu1 %v6229_v18, %s4068_s29  ;;  %v6273_v53 = vpop.permute.xlu2 %1864 }
 0x320   :  { %8844 = vst [vmem:[#allocation71_spill] sm:$0xff] %v6273_v53 }
 0x321   :  { %v6275_v43 = vpop.permute.xlu0 %1777  ;;  %v6277_v9 = vpop.permute.xlu1 %1814 }
 0x325   :  { %2009 = vrot.lane.b32.xlu2 %v5989_v28, %s4065_s26 }
 0x327   :  { %2013 = vrot.lane.b32.xlu0 %v6053_v51, %s4073_s14  ;;  %1715 = vrot.lane.b32.xlu1 %v6229_v18, %s4066_s27  ;;  %v6285_v2 = vpop.permute.xlu2 %1872 }
 0x329   :  { %v6287_v27 = vpop.permute.xlu0 %1786  ;;  %v6289_v33 = vpop.permute.xlu1 %1820 }
 0x32a   :  { %8845 = vst [vmem:[#allocation58_spill] sm:$0xff] %v6287_v27 }
 0x32d   :  { %2015 = vrot.lane.b32.xlu2 %v5989_v28, %s4073_s14 }
 0x32f   :  { %2028 = vrot.lane.b32.xlu0 %v5777_v49, %s4082_s5  ;;  %1733 = vrot.lane.b32.xlu1 %v6293_v3, %s4072_s0  ;;  %v6301_v51 = vpop.permute.xlu2 %1878 }
 0x330   :  { %8847 = vst [vmem:[#allocation7_spill] sm:$0xff] %v6301_v51 }
 0x331   :  { %v6303_v5 = vpop.permute.xlu0 %1840  ;;  %v6305_v52 = vpop.permute.xlu1 %1838 }
 0x335   :  { %2024 = vrot.lane.b32.xlu2 %v5989_v28, %s4069_s30 }
 0x337   :  { %1650 = vrot.lane.b32.xlu0 %v6307_v59, %s4064_s3  ;;  %1751 = vrot.lane.b32.xlu1 %v6229_v18, %s4069_s30  ;;  %v6315_v16 = vpop.permute.xlu2 %1886 }
 0x338   :  { %8849 = vst [vmem:[#allocation21_spill] sm:$0xff] %v6315_v16 }
 0x339   :  { %v6317_v22 = vpop.permute.xlu0 %1848  ;;  %v6319_v19 = vpop.permute.xlu1 %1852 }
 0x33a   :  { %8850 = vst [vmem:[#allocation12_spill] sm:$0xff] %v6317_v22 }
 0x33d   :  { %2030 = vrot.lane.b32.xlu2 %v5720_v45, %s4082_s5 }
 0x33f   :  { %1659 = vrot.lane.b32.xlu0 %v6307_v59, %s4066_s27  ;;  %1766 = vrot.lane.b32.xlu1 %v6293_v3, %s4075_s16  ;;  %v6327_v28 = vpop.permute.xlu2 %1892 }
 0x341   :  { %v6329_v30 = vpop.permute.xlu0 %1854  ;;  %v6331_v31 = vpop.permute.xlu1 %1909 }
 0x342   :  { %8851 = vst [vmem:[#allocation61_spill] sm:$0xff] %v6331_v31 }
 0x345   :  { %1652 = vrot.lane.b32.xlu2 %v6229_v18, %s4064_s3 }
 0x347   :  { %1681 = vrot.lane.b32.xlu0 %v6293_v3, %s4063_s1  ;;  %1781 = vrot.lane.b32.xlu1 %v6293_v3, %s4076_s17  ;;  %v6339_v45 = vpop.permute.xlu2 %1901 }
 0x349   :  { %v6341_v42 = vpop.permute.xlu0 %1862  ;;  %v6343_v60 = vpop.permute.xlu1 %1924 }
 0x34a   :  { %8852 = vst [vmem:[#allocation60_spill] sm:$0xff] %v6341_v42 }
 0x34b   :  { %8853 = vst [vmem:[#allocation6_spill] sm:$0xff] %v6343_v60 }
 0x34d   :  { %1692 = vrot.lane.b32.xlu2 %v6307_v59, %s4065_s26 }
 0x34f   :  { %1711 = vrot.lane.b32.xlu0 %v6307_v59, %s4070_s12  ;;  %1790 = vrot.lane.b32.xlu1 %v6307_v59, %s4079_s20  ;;  %v6351_v26 = vpop.permute.xlu2 %1928 }
 0x351   :  { %v6353_v21 = vpop.permute.xlu0 %1876  ;;  %v6355_v40 = vpop.permute.xlu1 %1930 }
 0x352   :  { %8854 = vst [vmem:[#allocation10_spill] sm:$0xff] %v6353_v21 }
 0x355   :  { %1698 = vrot.lane.b32.xlu2 %v6307_v59, %s4068_s29 }
 0x357   :  { %1729 = vrot.lane.b32.xlu0 %v6229_v18, %s4071_s13  ;;  %1844 = vrot.lane.b32.xlu1 %v6061_v35, %s4067_s28  ;;  %v6363_v7 = vpop.permute.xlu2 %1943  ;;  %s8881_s13 = smov 102  }
 0x358   :  { %8855 = vst [vmem:[#allocation23_spill] sm:$0xff] %v6363_v7 }
 0x359   :  { %v6365_v50 = vpop.permute.xlu0 %1890  ;;  %v6367_v1 = vpop.permute.xlu1 %1939 }
 0x35a   :  { %8856 = vst [vmem:[#allocation25_spill] sm:$0xff] %v6367_v1 }
 0x35d   :  { %1707 = vrot.lane.b32.xlu2 %v6307_v59, %s4069_s30 }
 0x35f   :  { %1747 = vrot.lane.b32.xlu0 %v6307_v59, %s4073_s14  ;;  %1858 = vrot.lane.b32.xlu1 %v6061_v35, %s4072_s0  ;;  %v6375_v62 = vpop.permute.xlu2 %1967 }
 0x360   :  { %8857 = vst [vmem:[#allocation66_spill] sm:$0xff] %v6375_v62 }
 0x361   :  { %v6377_v47 = vpop.permute.xlu0 %1905  ;;  %v6379_v37 = vpop.permute.xlu1 %1945 }
 0x362   :  { %8858 = vst [vmem:[#allocation68_spill] sm:$0xff] %v6377_v47 }
 0x363   :  { %8859 = vst [vmem:[#allocation72_spill] sm:$0xff] %v6379_v37 }
 0x365   :  { %1722 = vrot.lane.b32.xlu2 %v6293_v3, %s4067_s28 }
 0x367   :  { %1792 = vrot.lane.b32.xlu0 %v6229_v18, %s4079_s20  ;;  %1866 = vrot.lane.b32.xlu1 %v6293_v3, %s4065_s26  ;;  %v6387_v46 = vpop.permute.xlu2 %1976 }
 0x368   :  { %8860 = vst [vmem:[#allocation73_spill] sm:$0xff] %v6387_v46 }
 0x369   :  { %v6389_v6 = vpop.permute.xlu0 %1911  ;;  %v6391_v7 = vpop.permute.xlu1 %1954 }
 0x36a   :  { %8861 = vst [vmem:[#allocation9_spill] sm:$0xff] %v6389_v6 }
 0x36b   :  { %8862 = vst [vmem:[#allocation15_spill] sm:$0xff] %v6391_v7 }
 0x36d   :  { %1740 = vrot.lane.b32.xlu2 %v6229_v18, %s4065_s26 }
 0x36f   :  { %1801 = vrot.lane.b32.xlu0 %v6229_v18, %s4078_s19  ;;  %1874 = vrot.lane.b32.xlu1 %v6041_v11, %s4068_s29  ;;  %v6399_v37 = vpop.permute.xlu2 %1982  ;;  %s8879_s29 = smov 54  }
 0x370   :  { %8863 = vst [vmem:[#allocation22_spill] sm:$0xff] %v6399_v37 }
 0x371   :  { %v6401_v62 = vpop.permute.xlu0 %1920  ;;  %v6403_v10 = vpop.permute.xlu1 %2002 }
 0x372   :  { %8864 = vst [vmem:[#allocation32_spill] sm:$0xff] %v6401_v62 }
 0x373   :  { %8865 = vst [vmem:[#allocation24_spill] sm:$0xff] %v6403_v10 }
 0x375   :  { %1758 = vrot.lane.b32.xlu2 %v6229_v18, %s4074_s15  ;;  %s8884_s15 = smov 80  }
 0x377   :  { %1816 = vrot.lane.b32.xlu0 %v6041_v11, %s4064_s3  ;;  %1880 = vrot.lane.b32.xlu1 %v6293_v3, %s4069_s30  ;;  %v6411_v46 = vpop.permute.xlu2 %1991  ;;  %s8876_s3 = smov 103  }
 0x378   :  { %8866 = vst [vmem:[#allocation13_spill] sm:$0xff] %v6411_v46 }
 0x379   :  { %v6413_v7 = vpop.permute.xlu0 %1956  ;;  %v6415_v21 = vpop.permute.xlu1 %1663 }
 0x37a   :  { %8867 = vst [vmem:[#allocation64_spill] sm:$0xff] %v6413_v7 }
 0x37d   :  { %1764 = vrot.lane.b32.xlu2 %v6229_v18, %s4075_s16 }
 0x37f   :  { %1822 = vrot.lane.b32.xlu0 %v6293_v3, %s4066_s27  ;;  %1888 = vrot.lane.b32.xlu1 %v6041_v11, %s4082_s5  ;;  %v6423_v37 = vpop.permute.xlu2 %2009 }
 0x380   :  { %8868 = vst [vmem:[#allocation69_spill] sm:$0xff] %v6423_v37 }
 0x381   :  { %v6425_v10 = vpop.permute.xlu0 %1965  ;;  %v6427_v51 = vpop.permute.xlu1 %1679 }
 0x382   :  { %8869 = vst [vmem:[#allocation74_spill] sm:$0xff] %v6425_v10 }
 0x385   :  { %1773 = vrot.lane.b32.xlu2 %v6229_v18, %s4077_s18 }
 0x387   :  { %1868 = vrot.lane.b32.xlu0 %v6041_v11, %s4065_s26  ;;  %1894 = vrot.lane.b32.xlu1 %v6293_v3, %s4084_s6  ;;  %v6435_v7 = vpop.permute.xlu2 %2015 }
 0x388   :  { %8870 = vst [vmem:[#allocation16_spill] sm:$0xff] %v6435_v7 }
 0x389   :  { %v6437_v1 = vpop.permute.xlu0 %1980  ;;  %v6439_v46 = vpop.permute.xlu1 %1688 }
 0x38a   :  { %8871 = vst [vmem:[#allocation36_spill] sm:$0xff] %v6437_v1 }
 0x38d   :  { %1779 = vrot.lane.b32.xlu2 %v6229_v18, %s4076_s17 }
 0x38f   :  { %1882 = vrot.lane.b32.xlu0 %v6041_v11, %s4069_s30  ;;  %1903 = vrot.lane.b32.xlu1 %v6041_v11, %s4086_s24  ;;  %v6447_v49 = vpop.permute.xlu2 %2024 }
 0x390   :  { %8872 = vst [vmem:[#allocation46_spill] sm:$0xff] %v6447_v49 }
 0x391   :  { %v6449_v13 = vpop.permute.xlu0 %1998  ;;  %v6451_v41 = vpop.permute.xlu1 %1700 }
 0x392   :  { %8873 = vst [vmem:[#allocation30_spill] sm:$0xff] %v6449_v13 }
 0x395   :  { %1803 = vrot.lane.b32.xlu2 %v6293_v3, %s4078_s19 }
 0x397   :  { %1896 = vrot.lane.b32.xlu0 %v6041_v11, %s4084_s6  ;;  %1915 = vrot.lane.b32.xlu1 %v6061_v35, %s4080_s21  ;;  %v6459_v1 = vpop.permute.xlu2 %2030 }
 0x398   :  { %8874 = vst [vmem:[#allocation43_spill] sm:$0xff] %v6459_v1 }
 0x399   :  { %v6461_v7 = vpop.permute.xlu0 %2013  ;;  %v6463_v37 = vpop.permute.xlu1 %1715 }
 0x39a   :  { %8875 = vst [vmem:[#allocation47_spill] sm:$0xff] %v6461_v7 }
 0x39d   :  { %1824 = vrot.lane.b32.xlu2 %v6041_v11, %s4066_s27 }
 0x39f   :  { %1926 = vrot.lane.b32.xlu0 %v6041_v11, %s8876_s3  ;;  %1960 = vrot.lane.b32.xlu1 %v6041_v11, %s4089_s25  ;;  %v6471_v49 = vpop.permute.xlu2 %1652 }
 0x3a0   :  { %8877 = vst [vmem:[#allocation51_spill] sm:$0xff] %v6471_v49 }
 0x3a1   :  { %v6473_v13 = vpop.permute.xlu0 %2028  ;;  %v6475_v22 = vpop.permute.xlu1 %1733 }
 0x3a2   :  { %8878 = vst [vmem:[#allocation34_spill] sm:$0xff] %v6473_v13 }
 0x3a5   :  { %1842 = vrot.lane.b32.xlu2 %v6041_v11, %s4067_s28  ;;  %s8883_s28 = smov 32  }
 0x3a7   :  { %1932 = vrot.lane.b32.xlu0 %v6293_v3, %s8879_s29  ;;  %1969 = vrot.lane.b32.xlu1 %v6041_v11, %s4090_s4  ;;  %v6483_v1 = vpop.permute.xlu2 %1692 }
 0x3a9   :  { %v6485_v7 = vpop.permute.xlu0 %1650  ;;  %v6487_v10 = vpop.permute.xlu1 %1751 }
 0x3aa   :  { %8880 = vst [vmem:[#allocation39_spill] sm:$0xff] %v6485_v7 }
 0x3ad   :  { %1850 = vrot.lane.b32.xlu2 %v6061_v35, %s4063_s1 }
 0x3af   :  { %1941 = vrot.lane.b32.xlu0 %v6041_v11, %s8881_s13  ;;  %1978 = vrot.lane.b32.xlu1 %v6061_v35, %s4091_s22  ;;  %v6495_v13 = vpop.permute.xlu2 %1698 }
 0x3b1   :  { %v6497_v49 = vpop.permute.xlu0 %1659  ;;  %v6499_v31 = vpop.permute.xlu1 %1766 }
 0x3b2   :  { %8882 = vst [vmem:[#allocation41_spill] sm:$0xff] %v6499_v31 }
 0x3b5   :  { %1856 = vrot.lane.b32.xlu2 %v6041_v11, %s4072_s0 }
 0x3b7   :  { %1947 = vrot.lane.b32.xlu0 %v6041_v11, %s8883_s28  ;;  %1984 = vrot.lane.b32.xlu1 %v6041_v11, %s4092_s23  ;;  %v6507_v7 = vpop.permute.xlu2 %1707 }
 0x3b9   :  { %v6509_v6 = vpop.permute.xlu0 %1681  ;;  %v6511_v4 = vpop.permute.xlu1 %1781 }
 0x3bd   :  { %1907 = vrot.lane.b32.xlu2 %v6061_v35, %s8884_s15 }
 0x3bf   :  { %1971 = vrot.lane.b32.xlu0 %v6061_v35, %s4090_s4  ;;  %1993 = vrot.lane.b32.xlu1 %v6041_v11, %s4070_s12  ;;  %v6519_v39 = vpop.permute.xlu2 %1722 }
 0x3c1   :  { %v1712_v24 = vpop.permute.xlu0 %1711  ;;  %v6521_v16 = vpop.permute.xlu1 %1790 }
 0x3c2   :  { %8885 = vst [vmem:[#allocation49_spill] sm:$0xff] %v6521_v16 }
 0x3c5   :  { %1913 = vrot.lane.b32.xlu2 %v6041_v11, %s4080_s21 }
 0x3c7   :  { %1986 = vrot.lane.b32.xlu0 %v6061_v35, %s4092_s23  ;;  %2011 = vrot.lane.b32.xlu1 %v6061_v35, %s4065_s26  ;;  %v6529_v31 = vpop.permute.xlu2 %1740  ;;  %s4093_s26 = smov 64  }
 0x3c9   :  { %v6531_v42 = vpop.permute.xlu0 %1729  ;;  %v6533_v53 = vpop.permute.xlu1 %1844 }
 0x3ca   :  { %8886 = vst [vmem:[#allocation27_spill] sm:$0xff] %v6533_v53 }
 0x3cd   :  { %1922 = vrot.lane.b32.xlu2 %v6061_v35, %s4070_s12 }
 0x3cf   :  { %2004 = vrot.lane.b32.xlu0 %v6293_v3, %s8881_s13  ;;  %2017 = vrot.lane.b32.xlu1 %v6041_v11, %s4073_s14  ;;  %v6541_v16 = vpop.permute.xlu2 %1758 }
 0x3d0   :  { %8887 = vst [vmem:[#allocation59_spill] sm:$0xff] %v6541_v16 }
 0x3d1   :  { %v6543_v27 = vpop.permute.xlu0 %1747  ;;  %v6545_v36 = vpop.permute.xlu1 %1858 }
 0x3d2   :  { %8888 = vst [vmem:[#allocation14_spill] sm:$0xff] %v6545_v36 }
 0x3d5   :  { %1934 = vrot.lane.b32.xlu2 %v6041_v11, %s8879_s29 }
 0x3d7   :  { %2019 = vrot.lane.b32.xlu0 %v6061_v35, %s4073_s14  ;;  %2026 = vrot.lane.b32.xlu1 %v6061_v35, %s4069_s30  ;;  %v6553_v62 = vpop.permute.xlu2 %1764 }
 0x3d8   :  { %8889 = vst [vmem:[#allocation67_spill] sm:$0xff] %v6553_v62  ;;  %v6612_v62 = vsel %vm1702_vm14, %v6179_v20, %v6173_v32  ;;  %v1784_v32 = vsel %vm1783_vm15, %v6253_v44, %v6275_v43 }
 0x3d9   :  { %v6555_v53 = vpop.permute.xlu0 %1792  ;;  %v6557_v38 = vpop.permute.xlu1 %1866 }
 0x3da   :  { %8890 = vst [vmem:[#allocation38_spill] sm:$0xff] %v6555_v53 }
 0x3db   :  { %8891 = vst [vmem:[#allocation48_spill] sm:$0xff] %v6557_v38 }
 0x3dd   :  { %1949 = vrot.lane.b32.xlu2 %v6061_v35, %s8883_s28 }
 0x3df   :  { %2034 = vrot.lane.b32.xlu0 %v6229_v18, %s4082_s5  ;;  %2032 = vrot.lane.b32.xlu1 %v6307_v59, %s4082_s5  ;;  %v6565_v11 = vpop.permute.xlu2 %1773 }
 0x3e0   :  { %8892 = vst [vmem:[#allocation37_spill] sm:$0xff] %v6565_v11 }
 0x3e1   :  { %v6567_v16 = vpop.permute.xlu0 %1801  ;;  %v6569_v36 = vpop.permute.xlu1 %1874 }
 0x3e2   :  { %8893 = vst [vmem:[#allocation19_spill] sm:$0xff] %v6567_v16 }
 0x3e5   :  { %1958 = vrot.lane.b32.xlu2 %v6293_v3, %s4089_s25 }
 0x3e7   :  { %2105 = vrot.lane.b32.xlu0 %v6171_v0, %s4093_s26  ;;  %2050 = vrot.lane.b32.xlu1 %v6209_v55, %s4082_s5  ;;  %v6577_v18 = vpop.permute.xlu2 %1779 }
 0x3e9   :  { %v6579_v53 = vpop.permute.xlu0 %1816  ;;  %v6581_v59 = vpop.permute.xlu1 %1880 }
 0x3ea   :  { %8894 = vst [vmem:[#allocation20_spill] sm:$0xff] %v6581_v59  ;;  %v1718_v59 = vsel %vm1717_vm13, %v6121_v8, %v6195_v57 }
 0x3ed   :  { %2000 = vrot.lane.b32.xlu2 %v6061_v35, %s4066_s27 }
 0x3ef   :  { %2165 = vrot.lane.b32.xlu0 %v6285_v2, %s4093_s26  ;;  %2070 = vrot.lane.b32.xlu1 %v6225_v34, %s4082_s5  ;;  %v6589_v16 = vpop.permute.xlu2 %1803 }
 0x3f0   :  { %8895 = vst [vmem:[#allocation26_spill] sm:$0xff] %v6589_v16 }
 0x3f1   :  { %v6591_v3 = vpop.permute.xlu0 %1822  ;;  %v6593_v38 = vpop.permute.xlu1 %1888 }
 0x3f5   :  { %2036 = vrot.lane.b32.xlu2 %v6199_v54, %s4082_s5 }
 0x3f7   :  { %2040 = vrot.lane.b32.xlu0 %v1718_v59, %s4082_s5  ;;  %2062 = vrot.lane.b32.xlu1 %v6207_v15, %s4082_s5  ;;  %v6603_v35 = vpop.permute.xlu2 %1824 }
 0x3f9   :  { %v6605_v2 = vpop.permute.xlu0 %1868  ;;  %v6607_v16 = vpop.permute.xlu1 %1894 }
 0x3fd   :  { %2042 = vrot.lane.b32.xlu2 %v6195_v57, %s4082_s5 }
 0x3ff   :  { %2113 = vrot.lane.b32.xlu0 %v6612_v62, %s4093_s26  ;;  %2038 = vrot.lane.b32.xlu1 %v1712_v24, %s4082_s5  ;;  %v6619_v54 = vpop.permute.xlu2 %1842 }
 0x401   :  { %v6621_v59 = vpop.permute.xlu0 %1882  ;;  %v6623_v8 = vpop.permute.xlu1 %1903 }
 0x402   :  { %8896 = vst [vmem:[#allocation18_spill] sm:$0xff] %v6621_v59  ;;  %v1754_v59 = vsel %vm1753_vm1, %v6197_v63, %v6223_v23 }
 0x405   :  { %2076 = vrot.lane.b32.xlu2 %v6227_v17, %s4082_s5 }
 0x407   :  { %2109 = vrot.lane.b32.xlu0 %v1784_v32, %s4093_s26  ;;  %2054 = vrot.lane.b32.xlu1 %v6519_v39, %s4082_s5  ;;  %v6633_v24 = vpop.permute.xlu2 %1850  ;;  %v6656_v32 = vsel %vm197_vm0, %v6089_v61, %v6119_v48  ;;  %v1846_v61 = vsel %vm1724_vm2, %v6305_v52, %v6303_v5 }
 0x408   :  { %8897 = vst [vmem:[#allocation33_spill] sm:$0xff] %v6633_v24 }
 0x409   :  { %v6635_v20 = vpop.permute.xlu0 %1896  ;;  %v6637_v57 = vpop.permute.xlu1 %1915 }
 0x40d   :  { %2082 = vrot.lane.b32.xlu2 %v6223_v23, %s4082_s5 }
 0x40f   :  { %2080 = vrot.lane.b32.xlu0 %v1754_v59, %s4082_s5  ;;  %2074 = vrot.lane.b32.xlu1 %v6529_v31, %s4082_s5  ;;  %v6647_v17 = vpop.permute.xlu2 %1856 }
 0x411   :  { %v6649_v44 = vpop.permute.xlu0 %1926  ;;  %v6651_v43 = vpop.permute.xlu1 %1960 }
 0x412   :  { %8898 = vst [vmem:[#allocation35_spill] sm:$0xff] %v6649_v44 }
 0x413   :  { %8899 = vst [vmem:[#allocation40_spill] sm:$0xff] %v6651_v43 }
 0x415   :  { %2056 = vrot.lane.b32.xlu2 %v6213_v14, %s4082_s5 }
 0x417   :  { %2101 = vrot.lane.b32.xlu0 %v6656_v32, %s4093_s26  ;;  %2066 = vrot.lane.b32.xlu1 %v6475_v22, %s4082_s5  ;;  %v6664_v23 = vpop.permute.xlu2 %1907 }
 0x418   :  { %8900 = vst [vmem:[#allocation44_spill] sm:$0xff] %v6664_v23 }
 0x419   :  { %v6666_v59 = vpop.permute.xlu0 %1932  ;;  %v6668_v63 = vpop.permute.xlu1 %1969 }
 0x41d   :  { %2185 = vrot.lane.b32.xlu2 %v6377_v47, %s4093_s26  ;;  %v1719_v47 = vsel %vm1717_vm13, %v6497_v49, %v6463_v37 }
 0x41f   :  { %2149 = vrot.lane.b32.xlu0 %v1846_v61, %s4093_s26  ;;  %2058 = vrot.lane.b32.xlu1 %v6531_v42, %s4082_s5  ;;  %v6678_v48 = vpop.permute.xlu2 %1913  ;;  %v1725_v61 = vsel %vm1724_vm2, %v6093_v58, %v6209_v55  ;;  %v1743_v55 = vsel %vm1742_vm3, %v6109_v12, %v6225_v34 }
 0x421   :  { %v6680_v14 = vpop.permute.xlu0 %1941  ;;  %v6682_v43 = vpop.permute.xlu1 %1978 }
 0x422   :  { %8901 = vst [vmem:[#allocation11_spill] sm:$0xff] %v6682_v43 }
 0x425   :  { %2129 = vrot.lane.b32.xlu2 %v6263_v29, %s4093_s26 }
 0x427   :  { %2046 = vrot.lane.b32.xlu0 %v6463_v37, %s4082_s5  ;;  %2131 = vrot.lane.b32.xlu1 %v6565_v11, %s4093_s26  ;;  %v6690_v5 = vpop.permute.xlu2 %1922 }
 0x429   :  { %v6692_v52 = vpop.permute.xlu0 %1947  ;;  %v6694_v42 = vpop.permute.xlu1 %1984 }
 0x42a   :  { %8902 = vst [vmem:[#allocation17_spill] sm:$0xff] %v6692_v52 }
 0x42d   :  { %2048 = vrot.lane.b32.xlu2 %v1725_v61, %s4082_s5 }
 0x42f   :  { %2078 = vrot.lane.b32.xlu0 %v6543_v27, %s4082_s5  ;;  %2044 = vrot.lane.b32.xlu1 %v1719_v47, %s4082_s5  ;;  %v6706_v43 = vpop.permute.xlu2 %1934  ;;  %v6718_v27 = vsel %vm1702_vm14, %v6495_v13, %v6451_v41  ;;  %v1736_v13 = vsel %vm1735_vm4, %v6171_v0, %v6207_v15  ;;  %vm1654_vm14 = vcmask 392192  }
 0x431   :  { %v6708_v52 = vpop.permute.xlu0 %1971  ;;  %v6710_v29 = vpop.permute.xlu1 %1993 }
 0x432   :  { %8903 = vst [vmem:[#allocation28_spill] sm:$0xff] %v6708_v52  ;;  %v8916_v52 = vld [vmem:[#allocation71_spill] sm:$0xff] }
 0x435   :  { %2068 = vrot.lane.b32.xlu2 %v1743_v55, %s4082_s5 }
 0x437   :  { %2107 = vrot.lane.b32.xlu0 %v6439_v46, %s4093_s26  ;;  %2115 = vrot.lane.b32.xlu1 %v6718_v27, %s4093_s26  ;;  %v6725_v47 = vpop.permute.xlu2 %1949 }
 0x438   :  { %8904 = vst [vmem:[#allocation42_spill] sm:$0xff] %v6725_v47 }
 0x439   :  { %v6727_v37 = vpop.permute.xlu0 %1986  ;;  %v6729_v61 = vpop.permute.xlu1 %2011 }
 0x43a   :  { %8905 = vst [vmem:[#allocation45_spill] sm:$0xff] %v6727_v37  ;;  %v6748_v37 = vsel %vm1936_vm5, %v6351_v26, %v6355_v40  ;;  %v1785_v26 = vsel %vm1783_vm15, %v6577_v18, %v6511_v4  ;;  %v6768_v40 = vsel %vm1768_vm6, %v6241_v25, %v6251_v56  ;;  %v1755_v4 = vsel %vm1753_vm1, %v6507_v7, %v6487_v10 }
 0x43b   :  { %8907 = vst [vmem:[#allocation29_spill] sm:$0xff] %v6748_v37  ;;  %vm2006_vm15 = vcmask 834560  }
 0x43c   :  { %8908 = vst [vmem:[#allocation3_spill] sm:$0xff] %v6768_v40 }
 0x43d   :  { %2060 = vrot.lane.b32.xlu2 %v1736_v13, %s4082_s5 }
 0x43f   :  { %2187 = vrot.lane.b32.xlu0 %v6664_v23, %s4093_s26  ;;  %2181 = vrot.lane.b32.xlu1 %v6339_v45, %s4093_s26  ;;  %v6739_v41 = vpop.permute.xlu2 %1958  ;;  %v8914_v23 = vld [vmem:[#allocation2_spill] sm:$0xff] }
 0x440   :  { %8906 = vst [vmem:[#allocation52_spill] sm:$0xff] %v6739_v41 }
 0x441   :  { %v6741_v34 = vpop.permute.xlu0 %2004  ;;  %v6743_v55 = vpop.permute.xlu1 %2017 }
 0x445   :  { %2201 = vrot.lane.b32.xlu2 %v6748_v37, %s4093_s26 }
 0x447   :  { %2183 = vrot.lane.b32.xlu0 %v6623_v8, %s4093_s26  ;;  %2197 = vrot.lane.b32.xlu1 %v6343_v60, %s4093_s26  ;;  %v6756_v15 = vpop.permute.xlu2 %2000 }
 0x449   :  { %v6758_v45 = vpop.permute.xlu0 %2019  ;;  %v6760_v13 = vpop.permute.xlu1 %2026 }
 0x44d   :  { %2086 = vrot.lane.b32.xlu2 %v6487_v10, %s4082_s5  ;;  %v6801_v10 = vsel %vm197_vm0, %v6427_v51, %v6509_v6  ;;  %v1860_v51 = vsel %vm1735_vm4, %v6319_v19, %v6329_v30  ;;  %vm1898_vm0 = vcmask 515072   ;;  %v1737_v19 = vsel %vm1735_vm4, %v6439_v46, %v6475_v22 }
 0x44f   :  { %2111 = vrot.lane.b32.xlu0 %v1785_v26, %s4093_s26  ;;  %2125 = vrot.lane.b32.xlu1 %v6768_v40, %s4093_s26  ;;  %v6775_v8 = vpop.permute.xlu2 %2036  ;;  %v1726_v26 = vsel %vm1724_vm2, %v6415_v21, %v6519_v39  ;;  %v1744_v39 = vsel %vm1742_vm3, %v6483_v1, %v6529_v31  ;;  %v1899_v31 = vsel %vm1898_vm0, %v6365_v50, %v6327_v28  ;;  %v8911_v50 = vld [vmem:[#allocation27_spill] sm:$0xff]  ;;  %v8933_v40 = vld [vmem:[#allocation61_spill] sm:$0xff] }
 0x450   :  { %v1847_v22 = vsel %vm1724_vm2, %v6619_v54, %v8911_v50  ;;  %v8917_v54 = vld [vmem:[#allocation60_spill] sm:$0xff]  ;;  %v6871_v50 = vsel %vm1936_vm5, %v6666_v59, %v6706_v43  ;;  %vm1951_vm2 = vcmask 261120  }
 0x451   :  { %v6777_v60 = vpop.permute.xlu0 %2034  ;;  %v6779_v47 = vpop.permute.xlu1 %2032  ;;  %8918 = vst [vmem:[#allocation27_spill] sm:$0xff] %v6871_v50 }
 0x455   :  { %2167 = vrot.lane.b32.xlu2 %v6569_v36, %s4093_s26 }
 0x457   :  { %2084 = vrot.lane.b32.xlu0 %v1755_v4, %s4082_s5  ;;  %2141 = vrot.lane.b32.xlu1 %v6277_v9, %s4093_s26  ;;  %v6789_v25 = vpop.permute.xlu2 %2042 }
 0x459   :  { %v6791_v56 = vpop.permute.xlu0 %2105  ;;  %v6793_v18 = vpop.permute.xlu1 %2050 }
 0x45d   :  { %2052 = vrot.lane.b32.xlu2 %v1726_v26, %s4082_s5 }
 0x45f   :  { %2199 = vrot.lane.b32.xlu0 %v6649_v44, %s4093_s26  ;;  %2103 = vrot.lane.b32.xlu1 %v6801_v10, %s4093_s26  ;;  %v6808_v36 = vpop.permute.xlu2 %2076 }
 0x461   :  { %v6810_v9 = vpop.permute.xlu0 %2165  ;;  %v6812_v4 = vpop.permute.xlu1 %2070 }
 0x462   :  { %8909 = vst [vmem:[#allocation5_spill] sm:$0xff] %v6810_v9 }
 0x465   :  { %2072 = vrot.lane.b32.xlu2 %v1744_v39, %s4082_s5 }
 0x467   :  { %2143 = vrot.lane.b32.xlu0 %v6579_v53, %s4093_s26  ;;  %2157 = vrot.lane.b32.xlu1 %v1860_v51, %s4093_s26  ;;  %v6824_v6 = vpop.permute.xlu2 %2082  ;;  %v8910_v51 = vld [vmem:[#allocation31_spill] sm:$0xff] }
 0x468   :  { %v1826_v28 = vsel %vm1717_vm13, %v8910_v51, %v6289_v33  ;;  %v8915_v33 = vld [vmem:[#allocation58_spill] sm:$0xff] }
 0x469   :  { %v6826_v26 = vpop.permute.xlu0 %2040  ;;  %v6828_v44 = vpop.permute.xlu1 %2062  ;;  %v1795_v51 = vsel %vm1794_vm7, %v8915_v33, %v8914_v23 }
 0x46d   :  { %2064 = vrot.lane.b32.xlu2 %v1737_v19, %s4082_s5 }
 0x46f   :  { %2177 = vrot.lane.b32.xlu0 %v1899_v31, %s4093_s26  ;;  %2175 = vrot.lane.b32.xlu1 %v6593_v38, %s4093_s26  ;;  %v6840_v53 = vpop.permute.xlu2 %2056  ;;  %v8912_v31 = vld [vmem:[#allocation32_spill] sm:$0xff] }
 0x471   :  { %v6842_v30 = vpop.permute.xlu0 %2113  ;;  %v6844_v39 = vpop.permute.xlu1 %2038 }
 0x475   :  { %2145 = vrot.lane.b32.xlu2 %v1826_v28, %s4093_s26  ;;  %v1870_v28 = vsel %vm1742_vm3, %v8917_v54, %v8916_v52  ;;  %v1827_v52 = vsel %vm1717_vm13, %v6591_v3, %v6603_v35  ;;  %v8921_v54 = vld [vmem:[#allocation67_spill] sm:$0xff]  ;;  %v8922_v3 = vld [vmem:[#allocation48_spill] sm:$0xff]  ;;  %vm1995_vm13 = vcmask 646144  }
 0x476   :  { %v1871_v35 = vsel %vm1742_vm3, %v8922_v3, %v6605_v2  ;;  %v8926_v2 = vld [vmem:[#allocation21_spill] sm:$0xff]  ;;  %vm1973_vm3 = vcmask 187392  }
 0x477   :  { %2193 = vrot.lane.b32.xlu0 %v8912_v31, %s4093_s26  ;;  %2151 = vrot.lane.b32.xlu1 %v1847_v22, %s4093_s26  ;;  %v6856_v38 = vpop.permute.xlu2 %2185 }
 0x478   :  { %8913 = vst [vmem:[#allocation31_spill] sm:$0xff] %v6856_v38  ;;  %v8928_v38 = vld [vmem:[#allocation19_spill] sm:$0xff] }
 0x479   :  { %v6858_v19 = vpop.permute.xlu0 %2109  ;;  %v6860_v37 = vpop.permute.xlu1 %2054 }
 0x47d   :  { %2161 = vrot.lane.b32.xlu2 %v1870_v28, %s4093_s26 }
 0x47f   :  { %2121 = vrot.lane.b32.xlu0 %v1795_v51, %s4093_s26  ;;  %2203 = vrot.lane.b32.xlu1 %v6871_v50, %s4093_s26  ;;  %v6877_v22 = vpop.permute.xlu2 %2129  ;;  %v8920_v51 = vld [vmem:[#allocation41_spill] sm:$0xff]  ;;  %v8923_v50 = vld [vmem:[#allocation63_spill] sm:$0xff] }
 0x480   :  { %8919 = vst [vmem:[#allocation2_spill] sm:$0xff] %v6877_v22  ;;  %v6900_v28 = vsel %vm1768_vm6, %v8921_v54, %v8920_v51  ;;  %v8925_v51 = vld [vmem:[#allocation14_spill] sm:$0xff] }
 0x481   :  { %v6879_v41 = vpop.permute.xlu0 %2080  ;;  %v6881_v23 = vpop.permute.xlu1 %2074  ;;  %v1861_v54 = vsel %vm1735_vm4, %v6647_v17, %v8925_v51  ;;  %v6932_v17 = vsel %vm1917_vm9, %v6678_v48, %v6637_v57  ;;  %v8929_v51 = vld [vmem:[#allocation53_spill] sm:$0xff]  ;;  %v8931_v57 = vld [vmem:[#allocation62_spill] sm:$0xff]  ;;  %vm1988_vm4 = vcmask 179200  }
 0x485   :  { %2195 = vrot.lane.b32.xlu2 %v6690_v5, %s4093_s26 }
 0x487   :  { %2119 = vrot.lane.b32.xlu0 %v6507_v7, %s4093_s26  ;;  %2147 = vrot.lane.b32.xlu1 %v1827_v52, %s4093_s26  ;;  %v6891_v43 = vpop.permute.xlu2 %2048 }
 0x489   :  { %v6893_v59 = vpop.permute.xlu0 %2101  ;;  %v6895_v33 = vpop.permute.xlu1 %2066 }
 0x48d   :  { %2139 = vrot.lane.b32.xlu2 %v8923_v50, %s4093_s26 }
 0x48f   :  { %2127 = vrot.lane.b32.xlu0 %v6900_v28, %s4093_s26  ;;  %2163 = vrot.lane.b32.xlu1 %v1871_v35, %s4093_s26  ;;  %v6910_v52 = vpop.permute.xlu2 %2068 }
 0x491   :  { %v6912_v11 = vpop.permute.xlu0 %2149  ;;  %v6914_v9 = vpop.permute.xlu1 %2058 }
 0x492   :  { %8924 = vst [vmem:[#allocation58_spill] sm:$0xff] %v6912_v11  ;;  %v8927_v11 = vld [vmem:[#allocation26_spill] sm:$0xff] }
 0x493   :  { %v1807_v31 = vsel %vm1805_vm8, %v8928_v38, %v8927_v11  ;;  %v8930_v38 = vld [vmem:[#allocation70_spill] sm:$0xff] }
 0x494   :  { %v1806_v48 = vsel %vm1805_vm8, %v8931_v57, %v8930_v38  ;;  %v8935_v57 = vld [vmem:[#allocation49_spill] sm:$0xff] }
 0x495   :  { %2155 = vrot.lane.b32.xlu2 %v6633_v24, %s4093_s26 }
 0x497   :  { %2159 = vrot.lane.b32.xlu0 %v1861_v54, %s4093_s26  ;;  %2173 = vrot.lane.b32.xlu1 %v8926_v2, %s4093_s26  ;;  %v6924_v50 = vpop.permute.xlu2 %2060 }
 0x499   :  { %v2047_v3 = vpop.permute.xlu0 %2046  ;;  %v6926_v35 = vpop.permute.xlu1 %2131 }
 0x49d   :  { %2137 = vrot.lane.b32.xlu2 %v8929_v51, %s4093_s26  ;;  %v1900_v51 = vsel %vm1898_vm0, %v6607_v16, %v6635_v20 }
 0x49f   :  { %2135 = vrot.lane.b32.xlu0 %v1807_v31, %s4093_s26  ;;  %2191 = vrot.lane.b32.xlu1 %v6932_v17, %s4093_s26  ;;  %v6939_v54 = vpop.permute.xlu2 %2201  ;;  %v8932_v31 = vld [vmem:[#allocation9_spill] sm:$0xff] }
 0x4a0   :  { %v6950_v22 = vsel %vm1917_vm9, %v8933_v40, %v8932_v31  ;;  %v8934_v40 = vld [vmem:[#allocation38_spill] sm:$0xff] }
 0x4a1   :  { %v2079_v2 = vpop.permute.xlu0 %2078  ;;  %v2045_v11 = vpop.permute.xlu1 %2044 }
 0x4a2   :  { %v2304_v24 = vsel %vm2241_vm10, %v6718_v27, %v2079_v2  ;;  %v2300_v2 = vsel %vm2241_vm10, %v6612_v62, %v6808_v36  ;;  %v2333_v36 = vsel %vm2241_vm10, %v6109_v12, %v6842_v30  ;;  %v8937_v30 = vld [vmem:[#allocation12_spill] sm:$0xff] }
 0x4a3   :  { %2684 = vmatpush.bf16.msrb.mxu1 %v2304_v24 }
 0x4a5   :  { %2179 = vrot.lane.b32.xlu2 %v1900_v51, %s4093_s26  ;;  %v8936_v51 = vld [vmem:[#allocation74_spill] sm:$0xff] }
 0x4a7   :  { %2133 = vrot.lane.b32.xlu0 %v1806_v48, %s4093_s26  ;;  %2189 = vrot.lane.b32.xlu1 %v6950_v22, %s4093_s26  ;;  %v6959_v24 = vpop.permute.xlu2 %2086  ;;  %v1796_v48 = vsel %vm1794_vm7, %v8935_v57, %v8934_v40 }
 0x4a8   :  { %2685 = vmatpush.bf16.msrb.mxu1 %v2300_v2 }
 0x4a9   :  { %v6961_v38 = vpop.permute.xlu0 %2107  ;;  %v2116_v16 = vpop.permute.xlu1 %2115 }
 0x4aa   :  { %v2336_v20 = vsel %vm2241_vm10, %v6483_v1, %v2116_v16 }
 0x4ab   :  { %2742 = vmatpush.bf16.msrb.mxu3 %v2336_v20  ;;  %v2023_v20 = vsel %vm2021_vm11, %v6743_v55, %v6758_v45  ;;  %v2093_v45 = vsel %vm2088_vm12, %v6891_v43, %v6793_v18 }
 0x4ad   :  { %2123 = vrot.lane.b32.xlu2 %v1796_v48, %s4093_s26 }
 0x4af   :  { %2219 = vrot.lane.b32.xlu0 %v6668_v63, %s4063_s1  ;;  %2743 = vmatpush.bf16.msrb.mxu3 %v2333_v36  ;;  %v6976_v31 = vpop.permute.xlu2 %2167 }
 0x4b0   :  { %2217 = vrot.lane.b32.xlu1 %v8936_v51, %s4063_s1 }
 0x4b1   :  { %v6978_v2 = vpop.permute.xlu0 %2187  ;;  %v6980_v16 = vpop.permute.xlu1 %2181 }
 0x4b5   :  { %2153 = vrot.lane.b32.xlu2 %v8937_v30, %s4093_s26  ;;  %v8939_v30 = vld [vmem:[#allocation30_spill] sm:$0xff] }
 0x4b7   :  { %2231 = vrot.lane.b32.xlu0 %v6729_v61, %s4063_s1  ;;  %v2053_v40 = vpop.permute.xlu2 %2052  ;;  %v8938_v61 = vld [vmem:[#allocation57_spill] sm:$0xff] }
 0x4b8   :  { %2235 = vrot.lane.b32.xlu1 %v2023_v20, %s4063_s1  ;;  %v2094_v48 = vsel %vm2088_vm12, %v2053_v40, %v6860_v37  ;;  %v2268_v20 = vsel %vm2241_vm10, %v6093_v58, %v2093_v45  ;;  %v2092_v37 = vsel %vm2088_vm12, %v2045_v11, %v2047_v3  ;;  %v8940_v40 = vld [vmem:[#allocation69_spill] sm:$0xff]  ;;  %v2091_v11 = vsel %vm2088_vm12, %v6826_v26, %v6789_v25  ;;  %v8944_v25 = vld [vmem:[#allocation36_spill] sm:$0xff] }
 0x4b9   :  { %v6990_v57 = vpop.permute.xlu0 %2183  ;;  %v6994_v36 = vpop.permute.xlu1 %2197  ;;  %v2272_v55 = vsel %vm2241_vm10, %v6415_v21, %v2094_v48  ;;  %v2264_v45 = vsel %vm2241_vm10, %v6497_v49, %v2092_v37  ;;  %v8943_v49 = vld [vmem:[#allocation56_spill] sm:$0xff]  ;;  %v2327_v26 = vsel %vm2241_vm10, %v6171_v0, %v6858_v19 }
 0x4ba   :  { %2655 = vmatpush.bf16.msrb.mxu0 %v2272_v55 }
 0x4bd   :  { %2117 = vrot.lane.b32.xlu2 %v8938_v61, %s4093_s26 }
 0x4be   :  { %2656 = vmatpush.bf16.msrb.mxu0 %v2268_v20  ;;  %v8942_v20 = vld [vmem:[#allocation47_spill] sm:$0xff] }
 0x4bf   :  { %2213 = vrot.lane.b32.xlu0 %v8939_v30, %s4063_s1  ;;  %v2073_v48 = vpop.permute.xlu2 %2072  ;;  %v8941_v30 = vld [vmem:[#allocation16_spill] sm:$0xff] }
 0x4c0   :  { %2229 = vrot.lane.b32.xlu1 %v8940_v40, %s4063_s1  ;;  %v2098_v18 = vsel %vm2088_vm12, %v2073_v48, %v6881_v23  ;;  %v2097_v23 = vsel %vm2088_vm12, %v6910_v52, %v6812_v4  ;;  %v1997_v4 = vsel %vm1995_vm13, %v6710_v29, %v6690_v5  ;;  %v8946_v48 = vld [vmem:[#allocation39_spill] sm:$0xff] }
 0x4c1   :  { %v2112_v51 = vpop.permute.xlu0 %2111  ;;  %v7012_v43 = vpop.permute.xlu1 %2125  ;;  %v2296_v3 = vsel %vm2241_vm10, %v6483_v1, %v2098_v18  ;;  %v2260_v1 = vsel %vm2241_vm10, %v8943_v49, %v2091_v11  ;;  %v2292_v37 = vsel %vm2241_vm10, %v6109_v12, %v2097_v23  ;;  %v8945_v12 = vld [vmem:[#allocation51_spill] sm:$0xff]  ;;  %v2095_v11 = vsel %vm2088_vm12, %v6924_v50, %v6828_v44  ;;  %v3993_v50 = vld [vmem:[%s8409_s7 + $0x10] sm:$0xf0] }
 0x4c2   :  { %v2330_v55 = vsel %vm2241_vm10, %v6439_v46, %v2112_v51  ;;  %2657 = vmatpush.bf16.msrb.mxu0 %v2264_v45  ;;  %2686 = vmatpush.bf16.msrb.mxu1 %v2296_v3  ;;  %v2022_v51 = vsel %vm2021_vm11, %v8942_v20, %v8941_v30  ;;  %v1656_v18 = vsel %vm1654_vm14, %v8946_v48, %v8945_v12  ;;  %v3915_v44 = vld [vmem:[%s8409_s7 + $0x8] sm:$0xf]  ;;  %v8950_v20 = vld [vmem:[#allocation34_spill] sm:$0xff] }
 0x4c3   :  { %2744 = vmatpush.bf16.msrb.mxu3 %v2330_v55  ;;  %v2256_v19 = vsel %vm2241_vm10, %v1656_v18, %v6844_v39  ;;  %v8948_v39 = vld [vmem:[#allocation54_spill] sm:$0xff]  ;;  %v2284_v30 = vsel %vm2241_vm10, %v6171_v0, %v2095_v11  ;;  %v2364_v18 = vsel %vm2241_vm10, %v6900_v28, %v6926_v35  ;;  %v8957_v35 = vld [vmem:[#allocation32_spill] sm:$0xff] }
 0x4c4   :  { %v8955_v28 = vld [vmem:[#allocation2_spill] sm:$0xff] }
 0x4c5   :  { %2233 = vrot.lane.b32.xlu2 %v2022_v51, %s4063_s1 }
 0x4c6   :  { %2658 = vmatpush.bf16.msrb.mxu0 %v2260_v1  ;;  %2687 = vmatpush.bf16.msrb.mxu1 %v2292_v37  ;;  %v2280_v1 = vsel %vm2241_vm10, %v6801_v10, %v6914_v9  ;;  %v3907_v37 = vld [vmem:[%s8409_s7] sm:$0xf] }
 0x4c7   :  { %2225 = vrot.lane.b32.xlu0 %v8944_v25, %s4063_s1  ;;  %v2065_v52 = vpop.permute.xlu2 %2064  ;;  %2745 = vmatpush.bf16.msrb.mxu3 %v2327_v26  ;;  %v3992_v26 = vld [vmem:[%s8409_s7 + $0x8] sm:$0xf0]  ;;  %v8952_v9 = vld [vmem:[#allocation50_spill] sm:$0xff] }
 0x4c8   :  { %2211 = vrot.lane.b32.xlu1 %v1997_v4, %s4063_s1  ;;  %v2096_v55 = vsel %vm2088_vm12, %v2065_v52, %v6895_v33  ;;  %v2324_v33 = vsel %vm2241_vm10, %v6801_v10, %v6961_v38  ;;  %v3991_v52 = vld [vmem:[%s8409_s7 + $0x4] sm:$0xf]  ;;  %v3909_v10 = vld [vmem:[%s8409_s7 + $0xc] sm:$0xf0]  ;;  %v7133_v12 = vor.u32 %v3992_v26, %v3907_v37 }
 0x4c9   :  { %v2085_v40 = vpop.permute.xlu0 %2084  ;;  %v7048_v29 = vpop.permute.xlu1 %2141  ;;  %v2288_v45 = vsel %vm2241_vm10, %v6439_v46, %v2096_v55  ;;  %v2099_v46 = vsel %vm2088_vm12, %v6879_v41, %v6824_v6  ;;  %v2008_v41 = vsel %vm2006_vm15, %v6741_v34, %v6680_v14  ;;  %v2090_v6 = vsel %vm2088_vm12, %v6779_v47, %v6777_v60  ;;  %v8949_v47 = vld [vmem:[#allocation43_spill] sm:$0xff] }
 0x4ca   :  { %v2100_v5 = vsel %vm2088_vm12, %v2085_v40, %v6959_v24  ;;  %2659 = vmatpush.bf16.msrb.mxu0 %v2256_v19  ;;  %2688 = vmatpush.bf16.msrb.mxu1 %v2288_v45  ;;  %v8947_v24 = vld [vmem:[#allocation55_spill] sm:$0xff]  ;;  %v2308_v0 = vsel %vm2241_vm10, %v8938_v61, %v2099_v46  ;;  %v7100_v34 = vor.u32 %v3993_v50, %v3915_v44  ;;  %v8954_v19 = vld [vmem:[#allocation20_spill] sm:$0xff]  ;;  %v8961_v46 = vld [vmem:[#allocation10_spill] sm:$0xff] }
 0x4cb   :  { %v2312_v3 = vsel %vm2241_vm10, %v6507_v7, %v2100_v5  ;;  %2746 = vmatpush.bf16.msrb.mxu3 %v2324_v33  ;;  %v1655_v23 = vsel %vm1654_vm14, %v8948_v39, %v8947_v24  ;;  %v2089_v51 = vsel %vm2088_vm12, %v8950_v20, %v8949_v47  ;;  %v2276_v40 = vsel %vm2241_vm10, %v6656_v32, %v6840_v53  ;;  %v8953_v5 = vld [vmem:[#allocation18_spill] sm:$0xff]  ;;  %v3996_v24 = vld [vmem:[%s8409_s7 + $0x28] sm:$0xf0]  ;;  %v8959_v39 = vld [vmem:[#allocation25_spill] sm:$0xff] }
 0x4cc   :  { %2719 = vmatpush.bf16.msrb.mxu2 %v2312_v3  ;;  %v2252_v38 = vsel %vm2241_vm10, %v1655_v23, %v6775_v8  ;;  %v7135_v48 = vor.u32 %v3991_v52, %v3909_v10  ;;  %v2315_v55 = vsel %vm2241_vm10, %v6093_v58, %v6893_v59  ;;  %v8956_v58 = vld [vmem:[#allocation3_spill] sm:$0xff]  ;;  %v8958_v3 = vld [vmem:[#allocation13_spill] sm:$0xff]  ;;  %v3927_v33 = vld [vmem:[%s8409_s7 + $0x20] sm:$0xf] }
 0x4cd   :  { %2215 = vrot.lane.b32.xlu2 %v6756_v15, %s4063_s1  ;;  %v2321_v15 = vsel %vm2241_vm10, %v6656_v32, %v6791_v56  ;;  %v8951_v56 = vld [vmem:[#allocation8_spill] sm:$0xff]  ;;  %v1885_v32 = vsel %vm1753_vm1, %v8954_v19, %v8953_v5  ;;  %v2360_v59 = vsel %vm2241_vm10, %v8956_v58, %v8955_v28  ;;  %v1996_v11 = vsel %vm1995_vm13, %v8958_v3, %v8957_v35  ;;  %v8960_v23 = vld [vmem:[#allocation7_spill] sm:$0xff]  ;;  %v3998_v3 = vld [vmem:[%s8409_s7 + $0x38] sm:$0xf0] }
 0x4ce   :  { %2660 = vmatpush.bf16.msrb.mxu0 %v2252_v38  ;;  %2689 = vmatpush.bf16.msrb.mxu1 %v2284_v30  ;;  %v2248_v49 = vsel %vm2241_vm10, %v8951_v56, %v2090_v6  ;;  %v1884_v44 = vsel %vm1753_vm1, %v8961_v46, %v8960_v23  ;;  %v7180_v30 = vor.u32 %v3996_v24, %v3927_v33  ;;  %v3919_v6 = vld [vmem:[%s8409_s7 + $0x18] sm:$0xf]  ;;  %v2536_v47 = vld [vmem:[%s8410_s8 + $0x10] sm:$0xff]  ;;  %v2539_v10 = vld [vmem:[%s8410_s8 + $0x28] sm:$0xff]  ;;  %vm1962_vm1 = vcmask 449536  }
 0x4cf   :  { %2239 = vrot.lane.b32.xlu0 %v6760_v13, %s4063_s1  ;;  %v7093_v8 = vpop.permute.xlu2 %2145  ;;  %2747 = vmatpush.bf16.msrb.mxu3 %v2321_v15  ;;  %v3995_v15 = vld [vmem:[%s8409_s7 + $0x20] sm:$0xf0]  ;;  %v8962_v20 = vld [vmem:[#allocation24_spill] sm:$0xff]  ;;  %v3933_v24 = vld [vmem:[%s8409_s7 + $0x3c] sm:$0xf0] }
 0x4d0   :  { %2223 = vrot.lane.b32.xlu1 %v2008_v41, %s4063_s1  ;;  %2720 = vmatpush.bf16.msrb.mxu2 %v2308_v0  ;;  %v3994_v0 = vld [vmem:[%s8409_s7 + $0x1c] sm:$0xf]  ;;  %v7206_v56 = vor.u32 %v3995_v15, %v3919_v6  ;;  %v3931_v35 = vld [vmem:[%s8409_s7 + $0x30] sm:$0xf]  ;;  %v3997_v33 = vld [vmem:[%s8409_s7 + $0x34] sm:$0xf] }
 0x4d1   :  { %v7098_v13 = vpop.permute.xlu0 %2199  ;;  %v2104_v60 = vpop.permute.xlu1 %2103  ;;  %v7267_v23 = vor.u32 %v3998_v3, %v3931_v35  ;;  %v2541_v46 = vld [vmem:[%s8410_s8 + $0x38] sm:$0xff] }
 0x4d2   :  { %v2318_v4 = vsel %vm2241_vm10, %v6415_v21, %v2104_v60  ;;  %2661 = vmatpush.bf16.msrb.mxu0 %v2248_v49  ;;  %2690 = vmatpush.bf16.msrb.mxu1 %v2280_v1  ;;  %v2244_v21 = vsel %vm2241_vm10, %v8952_v9, %v2089_v51  ;;  %v3921_v60 = vld [vmem:[%s8409_s7 + $0x24] sm:$0xf0]  ;;  %v2007_v51 = vsel %vm2006_vm15, %v8962_v20, %v8959_v39  ;;  %v3939_v9 = vld [vmem:[%s8409_s7 + $0x38] sm:$0xf] }
 0x4d3   :  { %3953 = vmatmul.msk.bf16.vlgmr.msrb.gmra.mxu2 %vm1951_vm2, %v7100_v34  ;;  %2748 = vmatpush.bf16.msrb.mxu3 %v2318_v4  ;;  %v7208_v49 = vor.u32 %v3994_v0, %v3921_v60  ;;  %v2535_v1 = vld [vmem:[%s8410_s8 + $0x8] sm:$0xff]  ;;  %v2537_v20 = vld [vmem:[%s8410_s8 + $0x18] sm:$0xff] }
 0x4d4   :  { %v3364_v35 = vld [vmem:[%s8411_s9 + $0x38] sm:$0xff] }
 0x4d5   :  { %2227 = vrot.lane.b32.xlu2 %v6694_v42, %s4063_s1 }
 0x4d6   :  { %2662 = vmatpush.bf16.msrb.mxu0 %v2244_v21  ;;  %2691 = vmatpush.bf16.msrb.mxu1 %v2276_v40  ;;  %v3999_v21 = vld [vmem:[%s8409_s7 + $0x40] sm:$0xf0] }
 0x4d7   :  { %2207 = vrot.lane.b32.xlu0 %v6680_v14, %s4093_s26  ;;  %v7148_v53 = vpop.permute.xlu2 %2161  ;;  %2749 = vmatpush.bf16.msrb.mxu3 %v2315_v55  ;;  %v8963_v40 = vld [vmem:[#allocation46_spill] sm:$0xff]  ;;  %v7243_v28 = vor.u32 %v3999_v21, %v3939_v9 }
 0x4d8   :  { %2171 = vrot.lane.b32.xlu1 %v1885_v32, %s4093_s26  ;;  %v8965_v55 = vld [vmem:[#allocation58_spill] sm:$0xff] }
 0x4d9   :  { %v7150_v45 = vpop.permute.xlu0 %2143  ;;  %v7153_v14 = vpop.permute.xlu1 %2157  ;;  %2663 = vmatmul.bf16.vlgmr.msrb.gmra.mxu0 %v7133_v12  ;;  %2692 = vmatmul.bf16.vlgmr.msrb.gmra.mxu1 %v7135_v48 }
 0x4da   :  { %2771 = vmatpush.bf16.msra.mxu0 %v2364_v18  ;;  %2750 = vmatmul.bf16.vlgmr.msrb.gmra.mxu3 %v7133_v12  ;;  %v8964_v18 = vld [vmem:[#allocation31_spill] sm:$0xff] }
 0x4db   :  { %v2400_v5 = vsel %vm2241_vm10, %v8965_v55, %v8964_v18  ;;  %v2540_v18 = vld [vmem:[%s8410_s8 + $0x30] sm:$0xff]  ;;  %v3943_v55 = vld [vmem:[%s8409_s7 + $0x48] sm:$0xf] }
 0x4dd   :  { %2209 = vrot.lane.b32.xlu2 %v1996_v11, %s4063_s1 }
 0x4de   :  { %2772 = vmatpush.bf16.msra.mxu0 %v2360_v59  ;;  %v2534_v59 = vld [vmem:[%s8410_s8] sm:$0xff] }
 0x4df   :  { %2205 = vrot.lane.b32.xlu0 %v8959_v39, %s4093_s26  ;;  %v7176_v50 = vpop.permute.xlu2 %2195  ;;  %v3359_v39 = vld [vmem:[%s8411_s9 + $0x10] sm:$0xff] }
 0x4e0   :  { %2169 = vrot.lane.b32.xlu1 %v1884_v44, %s4093_s26  ;;  %v8966_v44 = vld [vmem:[#allocation5_spill] sm:$0xff] }
 0x4e1   :  { %v7178_v38 = vpop.permute.xlu0 %2177  ;;  %v7183_v41 = vpop.permute.xlu1 %2175  ;;  %v2432_v6 = vsel %vm2241_vm10, %v8966_v44, %v6939_v54  ;;  %v3361_v54 = vld [vmem:[%s8411_s9 + $0x20] sm:$0xff] }
 0x4e3   :  { %3954 = vmatmul.msk.bf16.gmra.mxu2 %vm1951_vm2, %v7180_v30 }
 0x4e5   :  { %2221 = vrot.lane.b32.xlu2 %v2007_v51, %s4063_s1  ;;  %v3951_v51 = vld [vmem:[%s8409_s7 + $0x50] sm:$0xf] }
 0x4e7   :  { %2554 = vperm.xlu0 %4035, %v2536_v47   ;;  %v7213_v37 = vpop.permute.xlu2 %2139 }
 0x4e8   :  { %2549 = vperm.xlu1 %4036, %v2535_v1   ;;  %v4002_v1 = vld [vmem:[%s8409_s7 + $0x58] sm:$0xf0] }
 0x4e9   :  { %v7215_v4 = vpop.permute.xlu0 %2193  ;;  %v2152_v26 = vpop.permute.xlu1 %2151  ;;  %2668 = vmatmul.bf16.gmra.mxu0 %v7206_v56  ;;  %2697 = vmatmul.bf16.gmra.mxu1 %v7208_v49  ;;  %v7304_v9 = vor.u32 %v4002_v1, %v3951_v51 }
 0x4ea   :  { %v2404_v52 = vsel %vm2241_vm10, %v2152_v26, %v6978_v2  ;;  %2755 = vmatmul.bf16.gmra.mxu3 %v7206_v56  ;;  %v2538_v2 = vld [vmem:[%s8410_s8 + $0x20] sm:$0xff]  ;;  %v2392_v26 = vsel %vm2241_vm10, %v7093_v8, %v6980_v16  ;;  %v4001_v16 = vld [vmem:[%s8409_s7 + $0x50] sm:$0xf0] }
 0x4eb   :  { %2829 = vmatpush.bf16.msra.mxu2 %v2404_v52  ;;  %v7335_v3 = vor.u32 %v4001_v16, %v3943_v55 }
 0x4ed   :  { %2237 = vrot.lane.b32.xlu2 %v8963_v40, %s4063_s1  ;;  %v8967_v40 = vld [vmem:[#allocation59_spill] sm:$0xff] }
 0x4ef   :  { %2569 = vperm.xlu0 %4035, %v2539_v10   ;;  %2830 = vmatpush.bf16.msra.mxu2 %v2400_v5  ;;  %v7239_v19 = vpop.permute.xlu2 %2155 }
 0x4f0   :  { %2564 = vperm.xlu1 %4036, %v2538_v2  }
 0x4f1   :  { %v7241_v32 = vpop.permute.xlu0 %2121  ;;  %v2204_v58 = vpop.permute.xlu1 %2203 }
 0x4f2   :  { %v2436_v11 = vsel %vm2241_vm10, %v6976_v31, %v2204_v58  ;;  %v7269_v31 = vor.u32 %v3997_v33, %v3933_v24  ;;  %v4000_v58 = vld [vmem:[%s8409_s7 + $0x4c] sm:$0xf]  ;;  %v2384_v24 = vsel %vm2241_vm10, %v7048_v29, %v7178_v38  ;;  %v3357_v38 = vld [vmem:[%s8411_s9] sm:$0xff] }
 0x4f3   :  { %2858 = vmatpush.bf16.msra.mxu3 %v2436_v11  ;;  %3955 = vmatmul.msk.bf16.gmra.mxu2 %vm1951_vm2, %v7243_v28  ;;  %v3362_v33 = vld [vmem:[%s8411_s9 + $0x28] sm:$0xff] }
 0x4f5   :  { %2544 = vperm.xlu2 %4037, %v2534_v59   ;;  %v3945_v59 = vld [vmem:[%s8409_s7 + $0x54] sm:$0xf0] }
 0x4f6   :  { %v7337_v11 = vor.u32 %v4000_v58, %v3945_v59  ;;  %v8973_v58 = vld [vmem:[#allocation64_spill] sm:$0xff]  ;;  %v8974_v59 = vld [vmem:[#allocation15_spill] sm:$0xff] }
 0x4f7   :  { %3377 = vperm.xlu0 %4035, %v3359_v39   ;;  %2859 = vmatpush.bf16.msra.mxu3 %v2432_v6  ;;  %v7277_v15 = vpop.permute.xlu2 %2137 }
 0x4f8   :  { %2579 = vperm.xlu1 %4036, %v2541_v46  }
 0x4f9   :  { %v7279_v0 = vpop.permute.xlu0 %2119  ;;  %v2148_v60 = vpop.permute.xlu1 %2147  ;;  %2673 = vmatmul.bf16.gmra.mxu0 %v7267_v23  ;;  %2702 = vmatmul.bf16.gmra.mxu1 %v7269_v31 }
 0x4fa   :  { %v2396_v47 = vsel %vm2241_vm10, %v2148_v60, %v6990_v57  ;;  %2760 = vmatmul.bf16.gmra.mxu3 %v7267_v23  ;;  %v3358_v57 = vld [vmem:[%s8411_s9 + $0x8] sm:$0xff] }
 0x4fb   :  { %2831 = vmatpush.bf16.msra.mxu2 %v2396_v47 }
 0x4fd   :  { %2559 = vperm.xlu2 %4037, %v2537_v20   ;;  %v8969_v20 = vld [vmem:[#allocation37_spill] sm:$0xff] }
 0x4ff   :  { %3387 = vperm.xlu0 %4035, %v3361_v54   ;;  %2832 = vmatpush.bf16.msra.mxu2 %v2392_v26  ;;  %v2180_v52 = vpop.permute.xlu2 %2179 }
 0x500   :  { %3372 = vperm.xlu1 %4036, %v3358_v57   ;;  %v2388_v8 = vsel %vm2241_vm10, %v7150_v45, %v2180_v52  ;;  %v8968_v45 = vld [vmem:[#allocation4_spill] sm:$0xff]  ;;  %v8970_v57 = vld [vmem:[#allocation65_spill] sm:$0xff] }
 0x501   :  { %v2128_v10 = vpop.permute.xlu0 %2127  ;;  %v2164_v21 = vpop.permute.xlu1 %2163 }
 0x502   :  { %v2356_v2 = vsel %vm2241_vm10, %v8967_v40, %v2128_v10  ;;  %v2428_v5 = vsel %vm2241_vm10, %v2164_v21, %v7098_v13  ;;  %v2352_v13 = vsel %vm2241_vm10, %v8968_v45, %v7012_v43  ;;  %v2424_v43 = vsel %vm2241_vm10, %v7148_v53, %v6994_v36  ;;  %v3439_v53 = vld [vmem:[%s8412_s10 + $0x10] sm:$0xff] }
 0x503   :  { %2773 = vmatpush.bf16.msra.mxu0 %v2356_v2  ;;  %2833 = vmatpush.bf16.msra.mxu2 %v2388_v8  ;;  %v2380_v36 = vsel %vm2241_vm10, %v7213_v37, %v7183_v41  ;;  %v2416_v37 = vsel %vm2241_vm10, %v7153_v14, %v7215_v4  ;;  %v3360_v14 = vld [vmem:[%s8411_s9 + $0x18] sm:$0xff]  ;;  %v3442_v4 = vld [vmem:[%s8412_s10 + $0x28] sm:$0xff]  ;;  %v3363_v10 = vld [vmem:[%s8411_s9 + $0x30] sm:$0xff] }
 0x504   :  { %2860 = vmatpush.bf16.msra.mxu3 %v2428_v5  ;;  %3956 = vmatmul.msk.bf16.gmra.mxu2 %vm1951_vm2, %v7304_v9  ;;  %v8971_v21 = vld [vmem:[#allocation40_spill] sm:$0xff]  ;;  %v3438_v5 = vld [vmem:[%s8412_s10 + $0x8] sm:$0xff] }
 0x505   :  { %2574 = vperm.xlu2 %4037, %v2540_v18   ;;  %v8972_v40 = vld [vmem:[#allocation52_spill] sm:$0xff] }
 0x506   :  { %v1964_v2 = vsel %vm1962_vm1, %v8972_v40, %v8971_v21 }
 0x507   :  { %3402 = vperm.xlu0 %4035, %v3364_v35   ;;  %2774 = vmatpush.bf16.msra.mxu0 %v2352_v13  ;;  %v2124_v39 = vpop.permute.xlu2 %2123  ;;  %v1963_v35 = vsel %vm1962_vm1, %v8974_v59, %v8973_v58 }
 0x508   :  { %2834 = vmatpush.bf16.msra.mxu2 %v2384_v24  ;;  %2861 = vmatpush.bf16.msra.mxu3 %v2424_v43  ;;  %v2348_v29 = vsel %vm2241_vm10, %v6507_v7, %v2124_v39  ;;  %v3437_v7 = vld [vmem:[%s8412_s10] sm:$0xff]  ;;  %v8975_v39 = vld [vmem:[#allocation11_spill] sm:$0xff] }
 0x509   :  { %v2160_v46 = vpop.permute.xlu0 %2159  ;;  %3392 = vperm.xlu1 %4036, %v3362_v33   ;;  %v2174_v44 = vpop.permute.xlu1 %2173  ;;  %2678 = vmatmul.bf16.gmra.mxu0 %v7335_v3 }
 0x50a   :  { %v2420_v6 = vsel %vm2241_vm10, %v2160_v46, %v7176_v50  ;;  %2707 = vmatmul.bf16.gmra.mxu1 %v7337_v11  ;;  %2765 = vmatmul.bf16.gmra.mxu3 %v7335_v3  ;;  %v2345_v50 = vsel %vm2241_vm10, %v8938_v61, %v7241_v32  ;;  %v2376_v41 = vsel %vm2241_vm10, %v7277_v15, %v2174_v44  ;;  %v3441_v44 = vld [vmem:[%s8412_s10 + $0x20] sm:$0xff] }
 0x50b   :  { %2775 = vmatpush.bf16.msra.mxu0 %v2348_v29  ;;  %v2342_v61 = vsel %vm2241_vm10, %v6718_v27, %v7279_v0  ;;  %v3440_v27 = vld [vmem:[%s8412_s10 + $0x18] sm:$0xff] }
 0x50c   :  { %2835 = vmatpush.bf16.msra.mxu2 %v2380_v36  ;;  %2862 = vmatpush.bf16.msra.mxu3 %v2420_v6  ;;  %v8976_v6 = vld [vmem:[#allocation73_spill] sm:$0xff]  ;;  %v8977_v36 = vld [vmem:[#allocation28_spill] sm:$0xff] }
 0x50d   :  { %3367 = vperm.xlu2 %4037, %v3357_v38  }
 0x50f   :  { %3457 = vperm.xlu0 %4035, %v3439_v53   ;;  %2776 = vmatpush.bf16.msra.mxu0 %v2345_v50  ;;  %v2154_v60 = vpop.permute.xlu2 %2153  ;;  %v1975_v53 = vsel %vm1973_vm3, %v6668_v63, %v8977_v36  ;;  %v8980_v63 = vld [vmem:[#allocation27_spill] sm:$0xff] }
 0x510   :  { %2836 = vmatpush.bf16.msra.mxu2 %v2376_v41  ;;  %2863 = vmatpush.bf16.msra.mxu3 %v2416_v37  ;;  %v8978_v37 = vld [vmem:[#allocation66_spill] sm:$0xff] }
 0x511   :  { %v2136_v47 = vpop.permute.xlu0 %2135  ;;  %3447 = vperm.xlu1 %4036, %v3437_v7   ;;  %v2192_v51 = vpop.permute.xlu1 %2191 }
 0x512   :  { %v2372_v54 = vsel %vm2241_vm10, %v8969_v20, %v2136_v47  ;;  %v2412_v32 = vsel %vm2241_vm10, %v7239_v19, %v2192_v51 }
 0x513   :  { %2806 = vmatpush.bf16.msra.mxu1 %v2372_v54  ;;  %2777 = vmatpush.bf16.msra.mxu0 %v2342_v61 }
 0x514   :  { %2837 = vmatmul.bf16.vlgmr.msra.gmra.mxu2 %v7133_v12  ;;  %2864 = vmatpush.bf16.msra.mxu3 %v2412_v32 }
 0x515   :  { %3382 = vperm.xlu2 %4037, %v3360_v14   ;;  %v8981_v14 = vld [vmem:[#allocation44_spill] sm:$0xff] }
 0x517   :  { %3472 = vperm.xlu0 %4035, %v3442_v4   ;;  %v2118_v15 = vpop.permute.xlu2 %2117  ;;  %v8982_v4 = vld [vmem:[#allocation29_spill] sm:$0xff] }
 0x518   :  { %v2339_v0 = vsel %vm2241_vm10, %v6612_v62, %v2118_v15  ;;  %v3443_v62 = vld [vmem:[%s8412_s10 + $0x30] sm:$0xff] }
 0x519   :  { %v2134_v19 = vpop.permute.xlu0 %2133  ;;  %3462 = vperm.xlu1 %4036, %v3440_v27   ;;  %v2190_v1 = vpop.permute.xlu1 %2189  ;;  %2778 = vmatpush.bf16.msra.mxu0 %v2339_v0  ;;  %v8983_v15 = vld [vmem:[#allocation68_spill] sm:$0xff]  ;;  %v8984_v0 = vld [vmem:[#allocation42_spill] sm:$0xff] }
 0x51a   :  { %v2368_v26 = vsel %vm2241_vm10, %v8970_v57, %v2134_v19  ;;  %v2408_v52 = vsel %vm2241_vm10, %v2154_v60, %v2190_v1  ;;  %v8979_v60 = vld [vmem:[#allocation74_spill] sm:$0xff]  ;;  %v8985_v1 = vld [vmem:[#allocation17_spill] sm:$0xff] }
 0x51b   :  { %2807 = vmatpush.bf16.msra.mxu1 %v2368_v26  ;;  %2865 = vmatpush.bf16.msra.mxu3 %v2408_v52  ;;  %v1974_v47 = vsel %vm1973_vm3, %v8979_v60, %v8978_v37  ;;  %v1953_v57 = vsel %vm1951_vm2, %v8985_v1, %v8984_v0  ;;  %v8986_v26 = vld [vmem:[#allocation45_spill] sm:$0xff] }
 0x51c   :  { %2779 = vmatmul.bf16.vlgmr.msra.gmra.mxu0 %v7135_v48  ;;  %v1990_v52 = vsel %vm1988_vm4, %v6694_v42, %v8986_v26  ;;  %v8991_v42 = vld [vmem:[#allocation12_spill] sm:$0xff] }
 0x51d   :  { %3397 = vperm.xlu2 %4037, %v3363_v10  }
 0x51e   :  { %3957 = vmatmul.msk.bf16.vlgmr.msra.gmra.mxu1 %vm1951_vm2, %v7100_v34  ;;  %2866 = vmatmul.bf16.vlgmr.msra.gmra.mxu3 %v7135_v48 }
 0x51f   :  { %v2234_v18 = vpop.permute.xlu2 %2233 }
 0x521   :  { %v2220_v55 = vpop.permute.xlu0 %2219  ;;  %3477 = vperm.xlu1 %4036, %v3443_v62  }
 0x522   :  { %v2476_v16 = vsel %vm2241_vm10, %v1964_v2, %v2220_v55  ;;  %v2218_v8 = vpop.permute.xlu1 %2217  ;;  %v8987_v2 = vld [vmem:[#allocation33_spill] sm:$0xff]  ;;  %v8988_v55 = vld [vmem:[#allocation35_spill] sm:$0xff] }
 0x523   :  { %2916 = vmatpush.bf16.msrb.mxu1 %v2476_v16  ;;  %v2472_v45 = vsel %vm2241_vm10, %v1963_v35, %v2218_v8  ;;  %v8989_v8 = vld [vmem:[#allocation72_spill] sm:$0xff]  ;;  %v8992_v35 = vld [vmem:[#allocation22_spill] sm:$0xff] }
 0x524   :  { %2842 = vmatmul.bf16.gmra.mxu2 %v7206_v56 }
 0x525   :  { %3452 = vperm.xlu2 %4037, %v3438_v5   ;;  %v8990_v5 = vld [vmem:[#allocation23_spill] sm:$0xff] }
 0x526   :  { %v1952_v58 = vsel %vm1951_vm2, %v8990_v5, %v8989_v8 }
 0x527   :  { %2917 = vmatpush.bf16.msrb.mxu1 %v2472_v45  ;;  %v2216_v13 = vpop.permute.xlu2 %2215  ;;  %v2448_v59 = vsel %vm2241_vm10, %v1952_v58, %v8991_v42  ;;  %v1989_v45 = vsel %vm1988_vm4, %v8944_v25, %v8992_v35 }
 0x528   :  { %v2468_v43 = vsel %vm2241_vm10, %v6932_v17, %v2216_v13  ;;  %v2504_v17 = vsel %vm2241_vm10, %v8976_v6, %v2234_v18  ;;  %v2452_v18 = vsel %vm2241_vm10, %v1953_v57, %v8987_v2 }
 0x529   :  { %v2232_v33 = vpop.permute.xlu0 %2231 }
 0x52a   :  { %v2236_v24 = vpop.permute.xlu1 %2235  ;;  %v2500_v41 = vsel %vm2241_vm10, %v1975_v53, %v2232_v33  ;;  %v8993_v33 = vld [vmem:[#allocation6_spill] sm:$0xff] }
 0x52b   :  { %v2508_v46 = vsel %vm2241_vm10, %v8975_v39, %v2236_v24  ;;  %2918 = vmatpush.bf16.msrb.mxu1 %v2468_v43 }
 0x52c   :  { %2945 = vmatpush.bf16.msrb.mxu2 %v2508_v46  ;;  %2784 = vmatmul.bf16.gmra.mxu0 %v7208_v49 }
 0x52d   :  { %3467 = vperm.xlu2 %4037, %v3441_v44  }
 0x52e   :  { %3958 = vmatmul.msk.bf16.gmra.mxu1 %vm1951_vm2, %v7180_v30  ;;  %2871 = vmatmul.bf16.gmra.mxu3 %v7208_v49 }
 0x52f   :  { %v2228_v29 = vpop.permute.xlu2 %2227 }
 0x530   :  { %2946 = vmatpush.bf16.msrb.mxu2 %v2504_v17  ;;  %v2492_v32 = vsel %vm2241_vm10, %v8980_v63, %v2228_v29 }
 0x531   :  { %v2214_v38 = vpop.permute.xlu0 %2213 }
 0x532   :  { %v2230_v7 = vpop.permute.xlu1 %2229  ;;  %v2464_v50 = vsel %vm2241_vm10, %v6950_v22, %v2214_v38 }
 0x533   :  { %2919 = vmatpush.bf16.msrb.mxu1 %v2464_v50  ;;  %v2496_v20 = vsel %vm2241_vm10, %v1974_v47, %v2230_v7 }
 0x534   :  { %2947 = vmatpush.bf16.msrb.mxu2 %v2500_v41 }
 0x535   :  { %2847 = vmatmul.bf16.gmra.mxu2 %v7267_v23 }
 0x537   :  { %v2210_v54 = vpop.permute.xlu2 %2209 }
 0x538   :  { %2948 = vmatpush.bf16.msrb.mxu2 %v2496_v20  ;;  %v2456_v19 = vsel %vm2241_vm10, %v8983_v15, %v2210_v54 }
 0x539   :  { %v2226_v51 = vpop.permute.xlu0 %2225 }
 0x53a   :  { %v2212_v61 = vpop.permute.xlu1 %2211  ;;  %v2488_v27 = vsel %vm2241_vm10, %v8982_v4, %v2226_v51 }
 0x53b   :  { %v2460_v22 = vsel %vm2241_vm10, %v8981_v14, %v2212_v61 }
 0x53c   :  { %2949 = vmatpush.bf16.msrb.mxu2 %v2492_v32  ;;  %2920 = vmatpush.bf16.msrb.mxu1 %v2460_v22 }
 0x53d   :  { %2789 = vmatmul.bf16.gmra.mxu0 %v7269_v31 }
 0x53e   :  { %3959 = vmatmul.msk.bf16.gmra.mxu1 %vm1951_vm2, %v7243_v28  ;;  %2876 = vmatmul.bf16.gmra.mxu3 %v7269_v31 }
 0x53f   :  { %v2222_v10 = vpop.permute.xlu2 %2221 }
 0x540   :  { %2950 = vmatpush.bf16.msrb.mxu2 %v2488_v27  ;;  %2921 = vmatpush.bf16.msrb.mxu1 %v2456_v19  ;;  %v2480_v24 = vsel %vm2241_vm10, %v8993_v33, %v2222_v10 }
 0x541   :  { %v2240_v62 = vpop.permute.xlu0 %2239 }
 0x542   :  { %v2516_v21 = vsel %vm2241_vm10, %v1990_v52, %v2240_v62  ;;  %v2224_v40 = vpop.permute.xlu1 %2223 }
 0x543   :  { %2980 = vmatpush.bf16.msrb.mxu3 %v2516_v21  ;;  %v2484_v16 = vsel %vm2241_vm10, %v8988_v55, %v2224_v40 }
 0x544   :  { %2922 = vmatpush.bf16.msrb.mxu1 %v2452_v18  ;;  %2951 = vmatpush.bf16.msrb.mxu2 %v2484_v16 }
 0x545   :  { %2852 = vmatmul.bf16.gmra.mxu2 %v7335_v3 }
 0x547   :  { %v2238_v13 = vpop.permute.xlu2 %2237 }
 0x548   :  { %2923 = vmatpush.bf16.msrb.mxu1 %v2448_v59  ;;  %2952 = vmatpush.bf16.msrb.mxu2 %v2480_v24  ;;  %v2512_v39 = vsel %vm2241_vm10, %v1989_v45, %v2238_v13 }
 0x549   :  { %v2208_v43 = vpop.permute.xlu0 %2207  ;;  %2981 = vmatpush.bf16.msrb.mxu3 %v2512_v39 }
 0x54a   :  { %v2172_v46 = vpop.permute.xlu1 %2171 }
 0x54b   :  { %v2444_v44 = vsel %vm2241_vm10, %v2172_v46, %v2208_v43 }
 0x54c   :  { %2893 = vmatpush.bf16.msrb.mxu0 %v2444_v44 }
 0x54d   :  { %2794 = vmatmul.bf16.gmra.mxu0 %v7337_v11 }
 0x54e   :  { %3960 = vmatmul.msk.bf16.gmra.mxu1 %vm1951_vm2, %v7304_v9  ;;  %2881 = vmatmul.bf16.gmra.mxu3 %v7337_v11 }
 0x54f   :  { %v7481_v29 = vpop.permute.xlu2 %2544 }
 0x551   :  { %v2206_v25 = vpop.permute.xlu0 %2205 }
 0x552   :  { %v2170_v6 = vpop.permute.xlu1 %2169 }
 0x553   :  { %v2440_v17 = vsel %vm2241_vm10, %v2170_v6, %v2206_v25 }
 0x554   :  { %2894 = vmatpush.bf16.msrb.mxu0 %v2440_v17 }
 0x555   :  { %2953 = vmatmul.bf16.vlgmr.msrb.gmra.mxu2 %v7135_v48 }
 0x556   :  { %v2664_v38 = vpop.f32.mrf.mxu0  ;;  %v2693_v36 = vpop.f32.mrf.mxu1 }
 0x557   :  { %v2665_v53 = vadd.f32 %v2664_v38, %v7481_v29  ;;  %v2722_v7 = vpop.f32.mrf.mxu2  ;;  %v7509_v15 = vpop.permute.xlu2 %2559 }
 0x559   :  { %v2694_v50 = vadd.f32 %v2693_v36, %v2665_v53  ;;  %v7499_v63 = vpop.permute.xlu0 %2554 }
 0x55a   :  { %v7486_v37 = vpop.permute.xlu1 %2549 }
 0x55b   :  { %v7484_v41 = vadd.f32 %v2722_v7, %v2694_v50 }
 0x55d   :  { %3961 = vmatmul.msk.bf16.vlgmr.msrb.gmra.mxu0 %vm1951_vm2, %v7100_v34  ;;  %v7491_v60 = vpop.f32.mrf.mxu3 }
 0x55e   :  { %2924 = vmatmul.bf16.vlgmr.msrb.gmra.mxu1 %v7133_v12  ;;  %3965 = vmatmul.msk.bf16.vlgmr.msrb.gmra.mxu3 %vm1951_vm2, %v7100_v34  ;;  %v2666_v48 = vpop.f32.mrf.mxu0  ;;  %v2695_v47 = vpop.f32.mrf.mxu1  ;;  %v2752_v53 = vadd.f32 %v7491_v60, %v7481_v29 }
 0x55f   :  { %v2667_v20 = vadd.f32 %v2666_v48, %v7486_v37  ;;  %v2724_v54 = vpop.f32.mrf.mxu2  ;;  %v7535_v35 = vpop.permute.xlu2 %2574 }
 0x561   :  { %v2696_v51 = vadd.f32 %v2695_v47, %v2667_v20  ;;  %v7527_v55 = vpop.permute.xlu0 %2569 }
 0x562   :  { %v7519_v10 = vpop.permute.xlu1 %2564 }
 0x563   :  { %v7496_v61 = vadd.f32 %v2724_v54, %v2696_v51 }
 0x565   :  { %2958 = vmatmul.bf16.gmra.mxu2 %v7208_v49  ;;  %v7501_v32 = vpop.f32.mrf.mxu3 }
 0x566   :  { %v2669_v12 = vpop.f32.mrf.mxu0  ;;  %v2698_v14 = vpop.f32.mrf.mxu1 }
 0x567   :  { %v2670_v22 = vadd.f32 %v2669_v12, %v7499_v63  ;;  %v2727_v4 = vpop.f32.mrf.mxu2 }
 0x569   :  { %v2699_v34 = vadd.f32 %v2698_v14, %v2670_v22 }
 0x56a   :  { %v7543_v39 = vpop.permute.xlu1 %2579 }
 0x56b   :  { %v7504_v27 = vadd.f32 %v2727_v4, %v2699_v34 }
 0x56d   :  { %3962 = vmatmul.msk.bf16.gmra.mxu0 %vm1951_vm2, %v7180_v30  ;;  %v7511_v49 = vpop.f32.mrf.mxu3 }
 0x56e   :  { %2929 = vmatmul.bf16.gmra.mxu1 %v7206_v56  ;;  %3966 = vmatmul.msk.bf16.gmra.mxu3 %vm1951_vm2, %v7180_v30  ;;  %v2671_v19 = vpop.f32.mrf.mxu0  ;;  %v2700_v0 = vpop.f32.mrf.mxu1  ;;  %v2757_v60 = vadd.f32 %v7511_v49, %v7499_v63 }
 0x56f   :  { %v2672_v1 = vadd.f32 %v2671_v19, %v7509_v15  ;;  %v2729_v57 = vpop.f32.mrf.mxu2 }
 0x571   :  { %v2701_v26 = vadd.f32 %v2700_v0, %v2672_v1 }
 0x573   :  { %v7516_v52 = vadd.f32 %v2729_v57, %v2701_v26 }
 0x575   :  { %2963 = vmatmul.bf16.gmra.mxu2 %v7269_v31  ;;  %v2758_v56 = vpop.f32.mrf.mxu3 }
 0x576   :  { %v2674_v62 = vpop.f32.mrf.mxu0  ;;  %v2703_v21 = vpop.f32.mrf.mxu1 }
 0x577   :  { %v2675_v40 = vadd.f32 %v2674_v62, %v7519_v10  ;;  %v2732_v2 = vpop.f32.mrf.mxu2 }
 0x579   :  { %v2704_v18 = vadd.f32 %v2703_v21, %v2675_v40 }
 0x57b   :  { %v7522_v30 = vadd.f32 %v2732_v2, %v2704_v18 }
 0x57d   :  { %3963 = vmatmul.msk.bf16.gmra.mxu0 %vm1951_vm2, %v7243_v28  ;;  %v2761_v16 = vpop.f32.mrf.mxu3 }
 0x57e   :  { %2934 = vmatmul.bf16.gmra.mxu1 %v7267_v23  ;;  %3967 = vmatmul.msk.bf16.gmra.mxu3 %vm1951_vm2, %v7243_v28  ;;  %v2676_v31 = vpop.f32.mrf.mxu0  ;;  %v2705_v8 = vpop.f32.mrf.mxu1  ;;  %v2762_v49 = vadd.f32 %v2761_v16, %v7519_v10 }
 0x57f   :  { %v2677_v5 = vadd.f32 %v2676_v31, %v7527_v55  ;;  %v2734_v58 = vpop.f32.mrf.mxu2 }
 0x581   :  { %v2706_v42 = vadd.f32 %v2705_v8, %v2677_v5 }
 0x583   :  { %v7532_v59 = vadd.f32 %v2734_v58, %v2706_v42 }
 0x585   :  { %2968 = vmatmul.bf16.gmra.mxu2 %v7337_v11  ;;  %v2763_v45 = vpop.f32.mrf.mxu3 }
 0x586   :  { %v2679_v23 = vpop.f32.mrf.mxu0 }
 0x587   :  { %v2708_v13 = vpop.f32.mrf.mxu1  ;;  %v2680_v33 = vadd.f32 %v2679_v23, %v7535_v35  ;;  %v2737_v24 = vpop.f32.mrf.mxu2 }
 0x589   :  { %v2709_v43 = vadd.f32 %v2708_v13, %v2680_v33 }
 0x58b   :  { %v7538_v28 = vadd.f32 %v2737_v24, %v2709_v43 }
 0x58d   :  { %3964 = vmatmul.msk.bf16.gmra.mxu0 %vm1951_vm2, %v7304_v9  ;;  %v2766_v46 = vpop.f32.mrf.mxu3 }
 0x58e   :  { %2939 = vmatmul.bf16.gmra.mxu1 %v7335_v3  ;;  %3968 = vmatmul.msk.bf16.gmra.mxu3 %vm1951_vm2, %v7304_v9  ;;  %v2681_v11 = vpop.f32.mrf.mxu0  ;;  %v2754_v9 = vadd.f32 %v7501_v32, %v7486_v37  ;;  %v2759_v32 = vadd.f32 %v2758_v56, %v7509_v15  ;;  %v2764_v56 = vadd.f32 %v2763_v45, %v7527_v55 }
 0x58f   :  { %v2710_v44 = vpop.f32.mrf.mxu1  ;;  %v2682_v25 = vadd.f32 %v2681_v11, %v7543_v39  ;;  %v2739_v6 = vpop.f32.mrf.mxu2  ;;  %v2767_v16 = vadd.f32 %v2766_v46, %v7535_v35  ;;  %v3003_v46 = vld [vmem:[%s8413_s2] sm:$0xf] }
 0x591   :  { %v2711_v17 = vadd.f32 %v2710_v44, %v2682_v25 }
 0x593   :  { %v7548_v38 = vadd.f32 %v2739_v6, %v2711_v17 }
 0x595   :  { %v2768_v7 = vpop.f32.mrf.mxu3 }
 0x596   :  { %v2769_v45 = vadd.f32 %v2768_v7, %v7543_v39 }
 0x597   :  { %v2838_v36 = vpop.f32.mrf.mxu2 }
 0x599   :  { %v2780_v3 = vpop.f32.mrf.mxu0 }
 0x59a   :  { %v2781_v48 = vadd.f32 %v2780_v3, %v2752_v53 }
 0x59b   :  { %v2809_v50 = vpop.f32.mrf.mxu1 }
 0x59c   :  { %v7552_v47 = vadd.f32 %v2809_v50, %v2781_v48 }
 0x59f   :  { %v7554_v20 = vpop.f32.mrf.mxu2 }
 0x5a1   :  { %v2867_v54 = vpop.f32.mrf.mxu3  ;;  %v2782_v51 = vpop.f32.mrf.mxu0 }
 0x5a2   :  { %v2783_v14 = vadd.f32 %v2782_v51, %v2754_v9 }
 0x5a3   :  { %v2811_v12 = vpop.f32.mrf.mxu1 }
 0x5a4   :  { %v7558_v22 = vadd.f32 %v2811_v12, %v2783_v14 }
 0x5a7   :  { %v7560_v4 = vpop.f32.mrf.mxu2 }
 0x5a9   :  { %v2869_v34 = vpop.f32.mrf.mxu3  ;;  %v2785_v19 = vpop.f32.mrf.mxu0 }
 0x5aa   :  { %v2786_v1 = vadd.f32 %v2785_v19, %v2757_v60  ;;  %v2839_v19 = vadd.f32 %v2838_v36, %v7481_v29 }
 0x5ab   :  { %v2814_v0 = vpop.f32.mrf.mxu1 }
 0x5ac   :  { %v7564_v57 = vadd.f32 %v2814_v0, %v2786_v1 }
 0x5af   :  { %v7566_v26 = vpop.f32.mrf.mxu2 }
 0x5b1   :  { %v7569_v62 = vpop.f32.mrf.mxu3  ;;  %v2787_v21 = vpop.f32.mrf.mxu0 }
 0x5b2   :  { %v2788_v2 = vadd.f32 %v2787_v21, %v2759_v32  ;;  %v7607_v32 = vperm.slane %v3003_v46, 1  ;;  %v2868_v21 = vadd.f32 %v2867_v54, %v2839_v19 }
 0x5b3   :  { %v2816_v40 = vpop.f32.mrf.mxu1 }
 0x5b4   :  { %v7571_v18 = vadd.f32 %v2816_v40, %v2788_v2  ;;  %v7609_v2 = vperm.slane %v3003_v46, 0 }
 0x5b6   :  { %v3013_v36 = vmul.f32 %v7609_v2, %v7484_v41 }
 0x5b8   :  { %v7573_v31 = vpop.f32.mrf.mxu2 }
 0x5b9   :  { %v7576_v8 = vpop.f32.mrf.mxu3 }
 0x5ba   :  { %v2790_v5 = vpop.f32.mrf.mxu0 }
 0x5bb   :  { %v2819_v58 = vpop.f32.mrf.mxu1  ;;  %v2791_v42 = vadd.f32 %v2790_v5, %v2762_v49  ;;  %v7613_v5 = vperm.slane %v3003_v46, 2 }
 0x5bd   :  { %v7578_v23 = vadd.f32 %v2819_v58, %v2791_v42  ;;  %v3014_v42 = vmul.f32 %v7607_v32, %v7552_v47 }
 0x5c0   :  { %v7580_v13 = vpop.f32.mrf.mxu2 }
 0x5c1   :  { %v7583_v33 = vpop.f32.mrf.mxu3 }
 0x5c2   :  { %v2792_v24 = vpop.f32.mrf.mxu0 }
 0x5c3   :  { %v2821_v43 = vpop.f32.mrf.mxu1  ;;  %v2793_v11 = vadd.f32 %v2792_v24, %v2764_v56  ;;  %v2841_v56 = vadd.f32 %v7554_v20, %v7486_v37 }
 0x5c5   :  { %v7585_v44 = vadd.f32 %v2821_v43, %v2793_v11  ;;  %v7624_v43 = vperm.slane %v3003_v46, 3  ;;  %v3018_v46 = vmul.f32 %v7607_v32, %v7558_v22 }
 0x5c8   :  { %v7587_v25 = vpop.f32.mrf.mxu2 }
 0x5c9   :  { %v7590_v6 = vpop.f32.mrf.mxu3 }
 0x5ca   :  { %v2795_v17 = vpop.f32.mrf.mxu0 }
 0x5cb   :  { %v2824_v53 = vpop.f32.mrf.mxu1  ;;  %v2796_v3 = vadd.f32 %v2795_v17, %v2767_v16  ;;  %v3045_v17 = vadd.f32 %v3014_v42, %v3013_v36 }
 0x5cd   :  { %v7592_v50 = vadd.f32 %v2824_v53, %v2796_v3  ;;  %v2870_v53 = vadd.f32 %v2869_v34, %v2841_v56  ;;  %v2844_v34 = vadd.f32 %v7560_v4, %v7499_v63 }
 0x5d0   :  { %v7594_v48 = vpop.f32.mrf.mxu2 }
 0x5d1   :  { %v7597_v9 = vpop.f32.mrf.mxu3 }
 0x5d2   :  { %v2797_v51 = vpop.f32.mrf.mxu0 }
 0x5d3   :  { %v2826_v12 = vpop.f32.mrf.mxu1  ;;  %v2798_v14 = vadd.f32 %v2797_v51, %v2769_v45 }
 0x5d5   :  { %v7599_v60 = vadd.f32 %v2826_v12, %v2798_v14 }
 0x5d8   :  { %v2954_v0 = vpop.f32.mrf.mxu2 }
 0x5d9   :  { %v7605_v1 = vpop.f32.mrf.mxu3 }
 0x5da   :  { %v2896_v7 = vpop.f32.mrf.mxu0 }
 0x5db   :  { %v2925_v40 = vpop.f32.mrf.mxu1  ;;  %v7611_v49 = vadd.f32 %v2896_v7, %v2868_v21 }
 0x5dc   :  { %v2926_v58 = vadd.f32 %v2925_v40, %v7481_v29 }
 0x5dd   :  { %v3015_v54 = vmul.f32 %v7613_v5, %v7611_v49 }
 0x5de   :  { %v2955_v24 = vadd.f32 %v2954_v0, %v2926_v58  ;;  %v3017_v0 = vmul.f32 %v7609_v2, %v7496_v61 }
 0x5df   :  { %v3046_v51 = vadd.f32 %v3045_v17, %v3015_v54 }
 0x5e0   :  { %v2956_v11 = vpop.f32.mrf.mxu2  ;;  %v3050_v42 = vadd.f32 %v3018_v46, %v3017_v0 }
 0x5e1   :  { %v2983_v16 = vpop.f32.mrf.mxu3 }
 0x5e2   :  { %v2898_v29 = vpop.f32.mrf.mxu0  ;;  %v7626_v3 = vadd.f32 %v2983_v16, %v2955_v24 }
 0x5e3   :  { %v2927_v45 = vpop.f32.mrf.mxu1  ;;  %v7628_v12 = vadd.f32 %v2898_v29, %v2870_v53  ;;  %v3021_v29 = vmul.f32 %v7609_v2, %v7504_v27 }
 0x5e4   :  { %v3016_v20 = vmul.f32 %v7624_v43, %v7626_v3  ;;  %v2928_v14 = vadd.f32 %v2927_v45, %v7486_v37  ;;  %v2873_v37 = vadd.f32 %v7569_v62, %v2844_v34  ;;  %v2846_v62 = vadd.f32 %v7566_v26, %v7509_v15 }
 0x5e5   :  { %v3019_v21 = vmul.f32 %v7613_v5, %v7628_v12 }
 0x5e6   :  { %v3047_v19 = vadd.f32 %v3046_v51, %v3016_v20  ;;  %v2957_v7 = vadd.f32 %v2956_v11, %v2928_v14  ;;  %v3022_v11 = vmul.f32 %v7607_v32, %v7564_v57 }
 0x5e7   :  { %v3051_v24 = vadd.f32 %v3050_v42, %v3019_v21 }
 0x5e8   :  { %3048 = vadd.xlane.f32.xlu0 %v3047_v19  ;;  %v2959_v40 = vpop.f32.mrf.mxu2  ;;  %v3055_v46 = vadd.f32 %v3022_v11, %v3021_v29 }
 0x5e9   :  { %v2985_v58 = vpop.f32.mrf.mxu3 }
 0x5ea   :  { %v2901_v36 = vpop.f32.mrf.mxu0  ;;  %v7642_v56 = vadd.f32 %v2985_v58, %v2957_v7 }
 0x5eb   :  { %v2930_v54 = vpop.f32.mrf.mxu1  ;;  %v7644_v16 = vadd.f32 %v2901_v36, %v2873_v37  ;;  %v3025_v37 = vmul.f32 %v7609_v2, %v7516_v52 }
 0x5ec   :  { %v3020_v4 = vmul.f32 %v7624_v43, %v7642_v56  ;;  %v2931_v17 = vadd.f32 %v2930_v54, %v7499_v63  ;;  %v2875_v63 = vadd.f32 %v7576_v8, %v2846_v62  ;;  %v2849_v8 = vadd.f32 %v7573_v31, %v7519_v10 }
 0x5ed   :  { %v3023_v45 = vmul.f32 %v7613_v5, %v7644_v16 }
 0x5ee   :  { %v3052_v53 = vadd.f32 %v3051_v24, %v3020_v4  ;;  %v2960_v51 = vadd.f32 %v2959_v40, %v2931_v17  ;;  %v3026_v40 = vmul.f32 %v7607_v32, %v7571_v18 }
 0x5ef   :  { %v3056_v21 = vadd.f32 %v3055_v46, %v3023_v45  ;;  %v3029_v46 = vmul.f32 %v7609_v2, %v7522_v30 }
 0x5f0   :  { %3053 = vadd.xlane.f32.xlu2 %v3052_v53  ;;  %v2961_v20 = vpop.f32.mrf.mxu2  ;;  %v3060_v17 = vadd.f32 %v3026_v40, %v3025_v37 }
 0x5f1   :  { %v2988_v14 = vpop.f32.mrf.mxu3 }
 0x5f2   :  { %v2903_v19 = vpop.f32.mrf.mxu0  ;;  %v7658_v0 = vadd.f32 %v2988_v14, %v2960_v51 }
 0x5f3   :  { %v2932_v34 = vpop.f32.mrf.mxu1  ;;  %v7660_v7 = vadd.f32 %v2903_v19, %v2875_v63 }
 0x5f4   :  { %v3024_v26 = vmul.f32 %v7624_v43, %v7658_v0  ;;  %v2933_v58 = vadd.f32 %v2932_v34, %v7509_v15  ;;  %v2878_v15 = vadd.f32 %v7583_v33, %v2849_v8  ;;  %v2851_v33 = vadd.f32 %v7580_v13, %v7527_v55 }
 0x5f5   :  { %v3027_v36 = vmul.f32 %v7613_v5, %v7660_v7 }
 0x5f6   :  { %v3057_v42 = vadd.f32 %v3056_v21, %v3024_v26  ;;  %v2962_v54 = vadd.f32 %v2961_v20, %v2933_v58  ;;  %v3030_v20 = vmul.f32 %v7607_v32, %v7578_v23 }
 0x5f7   :  { %v3061_v62 = vadd.f32 %v3060_v17, %v3027_v36 }
 0x5f8   :  { %3058 = vadd.xlane.f32.xlu1 %v3057_v42  ;;  %v2964_v24 = vpop.f32.mrf.mxu2  ;;  %v3065_v26 = vadd.f32 %v3030_v20, %v3029_v46 }
 0x5f9   :  { %v2990_v4 = vpop.f32.mrf.mxu3 }
 0x5fa   :  { %v2906_v11 = vpop.f32.mrf.mxu0  ;;  %v7674_v53 = vadd.f32 %v2990_v4, %v2962_v54  ;;  %v3034_v54 = vmul.f32 %v7607_v32, %v7585_v44  ;;  %v3033_v4 = vmul.f32 %v7609_v2, %v7532_v59 }
 0x5fb   :  { %v2935_v29 = vpop.f32.mrf.mxu1  ;;  %v7676_v45 = vadd.f32 %v2906_v11, %v2878_v15 }
 0x5fc   :  { %v3028_v31 = vmul.f32 %v7624_v43, %v7674_v53  ;;  %v2936_v51 = vadd.f32 %v2935_v29, %v7519_v10  ;;  %v2880_v10 = vadd.f32 %v7590_v6, %v2851_v33  ;;  %v2854_v6 = vadd.f32 %v7587_v25, %v7535_v35 }
 0x5fd   :  { %v3031_v63 = vmul.f32 %v7613_v5, %v7676_v45  ;;  %v3070_v29 = vadd.f32 %v3034_v54, %v3033_v4 }
 0x5fe   :  { %v3062_v14 = vadd.f32 %v3061_v62, %v3028_v31  ;;  %v2965_v19 = vadd.f32 %v2964_v24, %v2936_v51  ;;  %v2883_v62 = vadd.f32 %v7597_v9, %v2854_v6  ;;  %v3037_v9 = vmul.f32 %v7609_v2, %v7538_v28 }
 0x5ff   :  { %v3066_v37 = vadd.f32 %v3065_v26, %v3031_v63  ;;  %v3038_v63 = vmul.f32 %v7607_v32, %v7592_v50  ;;  %v3042_v6 = vmul.f32 %v7607_v32, %v7599_v60 }
 0x600   :  { %3063 = vadd.xlane.f32.xlu0 %v3062_v14  ;;  %v2966_v21 = vpop.f32.mrf.mxu2 }
 0x601   :  { %v2993_v34 = vpop.f32.mrf.mxu3 }
 0x602   :  { %v2908_v58 = vpop.f32.mrf.mxu0  ;;  %v7690_v40 = vadd.f32 %v2993_v34, %v2965_v19  ;;  %v2856_v34 = vadd.f32 %v7594_v48, %v7543_v39 }
 0x603   :  { %v2937_v42 = vpop.f32.mrf.mxu1  ;;  %v7692_v8 = vadd.f32 %v2908_v58, %v2880_v10  ;;  %v3075_v58 = vadd.f32 %v3038_v63, %v3037_v9  ;;  %v3444_v63 = vld [vmem:[%s8412_s10 + $0x38] sm:$0xff] }
 0x604   :  { %v3032_v13 = vmul.f32 %v7624_v43, %v7690_v40  ;;  %v2938_v36 = vadd.f32 %v2937_v42, %v7527_v55  ;;  %v2885_v42 = vadd.f32 %v7605_v1, %v2856_v34  ;;  %v3041_v1 = vmul.f32 %v7609_v2, %v7548_v38 }
 0x605   :  { %v3035_v17 = vmul.f32 %v7613_v5, %v7692_v8 }
 0x606   :  { %v3067_v24 = vadd.f32 %v3066_v37, %v3032_v13  ;;  %v2967_v15 = vadd.f32 %v2966_v21, %v2938_v36 }
 0x607   :  { %v3071_v14 = vadd.f32 %v3070_v29, %v3035_v17 }
 0x608   :  { %3068 = vadd.xlane.f32.xlu2 %v3067_v24  ;;  %v2969_v20 = vpop.f32.mrf.mxu2 }
 0x609   :  { %v2995_v11 = vpop.f32.mrf.mxu3 }
 0x60a   :  { %v2911_v55 = vpop.f32.mrf.mxu0  ;;  %v7706_v31 = vadd.f32 %v2995_v11, %v2967_v15 }
 0x60b   :  { %v2940_v51 = vpop.f32.mrf.mxu1  ;;  %v7708_v46 = vadd.f32 %v2911_v55, %v2883_v62  ;;  %v3080_v62 = vadd.f32 %v3042_v6, %v3041_v1 }
 0x60c   :  { %v3036_v25 = vmul.f32 %v7624_v43, %v7706_v31  ;;  %v2941_v33 = vadd.f32 %v2940_v51, %v7535_v35 }
 0x60d   :  { %v3039_v21 = vmul.f32 %v7613_v5, %v7708_v46 }
 0x60e   :  { %v3072_v19 = vadd.f32 %v3071_v14, %v3036_v25  ;;  %v2970_v26 = vadd.f32 %v2969_v20, %v2941_v33  ;;  %v7739_v14 = vpop.permute.xlu0 %3377  ;;  %v7741_v25 = vpop.permute.xlu2 %3367 }
 0x60f   :  { %v3076_v36 = vadd.f32 %v3075_v58, %v3039_v21 }
 0x610   :  { %3073 = vadd.xlane.f32.xlu1 %v3072_v19  ;;  %v2971_v4 = vpop.f32.mrf.mxu2  ;;  %v7748_v19 = vpop.permute.xlu1 %3372 }
 0x611   :  { %v2998_v10 = vpop.f32.mrf.mxu3 }
 0x612   :  { %v2913_v35 = vpop.f32.mrf.mxu0  ;;  %v7722_v37 = vadd.f32 %v2998_v10, %v2970_v26 }
 0x613   :  { %v2942_v13 = vpop.f32.mrf.mxu1  ;;  %v7724_v54 = vadd.f32 %v2913_v35, %v2885_v42 }
 0x614   :  { %v3040_v24 = vmul.f32 %v7624_v43, %v7722_v37  ;;  %v2943_v48 = vadd.f32 %v2942_v13, %v7543_v39 }
 0x615   :  { %v3043_v15 = vmul.f32 %v7613_v5, %v7724_v54 }
 0x616   :  { %v3077_v17 = vadd.f32 %v3076_v36, %v3040_v24  ;;  %v2972_v11 = vadd.f32 %v2971_v4, %v2943_v48  ;;  %v7743_v33 = vpop.permute.xlu0 %3387  ;;  %v7750_v9 = vpop.permute.xlu2 %3382 }
 0x617   :  { %v3081_v51 = vadd.f32 %v3080_v62, %v3043_v15 }
 0x618   :  { %3078 = vadd.xlane.f32.xlu0 %v3077_v17  ;;  %v7754_v21 = vpop.permute.xlu1 %3392 }
 0x619   :  { %v3000_v29 = vpop.f32.mrf.mxu3 }
 0x61a   :  { %v7735_v55 = vadd.f32 %v3000_v29, %v2972_v11 }
 0x61c   :  { %v3044_v39 = vmul.f32 %v7624_v43, %v7735_v55 }
 0x61e   :  { %v3082_v20 = vadd.f32 %v3081_v51, %v3044_v39  ;;  %v7752_v34 = vpop.permute.xlu0 %3402  ;;  %v7756_v26 = vpop.permute.xlu2 %3397 }
 0x620   :  { %3083 = vadd.xlane.f32.xlu2 %v3082_v20  ;;  %v7760_v58 = vpop.permute.xlu1 %3447 }
 0x626   :  { %v7758_v10 = vpop.permute.xlu0 %3457  ;;  %v7762_v42 = vpop.permute.xlu2 %3452 }
 0x628   :  { %v7766_v13 = vpop.permute.xlu1 %3462 }
 0x62e   :  { %v7764_v35 = vpop.permute.xlu0 %3472  ;;  %v7768_v36 = vpop.permute.xlu2 %3467 }
 0x630   :  { %v7790_v62 = vpop.permute.xlu1 %3477 }
 0x631   :  { %8994 = vst [vmem:[#allocation71_spill] sm:$0xff] %v7790_v62 }
 0x638   :  { %3482 = vperm.xlu2 %4037, %v3444_v63  }
 0x65b   :  { %v3049_v24 = vpop.xlane.xlu0 %3048 }
 0x65c   :  { %v3085_v48 = vmul.f32 0.0025510204, %v3049_v24 }
 0x65e   :  { %v7771_v4 = vsub.f32 %v7484_v41, %v3085_v48  ;;  %v7774_v6 = vsub.f32 %v7552_v47, %v3085_v48  ;;  %v7777_v17 = vsub.f32 %v7611_v49, %v3085_v48  ;;  %v7780_v1 = vsub.f32 %v7626_v3, %v3085_v48 }
 0x660   :  { %v3125_v15 = vmul.f32 %v7771_v4, %v7771_v4  ;;  %v3126_v11 = vmul.f32 %v7774_v6, %v7774_v6  ;;  %v3127_v29 = vmul.f32 %v7777_v17, %v7777_v17  ;;  %v3128_v3 = vmul.f32 %v7780_v1, %v7780_v1 }
 0x662   :  { %v3157_v41 = vmul.f32 %v3125_v15, %v7609_v2  ;;  %v3158_v47 = vmul.f32 %v3126_v11, %v7607_v32  ;;  %v3159_v20 = vmul.f32 %v3127_v29, %v7613_v5  ;;  %v3160_v11 = vmul.f32 %v3128_v3, %v7624_v43 }
 0x663   :  { %v3054_v49 = vpop.xlane.xlu2 %3053 }
 0x664   :  { %v3086_v51 = vmul.f32 0.0025510204, %v3054_v49  ;;  %v3189_v39 = vadd.f32 %v3158_v47, %v3157_v41 }
 0x666   :  { %v7796_v63 = vsub.f32 %v7496_v61, %v3086_v51  ;;  %v7799_v24 = vsub.f32 %v7558_v22, %v3086_v51  ;;  %v7802_v48 = vsub.f32 %v7628_v12, %v3086_v51  ;;  %v7805_v15 = vsub.f32 %v7642_v56, %v3086_v51 }
 0x667   :  { %v3190_v62 = vadd.f32 %v3189_v39, %v3159_v20 }
 0x668   :  { %v3129_v41 = vmul.f32 %v7796_v63, %v7796_v63  ;;  %v3130_v29 = vmul.f32 %v7799_v24, %v7799_v24  ;;  %v3131_v22 = vmul.f32 %v7802_v48, %v7802_v48  ;;  %v3132_v49 = vmul.f32 %v7805_v15, %v7805_v15 }
 0x669   :  { %v3191_v61 = vadd.f32 %v3190_v62, %v3160_v11 }
 0x66a   :  { %v3161_v47 = vmul.f32 %v3129_v41, %v7609_v2  ;;  %v3162_v12 = vmul.f32 %v3130_v29, %v7607_v32  ;;  %v3163_v39 = vmul.f32 %v3131_v22, %v7613_v5  ;;  %v3164_v29 = vmul.f32 %v3132_v49, %v7624_v43 }
 0x66b   :  { %3192 = vadd.xlane.f32.xlu1 %v3191_v61  ;;  %v3059_v56 = vpop.xlane.xlu1 %3058 }
 0x66c   :  { %v3087_v3 = vmul.f32 0.0025510204, %v3059_v56  ;;  %v3194_v51 = vadd.f32 %v3162_v12, %v3161_v47 }
 0x66e   :  { %v7820_v20 = vsub.f32 %v7504_v27, %v3087_v3  ;;  %v7823_v62 = vsub.f32 %v7564_v57, %v3087_v3  ;;  %v7826_v11 = vsub.f32 %v7644_v16, %v3087_v3  ;;  %v7829_v41 = vsub.f32 %v7658_v0, %v3087_v3 }
 0x66f   :  { %v3195_v61 = vadd.f32 %v3194_v51, %v3163_v39 }
 0x670   :  { %v3133_v47 = vmul.f32 %v7820_v20, %v7820_v20  ;;  %v3134_v22 = vmul.f32 %v7823_v62, %v7823_v62  ;;  %v3135_v57 = vmul.f32 %v7826_v11, %v7826_v11  ;;  %v3136_v56 = vmul.f32 %v7829_v41, %v7829_v41 }
 0x671   :  { %v3196_v27 = vadd.f32 %v3195_v61, %v3164_v29 }
 0x672   :  { %v3165_v12 = vmul.f32 %v3133_v47, %v7609_v2  ;;  %v3166_v16 = vmul.f32 %v3134_v22, %v7607_v32  ;;  %v3167_v51 = vmul.f32 %v3135_v57, %v7613_v5  ;;  %v3168_v22 = vmul.f32 %v3136_v56, %v7624_v43 }
 0x673   :  { %3197 = vadd.xlane.f32.xlu0 %v3196_v27  ;;  %v3064_v0 = vpop.xlane.xlu0 %3063 }
 0x674   :  { %v3088_v49 = vmul.f32 0.0025510204, %v3064_v0  ;;  %v3199_v3 = vadd.f32 %v3166_v16, %v3165_v12 }
 0x676   :  { %v7844_v39 = vsub.f32 %v7516_v52, %v3088_v49  ;;  %v7847_v29 = vsub.f32 %v7571_v18, %v3088_v49  ;;  %v7850_v61 = vsub.f32 %v7660_v7, %v3088_v49  ;;  %v7853_v47 = vsub.f32 %v7674_v53, %v3088_v49 }
 0x677   :  { %v3200_v27 = vadd.f32 %v3199_v3, %v3167_v51 }
 0x678   :  { %v3137_v12 = vmul.f32 %v7844_v39, %v7844_v39  ;;  %v3138_v57 = vmul.f32 %v7847_v29, %v7847_v29  ;;  %v3139_v18 = vmul.f32 %v7850_v61, %v7850_v61  ;;  %v3140_v0 = vmul.f32 %v7853_v47, %v7853_v47 }
 0x679   :  { %v3201_v52 = vadd.f32 %v3200_v27, %v3168_v22 }
 0x67a   :  { %v3169_v16 = vmul.f32 %v3137_v12, %v7609_v2  ;;  %v3170_v7 = vmul.f32 %v3138_v57, %v7607_v32  ;;  %v3171_v3 = vmul.f32 %v3139_v18, %v7613_v5  ;;  %v3172_v57 = vmul.f32 %v3140_v0, %v7624_v43 }
 0x67b   :  { %3202 = vadd.xlane.f32.xlu2 %v3201_v52  ;;  %v3069_v53 = vpop.xlane.xlu2 %3068 }
 0x67c   :  { %v3089_v56 = vmul.f32 0.0025510204, %v3069_v53  ;;  %v3204_v49 = vadd.f32 %v3170_v7, %v3169_v16 }
 0x67e   :  { %v7868_v51 = vsub.f32 %v7522_v30, %v3089_v56  ;;  %v7871_v22 = vsub.f32 %v7578_v23, %v3089_v56  ;;  %v7874_v27 = vsub.f32 %v7676_v45, %v3089_v56  ;;  %v7877_v12 = vsub.f32 %v7690_v40, %v3089_v56 }
 0x67f   :  { %v3205_v52 = vadd.f32 %v3204_v49, %v3171_v3 }
 0x680   :  { %v3141_v16 = vmul.f32 %v7868_v51, %v7868_v51  ;;  %v3142_v18 = vmul.f32 %v7871_v22, %v7871_v22  ;;  %v3143_v23 = vmul.f32 %v7874_v27, %v7874_v27  ;;  %v3144_v53 = vmul.f32 %v7877_v12, %v7877_v12 }
 0x681   :  { %v3206_v30 = vadd.f32 %v3205_v52, %v3172_v57 }
 0x682   :  { %v3173_v7 = vmul.f32 %v3141_v16, %v7609_v2  ;;  %v3174_v45 = vmul.f32 %v3142_v18, %v7607_v32  ;;  %v3175_v49 = vmul.f32 %v3143_v23, %v7613_v5  ;;  %v3176_v18 = vmul.f32 %v3144_v53, %v7624_v43 }
 0x683   :  { %3207 = vadd.xlane.f32.xlu1 %v3206_v30  ;;  %v3074_v40 = vpop.xlane.xlu1 %3073 }
 0x684   :  { %v3090_v0 = vmul.f32 0.0025510204, %v3074_v40  ;;  %v3209_v56 = vadd.f32 %v3174_v45, %v3173_v7 }
 0x686   :  { %v7892_v3 = vsub.f32 %v7532_v59, %v3090_v0  ;;  %v7895_v57 = vsub.f32 %v7585_v44, %v3090_v0  ;;  %v7898_v52 = vsub.f32 %v7692_v8, %v3090_v0  ;;  %v7901_v16 = vsub.f32 %v7706_v31, %v3090_v0 }
 0x687   :  { %v3210_v30 = vadd.f32 %v3209_v56, %v3175_v49 }
 0x688   :  { %8995 = vst [vmem:[#allocation60_spill] sm:$0xff] %v7895_v57  ;;  %v3145_v7 = vmul.f32 %v7892_v3, %v7892_v3  ;;  %v3146_v23 = vmul.f32 %v7895_v57, %v7895_v57  ;;  %v3147_v44 = vmul.f32 %v7898_v52, %v7898_v52  ;;  %v3148_v40 = vmul.f32 %v7901_v16, %v7901_v16 }
 0x689   :  { %v3211_v59 = vadd.f32 %v3210_v30, %v3176_v18 }
 0x68a   :  { %v3177_v45 = vmul.f32 %v3145_v7, %v7609_v2  ;;  %v3178_v8 = vmul.f32 %v3146_v23, %v7607_v32  ;;  %v3179_v56 = vmul.f32 %v3147_v44, %v7613_v5  ;;  %v3180_v23 = vmul.f32 %v3148_v40, %v7624_v43 }
 0x68b   :  { %3212 = vadd.xlane.f32.xlu0 %v3211_v59  ;;  %v3079_v31 = vpop.xlane.xlu0 %3078 }
 0x68c   :  { %v3091_v53 = vmul.f32 0.0025510204, %v3079_v31  ;;  %v3214_v0 = vadd.f32 %v3178_v8, %v3177_v45 }
 0x68e   :  { %v7916_v49 = vsub.f32 %v7538_v28, %v3091_v53  ;;  %v7919_v18 = vsub.f32 %v7592_v50, %v3091_v53  ;;  %v7922_v30 = vsub.f32 %v7708_v46, %v3091_v53  ;;  %v7925_v7 = vsub.f32 %v7722_v37, %v3091_v53 }
 0x68f   :  { %v3215_v59 = vadd.f32 %v3214_v0, %v3179_v56 }
 0x690   :  { %8996 = vst [vmem:[#allocation41_spill] sm:$0xff] %v7919_v18  ;;  %v3149_v45 = vmul.f32 %v7916_v49, %v7916_v49  ;;  %v3150_v44 = vmul.f32 %v7919_v18, %v7919_v18  ;;  %v3151_v50 = vmul.f32 %v7922_v30, %v7922_v30  ;;  %v3152_v31 = vmul.f32 %v7925_v7, %v7925_v7 }
 0x691   :  { %8997 = vst [vmem:[#allocation67_spill] sm:$0xff] %v7925_v7  ;;  %v3216_v28 = vadd.f32 %v3215_v59, %v3180_v23 }
 0x692   :  { %v3181_v8 = vmul.f32 %v3149_v45, %v7609_v2  ;;  %v3182_v46 = vmul.f32 %v3150_v44, %v7607_v32  ;;  %v3183_v0 = vmul.f32 %v3151_v50, %v7613_v5  ;;  %v3184_v44 = vmul.f32 %v3152_v31, %v7624_v43 }
 0x693   :  { %3217 = vadd.xlane.f32.xlu2 %v3216_v28  ;;  %v3084_v37 = vpop.xlane.xlu2 %3083 }
 0x694   :  { %v3092_v40 = vmul.f32 0.0025510204, %v3084_v37  ;;  %v3219_v53 = vadd.f32 %v3182_v46, %v3181_v8 }
 0x696   :  { %v7940_v56 = vsub.f32 %v7548_v38, %v3092_v40  ;;  %v7943_v23 = vsub.f32 %v7599_v60, %v3092_v40  ;;  %v7946_v59 = vsub.f32 %v7724_v54, %v3092_v40  ;;  %v7949_v45 = vsub.f32 %v7735_v55, %v3092_v40 }
 0x697   :  { %v3220_v28 = vadd.f32 %v3219_v53, %v3183_v0 }
 0x698   :  { %8998 = vst [vmem:[#allocation48_spill] sm:$0xff] %v7943_v23  ;;  %v3153_v8 = vmul.f32 %v7940_v56, %v7940_v56  ;;  %v3154_v50 = vmul.f32 %v7943_v23, %v7943_v23  ;;  %v3155_v38 = vmul.f32 %v7946_v59, %v7946_v59  ;;  %v3156_v54 = vmul.f32 %v7949_v45, %v7949_v45 }
 0x699   :  { %v3221_v60 = vadd.f32 %v3220_v28, %v3184_v44 }
 0x69a   :  { %v3185_v46 = vmul.f32 %v3153_v8, %v7609_v2  ;;  %v3186_v55 = vmul.f32 %v3154_v50, %v7607_v32  ;;  %v3187_v37 = vmul.f32 %v3155_v38, %v7613_v5  ;;  %v3188_v40 = vmul.f32 %v3156_v54, %v7624_v43 }
 0x69b   :  { %3222 = vadd.xlane.f32.xlu1 %v3221_v60  ;;  %v7964_v44 = vpop.permute.xlu2 %3482 }
 0x69c   :  { %v3224_v31 = vadd.f32 %v3186_v55, %v3185_v46 }
 0x69e   :  { %v3225_v53 = vadd.f32 %v3224_v31, %v3187_v37 }
 0x6a0   :  { %v3226_v0 = vadd.f32 %v3225_v53, %v3188_v40 }
 0x6a2   :  { %3227 = vadd.xlane.f32.xlu0 %v3226_v0 }
 0x6de   :  { %v3193_v18 = vpop.xlane.xlu1 %3192 }
 0x6df   :  { %v3229_v23 = vmul.f32 0.0025510204, %v3193_v18 }
 0x6e1   :  { %v3237_v7 = vadd.f32 1e-05, %v3229_v23 }
 0x6e3   :  { %4046 = vrsqrt.f32 %v3237_v7  ;;  %vm3251_vm6 = vweird.f32 %v3237_v7 }
 0x6e6   :  { %v3198_v28 = vpop.xlane.xlu0 %3197 }
 0x6e7   :  { %v3230_v57 = vmul.f32 0.0025510204, %v3198_v28 }
 0x6e9   :  { %v4047_v2 = vpop.eup %4046  ;;  %v3238_v8 = vadd.f32 1e-05, %v3230_v57 }
 0x6ea   :  { %v3246_v32 = vmul.f32 %v4047_v2, %v3237_v7  ;;  %vm3252_vm5 = vweird.f32 %v4047_v2 }
 0x6eb   :  { %4048 = vrsqrt.f32 %v3238_v8  ;;  %vm3253_vm0 = vmor %vm3251_vm6, %vm3252_vm5  ;;  %vm3261_vm8 = vweird.f32 %v3238_v8 }
 0x6ec   :  { %v3247_v50 = vmul.f32 %v4047_v2, %v3246_v32 }
 0x6ee   :  { %v3248_v5 = vmul.f32 0.5, %v3247_v50  ;;  %v3203_v38 = vpop.xlane.xlu2 %3202 }
 0x6ef   :  { %v3231_v60 = vmul.f32 0.0025510204, %v3203_v38 }
 0x6f0   :  { %v3249_v43 = vsub.f32 1.5, %v3248_v5 }
 0x6f1   :  { %v4049_v54 = vpop.eup %4048  ;;  %v3239_v46 = vadd.f32 1e-05, %v3231_v60 }
 0x6f2   :  { %v3250_v55 = vmul.f32 %v4047_v2, %v3249_v43  ;;  %v3256_v18 = vmul.f32 %v4049_v54, %v3238_v8  ;;  %vm3262_vm7 = vweird.f32 %v4049_v54 }
 0x6f3   :  { %4050 = vrsqrt.f32 %v3239_v46  ;;  %vm3263_vm9 = vmor %vm3261_vm8, %vm3262_vm7  ;;  %vm3271_vm12 = vweird.f32 %v3239_v46 }
 0x6f4   :  { %v3254_v23 = vsel %vm3253_vm0, %v4047_v2, %v3250_v55  ;;  %v3257_v37 = vmul.f32 %v4049_v54, %v3256_v18 }
 0x6f5   :  { %v3327_v31 = vmul.f32 %v3254_v23, %v7777_v17  ;;  %v3326_v57 = vmul.f32 %v3254_v23, %v7774_v6  ;;  %v3325_v40 = vmul.f32 %v3254_v23, %v7771_v4  ;;  %v3328_v2 = vmul.f32 %v3254_v23, %v7780_v1 }
 0x6f6   :  { %v3258_v53 = vmul.f32 0.5, %v3257_v37  ;;  %v3208_v0 = vpop.xlane.xlu1 %3207 }
 0x6f7   :  { %v3232_v28 = vmul.f32 0.0025510204, %v3208_v0  ;;  %v3407_v32 = vmul.f32 %v7741_v25, %v3327_v31  ;;  %v3406_v50 = vmul.f32 %v7741_v25, %v3326_v57  ;;  %v3405_v7 = vmul.f32 %v7741_v25, %v3325_v40 }
 0x6f8   :  { %v3259_v5 = vsub.f32 1.5, %v3258_v53  ;;  %v3408_v57 = vmul.f32 %v7741_v25, %v3328_v2 }
 0x6f9   :  { %v4051_v38 = vpop.eup %4050  ;;  %v7973_v60 = vadd.f32 1e-05, %v3232_v28  ;;  %v7976_v6 = vadd.f32 %v7760_v58, %v3407_v32  ;;  %v7979_v4 = vadd.f32 %v7760_v58, %v3406_v50  ;;  %v7982_v17 = vadd.f32 %v7760_v58, %v3405_v7 }
 0x6fa   :  { %v3260_v43 = vmul.f32 %v4049_v54, %v3259_v5  ;;  %v3266_v55 = vmul.f32 %v4051_v38, %v3239_v46  ;;  %vm3272_vm11 = vweird.f32 %v4051_v38  ;;  %v8004_v7 = vadd.f32 %v7760_v58, %v3408_v57 }
 0x6fb   :  { %4052 = vrsqrt.f32 %v7973_v60  ;;  %v3519_v1 = vmax.f32 %v7976_v6, 0.0  ;;  %v3518_v18 = vmax.f32 %v7979_v4, 0.0  ;;  %v3517_v31 = vmax.f32 %v7982_v17, 0.0  ;;  %vm3273_vm13 = vmor %vm3271_vm12, %vm3272_vm11 }
 0x6fc   :  { %v3264_v23 = vsel %vm3263_vm9, %v4049_v54, %v3260_v43  ;;  %v3267_v37 = vmul.f32 %v4051_v38, %v3266_v55  ;;  %vm3281_vm15 = vweird.f32 %v7973_v60 }
 0x6fd   :  { %3645 = vrot.lane.b32.xlu1 %v3519_v1, %s4093_s26  ;;  %3597 = vrot.lane.b32.xlu2 %v3518_v18, %s4093_s26  ;;  %v3331_v8 = vmul.f32 %v3264_v23, %v7802_v48  ;;  %v3329_v40 = vmul.f32 %v3264_v23, %v7796_v63  ;;  %v3332_v32 = vmul.f32 %v3264_v23, %v7805_v15 }
 0x6fe   :  { %v3268_v53 = vmul.f32 0.5, %v3267_v37  ;;  %3557 = vrot.lane.b32.xlu0 %v3517_v31, %s4093_s26  ;;  %v3213_v54 = vpop.xlane.xlu0 %3212  ;;  %v3330_v63 = vmul.f32 %v3264_v23, %v7799_v24 }
 0x6ff   :  { %v3233_v0 = vmul.f32 0.0025510204, %v3213_v54  ;;  %v3411_v25 = vmul.f32 %v7748_v19, %v3331_v8  ;;  %v3409_v28 = vmul.f32 %v7748_v19, %v3329_v40  ;;  %v3412_v23 = vmul.f32 %v7748_v19, %v3332_v32 }
 0x700   :  { %v3269_v50 = vsub.f32 1.5, %v3268_v53  ;;  %v3520_v8 = vmax.f32 %v8004_v7, 0.0  ;;  %v3410_v40 = vmul.f32 %v7748_v19, %v3330_v63 }
 0x701   :  { %v4053_v48 = vpop.eup %4052  ;;  %v8007_v5 = vadd.f32 1e-05, %v3233_v0  ;;  %v8010_v2 = vadd.f32 %v7762_v42, %v3411_v25  ;;  %v8013_v43 = vadd.f32 %v7762_v42, %v3409_v28  ;;  %v8034_v19 = vadd.f32 %v7762_v42, %v3412_v23 }
 0x702   :  { %v3270_v55 = vmul.f32 %v4051_v38, %v3269_v50  ;;  %v3276_v15 = vmul.f32 %v4053_v48, %v7973_v60  ;;  %vm3282_vm14 = vweird.f32 %v4053_v48 }
 0x703   :  { %4054 = vrsqrt.f32 %v8007_v5  ;;  %v3523_v58 = vmax.f32 %v8010_v2, 0.0  ;;  %v3521_v24 = vmax.f32 %v8013_v43, 0.0  ;;  %vm3283_vm2 = vmor %vm3281_vm15, %vm3282_vm14  ;;  %vm3291_vm3 = vweird.f32 %v8007_v5 }
 0x704   :  { %v3274_v37 = vsel %vm3273_vm13, %v4051_v38, %v3270_v55  ;;  %v3277_v57 = vmul.f32 %v4053_v48, %v3276_v15 }
 0x705   :  { %3647 = vrot.lane.b32.xlu2 %v3523_v58, %s4093_s26  ;;  %3559 = vrot.lane.b32.xlu1 %v3521_v24, %s4093_s26  ;;  %v3333_v46 = vmul.f32 %v3274_v37, %v7820_v20  ;;  %v3334_v54 = vmul.f32 %v3274_v37, %v7823_v62  ;;  %v3336_v28 = vmul.f32 %v3274_v37, %v7829_v41 }
 0x706   :  { %v3278_v53 = vmul.f32 0.5, %v3277_v57  ;;  %3685 = vrot.lane.b32.xlu0 %v3520_v8, %s4093_s26  ;;  %v3218_v38 = vpop.xlane.xlu2 %3217  ;;  %v8039_v20 = vadd.f32 %v7762_v42, %v3410_v40  ;;  %v3335_v50 = vmul.f32 %v3274_v37, %v7826_v11  ;;  %v3524_v42 = vmax.f32 %v8034_v19, 0.0 }
 0x707   :  { %v3234_v0 = vmul.f32 0.0025510204, %v3218_v38  ;;  %v3413_v25 = vmul.f32 %v7739_v14, %v3333_v46  ;;  %v3414_v41 = vmul.f32 %v7739_v14, %v3334_v54  ;;  %v3416_v37 = vmul.f32 %v7739_v14, %v3336_v28 }
 0x708   :  { %v3279_v32 = vsub.f32 1.5, %v3278_v53  ;;  %v3522_v46 = vmax.f32 %v8039_v20, 0.0  ;;  %v3415_v53 = vmul.f32 %v7739_v14, %v3335_v50 }
 0x709   :  { %v4055_v63 = vpop.eup %4054  ;;  %v8042_v55 = vadd.f32 1e-05, %v3234_v0  ;;  %v8045_v62 = vadd.f32 %v7758_v10, %v3413_v25  ;;  %v8069_v14 = vadd.f32 %v7758_v10, %v3416_v37 }
 0x70a   :  { %v3280_v15 = vmul.f32 %v4053_v48, %v3279_v32  ;;  %v3286_v23 = vmul.f32 %v4055_v63, %v8007_v5  ;;  %vm3292_vm1 = vweird.f32 %v4055_v63  ;;  %v8074_v32 = vadd.f32 %v7758_v10, %v3415_v53 }
 0x70b   :  { %4056 = vrsqrt.f32 %v8042_v55  ;;  %v3525_v11 = vmax.f32 %v8045_v62, 0.0  ;;  %vm3293_vm4 = vmor %vm3291_vm3, %vm3292_vm1  ;;  %vm3301_vm6 = vweird.f32 %v8042_v55 }
 0x70c   :  { %v3284_v57 = vsel %vm3283_vm2, %v4053_v48, %v3280_v15  ;;  %v3287_v40 = vmul.f32 %v4055_v63, %v3286_v23  ;;  %v8066_v48 = vadd.f32 %v7758_v10, %v3414_v41 }
 0x70d   :  { %3687 = vrot.lane.b32.xlu1 %v3524_v42, %s4093_s26  ;;  %3561 = vrot.lane.b32.xlu2 %v3525_v11, %s4093_s26  ;;  %v3339_v0 = vmul.f32 %v3284_v57, %v7850_v61  ;;  %v3338_v25 = vmul.f32 %v3284_v57, %v7847_v29  ;;  %v3337_v50 = vmul.f32 %v3284_v57, %v7844_v39  ;;  %v8573_v29 = vmax.f32 %v8069_v14, 0.0 }
 0x70e   :  { %v3288_v60 = vmul.f32 0.5, %v3287_v40  ;;  %3599 = vrot.lane.b32.xlu0 %v3522_v46, %s4093_s26  ;;  %v3223_v38 = vpop.xlane.xlu1 %3222  ;;  %v3526_v37 = vmax.f32 %v8066_v48, 0.0  ;;  %v8574_v39 = vmax.f32 %v8074_v32, 0.0 }
 0x70f   :  { %v3235_v54 = vmul.f32 0.0025510204, %v3223_v38  ;;  %v3419_v61 = vmul.f32 %v7750_v9, %v3339_v0  ;;  %v3418_v10 = vmul.f32 %v7750_v9, %v3338_v25  ;;  %v3417_v38 = vmul.f32 %v7750_v9, %v3337_v50 }
 0x710   :  { %v3289_v28 = vsub.f32 1.5, %v3288_v60  ;;  %v3340_v0 = vmul.f32 %v3284_v57, %v7853_v47 }
 0x711   :  { %v4057_v15 = vpop.eup %4056  ;;  %v3243_v23 = vadd.f32 1e-05, %v3235_v54  ;;  %v8096_v25 = vadd.f32 %v7766_v13, %v3419_v61 }
 0x712   :  { %v3290_v40 = vmul.f32 %v4055_v63, %v3289_v28  ;;  %v3296_v41 = vmul.f32 %v4057_v15, %v8042_v55  ;;  %v8099_v28 = vadd.f32 %v7766_v13, %v3418_v10  ;;  %vm3302_vm5 = vweird.f32 %v4057_v15 }
 0x713   :  { %4058 = vrsqrt.f32 %v3243_v23  ;;  %vm3303_vm0 = vmor %vm3301_vm6, %vm3302_vm5  ;;  %v8575_v57 = vmax.f32 %v8096_v25, 0.0  ;;  %vm3311_vm8 = vweird.f32 %v3243_v23 }
 0x714   :  { %v3294_v53 = vsel %vm3293_vm4, %v4055_v63, %v3290_v40  ;;  %v3297_v60 = vmul.f32 %v4057_v15, %v3296_v41  ;;  %v8577_v61 = vmax.f32 %v8099_v28, 0.0 }
 0x715   :  { %3601 = vrot.lane.b32.xlu1 %v3526_v37, %s4093_s26  ;;  %3689 = vrot.lane.b32.xlu2 %v8573_v29, %s4093_s26  ;;  %v3228_v5 = vpop.xlane.xlu0 %3227  ;;  %v3341_v50 = vmul.f32 %v3294_v53, %v7868_v51  ;;  %v3343_v40 = vmul.f32 %v3294_v53, %v7874_v27  ;;  %v8104_v29 = vadd.f32 %v7766_v13, %v3417_v38 }
 0x716   :  { %v3298_v54 = vmul.f32 0.5, %v3297_v60  ;;  %3649 = vrot.lane.b32.xlu0 %v8574_v39, %s4093_s26  ;;  %v3236_v63 = vmul.f32 0.0025510204, %v3228_v5 }
 0x717   :  { %v3421_v51 = vmul.f32 %v7743_v33, %v3341_v50  ;;  %v3423_v27 = vmul.f32 %v7743_v33, %v3343_v40  ;;  %v8576_v38 = vmax.f32 %v8104_v29, 0.0 }
 0x718   :  { %v3299_v41 = vsub.f32 1.5, %v3298_v54  ;;  %v3244_v60 = vadd.f32 1e-05, %v3236_v63  ;;  %v3420_v63 = vmul.f32 %v7750_v9, %v3340_v0 }
 0x719   :  { %v4059_v39 = vpop.eup %4058  ;;  %v8126_v50 = vadd.f32 %v7768_v36, %v3421_v51  ;;  %v8129_v9 = vadd.f32 %v7768_v36, %v3423_v27 }
 0x71a   :  { %v3300_v5 = vmul.f32 %v4057_v15, %v3299_v41  ;;  %v3306_v47 = vmul.f32 %v4059_v39, %v3243_v23  ;;  %4060 = vrsqrt.f32 %v3244_v60  ;;  %vm3312_vm7 = vweird.f32 %v4059_v39 }
 0x71b   :  { %vm3313_vm9 = vmor %vm3311_vm8, %vm3312_vm7  ;;  %v3533_v27 = vmax.f32 %v8126_v50, 0.0  ;;  %vm3321_vm12 = vweird.f32 %v3244_v60 }
 0x71c   :  { %v8111_v10 = vsel %vm3303_vm0, %v4057_v15, %v3300_v5  ;;  %v3307_v54 = vmul.f32 %v4059_v39, %v3306_v47  ;;  %v3344_v15 = vmul.f32 %v3294_v53, %v7877_v12  ;;  %v8134_v5 = vadd.f32 %v7766_v13, %v3420_v63 }
 0x71d   :  { %3651 = vrot.lane.b32.xlu1 %v8575_v57, %s4093_s26  ;;  %3603 = vrot.lane.b32.xlu2 %v8577_v61, %s4093_s26  ;;  %v3345_v0 = vmul.f32 %v8111_v10, %v7892_v3  ;;  %v3342_v47 = vmul.f32 %v3294_v53, %v7871_v22 }
 0x71e   :  { %v3308_v55 = vmul.f32 0.5, %v3307_v54  ;;  %3563 = vrot.lane.b32.xlu0 %v8576_v38, %s4093_s26  ;;  %v3424_v12 = vmul.f32 %v7743_v33, %v3344_v15  ;;  %v3535_v38 = vmax.f32 %v8129_v9, 0.0  ;;  %v3532_v61 = vmax.f32 %v8134_v5, 0.0 }
 0x71f   :  { %v3425_v3 = vmul.f32 %v7754_v21, %v3345_v0  ;;  %v3422_v13 = vmul.f32 %v7743_v33, %v3342_v47 }
 0x720   :  { %v4061_v40 = vpop.eup %4060  ;;  %v3309_v41 = vsub.f32 1.5, %v3308_v55  ;;  %v8153_v22 = vadd.f32 %v7768_v36, %v3424_v12 }
 0x721   :  { %v3316_v54 = vmul.f32 %v4061_v40, %v3244_v60  ;;  %vm3322_vm11 = vweird.f32 %v4061_v40  ;;  %v8156_v33 = vadd.f32 %v7764_v35, %v3425_v3  ;;  %v8999_v60 = vld [vmem:[#allocation71_spill] sm:$0xff] }
 0x722   :  { %v3310_v57 = vmul.f32 %v4059_v39, %v3309_v41  ;;  %vm3323_vm13 = vmor %vm3321_vm12, %vm3322_vm11  ;;  %v3536_v41 = vmax.f32 %v8153_v22, 0.0 }
 0x723   :  { %v3317_v51 = vmul.f32 %v4061_v40, %v3316_v54  ;;  %v3537_v47 = vmax.f32 %v8156_v33, 0.0 }
 0x724   :  { %v3314_v55 = vsel %vm3313_vm9, %v4059_v39, %v3310_v57  ;;  %v8160_v39 = vadd.f32 %v7768_v36, %v3422_v13  ;;  %v3347_v57 = vmul.f32 %v8111_v10, %v7898_v52 }
 0x725   :  { %v3318_v63 = vmul.f32 0.5, %v3317_v51  ;;  %3565 = vrot.lane.b32.xlu1 %v3533_v27, %s4093_s26  ;;  %3653 = vrot.lane.b32.xlu2 %v3535_v38, %s4093_s26  ;;  %v3351_v53 = vmul.f32 %v3314_v55, %v7922_v30 }
 0x726   :  { %3691 = vrot.lane.b32.xlu0 %v3532_v61, %s4093_s26  ;;  %v3534_v12 = vmax.f32 %v8160_v39, 0.0  ;;  %v3427_v30 = vmul.f32 %v7754_v21, %v3347_v57 }
 0x727   :  { %v3319_v23 = vsub.f32 1.5, %v3318_v63  ;;  %v3431_v54 = vmul.f32 %v7756_v26, %v3351_v53  ;;  %v3349_v63 = vmul.f32 %v3314_v55, %v7916_v49 }
 0x728   :  { %v8187_v3 = vadd.f32 %v7764_v35, %v3427_v30 }
 0x729   :  { %v3320_v15 = vmul.f32 %v4061_v40, %v3319_v23 }
 0x72b   :  { %v3324_v0 = vsel %vm3323_vm13, %v4061_v40, %v3320_v15  ;;  %v8181_v40 = vadd.f32 %v8999_v60, %v3431_v54 }
 0x72c   :  { %v3355_v36 = vmul.f32 %v3324_v0, %v7946_v59  ;;  %v3353_v51 = vmul.f32 %v3324_v0, %v7940_v56  ;;  %v3348_v59 = vmul.f32 %v8111_v10, %v7901_v16  ;;  %v8580_v56 = vmax.f32 %v8187_v3, 0.0 }
 0x72d   :  { %3693 = vrot.lane.b32.xlu1 %v3536_v41, %s4093_s26  ;;  %3567 = vrot.lane.b32.xlu2 %v3537_v47, %s4093_s26  ;;  %v8578_v53 = vmax.f32 %v8181_v40, 0.0  ;;  %v3429_v16 = vmul.f32 %v7756_v26, %v3349_v63  ;;  %v3356_v30 = vmul.f32 %v3324_v0, %v7949_v45 }
 0x72e   :  { %3605 = vrot.lane.b32.xlu0 %v3534_v12, %s4093_s26  ;;  %v3435_v52 = vmul.f32 %v7752_v34, %v3355_v36  ;;  %v3433_v57 = vmul.f32 %v7752_v34, %v3353_v51  ;;  %v3428_v15 = vmul.f32 %v7754_v21, %v3348_v59  ;;  %v9000_v36 = vld [vmem:[#allocation60_spill] sm:$0xff]  ;;  %v9001_v59 = vld [vmem:[#allocation67_spill] sm:$0xff] }
 0x72f   :  { %v8218_v51 = vadd.f32 %v8999_v60, %v3429_v16  ;;  %v3352_v63 = vmul.f32 %v3314_v55, %v9001_v59  ;;  %v9002_v16 = vld [vmem:[#allocation48_spill] sm:$0xff] }
 0x730   :  { %v8190_v13 = vadd.f32 %v7964_v44, %v3435_v52  ;;  %v8209_v49 = vadd.f32 %v7964_v44, %v3433_v57  ;;  %v8212_v54 = vadd.f32 %v7764_v35, %v3428_v15  ;;  %v3346_v52 = vmul.f32 %v8111_v10, %v9000_v36 }
 0x731   :  { %v3436_v57 = vmul.f32 %v7752_v34, %v3356_v30  ;;  %v8583_v15 = vmax.f32 %v8218_v51, 0.0  ;;  %v3432_v45 = vmul.f32 %v7756_v26, %v3352_v63  ;;  %v3354_v30 = vmul.f32 %v3324_v0, %v9002_v16 }
 0x732   :  { %v8579_v23 = vmax.f32 %v8190_v13, 0.0 }
 0x733   :  { %v8237_v10 = vadd.f32 %v7964_v44, %v3436_v57  ;;  %v8244_v36 = vadd.f32 %v8999_v60, %v3432_v45 }
 0x735   :  { %3657 = vrot.lane.b32.xlu1 %v8578_v53, %s4093_s26  ;;  %3659 = vrot.lane.b32.xlu2 %v8579_v23, %s4093_s26  ;;  %v8581_v53 = vmax.f32 %v8209_v49, 0.0  ;;  %v8582_v23 = vmax.f32 %v8212_v54, 0.0  ;;  %v8587_v63 = vmax.f32 %v8237_v10, 0.0 }
 0x736   :  { %3655 = vrot.lane.b32.xlu0 %v8580_v56, %s4093_s26  ;;  %v3426_v56 = vmul.f32 %v7754_v21, %v3346_v52  ;;  %v9003_v52 = vld [vmem:[#allocation41_spill] sm:$0xff] }
 0x737   :  { %v3350_v59 = vmul.f32 %v3314_v55, %v9003_v52 }
 0x738   :  { %v8240_v21 = vadd.f32 %v7764_v35, %v3426_v56 }
 0x739   :  { %v3430_v57 = vmul.f32 %v7756_v26, %v3350_v59 }
 0x73d   :  { %3571 = vrot.lane.b32.xlu1 %v8581_v53, %s4093_s26  ;;  %3695 = vrot.lane.b32.xlu2 %v8582_v23, %s4093_s26  ;;  %v3538_v53 = vmax.f32 %v8240_v21, 0.0  ;;  %v3434_v23 = vmul.f32 %v7752_v34, %v3354_v30  ;;  %v8265_v34 = vadd.f32 %v8999_v60, %v3430_v57 }
 0x73e   :  { %3569 = vrot.lane.b32.xlu0 %v8583_v15, %s4093_s26  ;;  %v8586_v15 = vmax.f32 %v8244_v36, 0.0 }
 0x73f   :  { %v8262_v35 = vadd.f32 %v7964_v44, %v3434_v23  ;;  %v8585_v55 = vmax.f32 %v8265_v34, 0.0 }
 0x741   :  { %v8584_v26 = vmax.f32 %v8262_v35, 0.0 }
 0x745   :  { %3699 = vrot.lane.b32.xlu1 %v8587_v63, %s4093_s26  ;;  %3607 = vrot.lane.b32.xlu2 %v3538_v53, %s4093_s26 }
 0x746   :  { %3697 = vrot.lane.b32.xlu0 %v8586_v15, %s4093_s26 }
 0x74d   :  { %3611 = vrot.lane.b32.xlu1 %v8584_v26, %s4093_s26 }
 0x74e   :  { %3609 = vrot.lane.b32.xlu0 %v8585_v55, %s4093_s26 }
 0x757   :  { %v3598_v0 = vpop.permute.xlu2 %3597 }
 0x758   :  { %v8277_v60 = vmax.f32 %v3518_v18, %v3598_v0 }
 0x75f   :  { %v3648_v56 = vpop.permute.xlu2 %3647 }
 0x760   :  { %v3670_v17 = vmax.f32 %v3523_v58, %v3648_v56 }
 0x767   :  { %v3562_v45 = vpop.permute.xlu2 %3561 }
 0x76f   :  { %v3646_v44 = vpop.permute.xlu1 %3645  ;;  %v3690_v23 = vpop.permute.xlu2 %3689 }
 0x770   :  { %v3558_v16 = vpop.permute.xlu0 %3557  ;;  %v3669_v55 = vmax.f32 %v3519_v1, %v3646_v44 }
 0x771   :  { %v8281_v30 = vmax.f32 %v3517_v31, %v3558_v16 }
 0x773   :  { %v3629_v52 = vmax.f32 %v8281_v30, %v8277_v60 }
 0x777   :  { %v3560_v59 = vpop.permute.xlu1 %3559  ;;  %v3604_v57 = vpop.permute.xlu2 %3603 }
 0x778   :  { %v3686_v26 = vpop.permute.xlu0 %3685  ;;  %v8296_v16 = vmax.f32 %v3521_v24, %v3560_v59  ;;  %v9004_v24 = vmax.f32 %v8069_v14, 0.0 }
 0x779   :  { %v3709_v15 = vmax.f32 %v3520_v8, %v3686_v26  ;;  %v8307_v8 = vmax.f32 %v3525_v11, %v3562_v45 }
 0x77a   :  { %v3711_v20 = vmax.f32 %v9004_v24, %v3690_v23  ;;  %v9008_v23 = vmax.f32 %v8096_v25, 0.0  ;;  %v9013_v24 = vmax.f32 %v8181_v40, 0.0 }
 0x77b   :  { %v3717_v63 = vmax.f32 %v3669_v55, %v3709_v15  ;;  %v9006_v55 = vmax.f32 %v8099_v28, 0.0 }
 0x77d   :  { %3733 = vrot.lane.b32.xlu2 %v3717_v63, %s4093_s26  ;;  %v3624_v48 = vmax.f32 %v9006_v55, %v3604_v57 }
 0x77f   :  { %v3688_v4 = vpop.permute.xlu1 %3687  ;;  %v3654_v18 = vpop.permute.xlu2 %3653 }
 0x780   :  { %v3710_v31 = vmax.f32 %v3524_v42, %v3688_v4  ;;  %v3600_v0 = vpop.permute.xlu0 %3599  ;;  %v9005_v42 = vmax.f32 %v8074_v32, 0.0  ;;  %v3673_v28 = vmax.f32 %v3535_v38, %v3654_v18 }
 0x781   :  { %v8300_v6 = vmax.f32 %v3522_v46, %v3600_v0 }
 0x782   :  { %v3718_v1 = vmax.f32 %v3670_v17, %v3710_v31 }
 0x783   :  { %v3630_v7 = vmax.f32 %v8296_v16, %v8300_v6  ;;  %v9015_v16 = vmax.f32 %v8265_v34, 0.0 }
 0x784   :  { %3735 = vrot.lane.b32.xlu0 %v3718_v1, %s4093_s26 }
 0x787   :  { %v3602_v2 = vpop.permute.xlu1 %3601  ;;  %v3568_v58 = vpop.permute.xlu2 %3567 }
 0x788   :  { %v3650_v19 = vpop.permute.xlu0 %3649  ;;  %v8311_v43 = vmax.f32 %v3526_v37, %v3602_v2  ;;  %v9007_v37 = vmax.f32 %v8104_v29, 0.0  ;;  %v3586_v29 = vmax.f32 %v3537_v47, %v3568_v58  ;;  %v9009_v47 = vmax.f32 %v8212_v54, 0.0 }
 0x789   :  { %v3671_v46 = vmax.f32 %v9005_v42, %v3650_v19  ;;  %v9012_v58 = vmax.f32 %v8237_v10, 0.0 }
 0x78a   :  { %v3631_v15 = vmax.f32 %v8307_v8, %v8311_v43 }
 0x78b   :  { %v3719_v63 = vmax.f32 %v3671_v46, %v3711_v20  ;;  %v9014_v20 = vmax.f32 %v8244_v36, 0.0 }
 0x78d   :  { %3737 = vrot.lane.b32.xlu1 %v3719_v63, %s4093_s26 }
 0x78f   :  { %v3652_v62 = vpop.permute.xlu1 %3651  ;;  %v3660_v11 = vpop.permute.xlu2 %3659 }
 0x790   :  { %v3564_v26 = vpop.permute.xlu0 %3563  ;;  %v3672_v59 = vmax.f32 %v9008_v23, %v3652_v62 }
 0x791   :  { %v3584_v56 = vmax.f32 %v9007_v37, %v3564_v26 }
 0x793   :  { %v3632_v14 = vmax.f32 %v3584_v56, %v3624_v48 }
 0x797   :  { %v3566_v45 = vpop.permute.xlu1 %3565  ;;  %v3696_v44 = vpop.permute.xlu2 %3695 }
 0x798   :  { %v3692_v32 = vpop.permute.xlu0 %3691  ;;  %v3714_v22 = vmax.f32 %v9009_v47, %v3696_v44  ;;  %v9018_v44 = vmax.f32 %v8209_v49, 0.0 }
 0x799   :  { %v3712_v4 = vmax.f32 %v3532_v61, %v3692_v32  ;;  %v3585_v61 = vmax.f32 %v3533_v27, %v3566_v45 }
 0x79b   :  { %v3720_v17 = vmax.f32 %v3672_v59, %v3712_v4 }
 0x79d   :  { %3739 = vrot.lane.b32.xlu2 %v3720_v17, %s4093_s26 }
 0x79f   :  { %v3694_v31 = vpop.permute.xlu1 %3693  ;;  %v3608_v0 = vpop.permute.xlu2 %3607 }
 0x7a0   :  { %v3606_v57 = vpop.permute.xlu0 %3605  ;;  %v3713_v1 = vmax.f32 %v3536_v41, %v3694_v31  ;;  %v3626_v25 = vmax.f32 %v3538_v53, %v3608_v0  ;;  %v9010_v41 = vmax.f32 %v8187_v3, 0.0 }
 0x7a1   :  { %v3625_v5 = vmax.f32 %v3534_v12, %v3606_v57  ;;  %v9011_v12 = vmax.f32 %v8190_v13, 0.0 }
 0x7a2   :  { %v3721_v2 = vmax.f32 %v3673_v28, %v3713_v1  ;;  %v3634_v8 = vmax.f32 %v3586_v29, %v3626_v25 }
 0x7a3   :  { %v3633_v9 = vmax.f32 %v3585_v61, %v3625_v5  ;;  %v3676_v18 = vmax.f32 %v9011_v12, %v3660_v11 }
 0x7a4   :  { %3741 = vrot.lane.b32.xlu0 %v3721_v2, %s4093_s26 }
 0x7a7   :  { %v3658_v38 = vpop.permute.xlu1 %3657 }
 0x7a8   :  { %v3656_v33 = vpop.permute.xlu0 %3655  ;;  %v3675_v54 = vmax.f32 %v9013_v24, %v3658_v38 }
 0x7a9   :  { %v3674_v21 = vmax.f32 %v9010_v41, %v3656_v33 }
 0x7ab   :  { %v3722_v53 = vmax.f32 %v3674_v21, %v3714_v22 }
 0x7ad   :  { %3743 = vrot.lane.b32.xlu1 %v3722_v53, %s4093_s26 }
 0x7af   :  { %v3572_v50 = vpop.permute.xlu1 %3571 }
 0x7b0   :  { %v3570_v27 = vpop.permute.xlu0 %3569  ;;  %v3588_v32 = vmax.f32 %v9018_v44, %v3572_v50 }
 0x7b7   :  { %v3700_v39 = vpop.permute.xlu1 %3699 }
 0x7b8   :  { %v3716_v19 = vmax.f32 %v9012_v58, %v3700_v39  ;;  %v3698_v43 = vpop.permute.xlu0 %3697 }
 0x7b9   :  { %v3715_v3 = vmax.f32 %v9014_v20, %v3698_v43 }
 0x7ba   :  { %v3724_v42 = vmax.f32 %v3676_v18, %v3716_v19 }
 0x7bb   :  { %v3723_v46 = vmax.f32 %v3675_v54, %v3715_v3 }
 0x7bc   :  { %3747 = vrot.lane.b32.xlu0 %v3724_v42, %s4093_s26 }
 0x7bd   :  { %3745 = vrot.lane.b32.xlu2 %v3723_v46, %s4093_s26 }
 0x7bf   :  { %v3612_v36 = vpop.permute.xlu1 %3611 }
 0x7c0   :  { %v3610_v40 = vpop.permute.xlu0 %3609 }
 0x7c1   :  { %v3627_v6 = vmax.f32 %v9015_v16, %v3610_v40 }
 0x7d7   :  { %v3734_v63 = vpop.permute.xlu2 %3733 }
 0x7d8   :  { %v3757_v13 = vsel %vm2241_vm10, %v3629_v52, %v3734_v63 }
 0x7d9   :  { %3765 = vst [vmem:[%s8414_s11] sm:$0xff] %v3757_v13 }
 0x7f6   :  { %v3736_v10 = vpop.permute.xlu0 %3735 }
 0x7f7   :  { %v3758_v62 = vsel %vm2241_vm10, %v3630_v7, %v3736_v10  ;;  %v3740_v11 = vpop.permute.xlu2 %3739  ;;  %v9016_v7 = vmax.f32 %v8218_v51, 0.0  ;;  %v9017_v51 = vmax.f32 %v8262_v35, 0.0 }
 0x7f8   :  { %3766 = vst [vmem:[%s8414_s11 + $0x8] sm:$0xff] %v3758_v62  ;;  %v3760_v60 = vsel %vm2241_vm10, %v3632_v14, %v3740_v11 }
 0x7f9   :  { %3768 = vst [vmem:[%s8414_s11 + $0x18] sm:$0xff] %v3760_v60  ;;  %v3587_v26 = vmax.f32 %v9016_v7, %v3570_v27  ;;  %v3628_v45 = vmax.f32 %v9017_v51, %v3612_v36 }
 0x7fb   :  { %v3635_v55 = vmax.f32 %v3587_v26, %v3627_v6  ;;  %v3636_v23 = vmax.f32 %v3588_v32, %v3628_v45 }
 0x7ff   :  { %v3738_v30 = vpop.permute.xlu1 %3737 }
 0x800   :  { %v3759_v52 = vsel %vm2241_vm10, %v3631_v15, %v3738_v30 }
 0x801   :  { %3767 = vst [vmem:[%s8414_s11 + $0x10] sm:$0xff] %v3759_v52 }
 0x816   :  { %v3742_v48 = vpop.permute.xlu0 %3741 }
 0x817   :  { %v3761_v37 = vsel %vm2241_vm10, %v3633_v9, %v3742_v48  ;;  %v3746_v56 = vpop.permute.xlu2 %3745 }
 0x818   :  { %3769 = vst [vmem:[%s8414_s11 + $0x20] sm:$0xff] %v3761_v37  ;;  %v3763_v15 = vsel %vm2241_vm10, %v3635_v55, %v3746_v56 }
 0x819   :  { %3771 = vst [vmem:[%s8414_s11 + $0x30] sm:$0xff] %v3763_v15 }
 0x81f   :  { %v3744_v34 = vpop.permute.xlu1 %3743 }
 0x820   :  { %v3762_v14 = vsel %vm2241_vm10, %v3634_v8, %v3744_v34 }
 0x821   :  { %3770 = vst [vmem:[%s8414_s11 + $0x28] sm:$0xff] %v3762_v14 }
 0x82e   :  { %v3748_v59 = vpop.permute.xlu0 %3747 }
 0x82f   :  { %v3764_v4 = vsel %vm2241_vm10, %v3636_v23, %v3748_v59 }
 0x830   :  { %3772 = vst [vmem:[%s8414_s11 + $0x38] sm:$0xff] %v3764_v4 }

</bundles_post_ra>
